<compile_context>
chip_gen: v6e
topology: v6e:2x2x1
jax: 0.10.0
libtpu: 0.0.40
codegen_flags: <defaults>
</compile_context>

<pallas_src>
import math

import jax
import jax.numpy as jnp
from jax.experimental import pallas as pl
from jax.experimental.pallas import tpu as pltpu


def _vmem_limit_bytes():
    """Scoped-VMEM limit that fits every TPU generation (v7x has only 64 MiB/TC)."""
    try:
        cap = int(getattr(pltpu.get_tpu_info(), "vmem_capacity_bytes",
                          64 * 1024 * 1024))
    except Exception:
        cap = 64 * 1024 * 1024
    return int(min(96 * 1024 * 1024, max(cap - 16 * 1024 * 1024, 32 * 1024 * 1024)))


_VMEM_LIMIT = _vmem_limit_bytes()


# ------------------------- ConvTranspose2d(kernel=2, stride=2) -------------------------

def _conv_transpose_kernel(x1_ref, wt_ref, bt_ref, o_ref):
    # x1_ref: (H1, W1, Cin) f32      wt_ref: (Cin, 2*Cout) bf16, columns ordered (kw, c)
    # bt_ref: (1, 2*Cout) f32        o_ref : (H1*W1, 2*Cout) bf16
    H1, W1, Cin = x1_ref.shape
    x1m = x1_ref[...].reshape(H1 * W1, Cin).astype(jnp.bfloat16)
    y = jnp.dot(x1m, wt_ref[...], preferred_element_type=jnp.float32) + bt_ref[...]
    o_ref[...] = y.astype(o_ref.dtype)


def conv_transpose2x2_rows(x1, wt, bt):
    """ConvTranspose2d(k=2, s=2) producing per-kh "row images".

    x1: (N, H1, W1, Cin) f32, wt: (2, Cin, 2*Cout) bf16, bt: (1, 2*Cout) f32.
    Returns (N, 2, H1, 2*W1, Cout) bf16 where out[n, kh, h, 2*w + kw, c] is the
    transposed-conv output pixel (2*h + kh, 2*w + kw, c).  The trailing reshape is
    row-major compatible, i.e. free (no pixel-shuffle transpose in HBM).
    """
    N, H1, W1, Cin = x1.shape
    Cout2 = wt.shape[-1]
    Cout = Cout2 // 2
    y = pl.pallas_call(
        _conv_transpose_kernel,
        out_shape=jax.ShapeDtypeStruct((N, 2, H1 * W1, Cout2), jnp.bfloat16),
        grid=(N, 2),
        in_specs=[
            pl.BlockSpec((None, H1, W1, Cin), lambda n, kh: (n, 0, 0, 0)),
            pl.BlockSpec((None, Cin, Cout2), lambda n, kh: (kh, 0, 0)),
            pl.BlockSpec((1, Cout2), lambda n, kh: (0, 0)),
        ],
        out_specs=pl.BlockSpec((None, None, H1 * W1, Cout2),
                               lambda n, kh: (n, kh, 0, 0)),
        compiler_params=pltpu.CompilerParams(
            dimension_semantics=("parallel", "parallel"),
            vmem_limit_bytes=_VMEM_LIMIT),
    )(x1, wt, bt)
    return y.reshape(N, 2, H1, 2 * W1, Cout)


# ---------------- fused: assemble upsample + implicit concat + conv3x3 x2 ----------------

def _dbl_conv_kernel(x2_ref, rows_ref, w1a_ref, w1b_ref, b1_ref, w2_ref, b2_ref,
                     o_ref, a_pad, b_pad, m_pad):
    # x2_ref  : (H2, W2, Cout) f32          rows_ref: (2, H1, W2, Cout) bf16 (convT rows)
    # w1a/w1b : (9*Cout, Cout) bf16 (conv1 weights split along Cin: x2-part / up-part)
    # w2      : (9*Cout, Cout) bf16         b1/b2   : (1, Cout) f32
    # o_ref   : (H2, W2, Cout) f32
    # a_pad   : (H2+2, W2+2, Cout) f32  padded x2
    # b_pad   : (H1+1, 2, W2+2, Cout) f32  padded upsampled x1 in (row-pair, slot) layout
    # m_pad   : (H2+2, W2+2, Cout) f32  padded conv1 output
    H2, W2, Cout = o_ref.shape
    H1 = H2 // 2
    f32 = jnp.float32
    bf16 = jnp.bfloat16

    # zero-fill the 1-pixel halos ('same' padding done in VMEM, not via jnp.pad in HBM)
    a_pad[...] = jnp.zeros(a_pad.shape, f32)
    b_pad[...] = jnp.zeros(b_pad.shape, f32)
    m_pad[...] = jnp.zeros(m_pad.shape, f32)

    # x2 -> interior of its padded scratch
    a_pad[1:H2 + 1, 1:W2 + 1, :] = x2_ref[...]

    # scatter the transposed-conv row-images into the padded, pixel-shuffled layout:
    # padded row (2*h + kh + 1) == pair/slot below; the merge back to (H2+2, W2+2, C)
    # is a pure major-dim reshape.
    b_pad[0:H1, 1:2, 1:W2 + 1, :] = (
        rows_ref[0].astype(f32).reshape(H1, 1, W2, Cout))
    b_pad[1:H1 + 1, 0:1, 1:W2 + 1, :] = (
        rows_ref[1].astype(f32).reshape(H1, 1, W2, Cout))
    up_img = b_pad[...].reshape(H2 + 2, W2 + 2, Cout)

    def im2col(src):
        # (H2+2, W2+2, C) padded image/ref -> (H2*W2, 9*C) bf16 patch matrix
        return jnp.concatenate(
            [src[dh:dh + H2, dw:dw + W2, :].astype(bf16).reshape(H2 * W2, Cout)
             for dh in range(3) for dw in range(3)],
            axis=-1)

    # conv1 (3x3, Cin = 2*Cout) -- channel concat replaced by two accumulating matmuls
    acc = jnp.dot(im2col(a_pad), w1a_ref[...], preferred_element_type=f32)
    acc = acc + jnp.dot(im2col(up_img), w1b_ref[...], preferred_element_type=f32)
    acc = jnp.maximum(acc + b1_ref[...], 0.0)
    m_pad[1:H2 + 1, 1:W2 + 1, :] = acc.reshape(H2, W2, Cout)

    # conv2 (3x3) + ReLU
    acc2 = jnp.dot(im2col(m_pad), w2_ref[...], preferred_element_type=f32)
    acc2 = jnp.maximum(acc2 + b2_ref[...], 0.0)
    o_ref[...] = acc2.reshape(H2, W2, Cout).astype(o_ref.dtype)


def double_conv3x3(x2, rows, w1a, w1b, b1, w2, b2):
    """x2: (N,H2,W2,Cout) f32, rows: (N,2,H1,W2,Cout) bf16 -> (N,H2,W2,Cout) f32."""
    N, H2, W2, Cout = x2.shape
    H1 = H2 // 2
    return pl.pallas_call(
        _dbl_conv_kernel,
        out_shape=jax.ShapeDtypeStruct((N, H2, W2, Cout), jnp.float32),
        grid=(N,),
        in_specs=[
            pl.BlockSpec((None, H2, W2, Cout), lambda n: (n, 0, 0, 0)),
            pl.BlockSpec((None, 2, H1, W2, Cout), lambda n: (n, 0, 0, 0, 0)),
            pl.BlockSpec((9 * Cout, Cout), lambda n: (0, 0)),
            pl.BlockSpec((9 * Cout, Cout), lambda n: (0, 0)),
            pl.BlockSpec((1, Cout), lambda n: (0, 0)),
            pl.BlockSpec((9 * Cout, Cout), lambda n: (0, 0)),
            pl.BlockSpec((1, Cout), lambda n: (0, 0)),
        ],
        out_specs=pl.BlockSpec((None, H2, W2, Cout), lambda n: (n, 0, 0, 0)),
        scratch_shapes=[
            pltpu.VMEM((H2 + 2, W2 + 2, Cout), jnp.float32),
            pltpu.VMEM((H1 + 1, 2, W2 + 2, Cout), jnp.float32),
            pltpu.VMEM((H2 + 2, W2 + 2, Cout), jnp.float32),
        ],
        compiler_params=pltpu.CompilerParams(
            dimension_semantics=("parallel",),
            vmem_limit_bytes=_VMEM_LIMIT),
    )(x2, rows, w1a, w1b, b1, w2, b2)


# ----------------------------------- module forward -----------------------------------

def unet_up_forward(x1_nchw, x2_nchw, kp):
    """UNetUp.forward: x1 = up(x1); x = cat([x2, x1], dim=1); layer(x)."""
    x1 = jnp.transpose(x1_nchw, (0, 2, 3, 1))   # NCHW -> NHWC
    x2 = jnp.transpose(x2_nchw, (0, 2, 3, 1))
    rows = conv_transpose2x2_rows(x1, kp["wt"], kp["bt"])
    y = double_conv3x3(x2, rows, kp["w1a"], kp["w1b"], kp["b1"], kp["w2"], kp["b2"])
    return jnp.transpose(y, (0, 3, 1, 2))       # NHWC -> NCHW


# ----------------------------- parameters (PyTorch layouts) -----------------------------

def init_params(key, in_channels, out_channels):
    assert in_channels == 2 * out_channels, "UNetUp expects in_channels == 2*out_channels"
    kt, k1, k2 = jax.random.split(key, 3)

    def u(k, shape, fan_in):
        bound = 1.0 / math.sqrt(fan_in)
        return jax.random.uniform(k, shape, jnp.float32, -bound, bound)

    kt_w, kt_b = jax.random.split(kt)
    k1_w, k1_b = jax.random.split(k1)
    k2_w, k2_b = jax.random.split(k2)
    return {
        # ConvTranspose2d(in, out, 2, 2): weight (in, out, 2, 2)
        "up_w": u(kt_w, (in_channels, out_channels, 2, 2), in_channels * 4),
        "up_b": u(kt_b, (out_channels,), in_channels * 4),
        # Conv2d(in, out, 3, padding=1): weight (out, in, 3, 3)
        "c1_w": u(k1_w, (out_channels, in_channels, 3, 3), in_channels * 9),
        "c1_b": u(k1_b, (out_channels,), in_channels * 9),
        "c2_w": u(k2_w, (out_channels, out_channels, 3, 3), out_channels * 9),
        "c2_b": u(k2_b, (out_channels,), out_channels * 9),
    }


def prepare_params(p):
    """PyTorch-layout params -> kernel layout (bf16 weights, f32 biases)."""
    Cin, Cout = p["up_w"].shape[0], p["up_w"].shape[1]
    bf16 = jnp.bfloat16
    # ConvTranspose: (Cin, Cout, kh, kw) -> (kh, Cin, kw*Cout + c)
    wt = jnp.transpose(p["up_w"], (2, 0, 3, 1)).reshape(2, Cin, 2 * Cout)
    bt = jnp.tile(p["up_b"], 2).reshape(1, 2 * Cout)

    def conv_mat(w):  # (Cout, Ci, 3, 3) -> (9*Ci, Cout), rows ordered (dh, dw, ci)
        co, ci = w.shape[0], w.shape[1]
        return jnp.transpose(w, (2, 3, 1, 0)).reshape(9 * ci, co)

    return {
        "wt": wt.astype(bf16),
        "bt": bt.astype(jnp.float32),
        "w1a": conv_mat(p["c1_w"][:, :Cout]).astype(bf16),   # applies to x2
        "w1b": conv_mat(p["c1_w"][:, Cout:]).astype(bf16),   # applies to upsampled x1
        "b1": p["c1_b"].reshape(1, Cout).astype(jnp.float32),
        "w2": conv_mat(p["c2_w"]).astype(bf16),
        "b2": p["c2_b"].reshape(1, Cout).astype(jnp.float32),
    }


# ------------------------------ plain-JAX reference (f32) ------------------------------

def _reference_forward(x1_nchw, x2_nchw, p):
    hi = jax.lax.Precision.HIGHEST
    N, Cin, H1, W1 = x1_nchw.shape
    Cout = p["up_w"].shape[1]
    t = jnp.einsum("nchw,cokl->nohwkl", x1_nchw, p["up_w"], precision=hi)
    up = (t.transpose(0, 1, 2, 4, 3, 5).reshape(N, Cout, 2 * H1, 2 * W1)
          + p["up_b"][None, :, None, None])
    x = jnp.concatenate([x2_nchw, up], axis=1)

    def conv3(x, w, b):
        y = jax.lax.conv_general_dilated(
            x, w, (1, 1), ((1, 1), (1, 1)),
            dimension_numbers=("NCHW", "OIHW", "NCHW"), precision=hi)
        return jax.nn.relu(y + b[None, :, None, None])

    y = conv3(x, p["c1_w"], p["c1_b"])
    return conv3(y, p["c2_w"], p["c2_b"])


# --------------------------------------- main ---------------------------------------

if __name__ == "__main__":
    key = jax.random.PRNGKey(0)
    k1, k2, kp = jax.random.split(key, 3)

    N = 2
    in_channels, out_channels = 256, 128      # UNetUp(in, out) with in == 2*out
    H1 = W1 = 8                               # x1 spatial; x2/output spatial = 16x16

    x1 = jax.random.normal(k1, (N, in_channels, H1, W1), jnp.float32)
    x2 = jax.random.normal(k2, (N, out_channels, 2 * H1, 2 * W1), jnp.float32)

    torch_params = init_params(kp, in_channels, out_channels)
    kernel_params = prepare_params(torch_params)

    fwd = jax.jit(unet_up_forward)
    y = fwd(x1, x2, kernel_params)
    jax.block_until_ready(y)

    assert y.shape == (N, out_channels, 2 * H1, 2 * W1), y.shape
    assert bool(jnp.all(jnp.isfinite(y)))
    assert bool(jnp.all(y >= 0.0))            # output of a ReLU

    # numerical check against an f32 XLA reference (kernel uses bf16 weights/activations)
    y_ref = _reference_forward(x1, x2, torch_params)
    max_err = float(jnp.max(jnp.abs(y - y_ref)))
    assert max_err < 0.1, f"max abs error vs reference: {max_err}"

    print("KERNEL_OK")
</pallas_src>

<mosaic_0001>
module attributes {stable_mosaic.version = 11 : i64} {
  func.func @_conv_transpose_kernel(%arg0: i32, %arg1: i32, %arg2: memref<1x8x8x256xf32, #tpu.memory_space<vmem>>, %arg3: memref<1x256x256xbf16, #tpu.memory_space<vmem>>, %arg4: memref<1x256xf32, #tpu.memory_space<vmem>>, %arg5: memref<1x1x64x256xbf16, #tpu.memory_space<vmem>>) attributes {dimension_semantics = [#tpu.dimension_semantics<parallel>, #tpu.dimension_semantics<parallel>], iteration_bounds = array<i64: 2, 2>, scalar_prefetch = 0 : i64, scratch_operands = 0 : i64, tpu.core_type = #tpu.core_type<tc>, window_params = [{transform_indices = @transform_0, window_bounds = array<i64: 1, 8, 8, 256>}, {transform_indices = @transform_1, window_bounds = array<i64: 1, 256, 256>}, {pipeline_mode = #tpu.pipeline_mode<synchronous>, transform_indices = @transform_2, window_bounds = array<i64: 1, 256>}, {transform_indices = @transform_3, window_bounds = array<i64: 1, 1, 64, 256>}]} {
    %c0 = arith.constant 0 : index
    %c0_0 = arith.constant 0 : index
    %c0_1 = arith.constant 0 : index
    %c0_2 = arith.constant 0 : index
    %0 = vector.load %arg2[%c0, %c0_0, %c0_1, %c0_2] : memref<1x8x8x256xf32, #tpu.memory_space<vmem>>, vector<1x8x8x256xf32>
    %1 = vector.shape_cast %0 : vector<1x8x8x256xf32> to vector<8x8x256xf32>
    %2 = vector.shape_cast %1 : vector<8x8x256xf32> to vector<64x256xf32>
    %3 = arith.truncf %2 : vector<64x256xf32> to vector<64x256xbf16>
    %c0_3 = arith.constant 0 : index
    %c0_4 = arith.constant 0 : index
    %c0_5 = arith.constant 0 : index
    %4 = vector.load %arg3[%c0_3, %c0_4, %c0_5] : memref<1x256x256xbf16, #tpu.memory_space<vmem>>, vector<1x256x256xbf16>
    %5 = vector.shape_cast %4 : vector<1x256x256xbf16> to vector<256x256xbf16>
    %cst = arith.constant dense<0.000000e+00> : vector<64x256xf32>
    %6 = tpu.matmul %3, %5, %cst {dimension_numbers = #tpu.dot_dimension_numbers<[1], [0], [0], [1], [0, 0, 1, 1], [], []>} : vector<64x256xbf16>, vector<256x256xbf16>, vector<64x256xf32> -> vector<64x256xf32>
    %c0_6 = arith.constant 0 : index
    %c0_7 = arith.constant 0 : index
    %7 = vector.load %arg4[%c0_6, %c0_7] : memref<1x256xf32, #tpu.memory_space<vmem>>, vector<1x256xf32>
    %8 = vector.broadcast %7 : vector<1x256xf32> to vector<64x256xf32>
    %9 = arith.addf %6, %8 : vector<64x256xf32>
    %10 = arith.truncf %9 : vector<64x256xf32> to vector<64x256xbf16>
    %c0_8 = arith.constant 0 : index
    %c0_9 = arith.constant 0 : index
    %c0_10 = arith.constant 0 : index
    %c0_11 = arith.constant 0 : index
    %11 = vector.load %arg5[%c0_8, %c0_9, %c0_10, %c0_11] : memref<1x1x64x256xbf16, #tpu.memory_space<vmem>>, vector<1x1x64x256xbf16>
    %12 = vector.shape_cast %11 : vector<1x1x64x256xbf16> to vector<64x256xbf16>
    %13 = vector.shape_cast %10 : vector<64x256xbf16> to vector<1x1x64x256xbf16>
    tpu.vector_store %arg5[%c0_8, %c0_9, %c0_10, %c0_11], %13 {strides = array<i32>} : memref<1x1x64x256xbf16, #tpu.memory_space<vmem>>, vector<1x1x64x256xbf16>,
    return
  }
  func.func @transform_0(%arg0: i32, %arg1: i32) -> (i32, i32, i32, i32) {
    %c0_i32 = arith.constant 0 : i32
    %c0_i32_0 = arith.constant 0 : i32
    %c0_i32_1 = arith.constant 0 : i32
    %c0_i32_2 = arith.constant 0 : i32
    return %arg0, %c0_i32, %c0_i32_0, %c0_i32_1 : i32, i32, i32, i32
  }
  func.func @transform_1(%arg0: i32, %arg1: i32) -> (i32, i32, i32) {
    %c0_i32 = arith.constant 0 : i32
    %c0_i32_0 = arith.constant 0 : i32
    %c0_i32_1 = arith.constant 0 : i32
    return %arg1, %c0_i32, %c0_i32_0 : i32, i32, i32
  }
  func.func @transform_2(%arg0: i32, %arg1: i32) -> (i32, i32) {
    %c0_i32 = arith.constant 0 : i32
    %c0_i32_0 = arith.constant 0 : i32
    %c0_i32_1 = arith.constant 0 : i32
    return %c0_i32, %c0_i32_0 : i32, i32
  }
  func.func @transform_3(%arg0: i32, %arg1: i32) -> (i32, i32, i32, i32) {
    %c0_i32 = arith.constant 0 : i32
    %c0_i32_0 = arith.constant 0 : i32
    %c0_i32_1 = arith.constant 0 : i32
    return %arg0, %arg1, %c0_i32, %c0_i32_0 : i32, i32, i32, i32
  }
}

module attributes {stable_mosaic.version = 11 : i64} {
  func.func @_dbl_conv_kernel(%arg0: i32, %arg1: memref<1x16x16x128xf32, #tpu.memory_space<vmem>>, %arg2: memref<1x2x8x16x128xbf16, #tpu.memory_space<vmem>>, %arg3: memref<1152x128xbf16, #tpu.memory_space<vmem>>, %arg4: memref<1152x128xbf16, #tpu.memory_space<vmem>>, %arg5: memref<1x128xf32, #tpu.memory_space<vmem>>, %arg6: memref<1152x128xbf16, #tpu.memory_space<vmem>>, %arg7: memref<1x128xf32, #tpu.memory_space<vmem>>, %arg8: memref<1x16x16x128xf32, #tpu.memory_space<vmem>>, %arg9: memref<18x18x128xf32, #tpu.memory_space<vmem>>, %arg10: memref<9x2x18x128xf32, #tpu.memory_space<vmem>>, %arg11: memref<18x18x128xf32, #tpu.memory_space<vmem>>) attributes {dimension_semantics = [#tpu.dimension_semantics<parallel>], iteration_bounds = array<i64: 2>, scalar_prefetch = 0 : i64, scratch_operands = 3 : i64, tpu.core_type = #tpu.core_type<tc>, window_params = [{transform_indices = @transform_0, window_bounds = array<i64: 1, 16, 16, 128>}, {transform_indices = @transform_1, window_bounds = array<i64: 1, 2, 8, 16, 128>}, {pipeline_mode = #tpu.pipeline_mode<synchronous>, transform_indices = @transform_2, window_bounds = array<i64: 1152, 128>}, {pipeline_mode = #tpu.pipeline_mode<synchronous>, transform_indices = @transform_3, window_bounds = array<i64: 1152, 128>}, {pipeline_mode = #tpu.pipeline_mode<synchronous>, transform_indices = @transform_4, window_bounds = array<i64: 1, 128>}, {pipeline_mode = #tpu.pipeline_mode<synchronous>, transform_indices = @transform_5, window_bounds = array<i64: 1152, 128>}, {pipeline_mode = #tpu.pipeline_mode<synchronous>, transform_indices = @transform_6, window_bounds = array<i64: 1, 128>}, {transform_indices = @transform_7, window_bounds = array<i64: 1, 16, 16, 128>}]} {
    %cst = arith.constant 0.000000e+00 : f32
    %0 = vector.broadcast %cst : f32 to vector<18x18x128xf32>
    %c0 = arith.constant 0 : index
    %c0_0 = arith.constant 0 : index
    %c0_1 = arith.constant 0 : index
    %1 = vector.load %arg9[%c0, %c0_0, %c0_1] : memref<18x18x128xf32, #tpu.memory_space<vmem>>, vector<18x18x128xf32>
    tpu.vector_store %arg9[%c0, %c0_0, %c0_1], %0 {strides = array<i32>} : memref<18x18x128xf32, #tpu.memory_space<vmem>>, vector<18x18x128xf32>,
    %cst_2 = arith.constant 0.000000e+00 : f32
    %2 = vector.broadcast %cst_2 : f32 to vector<9x2x18x128xf32>
    %c0_3 = arith.constant 0 : index
    %c0_4 = arith.constant 0 : index
    %c0_5 = arith.constant 0 : index
    %c0_6 = arith.constant 0 : index
    %3 = vector.load %arg10[%c0_3, %c0_4, %c0_5, %c0_6] : memref<9x2x18x128xf32, #tpu.memory_space<vmem>>, vector<9x2x18x128xf32>
    tpu.vector_store %arg10[%c0_3, %c0_4, %c0_5, %c0_6], %2 {strides = array<i32>} : memref<9x2x18x128xf32, #tpu.memory_space<vmem>>, vector<9x2x18x128xf32>,
    %cst_7 = arith.constant 0.000000e+00 : f32
    %4 = vector.broadcast %cst_7 : f32 to vector<18x18x128xf32>
    %c0_8 = arith.constant 0 : index
    %c0_9 = arith.constant 0 : index
    %c0_10 = arith.constant 0 : index
    %5 = vector.load %arg11[%c0_8, %c0_9, %c0_10] : memref<18x18x128xf32, #tpu.memory_space<vmem>>, vector<18x18x128xf32>
    tpu.vector_store %arg11[%c0_8, %c0_9, %c0_10], %4 {strides = array<i32>} : memref<18x18x128xf32, #tpu.memory_space<vmem>>, vector<18x18x128xf32>,
    %c0_11 = arith.constant 0 : index
    %c0_12 = arith.constant 0 : index
    %c0_13 = arith.constant 0 : index
    %c0_14 = arith.constant 0 : index
    %6 = vector.load %arg1[%c0_11, %c0_12, %c0_13, %c0_14] : memref<1x16x16x128xf32, #tpu.memory_space<vmem>>, vector<1x16x16x128xf32>
    %7 = vector.shape_cast %6 : vector<1x16x16x128xf32> to vector<16x16x128xf32>
    %c1 = arith.constant 1 : index
    %c1_15 = arith.constant 1 : index
    %c0_16 = arith.constant 0 : index
    %8 = vector.load %arg9[%c1, %c1_15, %c0_16] : memref<18x18x128xf32, #tpu.memory_space<vmem>>, vector<16x16x128xf32>
    tpu.vector_store %arg9[%c1, %c1_15, %c0_16], %7 {strides = array<i32>} : memref<18x18x128xf32, #tpu.memory_space<vmem>>, vector<16x16x128xf32>,
    %c0_17 = arith.constant 0 : index
    %c0_18 = arith.constant 0 : index
    %c0_19 = arith.constant 0 : index
    %c0_20 = arith.constant 0 : index
    %c0_21 = arith.constant 0 : index
    %9 = vector.load %arg2[%c0_17, %c0_18, %c0_19, %c0_20, %c0_21] : memref<1x2x8x16x128xbf16, #tpu.memory_space<vmem>>, vector<1x1x8x16x128xbf16>
    %10 = vector.shape_cast %9 : vector<1x1x8x16x128xbf16> to vector<8x16x128xbf16>
    %11 = arith.extf %10 : vector<8x16x128xbf16> to vector<8x16x128xf32>
    %12 = vector.shape_cast %11 : vector<8x16x128xf32> to vector<8x1x16x128xf32>
    %c0_22 = arith.constant 0 : index
    %c1_23 = arith.constant 1 : index
    %c1_24 = arith.constant 1 : index
    %c0_25 = arith.constant 0 : index
    %13 = vector.load %arg10[%c0_22, %c1_23, %c1_24, %c0_25] : memref<9x2x18x128xf32, #tpu.memory_space<vmem>>, vector<8x1x16x128xf32>
    tpu.vector_store %arg10[%c0_22, %c1_23, %c1_24, %c0_25], %12 {strides = array<i32>} : memref<9x2x18x128xf32, #tpu.memory_space<vmem>>, vector<8x1x16x128xf32>,
    %c0_26 = arith.constant 0 : index
    %c1_27 = arith.constant 1 : index
    %c0_28 = arith.constant 0 : index
    %c0_29 = arith.constant 0 : index
    %c0_30 = arith.constant 0 : index
    %14 = vector.load %arg2[%c0_26, %c1_27, %c0_28, %c0_29, %c0_30] : memref<1x2x8x16x128xbf16, #tpu.memory_space<vmem>>, vector<1x1x8x16x128xbf16>
    %15 = vector.shape_cast %14 : vector<1x1x8x16x128xbf16> to vector<8x16x128xbf16>
    %16 = arith.extf %15 : vector<8x16x128xbf16> to vector<8x16x128xf32>
    %17 = vector.shape_cast %16 : vector<8x16x128xf32> to vector<8x1x16x128xf32>
    %c1_31 = arith.constant 1 : index
    %c0_32 = arith.constant 0 : index
    %c1_33 = arith.constant 1 : index
    %c0_34 = arith.constant 0 : index
    %18 = vector.load %arg10[%c1_31, %c0_32, %c1_33, %c0_34] : memref<9x2x18x128xf32, #tpu.memory_space<vmem>>, vector<8x1x16x128xf32>
    tpu.vector_store %arg10[%c1_31, %c0_32, %c1_33, %c0_34], %17 {strides = array<i32>} : memref<9x2x18x128xf32, #tpu.memory_space<vmem>>, vector<8x1x16x128xf32>,
    %c0_35 = arith.constant 0 : index
    %c0_36 = arith.constant 0 : index
    %c0_37 = arith.constant 0 : index
    %c0_38 = arith.constant 0 : index
    %19 = vector.load %arg10[%c0_35, %c0_36, %c0_37, %c0_38] : memref<9x2x18x128xf32, #tpu.memory_space<vmem>>, vector<9x2x18x128xf32>
    %20 = vector.shape_cast %19 : vector<9x2x18x128xf32> to vector<18x18x128xf32>
    %c0_39 = arith.constant 0 : index
    %c0_40 = arith.constant 0 : index
    %c0_41 = arith.constant 0 : index
    %21 = vector.load %arg9[%c0_39, %c0_40, %c0_41] : memref<18x18x128xf32, #tpu.memory_space<vmem>>, vector<16x16x128xf32>
    %22 = arith.truncf %21 : vector<16x16x128xf32> to vector<16x16x128xbf16>
    %23 = vector.shape_cast %22 : vector<16x16x128xbf16> to vector<256x128xbf16>
    %c0_42 = arith.constant 0 : index
    %c1_43 = arith.constant 1 : index
    %c0_44 = arith.constant 0 : index
    %24 = vector.load %arg9[%c0_42, %c1_43, %c0_44] : memref<18x18x128xf32, #tpu.memory_space<vmem>>, vector<16x16x128xf32>
    %25 = arith.truncf %24 : vector<16x16x128xf32> to vector<16x16x128xbf16>
    %26 = vector.shape_cast %25 : vector<16x16x128xbf16> to vector<256x128xbf16>
    %c0_45 = arith.constant 0 : index
    %c2 = arith.constant 2 : index
    %c0_46 = arith.constant 0 : index
    %27 = vector.load %arg9[%c0_45, %c2, %c0_46] : memref<18x18x128xf32, #tpu.memory_space<vmem>>, vector<16x16x128xf32>
    %28 = arith.truncf %27 : vector<16x16x128xf32> to vector<16x16x128xbf16>
    %29 = vector.shape_cast %28 : vector<16x16x128xbf16> to vector<256x128xbf16>
    %c1_47 = arith.constant 1 : index
    %c0_48 = arith.constant 0 : index
    %c0_49 = arith.constant 0 : index
    %30 = vector.load %arg9[%c1_47, %c0_48, %c0_49] : memref<18x18x128xf32, #tpu.memory_space<vmem>>, vector<16x16x128xf32>
    %31 = arith.truncf %30 : vector<16x16x128xf32> to vector<16x16x128xbf16>
    %32 = vector.shape_cast %31 : vector<16x16x128xbf16> to vector<256x128xbf16>
    %c1_50 = arith.constant 1 : index
    %c1_51 = arith.constant 1 : index
    %c0_52 = arith.constant 0 : index
    %33 = vector.load %arg9[%c1_50, %c1_51, %c0_52] : memref<18x18x128xf32, #tpu.memory_space<vmem>>, vector<16x16x128xf32>
    %34 = arith.truncf %33 : vector<16x16x128xf32> to vector<16x16x128xbf16>
    %35 = vector.shape_cast %34 : vector<16x16x128xbf16> to vector<256x128xbf16>
    %c1_53 = arith.constant 1 : index
    %c2_54 = arith.constant 2 : index
    %c0_55 = arith.constant 0 : index
    %36 = vector.load %arg9[%c1_53, %c2_54, %c0_55] : memref<18x18x128xf32, #tpu.memory_space<vmem>>, vector<16x16x128xf32>
    %37 = arith.truncf %36 : vector<16x16x128xf32> to vector<16x16x128xbf16>
    %38 = vector.shape_cast %37 : vector<16x16x128xbf16> to vector<256x128xbf16>
    %c2_56 = arith.constant 2 : index
    %c0_57 = arith.constant 0 : index
    %c0_58 = arith.constant 0 : index
    %39 = vector.load %arg9[%c2_56, %c0_57, %c0_58] : memref<18x18x128xf32, #tpu.memory_space<vmem>>, vector<16x16x128xf32>
    %40 = arith.truncf %39 : vector<16x16x128xf32> to vector<16x16x128xbf16>
    %41 = vector.shape_cast %40 : vector<16x16x128xbf16> to vector<256x128xbf16>
    %c2_59 = arith.constant 2 : index
    %c1_60 = arith.constant 1 : index
    %c0_61 = arith.constant 0 : index
    %42 = vector.load %arg9[%c2_59, %c1_60, %c0_61] : memref<18x18x128xf32, #tpu.memory_space<vmem>>, vector<16x16x128xf32>
    %43 = arith.truncf %42 : vector<16x16x128xf32> to vector<16x16x128xbf16>
    %44 = vector.shape_cast %43 : vector<16x16x128xbf16> to vector<256x128xbf16>
    %c2_62 = arith.constant 2 : index
    %c2_63 = arith.constant 2 : index
    %c0_64 = arith.constant 0 : index
    %45 = vector.load %arg9[%c2_62, %c2_63, %c0_64] : memref<18x18x128xf32, #tpu.memory_space<vmem>>, vector<16x16x128xf32>
    %46 = arith.truncf %45 : vector<16x16x128xf32> to vector<16x16x128xbf16>
    %47 = vector.shape_cast %46 : vector<16x16x128xbf16> to vector<256x128xbf16>
    %48 = tpu.concatenate %23, %26, %29, %32, %35, %38, %41, %44, %47 in 1 : vector<256x128xbf16>, vector<256x128xbf16>, vector<256x128xbf16>, vector<256x128xbf16>, vector<256x128xbf16>, vector<256x128xbf16>, vector<256x128xbf16>, vector<256x128xbf16>, vector<256x128xbf16> -> vector<256x1152xbf16>
    %c0_65 = arith.constant 0 : index
    %c0_66 = arith.constant 0 : index
    %49 = vector.load %arg3[%c0_65, %c0_66] : memref<1152x128xbf16, #tpu.memory_space<vmem>>, vector<1152x128xbf16>
    %cst_67 = arith.constant dense<0.000000e+00> : vector<256x128xf32>
    %50 = tpu.matmul %48, %49, %cst_67 {dimension_numbers = #tpu.dot_dimension_numbers<[1], [0], [0], [1], [0, 0, 1, 1], [], []>} : vector<256x1152xbf16>, vector<1152x128xbf16>, vector<256x128xf32> -> vector<256x128xf32>
    %51 = vector.extract_strided_slice %20 {offsets = [0, 0, 0], sizes = [16, 16, 128], strides = [1, 1, 1]} : vector<18x18x128xf32> to vector<16x16x128xf32>
    %52 = arith.truncf %51 : vector<16x16x128xf32> to vector<16x16x128xbf16>
    %53 = vector.shape_cast %52 : vector<16x16x128xbf16> to vector<256x128xbf16>
    %54 = vector.extract_strided_slice %20 {offsets = [0, 1, 0], sizes = [16, 16, 128], strides = [1, 1, 1]} : vector<18x18x128xf32> to vector<16x16x128xf32>
    %55 = arith.truncf %54 : vector<16x16x128xf32> to vector<16x16x128xbf16>
    %56 = vector.shape_cast %55 : vector<16x16x128xbf16> to vector<256x128xbf16>
    %57 = vector.extract_strided_slice %20 {offsets = [0, 2, 0], sizes = [16, 16, 128], strides = [1, 1, 1]} : vector<18x18x128xf32> to vector<16x16x128xf32>
    %58 = arith.truncf %57 : vector<16x16x128xf32> to vector<16x16x128xbf16>
    %59 = vector.shape_cast %58 : vector<16x16x128xbf16> to vector<256x128xbf16>
    %60 = vector.extract_strided_slice %20 {offsets = [1, 0, 0], sizes = [16, 16, 128], strides = [1, 1, 1]} : vector<18x18x128xf32> to vector<16x16x128xf32>
    %61 = arith.truncf %60 : vector<16x16x128xf32> to vector<16x16x128xbf16>
    %62 = vector.shape_cast %61 : vector<16x16x128xbf16> to vector<256x128xbf16>
    %63 = vector.extract_strided_slice %20 {offsets = [1, 1, 0], sizes = [16, 16, 128], strides = [1, 1, 1]} : vector<18x18x128xf32> to vector<16x16x128xf32>
    %64 = arith.truncf %63 : vector<16x16x128xf32> to vector<16x16x128xbf16>
    %65 = vector.shape_cast %64 : vector<16x16x128xbf16> to vector<256x128xbf16>
    %66 = vector.extract_strided_slice %20 {offsets = [1, 2, 0], sizes = [16, 16, 128], strides = [1, 1, 1]} : vector<18x18x128xf32> to vector<16x16x128xf32>
    %67 = arith.truncf %66 : vector<16x16x128xf32> to vector<16x16x128xbf16>
    %68 = vector.shape_cast %67 : vector<16x16x128xbf16> to vector<256x128xbf16>
    %69 = vector.extract_strided_slice %20 {offsets = [2, 0, 0], sizes = [16, 16, 128], strides = [1, 1, 1]} : vector<18x18x128xf32> to vector<16x16x128xf32>
    %70 = arith.truncf %69 : vector<16x16x128xf32> to vector<16x16x128xbf16>
    %71 = vector.shape_cast %70 : vector<16x16x128xbf16> to vector<256x128xbf16>
    %72 = vector.extract_strided_slice %20 {offsets = [2, 1, 0], sizes = [16, 16, 128], strides = [1, 1, 1]} : vector<18x18x128xf32> to vector<16x16x128xf32>
    %73 = arith.truncf %72 : vector<16x16x128xf32> to vector<16x16x128xbf16>
    %74 = vector.shape_cast %73 : vector<16x16x128xbf16> to vector<256x128xbf16>
    %75 = vector.extract_strided_slice %20 {offsets = [2, 2, 0], sizes = [16, 16, 128], strides = [1, 1, 1]} : vector<18x18x128xf32> to vector<16x16x128xf32>
    %76 = arith.truncf %75 : vector<16x16x128xf32> to vector<16x16x128xbf16>
    %77 = vector.shape_cast %76 : vector<16x16x128xbf16> to vector<256x128xbf16>
    %78 = tpu.concatenate %53, %56, %59, %62, %65, %68, %71, %74, %77 in 1 : vector<256x128xbf16>, vector<256x128xbf16>, vector<256x128xbf16>, vector<256x128xbf16>, vector<256x128xbf16>, vector<256x128xbf16>, vector<256x128xbf16>, vector<256x128xbf16>, vector<256x128xbf16> -> vector<256x1152xbf16>
    %c0_68 = arith.constant 0 : index
    %c0_69 = arith.constant 0 : index
    %79 = vector.load %arg4[%c0_68, %c0_69] : memref<1152x128xbf16, #tpu.memory_space<vmem>>, vector<1152x128xbf16>
    %cst_70 = arith.constant dense<0.000000e+00> : vector<256x128xf32>
    %80 = tpu.matmul %78, %79, %cst_70 {dimension_numbers = #tpu.dot_dimension_numbers<[1], [0], [0], [1], [0, 0, 1, 1], [], []>} : vector<256x1152xbf16>, vector<1152x128xbf16>, vector<256x128xf32> -> vector<256x128xf32>
    %81 = arith.addf %50, %80 : vector<256x128xf32>
    %c0_71 = arith.constant 0 : index
    %c0_72 = arith.constant 0 : index
    %82 = vector.load %arg5[%c0_71, %c0_72] : memref<1x128xf32, #tpu.memory_space<vmem>>, vector<1x128xf32>
    %83 = vector.broadcast %82 : vector<1x128xf32> to vector<256x128xf32>
    %84 = arith.addf %81, %83 : vector<256x128xf32>
    %cst_73 = arith.constant 0.000000e+00 : f32
    %85 = vector.broadcast %cst_73 : f32 to vector<256x128xf32>
    %86 = arith.maximumf %84, %85 : vector<256x128xf32>
    %87 = vector.shape_cast %86 : vector<256x128xf32> to vector<16x16x128xf32>
    %c1_74 = arith.constant 1 : index
    %c1_75 = arith.constant 1 : index
    %c0_76 = arith.constant 0 : index
    %88 = vector.load %arg11[%c1_74, %c1_75, %c0_76] : memref<18x18x128xf32, #tpu.memory_space<vmem>>, vector<16x16x128xf32>
    tpu.vector_store %arg11[%c1_74, %c1_75, %c0_76], %87 {strides = array<i32>} : memref<18x18x128xf32, #tpu.memory_space<vmem>>, vector<16x16x128xf32>,
    %c0_77 = arith.constant 0 : index
    %c0_78 = arith.constant 0 : index
    %c0_79 = arith.constant 0 : index
    %89 = vector.load %arg11[%c0_77, %c0_78, %c0_79] : memref<18x18x128xf32, #tpu.memory_space<vmem>>, vector<16x16x128xf32>
    %90 = arith.truncf %89 : vector<16x16x128xf32> to vector<16x16x128xbf16>
    %91 = vector.shape_cast %90 : vector<16x16x128xbf16> to vector<256x128xbf16>
    %c0_80 = arith.constant 0 : index
    %c1_81 = arith.constant 1 : index
    %c0_82 = arith.constant 0 : index
    %92 = vector.load %arg11[%c0_80, %c1_81, %c0_82] : memref<18x18x128xf32, #tpu.memory_space<vmem>>, vector<16x16x128xf32>
    %93 = arith.truncf %92 : vector<16x16x128xf32> to vector<16x16x128xbf16>
    %94 = vector.shape_cast %93 : vector<16x16x128xbf16> to vector<256x128xbf16>
    %c0_83 = arith.constant 0 : index
    %c2_84 = arith.constant 2 : index
    %c0_85 = arith.constant 0 : index
    %95 = vector.load %arg11[%c0_83, %c2_84, %c0_85] : memref<18x18x128xf32, #tpu.memory_space<vmem>>, vector<16x16x128xf32>
    %96 = arith.truncf %95 : vector<16x16x128xf32> to vector<16x16x128xbf16>
    %97 = vector.shape_cast %96 : vector<16x16x128xbf16> to vector<256x128xbf16>
    %c1_86 = arith.constant 1 : index
    %c0_87 = arith.constant 0 : index
    %c0_88 = arith.constant 0 : index
    %98 = vector.load %arg11[%c1_86, %c0_87, %c0_88] : memref<18x18x128xf32, #tpu.memory_space<vmem>>, vector<16x16x128xf32>
    %99 = arith.truncf %98 : vector<16x16x128xf32> to vector<16x16x128xbf16>
    %100 = vector.shape_cast %99 : vector<16x16x128xbf16> to vector<256x128xbf16>
    %c1_89 = arith.constant 1 : index
    %c1_90 = arith.constant 1 : index
    %c0_91 = arith.constant 0 : index
    %101 = vector.load %arg11[%c1_89, %c1_90, %c0_91] : memref<18x18x128xf32, #tpu.memory_space<vmem>>, vector<16x16x128xf32>
    %102 = arith.truncf %101 : vector<16x16x128xf32> to vector<16x16x128xbf16>
    %103 = vector.shape_cast %102 : vector<16x16x128xbf16> to vector<256x128xbf16>
    %c1_92 = arith.constant 1 : index
    %c2_93 = arith.constant 2 : index
    %c0_94 = arith.constant 0 : index
    %104 = vector.load %arg11[%c1_92, %c2_93, %c0_94] : memref<18x18x128xf32, #tpu.memory_space<vmem>>, vector<16x16x128xf32>
    %105 = arith.truncf %104 : vector<16x16x128xf32> to vector<16x16x128xbf16>
    %106 = vector.shape_cast %105 : vector<16x16x128xbf16> to vector<256x128xbf16>
    %c2_95 = arith.constant 2 : index
    %c0_96 = arith.constant 0 : index
    %c0_97 = arith.constant 0 : index
    %107 = vector.load %arg11[%c2_95, %c0_96, %c0_97] : memref<18x18x128xf32, #tpu.memory_space<vmem>>, vector<16x16x128xf32>
    %108 = arith.truncf %107 : vector<16x16x128xf32> to vector<16x16x128xbf16>
    %109 = vector.shape_cast %108 : vector<16x16x128xbf16> to vector<256x128xbf16>
    %c2_98 = arith.constant 2 : index
    %c1_99 = arith.constant 1 : index
    %c0_100 = arith.constant 0 : index
    %110 = vector.load %arg11[%c2_98, %c1_99, %c0_100] : memref<18x18x128xf32, #tpu.memory_space<vmem>>, vector<16x16x128xf32>
    %111 = arith.truncf %110 : vector<16x16x128xf32> to vector<16x16x128xbf16>
    %112 = vector.shape_cast %111 : vector<16x16x128xbf16> to vector<256x128xbf16>
    %c2_101 = arith.constant 2 : index
    %c2_102 = arith.constant 2 : index
    %c0_103 = arith.constant 0 : index
    %113 = vector.load %arg11[%c2_101, %c2_102, %c0_103] : memref<18x18x128xf32, #tpu.memory_space<vmem>>, vector<16x16x128xf32>
    %114 = arith.truncf %113 : vector<16x16x128xf32> to vector<16x16x128xbf16>
    %115 = vector.shape_cast %114 : vector<16x16x128xbf16> to vector<256x128xbf16>
    %116 = tpu.concatenate %91, %94, %97, %100, %103, %106, %109, %112, %115 in 1 : vector<256x128xbf16>, vector<256x128xbf16>, vector<256x128xbf16>, vector<256x128xbf16>, vector<256x128xbf16>, vector<256x128xbf16>, vector<256x128xbf16>, vector<256x128xbf16>, vector<256x128xbf16> -> vector<256x1152xbf16>
    %c0_104 = arith.constant 0 : index
    %c0_105 = arith.constant 0 : index
    %117 = vector.load %arg6[%c0_104, %c0_105] : memref<1152x128xbf16, #tpu.memory_space<vmem>>, vector<1152x128xbf16>
    %cst_106 = arith.constant dense<0.000000e+00> : vector<256x128xf32>
    %118 = tpu.matmul %116, %117, %cst_106 {dimension_numbers = #tpu.dot_dimension_numbers<[1], [0], [0], [1], [0, 0, 1, 1], [], []>} : vector<256x1152xbf16>, vector<1152x128xbf16>, vector<256x128xf32> -> vector<256x128xf32>
    %c0_107 = arith.constant 0 : index
    %c0_108 = arith.constant 0 : index
    %119 = vector.load %arg7[%c0_107, %c0_108] : memref<1x128xf32, #tpu.memory_space<vmem>>, vector<1x128xf32>
    %120 = vector.broadcast %119 : vector<1x128xf32> to vector<256x128xf32>
    %121 = arith.addf %118, %120 : vector<256x128xf32>
    %cst_109 = arith.constant 0.000000e+00 : f32
    %122 = vector.broadcast %cst_109 : f32 to vector<256x128xf32>
    %123 = arith.maximumf %121, %122 : vector<256x128xf32>
    %124 = vector.shape_cast %123 : vector<256x128xf32> to vector<16x16x128xf32>
    %c0_110 = arith.constant 0 : index
    %c0_111 = arith.constant 0 : index
    %c0_112 = arith.constant 0 : index
    %c0_113 = arith.constant 0 : index
    %125 = vector.load %arg8[%c0_110, %c0_111, %c0_112, %c0_113] : memref<1x16x16x128xf32, #tpu.memory_space<vmem>>, vector<1x16x16x128xf32>
    %126 = vector.shape_cast %125 : vector<1x16x16x128xf32> to vector<16x16x128xf32>
    %127 = vector.shape_cast %124 : vector<16x16x128xf32> to vector<1x16x16x128xf32>
    tpu.vector_store %arg8[%c0_110, %c0_111, %c0_112, %c0_113], %127 {strides = array<i32>} : memref<1x16x16x128xf32, #tpu.memory_space<vmem>>, vector<1x16x16x128xf32>,
    return
  }
  func.func @transform_0(%arg0: i32) -> (i32, i32, i32, i32) {
    %c0_i32 = arith.constant 0 : i32
    %c0_i32_0 = arith.constant 0 : i32
    %c0_i32_1 = arith.constant 0 : i32
    %c0_i32_2 = arith.constant 0 : i32
    return %arg0, %c0_i32, %c0_i32_0, %c0_i32_1 : i32, i32, i32, i32
  }
  func.func @transform_1(%arg0: i32) -> (i32, i32, i32, i32, i32) {
    %c0_i32 = arith.constant 0 : i32
    %c0_i32_0 = arith.constant 0 : i32
    %c0_i32_1 = arith.constant 0 : i32
    %c0_i32_2 = arith.constant 0 : i32
    %c0_i32_3 = arith.constant 0 : i32
    return %arg0, %c0_i32, %c0_i32_0, %c0_i32_1, %c0_i32_2 : i32, i32, i32, i32, i32
  }
  func.func @transform_2(%arg0: i32) -> (i32, i32) {
    %c0_i32 = arith.constant 0 : i32
    %c0_i32_0 = arith.constant 0 : i32
    %c0_i32_1 = arith.constant 0 : i32
    return %c0_i32, %c0_i32_0 : i32, i32
  }
  func.func @transform_3(%arg0: i32) -> (i32, i32) {
    %c0_i32 = arith.constant 0 : i32
    %c0_i32_0 = arith.constant 0 : i32
    %c0_i32_1 = arith.constant 0 : i32
    return %c0_i32, %c0_i32_0 : i32, i32
  }
  func.func @transform_4(%arg0: i32) -> (i32, i32) {
    %c0_i32 = arith.constant 0 : i32
    %c0_i32_0 = arith.constant 0 : i32
    %c0_i32_1 = arith.constant 0 : i32
    return %c0_i32, %c0_i32_0 : i32, i32
  }
  func.func @transform_5(%arg0: i32) -> (i32, i32) {
    %c0_i32 = arith.constant 0 : i32
    %c0_i32_0 = arith.constant 0 : i32
    %c0_i32_1 = arith.constant 0 : i32
    return %c0_i32, %c0_i32_0 : i32, i32
  }
  func.func @transform_6(%arg0: i32) -> (i32, i32) {
    %c0_i32 = arith.constant 0 : i32
    %c0_i32_0 = arith.constant 0 : i32
    %c0_i32_1 = arith.constant 0 : i32
    return %c0_i32, %c0_i32_0 : i32, i32
  }
  func.func @transform_7(%arg0: i32) -> (i32, i32, i32, i32) {
    %c0_i32 = arith.constant 0 : i32
    %c0_i32_0 = arith.constant 0 : i32
    %c0_i32_1 = arith.constant 0 : i32
    %c0_i32_2 = arith.constant 0 : i32
    return %arg0, %c0_i32, %c0_i32_0, %c0_i32_1 : i32, i32, i32, i32
  }
}

</mosaic_0001>

<bundles_post_ra>
// kernel: unet_up_forward.2
= control target key start
LH: loop header
LB: loop body
LE: loop exit
PB: predicated region body
PF: predicated region fallthrough
CT: control target
= control target key end

     0   :  { %s1428_s0 = inlined_call_operand.hbm [shape: f32[2,8,8,256], index: 0, kind: input, shape index: {}]   ;;  %s1429_s1 = inlined_call_operand.hbm [shape: bf16[2,256,256], index: 1, kind: input, shape index: {}]   ;;  %s1430_s2 = inlined_call_operand.vmem [shape: f32[1,256], index: 2, kind: input, shape index: {}]   ;;  %s1431_s3 = inlined_call_operand.vmem [shape: bf16[2,2,64,256], index: 3, kind: output, shape index: {}]  }
   0x1   :  { %1433 = sst [smem:[#allocation9_spill]] %s1428_s0 }
   0x2   :  { %8 = vsyncpa [#allocation3], 0 }
   0x3   :  { %10 = vsyncpa [#allocation3 + $0x1], 0 }
   0x4   :  { %11 = vsyncpa [#allocation5], 0 }
   0x5   :  { %13 = vsyncpa [#allocation5 + $0x1], 0  ;;  %s1161_s12 = smov 0   ;;  %s1163_s13 = smov 0  }
   0x6   :  { %s1165_s14 = smov 0   ;;  %s1167_s15 = smov 0  }
   0x7   :  { %s1169_s16 = smov 0   ;;  %s1171_s17 = smov 0  }
   0x8   :  { %s1173_s18 = smov 0   ;;  %s1175_s19 = smov 0  }
   0x9   :  { %s1177_s20 = smov 0   ;;  %s1179_s21 = smov 0  }
   0xa   :  { %s1181_s22 = smov 0  }
   0xb LB: > { %s731_s23 = sadd.s32 4294967295, %s1133_s22   ;;  %s31_s24 = sadd.s32 1, %s1129_s21  ;;  %s1133_s22 = sphi %s1181_s22, %s19_s22   ;;  %s1129_s21 = sphi %s1179_s21, %s1453_s21   ;;  %s1125_s20 = sphi %s1177_s20, %s1452_s20   ;;  %s1121_s19 = sphi %s1175_s19, %s1451_s19   ;;  %s1117_s18 = sphi %s1173_s18, %s1450_s18   ;;  %s1113_s17 = sphi %s1171_s17, %s1449_s17   ;;  %s1109_s16 = sphi %s1169_s16, %s1448_s16   ;;  %s1105_s15 = sphi %s1167_s15, %s1447_s15   ;;  %s1101_s14 = sphi %s1165_s14, %s1446_s14   ;;  %s1097_s13 = sphi %s1163_s13, %s1445_s13   ;;  %s1093_s12 = sphi %s1161_s12, %s1444_s12  }
   0xc   : > { %s38_s25 = sadd.s32 1, %s1113_s17  ;;  %p45_p0 = scmp.ne.s32.totalorder %s1113_s17, %s1109_s16 }
   0xd   : > { %p46_p1 = scmp.eq.s32.totalorder %s1133_s22, 0  ;;  %p51_p2 = scmp.ne.s32.totalorder %s1109_s16, %s1105_s15 }
   0xe   : > { %p1221_p3 = scmp.eq.s32.totalorder %s731_s23, 0  ;;  %p842_p5 = scmp.lt.s32.totalorder %s1133_s22, 4 }
   0xf   : > { %p47_p4 = por %p46_p1, %p45_p0  ;;  %s153_s28 = sand.u32 1, %s1113_s17  }
  0x10   : > { %p1230_p6 = por %p1221_p3, %p51_p2  ;;  %s735_s29 = sshll.u32 %s153_s28, 7 }
  0x11   : > { %s789_s30 = sshll.u32 %s1129_s21, 11  ;;  %s1436_s0 = sld [smem:[#allocation9_spill]] }
  0x12   : > { %s157_s7 = scalar_lea.vmem [#allocation2], %s735_s29  ;;  %p1241_p7 = pnand %p842_p5, %p47_p4 }
  0x13   : > { %s164_s8 = sshll.u32 %s157_s7, 4  ;;  %p741_p8 = scmp.ge.s32.totalorder %s1133_s22, 1  ;;  %s165_s8 = int_to_ptr.vmem [resolvable:$true] %s164_s8 }
  0x14   : > { %s154_s10 = scalar_lea.sflag [#allocation3], %s153_s28  ;;  %p985_p9 = pneg %p1241_p7 }
  0x15   : > { %s996_s11 = scalar_lea.vmem %s165_s8, 2048  ;;  %s1135_s15 = smov [#allocation2]  }
  0x16   : > { %p997_p10 = scmp.ne.s32.totalorder %s165_s8, %s996_s11  ;;  %s1001_s23 = sshll.u32 %s1135_s15, 4  ;;  %s1002_s23 = int_to_ptr.vmem [resolvable:$false] %s1001_s23 }
  0x17   : > { %s163_s6 = scalar_lea.hbm %s1436_s0, %s789_s30  ;;  %s1003_s29 = scalar_lea.vmem %s1002_s23, 4096 }
  0x18   : > { %p999_p11 = pnand %p997_p10, %p985_p9  ;;  %p1004_p13 = scmp.lt.s32.totalorder %s165_s8, %s1002_s23 }
  0x19   : > { %p1005_p0 = scmp.lt.s32.totalorder %s1003_s29, %s996_s11 }
  0x1a   : > { %p1000_p12 = pneg %p999_p11 }
  0x1b   : > { %p1006_p2 = por %p1005_p0, %p1004_p13 }
  0x1d   : > { %p1007_p4 = pnand %p1006_p2, %p1000_p12 }
  0x1f   : > { %1010 = shalt.err (!%p1007_p4)
}
  0x20   : > { %s1136_s30 = smov 256   ;;  %s1137_s28 = smov 16  }
  0x21   : > { %838 = dma.hbm_to_vmem [thread:$0]  (!%p1241_p7), %s163_s6, 2048, %s165_s8, %s154_s10, %s1136_s30, %s1136_s30, %s1137_s28  }
  0x22   : > { %p193_p9 = scmp.lt.s32.totalorder %s1133_s22, 5  ;;  %s28_s5 = sadd.s32 1, %s1125_s20 }
  0x23   : > { %s64_s7 = sadd.s32 1, %s1101_s14  ;;  %p29_p11 = scmp.ge.s32.totalorder %s28_s5, 2 }
  0x24   : > { %p1253_p10 = pnand %p741_p8, %p193_p9  ;;  %p71_p12 = scmp.ne.s32.totalorder %s1101_s14, %s1097_s13 }
  0x25   : > { %p77_p13 = scmp.ne.s32.totalorder %s1097_s13, %s1093_s12  ;;  %s174_s11 = sand.u32 1, %s1101_s14  }
  0x26   : > { %s1455_s5 = smov (%p29_p11, %s28_s5), 0  ;;  %s1457_s24 = smov (!%p29_p11, %s31_s24), %s1129_s21 }
  0x27   : > { %1439 = sst [smem:[#allocation8_spill]] %s1455_s5  ;;  %s61_s6 = ssub.s32 %s1125_s20, %s1455_s5 }
  0x28   : > { %p1273_p7 = por %p71_p12, %p46_p1  ;;  %p33_p8 = scmp.ge.s32.totalorder %s1457_s24, 2 }
  0x29   : > { %p62_p0 = scmp.eq.s32.totalorder %s61_s6, 0  ;;  %p1279_p2 = por %p77_p13, %p1221_p3 }
  0x2a   : > { %s1459_s24 = smov (%p33_p8, %s1457_s24), 0  ;;  %s738_s15 = sshll.u32 %s174_s11, 8 }
  0x2b   : > { %s1286_s9 = scalar_select %p62_p0, %s1101_s14, %s64_s7  }
  0x2c   : > { %s35_s10 = ssub.s32 %s1129_s21, %s1459_s24  ;;  %s790_s23 = sshll.u32 %s1125_s20, 12 }
  0x2d   : > { %p36_p4 = scmp.eq.s32.totalorder %s35_s10, 0  ;;  %s178_s29 = scalar_lea.vmem [#allocation4], %s738_s15 }
  0x2e   : > { %s185_s30 = sshll.u32 %s178_s29, 4  ;;  %s184_s0 = scalar_lea.hbm %s1429_s1, %s790_s23  ;;  %s186_s30 = int_to_ptr.vmem [resolvable:$true] %s185_s30 }
  0x2f   : > { %s1294_s28 = scalar_select %p36_p4, %s1113_s17, %s38_s25  }
  0x30   : > { %p1303_p1 = pnand %p842_p5, %p1273_p7  ;;  %s175_s7 = scalar_lea.sflag [#allocation5], %s174_s11 }
  0x31   : > { %s1024_s10 = scalar_lea.vmem %s186_s30, 4096  ;;  %s1138_s25 = smov [#allocation4]  }
  0x32   : > { %p1013_p3 = pneg %p1303_p1  ;;  %p1025_p9 = scmp.ne.s32.totalorder %s186_s30, %s1024_s10 }
  0x33   : > { %s1029_s15 = sshll.u32 %s1138_s25, 4  ;;  %s1030_s15 = int_to_ptr.vmem [resolvable:$false] %s1029_s15 }
  0x34   : > { %p1027_p11 = pnand %p1025_p9, %p1013_p3  ;;  %s1031_s29 = scalar_lea.vmem %s1030_s15, 8192 }
  0x35   : > { %p1032_p13 = scmp.lt.s32.totalorder %s186_s30, %s1030_s15  ;;  %p1033_p8 = scmp.lt.s32.totalorder %s1031_s29, %s1024_s10 }
  0x36   : > { %p1028_p12 = pneg %p1027_p11 }
  0x37   : > { %p1034_p0 = por %p1033_p8, %p1032_p13 }
  0x39   : > { %p1035_p4 = pnand %p1034_p0, %p1028_p12 }
  0x3b   : > { %1038 = shalt.err (!%p1035_p4)
}
  0x3c   : > { %s1139_s8 = smov 128   ;;  %s1140_s23 = smov 8  }
  0x3d   : > { %841 = dma.hbm_to_vmem [thread:$0]  (!%p1303_p1), %s184_s0, 4096, %s186_s30, %s175_s7, %s1139_s8, %s1139_s8, %s1140_s23  }
  0x3e   : > { %197 = sbr.rel (%p1253_p10) target bundleno = 349 (0x15d), region = 32  ;;  %s199_s11 = sand.u32 (!%p1253_p10), 1, %s1109_s16  }
  0x3f   : > { %s742_s6 = sshll.u32 (!%p1253_p10), %s199_s11, 7  ;;  %s200_s26 = scalar_lea.sflag (!%p1253_p10), [#allocation3], %s199_s11 }
  0x40   : > { %s1314_s25 = scalar_lea.vmem (!%p1253_p10), [#allocation2], %s742_s6 }
  0x43   : > { %1084 = dma.done.wait (%p1230_p6), %s200_s26, 2048  }
  0x44   : > { %1086 = vsyncadd (%p1230_p6), %s200_s26, 4294965248  ;;  %s208_s10 = sand.u32 1, %s1097_s13  }
  0x45   : > { %s743_s5 = sshll.u32 %s208_s10, 8  ;;  %s209_s0 = scalar_lea.sflag [#allocation5], %s208_s10 }
  0x46   : > { %s1321_s30 = scalar_lea.vmem [#allocation4], %s743_s5 }
  0x47   : > { %1088 = dma.done.wait (%p1279_p2), %s209_s0, 4096  }
  0x48   : > { %1090 = vsyncadd (%p1279_p2), %s209_s0, 4294963200  ;;  %v935_v0 = vld [vmem:[%s1321_s30 + $0x74] ss:$8 sps:$4 sm:$0xff]   ;;  %v937_v1 = vld [vmem:[%s1321_s30 + $0x70] ss:$8 sps:$4 sm:$0xff]   ;;  %p244_p5 = scmp.lt.s32.totalorder %s1121_s19, 1  ;;  %v311_v56 = vlaneseq }
  0x49   : > { %481 = vmatprep.subr.bf16.mxu0 %v935_v0  ;;  %799 = vmatprep.subr.bf16.mxu1 %v935_v0  ;;  %v938_v2 = vld [vmem:[%s1321_s30 + $0x64] ss:$8 sps:$4 sm:$0xff]   ;;  %v940_v3 = vld [vmem:[%s1321_s30 + $0x60] ss:$8 sps:$4 sm:$0xff]   ;;  %v941_v4 = vld [vmem:[%s1321_s30 + $0x54] ss:$8 sps:$4 sm:$0xff]  }
  0x4a   : > { %482 = vmatpush1.bf16.msra.mxu0 %v937_v1  ;;  %815 = vmatpush1.bf16.msra.mxu1 %v937_v1  ;;  %v943_v5 = vld [vmem:[%s1321_s30 + $0x50] ss:$8 sps:$4 sm:$0xff]   ;;  %v944_v6 = vld [vmem:[%s1321_s30 + $0x44] ss:$8 sps:$4 sm:$0xff]   ;;  %v946_v7 = vld [vmem:[%s1321_s30 + $0x40] ss:$8 sps:$4 sm:$0xff]  }
  0x4b   : > { %483 = vmatprep.subr.bf16.mxu0 %v938_v2  ;;  %800 = vmatprep.subr.bf16.mxu1 %v938_v2  ;;  %v947_v8 = vld [vmem:[%s1321_s30 + $0x34] ss:$8 sps:$4 sm:$0xff]   ;;  %v949_v9 = vld [vmem:[%s1321_s30 + $0x30] ss:$8 sps:$4 sm:$0xff]   ;;  %v950_v10 = vld [vmem:[%s1321_s30 + $0x24] ss:$8 sps:$4 sm:$0xff]  }
  0x4c   : > { %v952_v11 = vld [vmem:[%s1321_s30 + $0x20] ss:$8 sps:$4 sm:$0xff]   ;;  %v953_v12 = vld [vmem:[%s1321_s30 + $0x14] ss:$8 sps:$4 sm:$0xff]   ;;  %v955_v18 = vld [vmem:[%s1321_s30 + $0x10] ss:$8 sps:$4 sm:$0xff]  }
  0x4d   : > { %v254_v13 = vld [vmem:[%s1314_s25 + $0x8] sm:$0xff]  ;;  %v256_v14 = vld [vmem:[%s1314_s25 + $0x18] sm:$0xff]  ;;  %v253_v38 = vld [vmem:[%s1314_s25] sm:$0xff]  ;;  %p246_p6 = scmp.lt.s32.totalorder %s1117_s18, 1  ;;  %s1461_s19 = smov (!%p244_p5, %s1121_s19), 1  ;;  %v312_v57 = vshrl.u32 %v311_v56, 7 }
  0x4e   : > { %484 = vmatpush1.bf16.msra.mxu0 %v940_v3  ;;  %816 = vmatpush1.bf16.msra.mxu1 %v940_v3  ;;  %v270_v15 = vpack.c.bf16 %v256_v14, %v254_v13  ;;  %v262_v16 = vld [vmem:[%s1314_s25 + $0x48] sm:$0xff]  ;;  %v264_v17 = vld [vmem:[%s1314_s25 + $0x58] sm:$0xff]  ;;  %v255_v39 = vld [vmem:[%s1314_s25 + $0x10] sm:$0xff]  ;;  %s745_s4 = sshll.u32 %s1461_s19, 5 }
  0x4f   : > { %485 = vmatprep.subr.bf16.mxu0 %v941_v4  ;;  %801 = vmatprep.subr.bf16.mxu1 %v941_v4  ;;  %v274_v19 = vpack.c.bf16 %v264_v17, %v262_v16  ;;  %v956_v20 = vld [vmem:[%s1321_s30 + $0x4] ss:$8 sps:$4 sm:$0xff]   ;;  %v958_v21 = vld [vmem:[%s1321_s30] ss:$8 sps:$4 sm:$0xff]   ;;  %v959_v22 = vld [vmem:[%s1321_s30 + $0xf4] ss:$8 sps:$4 sm:$0xff]   ;;  %v269_v46 = vpack.c.bf16 %v255_v39, %v253_v38 }
  0x50   : > { %513 = vmatprep.mubr.bf16.mxu0 %v270_v15  ;;  %v961_v23 = vld [vmem:[%s1321_s30 + $0xf0] ss:$8 sps:$4 sm:$0xff]   ;;  %v962_v24 = vld [vmem:[%s1321_s30 + $0xe4] ss:$8 sps:$4 sm:$0xff]   ;;  %v964_v25 = vld [vmem:[%s1321_s30 + $0xe0] ss:$8 sps:$4 sm:$0xff]  }
  0x51   : > { %533 = vmatprep.mubr.bf16.mxu1 %v274_v19  ;;  %v965_v26 = vld [vmem:[%s1321_s30 + $0xd4] ss:$8 sps:$4 sm:$0xff]   ;;  %v967_v27 = vld [vmem:[%s1321_s30 + $0xd0] ss:$8 sps:$4 sm:$0xff]   ;;  %v968_v28 = vld [vmem:[%s1321_s30 + $0xc4] ss:$8 sps:$4 sm:$0xff]  }
  0x52   : > { %486 = vmatpush1.bf16.msra.mxu0 %v943_v5  ;;  %817 = vmatpush1.bf16.msra.mxu1 %v943_v5  ;;  %v970_v29 = vld [vmem:[%s1321_s30 + $0xc0] ss:$8 sps:$4 sm:$0xff]   ;;  %v971_v30 = vld [vmem:[%s1321_s30 + $0xb4] ss:$8 sps:$4 sm:$0xff]   ;;  %v973_v31 = vld [vmem:[%s1321_s30 + $0xb0] ss:$8 sps:$4 sm:$0xff]  }
  0x53   : > { %487 = vmatprep.subr.bf16.mxu0 %v944_v6  ;;  %802 = vmatprep.subr.bf16.mxu1 %v944_v6  ;;  %v974_v32 = vld [vmem:[%s1321_s30 + $0xa4] ss:$8 sps:$4 sm:$0xff]   ;;  %v976_v33 = vld [vmem:[%s1321_s30 + $0xa0] ss:$8 sps:$4 sm:$0xff]   ;;  %v977_v34 = vld [vmem:[%s1321_s30 + $0x94] ss:$8 sps:$4 sm:$0xff]  }
  0x54   : > { %v979_v35 = vld [vmem:[%s1321_s30 + $0x90] ss:$8 sps:$4 sm:$0xff]   ;;  %v980_v36 = vld [vmem:[%s1321_s30 + $0x84] ss:$8 sps:$4 sm:$0xff]   ;;  %v982_v37 = vld [vmem:[%s1321_s30 + $0x80] ss:$8 sps:$4 sm:$0xff]  }
  0x55   : > { %v261_v40 = vld [vmem:[%s1314_s25 + $0x40] sm:$0xff]  ;;  %v263_v41 = vld [vmem:[%s1314_s25 + $0x50] sm:$0xff]  ;;  %v258_v42 = vld [vmem:[%s1314_s25 + $0x28] sm:$0xff]  ;;  %s1463_s18 = smov (!%p246_p6, %s1117_s18), 1  ;;  %v313_v58 = vsub.s32 0, %v312_v57  ;;  %v317_v59 = vsub.s32 1, %v312_v57 }
  0x56   : > { %488 = vmatpush1.bf16.msra.mxu0 %v946_v7  ;;  %818 = vmatpush1.bf16.msra.mxu1 %v946_v7  ;;  %v260_v43 = vld [vmem:[%s1314_s25 + $0x38] sm:$0xff]  ;;  %v266_v44 = vld [vmem:[%s1314_s25 + $0x68] sm:$0xff]  ;;  %v273_v47 = vpack.c.bf16 %v263_v41, %v261_v40  ;;  %v257_v50 = vld [vmem:[%s1314_s25 + $0x20] sm:$0xff]  ;;  %s744_s27 = sshll.u32 %s1463_s18, 4 }
  0x57   : > { %489 = vmatprep.subr.bf16.mxu0 %v947_v8  ;;  %803 = vmatprep.subr.bf16.mxu1 %v947_v8  ;;  %v268_v45 = vld [vmem:[%s1314_s25 + $0x78] sm:$0xff]  ;;  %v272_v48 = vpack.c.bf16 %v260_v43, %v258_v42  ;;  %v259_v51 = vld [vmem:[%s1314_s25 + $0x30] sm:$0xff]  ;;  %v265_v52 = vld [vmem:[%s1314_s25 + $0x60] sm:$0xff]  ;;  %s250_s15 = sadd.s32 %s745_s4, %s744_s27 }
  0x58   : > { %v276_v49 = vpack.c.bf16 %v268_v45, %v266_v44  ;;  %v267_v53 = vld [vmem:[%s1314_s25 + $0x70] sm:$0xff]  ;;  %v271_v54 = vpack.c.bf16 %v259_v51, %v257_v50  ;;  %v309_v60 = vld [vmem:[%s1430_s2] sm:$0x3]  ;;  %s746_s29 = sshll.u32 %s250_s15, 2 }
  0x59   : > { %v275_v55 = vpack.c.bf16 %v267_v53, %v265_v52  ;;  %v314_v61 = vrot.slane %v309_v60, %v313_v58  ;;  %v318_v62 = vrot.slane %v309_v60, %v317_v59  ;;  %s1385_s19 = scalar_lea.vmem %s1431_s3, %s746_s29 }
  0x5a   : > { %490 = vmatpush1.bf16.msra.mxu0 %v949_v9  ;;  %819 = vmatpush1.bf16.msra.mxu1 %v949_v9 }
  0x5b   : > { %491 = vmatprep.subr.bf16.mxu0 %v950_v10  ;;  %804 = vmatprep.subr.bf16.mxu1 %v950_v10 }
  0x5e   : > { %492 = vmatpush1.bf16.msra.mxu0 %v952_v11  ;;  %820 = vmatpush1.bf16.msra.mxu1 %v952_v11 }
  0x5f   : > { %493 = vmatprep.subr.bf16.mxu0 %v953_v12  ;;  %805 = vmatprep.subr.bf16.mxu1 %v953_v12 }
  0x62   : > { %494 = vmatpush1.bf16.msra.mxu0 %v955_v18  ;;  %821 = vmatpush1.bf16.msra.mxu1 %v955_v18 }
  0x63   : > { %495 = vmatprep.subr.bf16.mxu0 %v956_v20  ;;  %806 = vmatprep.subr.bf16.mxu1 %v956_v20 }
  0x66   : > { %496 = vmatpush1.bf16.msra.mxu0 %v958_v21  ;;  %822 = vmatpush1.bf16.msra.mxu1 %v958_v21 }
  0x67   : > { %497 = vmatprep.subr.bf16.mxu0 %v959_v22  ;;  %807 = vmatprep.subr.bf16.mxu1 %v959_v22 }
  0x6a   : > { %498 = vmatpush2.bf16.msra.mxu0 %v961_v23  ;;  %823 = vmatpush2.bf16.msra.mxu1 %v961_v23 }
  0x6b   : > { %499 = vmatprep.subr.bf16.mxu0 %v962_v24  ;;  %808 = vmatprep.subr.bf16.mxu1 %v962_v24 }
  0x6e   : > { %500 = vmatpush2.bf16.msra.mxu0 %v964_v25  ;;  %824 = vmatpush2.bf16.msra.mxu1 %v964_v25 }
  0x6f   : > { %501 = vmatprep.subr.bf16.mxu0 %v965_v26  ;;  %809 = vmatprep.subr.bf16.mxu1 %v965_v26 }
  0x72   : > { %502 = vmatpush2.bf16.msra.mxu0 %v967_v27  ;;  %825 = vmatpush2.bf16.msra.mxu1 %v967_v27 }
  0x73   : > { %503 = vmatprep.subr.bf16.mxu0 %v968_v28  ;;  %810 = vmatprep.subr.bf16.mxu1 %v968_v28 }
  0x76   : > { %504 = vmatpush2.bf16.msra.mxu0 %v970_v29  ;;  %826 = vmatpush2.bf16.msra.mxu1 %v970_v29 }
  0x77   : > { %505 = vmatprep.subr.bf16.mxu0 %v971_v30  ;;  %811 = vmatprep.subr.bf16.mxu1 %v971_v30 }
  0x7a   : > { %506 = vmatpush2.bf16.msra.mxu0 %v973_v31  ;;  %827 = vmatpush2.bf16.msra.mxu1 %v973_v31 }
  0x7b   : > { %507 = vmatprep.subr.bf16.mxu0 %v974_v32  ;;  %812 = vmatprep.subr.bf16.mxu1 %v974_v32 }
  0x7e   : > { %508 = vmatpush2.bf16.msra.mxu0 %v976_v33  ;;  %828 = vmatpush2.bf16.msra.mxu1 %v976_v33 }
  0x7f   : > { %509 = vmatprep.subr.bf16.mxu0 %v977_v34  ;;  %813 = vmatprep.subr.bf16.mxu1 %v977_v34 }
  0x82   : > { %510 = vmatpush2.bf16.msra.mxu0 %v979_v35  ;;  %829 = vmatpush2.bf16.msra.mxu1 %v979_v35 }
  0x83   : > { %511 = vmatprep.subr.bf16.mxu0 %v980_v36  ;;  %814 = vmatprep.subr.bf16.mxu1 %v980_v36 }
  0x86   : > { %512 = vmatpush2.bf16.msra.mxu0 %v982_v37  ;;  %830 = vmatpush2.bf16.msra.mxu1 %v982_v37 }
  0x89   : > { %514 = vmatmul.mubr.bf16.vlgmr.msra.gmra.mxu0 %v269_v46  ;;  %534 = vmatmul.mubr.bf16.vlgmr.msra.gmra.mxu1 %v273_v47 }
  0x8a   : > { %523 = vmatprep.mubr.bf16.mxu0 %v272_v48  ;;  %543 = vmatprep.mubr.bf16.mxu1 %v276_v49 }
  0x91   : > { %524 = vmatmul.mubr.bf16.gmra.mxu0 %v271_v54  ;;  %544 = vmatmul.mubr.bf16.gmra.mxu1 %v275_v55 }
 0x149   : > { %v515_v63 = vpop.f32.mrf.mxu0  ;;  %v535_v0 = vpop.f32.mrf.mxu1 }
 0x14a   : > { %v516_v3 = vadd.f32 %v515_v63, %v314_v61  ;;  %v536_v4 = vadd.f32 %v535_v0, %v314_v61 }
 0x14b   : > { %v517_v1 = vpop.f32.mrf.mxu0  ;;  %v537_v2 = vpop.f32.mrf.mxu1 }
 0x14c   : > { %v518_v5 = vadd.f32 %v517_v1, %v318_v62  ;;  %v538_v6 = vadd.f32 %v537_v2, %v318_v62 }
 0x14d   : > { %v519_v7 = vpop.f32.mrf.mxu0  ;;  %v539_v8 = vpop.f32.mrf.mxu1 }
 0x14e   : > { %v791_v9 = vpack.c.bf16 %v518_v5, %v516_v3  ;;  %v795_v10 = vpack.c.bf16 %v538_v6, %v536_v4  ;;  %v520_v13 = vadd.f32 %v519_v7, %v314_v61  ;;  %v540_v14 = vadd.f32 %v539_v8, %v314_v61 }
 0x14f   : > { %v521_v11 = vpop.f32.mrf.mxu0  ;;  %v541_v12 = vpop.f32.mrf.mxu1 }
 0x150   : > { %602 = vst [vmem:[%s1385_s19] sm:$0xff] %v791_v9  ;;  %606 = vst [vmem:[%s1385_s19 + $0x20] sm:$0xff] %v795_v10  ;;  %v522_v15 = vadd.f32 %v521_v11, %v318_v62  ;;  %v542_v16 = vadd.f32 %v541_v12, %v318_v62 }
 0x151   : > { %v525_v17 = vpop.f32.mrf.mxu0  ;;  %v545_v18 = vpop.f32.mrf.mxu1 }
 0x152   : > { %v792_v19 = vpack.c.bf16 %v522_v15, %v520_v13  ;;  %v796_v20 = vpack.c.bf16 %v542_v16, %v540_v14  ;;  %v526_v23 = vadd.f32 %v525_v17, %v314_v61  ;;  %v546_v24 = vadd.f32 %v545_v18, %v314_v61 }
 0x153   : > { %v527_v21 = vpop.f32.mrf.mxu0  ;;  %v547_v22 = vpop.f32.mrf.mxu1 }
 0x154   : > { %603 = vst [vmem:[%s1385_s19 + $0x8] sm:$0xff] %v792_v19  ;;  %607 = vst [vmem:[%s1385_s19 + $0x28] sm:$0xff] %v796_v20  ;;  %v528_v25 = vadd.f32 %v527_v21, %v318_v62  ;;  %v548_v26 = vadd.f32 %v547_v22, %v318_v62 }
 0x155   : > { %v529_v27 = vpop.f32.mrf.mxu0  ;;  %v549_v28 = vpop.f32.mrf.mxu1 }
 0x156   : > { %v793_v29 = vpack.c.bf16 %v528_v25, %v526_v23  ;;  %v797_v30 = vpack.c.bf16 %v548_v26, %v546_v24  ;;  %v530_v33 = vadd.f32 %v529_v27, %v314_v61  ;;  %v550_v34 = vadd.f32 %v549_v28, %v314_v61 }
 0x157   : > { %v531_v31 = vpop.f32.mrf.mxu0  ;;  %v551_v32 = vpop.f32.mrf.mxu1 }
 0x158   : > { %604 = vst [vmem:[%s1385_s19 + $0x10] sm:$0xff] %v793_v29  ;;  %608 = vst [vmem:[%s1385_s19 + $0x30] sm:$0xff] %v797_v30  ;;  %v532_v35 = vadd.f32 %v531_v31, %v318_v62  ;;  %v552_v36 = vadd.f32 %v551_v32, %v318_v62 }
 0x15a   : > { %v794_v37 = vpack.c.bf16 %v532_v35, %v530_v33  ;;  %v798_v38 = vpack.c.bf16 %v552_v36, %v550_v34 }
 0x15c   : > { %605 = vst [vmem:[%s1385_s19 + $0x18] sm:$0xff] %v794_v37  ;;  %609 = vst [vmem:[%s1385_s19 + $0x38] sm:$0xff] %v798_v38 }
 0x15d PF: > { %s19_s22 = sadd.s32 1, %s1133_s22   ;;  %s1443_s23 = sld [smem:[#allocation8_spill]] }
 0x15e   : > { %p16_p10 = scmp.ge.s32.totalorder %s19_s22, 6   ;;  %s1444_s12 = smov %s1097_s13 }
 0x15f   : > { %s1445_s13 = smov %s1101_s14  ;;  %s1446_s14 = smov %s1286_s9 }
 0x160   : > { %s1447_s15 = smov %s1109_s16  ;;  %s1448_s16 = smov %s1113_s17 }
 0x161   : > { %s1449_s17 = smov %s1294_s28  ;;  %s1450_s18 = smov %s1125_s20 }
 0x162   : > { %s1451_s19 = smov %s1129_s21  ;;  %s1453_s21 = smov %s1459_s24 }
 0x163   : > { %s1452_s20 = smov %s1443_s23  ;;  %18 = sbr.rel (!%p16_p10) target bundleno = 11 (0xb), region = 85 }
 0x168   :  { %639 = vsyncpa [#allocation3], 1 }
 0x169   :  { %641 = vsyncpa [#allocation3 + $0x1], 1 }
 0x16a   :  { %642 = vsyncpa [#allocation5], 1 }
 0x16b   :  { %644 = vsyncpa [#allocation5 + $0x1], 1 }

// kernel: unet_up_forward.3
= control target key start
LH: loop header
LB: loop body
LE: loop exit
PB: predicated region body
PF: predicated region fallthrough
CT: control target
= control target key end

     0   :  { %s11802_s0 = inlined_call_operand.hbm [shape: f32[2,16,16,128], index: 0, kind: input, shape index: {}]   ;;  %s11803_s1 = inlined_call_operand.vmem [shape: bf16[2,2,8,16,128], index: 1, kind: input, shape index: {}]   ;;  %s11804_s2 = inlined_call_operand.vmem [shape: bf16[1152,128], index: 2, kind: input, shape index: {}]   ;;  %s11805_s3 = inlined_call_operand.vmem [shape: bf16[1152,128], index: 3, kind: input, shape index: {}]   ;;  %s11806_s4 = inlined_call_operand.vmem [shape: f32[1,128], index: 4, kind: input, shape index: {}]   ;;  %s11807_s5 = inlined_call_operand.hbm [shape: bf16[1152,128], index: 5, kind: input, shape index: {}]   ;;  %s11808_s6 = inlined_call_operand.vmem [shape: f32[1,128], index: 6, kind: input, shape index: {}]   ;;  %s11809_s7 = inlined_call_operand.hbm [shape: f32[2,16,16,128], index: 7, kind: output, shape index: {}]  }
   0x1   :  { %11828 = sst [smem:[#allocation45_spill]] %s11807_s5 }
   0x2   :  { %12 = vsyncpa [#allocation6], 0 }
   0x3   :  { %14 = vsyncpa [#allocation6 + $0x1], 0 }
   0x4   :  { %15 = vsyncpa [#allocation9], 0 }
   0x5   :  { %16 = vsyncpa [#allocation7], 0 }
   0x6   :  { %18 = vsyncpa [#allocation7 + $0x1], 0  ;;  %s8755_s24 = smov 0   ;;  %s8757_s25 = smov 0  }
   0x7   :  { %s8759_s26 = smov 0   ;;  %s8761_s27 = smov 0  }
   0x8 LB: > { %s8776_s28 = sadd.s32 4294967295, %s8701_s27   ;;  %s6386_s29 = sadd.s32 4294967294, %s8701_s27   ;;  %s8701_s27 = sphi %s8761_s27, %s12038_s27   ;;  %s8697_s26 = sphi %s8759_s26, %s12037_s26   ;;  %s8693_s25 = sphi %s8757_s25, %s12036_s25   ;;  %s8689_s24 = sphi %s8755_s24, %s12035_s24  }
   0x9   : > { %p44_p0 = scmp.ne.s32.totalorder %s8693_s25, %s8689_s24  ;;  %p11810_p1 = scmp.eq.s32.totalorder %s8776_s28, 0 }
   0xa   : > { %p205_p3 = scmp.eq.s32.totalorder %s6386_s29, 1  ;;  %p6387_p5 = scmp.ge.s32.totalorder %s8701_s27, 1 }
   0xb   : > { %p8785_p4 = por %p11810_p1, %p44_p0  ;;  %p212_p7 = scmp.lt.s32.totalorder %s8701_s27, 3 }
   0xc   : > { %p8790_p6 = por %p205_p3, %p44_p0  ;;  %s8703_s10 = smov [#allocation8]  }
   0xd   : > { %s11829_s30 = scalar_select %p8785_p4, 1, 0 }
   0xe   : > { %s11830_s8 = scalar_select %p8790_p6, 1, 0 }
   0xf   : > { %p8795_p8 = pnand %p6387_p5, %p212_p7  ;;  %s233_s11 = sshll.u32 %s8703_s10, 4  ;;  %s234_s11 = int_to_ptr.vmem [resolvable:$true] %s233_s11 }
  0x10   : > { %s8809_s13 = sadd.s32 1, %s8701_s27   ;;  %s31_s14 = sadd.s32 1, %s8697_s26 }
  0x11   : > { %s11831_s9 = scalar_select %p8795_p8, 1, 0 }
  0x12   : > { %p8304_p9 = pneg %p8795_p8  ;;  %s28_s15 = ssub.s32 %s8701_s27, %s8809_s13 }
  0x13   : > { %s8590_s16 = scalar_lea.vmem %s234_s11, 9216  ;;  %p8598_p5 = scmp.lt.s32.totalorder %s234_s11, %s234_s11 }
  0x14   : > { %p8804_p11 = pnand %p8304_p9, %p11810_p1  ;;  %p8591_p13 = scmp.ne.s32.totalorder %s234_s11, %s8590_s16 }
  0x15   : > { %p8599_p7 = scmp.lt.s32.totalorder %s8590_s16, %s8590_s16 }
  0x16   : > { %p8581_p12 = pneg %p8804_p11 }
  0x17   : > { %p8600_p10 = por %p8599_p7, %p8598_p5 }
  0x18   : > { %p8593_p0 = pnand %p8591_p13, %p8581_p12 }
  0x1a   : > { %p8594_p3 = pneg %p8593_p0 }
  0x1c   : > { %p8601_p2 = pnand %p8600_p10, %p8594_p3 }
  0x1e   : > { %8604 = shalt.err (!%p8601_p2)
}
  0x1f   : > { %s8704_s17 = smov 64   ;;  %s8705_s18 = smov 4  }
  0x20   : > { %s11833_s5 = sld [smem:[#allocation45_spill]]  ;;  %p29_p9 = scmp.eq.s32.totalorder %s28_s15, 0 }
  0x21   : > { %p38_p12 = scmp.ne.s32.totalorder %s8697_s26, %s8693_s25  ;;  %p39_p10 = scmp.eq.s32.totalorder %s8701_s27, 0 }
  0x22   : > { %p8317_p2 = scmp.lt.s32.totalorder %s8701_s27, 2  ;;  %p11834_p0 = scmp.eq.s32.totalorder %s8776_s28, 1 }
  0x23   : > { %s8826_s21 = scalar_select %p29_p9, %s8697_s26, %s31_s14  }
  0x24   : > { %p40_p13 = por %p39_p10, %p38_p12  ;;  %p8830_p3 = por %p11834_p0, %p38_p12 }
  0x25   : > { %s250_s23 = sand.u32 1, %s8697_s26   ;;  %s6638_s29 = sshll.u32 %s8701_s27, 12 }
  0x26   : > { %8307 = dma.hbm_to_vmem [thread:$0]  (!%p8804_p11), %s11833_s5, 9216, %s234_s11, [#allocation9], %s8704_s17, %s8704_s17, %s8705_s18  }
  0x27   : > { %s11835_s22 = scalar_select %p8830_p3, 1, 0 }
  0x28   : > { %s6390_s10 = sshll.u32 %s250_s23, 8  ;;  %s8839_s19 = scalar_lea.hbm %s11802_s0, %s6638_s29 }
  0x29   : > { %s254_s11 = scalar_lea.vmem [#allocation5], %s6390_s10  ;;  %p8841_p11 = pnand %p8317_p2, %p40_p13 }
  0x2a   : > { %s261_s14 = sshll.u32 %s254_s11, 4  ;;  %s8847_s17 = scalar_lea.sflag [#allocation6], %s250_s23  ;;  %s8845_s14 = int_to_ptr.vmem [resolvable:$true] %s261_s14 }
  0x2b   : > { %s8605_s18 = scalar_lea.hbm %s8839_s19, 4096  ;;  %p8607_p7 = pneg %p8841_p11 }
  0x2c   : > { %p8606_p5 = scmp.ne.s32.totalorder %s8839_s19, %s8605_s18  ;;  %s8610_s10 = scalar_lea.hbm %s11802_s0, 8192 }
  0x2d   : > { %p8611_p10 = scmp.lt.s32.totalorder %s8839_s19, %s11802_s0  ;;  %p8612_p2 = scmp.lt.s32.totalorder %s8610_s10, %s8605_s18 }
  0x2e   : > { %p8608_p9 = pnand %p8607_p7, %p8606_p5 }
  0x2f   : > { %p8613_p13 = por %p8612_p2, %p8611_p10 }
  0x30   : > { %p8609_p12 = pneg %p8608_p9 }
  0x32   : > { %p8614_p0 = pnand %p8613_p13, %p8609_p12 }
  0x34   : > { %8617 = shalt.err (!%p8614_p0)
}
  0x35   : > { %s8618_s23 = scalar_lea.vmem %s8845_s14, 4096  ;;  %s8706_s11 = smov [#allocation5]  }
  0x36   : > { %p8619_p1 = scmp.ne.s32.totalorder %s8845_s14, %s8618_s23  ;;  %s8623_s5 = sshll.u32 %s8706_s11, 4  ;;  %s8624_s5 = int_to_ptr.vmem [resolvable:$false] %s8623_s5 }
  0x37   : > { %s8625_s20 = scalar_lea.vmem %s8624_s5, 8192  ;;  %p8626_p9 = scmp.lt.s32.totalorder %s8845_s14, %s8624_s5 }
  0x38   : > { %p8621_p6 = pnand %p8619_p1, %p8607_p7  ;;  %p8627_p3 = scmp.lt.s32.totalorder %s8625_s20, %s8618_s23 }
  0x3a   : > { %p8622_p5 = pneg %p8621_p6  ;;  %p8628_p4 = por %p8627_p3, %p8626_p9 }
  0x3c   : > { %p8629_p8 = pnand %p8628_p4, %p8622_p5 }
  0x3e   : > { %8632 = shalt.err (!%p8629_p8)
}
  0x3f   : > { %s8707_s18 = smov 128   ;;  %s8708_s29 = smov 8  }
  0x40   : > { %8311 = dma.hbm_to_vmem [thread:$0]  (!%p8841_p11), %s8839_s19, 4096, %s8845_s14, %s8847_s17, %s8707_s18, %s8707_s18, %s8708_s29  }
  0x41   : > { %p11837_p1 = scmp.ne.s32.totalorder %s11831_s9, 0 }
  0x43   : > { %281 = sbr.rel (%p11837_p1) target bundleno = 1458 (0x5b2), region = 48 }
  0x48   : > { %s8871_s10 = sand.u32 1, %s8693_s25   ;;  %p11838_p4 = scmp.ne.s32.totalorder %s11829_s30, 0 }
  0x49   : > { %s6394_s5 = sshll.u32 %s8871_s10, 8  ;;  %s284_s12 = scalar_lea.sflag [#allocation6], %s8871_s10 }
  0x4a   : > { %s8877_s16 = scalar_lea.vmem [#allocation5], %s6394_s5 }
  0x4b   : > { %8676 = dma.done.wait (%p11838_p4), %s284_s12, 4096  }
  0x4c   : > { %8678 = vsyncadd (%p11838_p4), %s284_s12, 4294963200  ;;  %p11839_p6 = scmp.eq.s32.totalorder %s8776_s28, 0 }
  0x4e   : > { %8680 = dma.done.wait (%p11839_p6), [#allocation9], 9216   ;;  %p11840_p8 = pmov %p11839_p6 }
  0x4f   : > { %v8709_v0 = vmov 0.0   ;;  %v8360_v1 = vld [vmem:[%s11805_s3 + $0x78] sm:$0xff]   ;;  %v8362_v3 = vld [vmem:[%s11805_s3 + $0x70] sm:$0xff]   ;;  %p327_p3 = scmp.lt.s32.totalorder %s8776_s28, 1  ;;  %v8364_v5 = vld [vmem:[%s11805_s3 + $0x68] sm:$0xff]   ;;  %v8710_v12 = vmov 0  }
  0x50   : > { %8682 = vsyncadd (%p11840_p8), [#allocation9], 4294958080  ;;  %387 = vst [vmem:[#allocation3] sm:$0xff] %v8709_v0  ;;  %v8361_v2 = vld [vmem:[%s11805_s3 + $0x38] sm:$0xff]   ;;  %6720 = vmatprep.subr.bf16.mxu0 %v8360_v1  ;;  %8280 = vmatprep.subr.bf16.mxu1 %v8360_v1  ;;  %v8363_v4 = vld [vmem:[%s11805_s3 + $0x30] sm:$0xff]   ;;  %v1328_v13 = vrot.slane %v8710_v12, 1 }
  0x51   : > { %389 = vst [vmem:[#allocation3 + $0x10] sm:$0x3] %v8709_v0  ;;  %333 = vst [vmem:[#allocation2] sm:$0xff] %v8709_v0  ;;  %6721 = vmatpush3.bf16.msra.mxu0 %v8361_v2  ;;  %8288 = vmatpush3.bf16.msra.mxu1 %v8361_v2  ;;  %s328_s29 = scalar_select %p327_p3, %s8776_s28, 1  ;;  %v8365_v6 = vld [vmem:[%s11805_s3 + $0x28] sm:$0xff]   ;;  %v8366_v7 = vld [vmem:[%s11805_s3 + $0x60] sm:$0xff]  }
  0x52   : > { %334 = vst [vmem:[#allocation2 + $0x8] sm:$0xff] %v8709_v0  ;;  %335 = vst [vmem:[#allocation2 + $0x10] sm:$0x3] %v8709_v0  ;;  %6722 = vmatprep.subr.bf16.mxu0 %v8362_v3  ;;  %8281 = vmatprep.subr.bf16.mxu1 %v8362_v3  ;;  %v8367_v8 = vld [vmem:[%s11805_s3 + $0x20] sm:$0xff]   ;;  %v8368_v9 = vld [vmem:[%s11805_s3 + $0x58] sm:$0xff]   ;;  %v8711_v3 = vmov 0.0|0.0  }
  0x53   : > { %336 = vst [vmem:[#allocation2 + $0x18] sm:$0xff] %v8709_v0  ;;  %337 = vst [vmem:[#allocation2 + $0x20] sm:$0xff] %v8709_v0  ;;  %s6639_s14 = sshll.u32 %s328_s29, 7  ;;  %v8369_v10 = vld [vmem:[%s11805_s3 + $0x18] sm:$0xff]   ;;  %v8370_v11 = vld [vmem:[%s11805_s3 + $0x50] sm:$0xff]   ;;  %vm1563_vm1 = vcmask 1046528  }
  0x54   : > { %338 = vst [vmem:[#allocation2 + $0x28] sm:$0x3] %v8709_v0  ;;  %339 = vst [vmem:[#allocation2 + $0x30] sm:$0xff] %v8709_v0  ;;  %s9078_s12 = scalar_lea.vmem %s11803_s1, %s6639_s14  ;;  %vm1322_vm0 = vsmask.f32 7424  ;;  %v8371_v19 = vld [vmem:[%s11805_s3 + $0x10] sm:$0xff]  }
  0x55   : > { %340 = vst [vmem:[#allocation2 + $0x38] sm:$0xff] %v8709_v0  ;;  %341 = vst [vmem:[#allocation2 + $0x40] sm:$0x3] %v8709_v0  ;;  %6723 = vmatpush3.bf16.msra.mxu0 %v8363_v4  ;;  %8289 = vmatpush3.bf16.msra.mxu1 %v8363_v4  ;;  %v6717_v15 = vld [vmem:[%s9078_s12 + $0x68] sm:$0xff]   ;;  %v6642_v22 = vld [vmem:[%s9078_s12] sm:$0xff]   ;;  %s11621_s30 = scalar_lea.vmem [#allocation10], %s6394_s5 }
  0x56   : > { %342 = vst [vmem:[#allocation2 + $0x48] sm:$0xff] %v8709_v0  ;;  %343 = vst [vmem:[#allocation2 + $0x50] sm:$0xff] %v8709_v0  ;;  %6724 = vmatprep.subr.bf16.mxu0 %v8364_v5  ;;  %8282 = vmatprep.subr.bf16.mxu1 %v8364_v5  ;;  %v6695_v17 = vunpack.c.l.bf16 %v6717_v15  ;;  %v6696_v18 = vunpack.c.h.bf16 %v6717_v15  ;;  %v8372_v20 = vld [vmem:[%s11805_s3 + $0x48] sm:$0xff]   ;;  %v6643_v24 = vunpack.c.l.bf16 %v6642_v22  ;;  %v6644_v25 = vunpack.c.h.bf16 %v6642_v22  ;;  %v6710_v26 = vld [vmem:[%s9078_s12 + $0x30] sm:$0xff]   ;;  %s6640_s5 = sshll.u32 %s8776_s28, 12  ;;  %s6291_s9 = sshll.u32 %s11621_s30, 4  ;;  %s11757_s9 = int_to_ptr.vmem [resolvable:$true] %s6291_s9 }
  0x57   : > { %344 = vst [vmem:[#allocation2 + $0x58] sm:$0x3] %v8709_v0  ;;  %345 = vst [vmem:[#allocation2 + $0x60] sm:$0xff] %v8709_v0  ;;  %v6667_v27 = vunpack.c.l.bf16 %v6710_v26  ;;  %v6668_v28 = vunpack.c.h.bf16 %v6710_v26  ;;  %v8373_v29 = vld [vmem:[%s11805_s3 + $0x8] sm:$0xff]   ;;  %v8374_v31 = vld [vmem:[%s11805_s3 + $0x40] sm:$0xff]   ;;  %s11755_s14 = scalar_lea.hbm %s11809_s7, %s6640_s5  ;;  %s6278_s15 = scalar_lea.sflag [#allocation7], %s8871_s10 }
  0x58   : > { %346 = vst [vmem:[#allocation2 + $0x68] sm:$0xff] %v8709_v0  ;;  %347 = vst [vmem:[#allocation2 + $0x70] sm:$0x3] %v8709_v0  ;;  %v661_v14 = vld [vmem:[#allocation3 + $0x10] sm:$0x3]  ;;  %v6718_v33 = vld [vmem:[%s9078_s12 + $0x70] sm:$0xff]  }
  0x59   : > { %348 = vst [vmem:[#allocation2 + $0x78] sm:$0xff] %v8709_v0  ;;  %349 = vst [vmem:[#allocation2 + $0x80] sm:$0xff] %v8709_v0  ;;  %6725 = vmatpush3.bf16.msra.mxu0 %v8365_v6  ;;  %8290 = vmatpush3.bf16.msra.mxu1 %v8365_v6  ;;  %v9087_v16 = vpack.c.bf16 %v661_v14, %v661_v14  ;;  %v6712_v32 = vld [vmem:[%s9078_s12 + $0x40] sm:$0xff]   ;;  %v6699_v39 = vunpack.c.l.bf16 %v6718_v33  ;;  %v6700_v40 = vunpack.c.h.bf16 %v6718_v33  ;;  %v8376_v44 = vld [vmem:[%s11805_s3 + $0xf8] sm:$0xff]   ;;  %s8633_s28 = scalar_lea.vmem %s11757_s9, 4096  ;;  %p12032_p7 = scmp.ne.s32.totalorder %s11835_s22, 0 }
  0x5a   : > { %350 = vst [vmem:[#allocation2 + $0x88] sm:$0x3] %v8709_v0  ;;  %351 = vst [vmem:[#allocation2 + $0x90] sm:$0xff] %v8709_v0  ;;  %6726 = vmatprep.subr.bf16.mxu0 %v8366_v7  ;;  %8283 = vmatprep.subr.bf16.mxu1 %v8366_v7  ;;  %v6675_v37 = vunpack.c.l.bf16 %v6712_v32  ;;  %v6676_v38 = vunpack.c.h.bf16 %v6712_v32  ;;  %v8375_v41 = vld [vmem:[%s11805_s3] sm:$0xff]   ;;  %v8377_v61 = vld [vmem:[%s11805_s3 + $0xb8] sm:$0xff]   ;;  %p8634_p11 = scmp.ne.s32.totalorder %s11757_s9, %s8633_s28  ;;  %s8712_s17 = smov [#allocation10]  }
  0x5b   : > { %352 = vst [vmem:[#allocation2 + $0x98] sm:$0xff] %v8709_v0  ;;  %353 = vst [vmem:[#allocation2 + $0xa0] sm:$0x3] %v8709_v0  ;;  %v1331_v21 = vshll.u32 %v9087_v16, 16  ;;  %v8378_v62 = vld [vmem:[%s11805_s3 + $0xf0] sm:$0xff]   ;;  %v6705_v2 = vld [vmem:[%s9078_s12 + $0x8] sm:$0xff]  }
  0x5c   : > { %354 = vst [vmem:[#allocation2 + $0xa8] sm:$0xff] %v8709_v0  ;;  %355 = vst [vmem:[#allocation2 + $0xb0] sm:$0xff] %v8709_v0  ;;  %v6647_v7 = vunpack.c.l.bf16 %v6705_v2  ;;  %v6648_v15 = vunpack.c.h.bf16 %v6705_v2  ;;  %v6714_v2 = vld [vmem:[%s9078_s12 + $0x50] sm:$0xff]   ;;  %p8635_p12 = pnand %p8634_p11, %p12032_p7  ;;  %s8637_s23 = sshll.u32 %s8712_s17, 4  ;;  %s8638_s23 = int_to_ptr.vmem [resolvable:$false] %s8637_s23 }
  0x5d   : > { %356 = vst [vmem:[#allocation2 + $0xb8] sm:$0x3] %v8709_v0  ;;  %357 = vst [vmem:[#allocation2 + $0xc0] sm:$0xff] %v8709_v0  ;;  %6727 = vmatpush3.bf16.msra.mxu0 %v8367_v8  ;;  %8291 = vmatpush3.bf16.msra.mxu1 %v8367_v8  ;;  %v1333_v23 = vrot.slane %v1331_v21, 1  ;;  %v6711_v8 = vld [vmem:[%s9078_s12 + $0x38] sm:$0xff]   ;;  %s8639_s11 = scalar_lea.vmem %s8638_s23, 8192  ;;  %p8640_p2 = scmp.lt.s32.totalorder %s11757_s9, %s8638_s23 }
  0x5e   : > { %358 = vst [vmem:[#allocation2 + $0xc8] sm:$0xff] %v8709_v0  ;;  %359 = vst [vmem:[#allocation2 + $0xd0] sm:$0x3] %v8709_v0  ;;  %6728 = vmatprep.subr.bf16.mxu0 %v8368_v9  ;;  %8284 = vmatprep.subr.bf16.mxu1 %v8368_v9  ;;  %p8636_p10 = pneg %p8635_p12  ;;  %p8641_p13 = scmp.lt.s32.totalorder %s8639_s11, %s8633_s28 }
  0x5f   : > { %360 = vst [vmem:[#allocation2 + $0xd8] sm:$0xff] %v8709_v0  ;;  %361 = vst [vmem:[#allocation2 + $0xe0] sm:$0xff] %v8709_v0  ;;  %v1334_v30 = vsel %vm1322_vm0, %v1328_v13, %v1333_v23 }
  0x60   : > { %362 = vst [vmem:[#allocation2 + $0xe8] sm:$0x3] %v8709_v0  ;;  %363 = vst [vmem:[#allocation2 + $0xf0] sm:$0xff] %v8709_v0  ;;  %2278 = vmatprep.mubr.bf16.mxu0 %v1334_v30  ;;  %p8642_p0 = por %p8641_p13, %p8640_p2 }
  0x61   : > { %364 = vst [vmem:[#allocation2 + $0xf8] sm:$0xff] %v8709_v0  ;;  %365 = vst [vmem:[#allocation2 + $0x100] sm:$0x3] %v8709_v0  ;;  %6729 = vmatpush3.bf16.msra.mxu0 %v8369_v10  ;;  %8292 = vmatpush3.bf16.msra.mxu1 %v8369_v10 }
  0x62   : > { %366 = vst [vmem:[#allocation2 + $0x108] sm:$0xff] %v8709_v0  ;;  %367 = vst [vmem:[#allocation2 + $0x110] sm:$0xff] %v8709_v0  ;;  %6730 = vmatprep.subr.bf16.mxu0 %v8370_v11  ;;  %8285 = vmatprep.subr.bf16.mxu1 %v8370_v11  ;;  %p8643_p5 = pnand %p8642_p0, %p8636_p10 }
  0x63   : > { %368 = vst [vmem:[#allocation2 + $0x118] sm:$0x3] %v8709_v0  ;;  %369 = vst [vmem:[#allocation2 + $0x120] sm:$0xff] %v8709_v0 }
  0x64   : > { %370 = vst [vmem:[#allocation2 + $0x128] sm:$0xff] %v8709_v0  ;;  %371 = vst [vmem:[#allocation2 + $0x130] sm:$0x3] %v8709_v0 }
  0x65   : > { %372 = vst [vmem:[#allocation2 + $0x138] sm:$0xff] %v8709_v0  ;;  %373 = vst [vmem:[#allocation2 + $0x140] sm:$0xff] %v8709_v0  ;;  %6731 = vmatpush3.bf16.msra.mxu0 %v8371_v19  ;;  %8293 = vmatpush3.bf16.msra.mxu1 %v8371_v19 }
  0x66   : > { %374 = vst [vmem:[#allocation2 + $0x148] sm:$0x3] %v8709_v0  ;;  %375 = vst [vmem:[#allocation2 + $0x150] sm:$0xff] %v8709_v0  ;;  %6732 = vmatprep.subr.bf16.mxu0 %v8372_v20  ;;  %8286 = vmatprep.subr.bf16.mxu1 %v8372_v20 }
  0x67   : > { %376 = vst [vmem:[#allocation2 + $0x158] sm:$0xff] %v8709_v0  ;;  %377 = vst [vmem:[#allocation2 + $0x160] sm:$0x3] %v8709_v0 }
  0x68   : > { %378 = vst [vmem:[#allocation2 + $0x168] sm:$0xff] %v8709_v0  ;;  %379 = vst [vmem:[#allocation2 + $0x170] sm:$0xff] %v8709_v0 }
  0x69   : > { %380 = vst [vmem:[#allocation2 + $0x178] sm:$0x3] %v8709_v0  ;;  %381 = vst [vmem:[#allocation2 + $0x180] sm:$0xff] %v8709_v0  ;;  %6733 = vmatpush3.bf16.msra.mxu0 %v8373_v29  ;;  %8294 = vmatpush3.bf16.msra.mxu1 %v8373_v29 }
  0x6a   : > { %382 = vst [vmem:[#allocation2 + $0x188] sm:$0xff] %v8709_v0  ;;  %383 = vst [vmem:[#allocation2 + $0x190] sm:$0x3] %v8709_v0  ;;  %6734 = vmatprep.subr.bf16.mxu0 %v8374_v31  ;;  %8287 = vmatprep.subr.bf16.mxu1 %v8374_v31 }
  0x6b   : > { %384 = vst [vmem:[#allocation2 + $0x198] sm:$0xff] %v8709_v0  ;;  %385 = vst [vmem:[#allocation2 + $0x1a0] sm:$0xff] %v8709_v0 }
  0x6c   : > { %386 = vst [vmem:[#allocation2 + $0x1a8] sm:$0x3] %v8709_v0  ;;  %390 = vst [vmem:[#allocation3 + $0x18] sm:$0xff] %v8709_v0 }
  0x6d   : > { %391 = vst [vmem:[#allocation3 + $0x20] sm:$0xff] %v8709_v0  ;;  %392 = vst [vmem:[#allocation3 + $0x28] sm:$0x3] %v8709_v0  ;;  %6735 = vmatpush3.bf16.msra.mxu0 %v8375_v41  ;;  %8295 = vmatpush3.bf16.msra.mxu1 %v8375_v41  ;;  %v6672_v41 = vunpack.c.h.bf16 %v6711_v8 }
  0x6e   : > { %393 = vst [vmem:[#allocation3 + $0x30] sm:$0xff] %v8709_v0  ;;  %394 = vst [vmem:[#allocation3 + $0x38] sm:$0xff] %v8709_v0  ;;  %6832 = vmatprep.subr.bf16.mxu1 %v8376_v44 }
  0x6f   : > { %395 = vst [vmem:[#allocation3 + $0x40] sm:$0x3] %v8709_v0  ;;  %396 = vst [vmem:[#allocation3 + $0x48] sm:$0xff] %v8709_v0 }
  0x70   : > { %397 = vst [vmem:[#allocation3 + $0x50] sm:$0xff] %v8709_v0  ;;  %398 = vst [vmem:[#allocation3 + $0x58] sm:$0x3] %v8709_v0  ;;  %2279 = vmatmul.mubr.bf16.vlgmr.msra.gmra.mxu0 %v8711_v3 }
  0x71   : > { %399 = vst [vmem:[#allocation3 + $0x60] sm:$0xff] %v8709_v0  ;;  %400 = vst [vmem:[#allocation3 + $0x68] sm:$0xff] %v8709_v0 }
  0x72   : > { %401 = vst [vmem:[#allocation3 + $0x70] sm:$0x3] %v8709_v0  ;;  %402 = vst [vmem:[#allocation3 + $0x78] sm:$0xff] %v8709_v0 }
  0x73   : > { %403 = vst [vmem:[#allocation3 + $0x80] sm:$0xff] %v8709_v0  ;;  %404 = vst [vmem:[#allocation3 + $0x88] sm:$0x3] %v8709_v0 }
  0x74   : > { %405 = vst [vmem:[#allocation3 + $0x90] sm:$0xff] %v8709_v0  ;;  %406 = vst [vmem:[#allocation3 + $0x98] sm:$0xff] %v8709_v0 }
  0x75   : > { %407 = vst [vmem:[#allocation3 + $0xa0] sm:$0x3] %v8709_v0  ;;  %408 = vst [vmem:[#allocation3 + $0xa8] sm:$0xff] %v8709_v0 }
  0x76   : > { %409 = vst [vmem:[#allocation3 + $0xb0] sm:$0xff] %v8709_v0  ;;  %410 = vst [vmem:[#allocation3 + $0xb8] sm:$0x3] %v8709_v0 }
  0x77   : > { %411 = vst [vmem:[#allocation3 + $0xc0] sm:$0xff] %v8709_v0  ;;  %412 = vst [vmem:[#allocation3 + $0xc8] sm:$0xff] %v8709_v0 }
  0x78   : > { %413 = vst [vmem:[#allocation3 + $0xd0] sm:$0x3] %v8709_v0  ;;  %414 = vst [vmem:[#allocation3 + $0xd8] sm:$0xff] %v8709_v0 }
  0x79   : > { %415 = vst [vmem:[#allocation3 + $0xe0] sm:$0xff] %v8709_v0  ;;  %416 = vst [vmem:[#allocation3 + $0xe8] sm:$0x3] %v8709_v0 }
  0x7a   : > { %417 = vst [vmem:[#allocation3 + $0xf0] sm:$0xff] %v8709_v0  ;;  %418 = vst [vmem:[#allocation3 + $0xf8] sm:$0xff] %v8709_v0 }
  0x7b   : > { %419 = vst [vmem:[#allocation3 + $0x100] sm:$0x3] %v8709_v0  ;;  %420 = vst [vmem:[#allocation3 + $0x108] sm:$0xff] %v8709_v0 }
  0x7c   : > { %421 = vst [vmem:[#allocation3 + $0x110] sm:$0xff] %v8709_v0  ;;  %422 = vst [vmem:[#allocation3 + $0x118] sm:$0x3] %v8709_v0 }
  0x7d   : > { %423 = vst [vmem:[#allocation3 + $0x120] sm:$0xff] %v8709_v0  ;;  %424 = vst [vmem:[#allocation3 + $0x128] sm:$0xff] %v8709_v0 }
  0x7e   : > { %425 = vst [vmem:[#allocation3 + $0x130] sm:$0x3] %v8709_v0  ;;  %426 = vst [vmem:[#allocation3 + $0x138] sm:$0xff] %v8709_v0 }
  0x7f   : > { %427 = vst [vmem:[#allocation3 + $0x140] sm:$0xff] %v8709_v0  ;;  %428 = vst [vmem:[#allocation3 + $0x148] sm:$0x3] %v8709_v0 }
  0x80   : > { %429 = vst [vmem:[#allocation3 + $0x150] sm:$0xff] %v8709_v0  ;;  %430 = vst [vmem:[#allocation3 + $0x158] sm:$0xff] %v8709_v0 }
  0x81   : > { %431 = vst [vmem:[#allocation3 + $0x160] sm:$0x3] %v8709_v0  ;;  %432 = vst [vmem:[#allocation3 + $0x168] sm:$0xff] %v8709_v0 }
  0x82   : > { %433 = vst [vmem:[#allocation3 + $0x170] sm:$0xff] %v8709_v0  ;;  %434 = vst [vmem:[#allocation3 + $0x178] sm:$0x3] %v8709_v0 }
  0x83   : > { %435 = vst [vmem:[#allocation3 + $0x180] sm:$0xff] %v8709_v0  ;;  %436 = vst [vmem:[#allocation3 + $0x188] sm:$0xff] %v8709_v0 }
  0x84   : > { %437 = vst [vmem:[#allocation3 + $0x190] sm:$0x3] %v8709_v0  ;;  %440 = vst [vmem:[#allocation3 + $0x1a8] sm:$0x3] %v8709_v0 }
  0x85   : > { %441 = vst [vmem:[#allocation4] sm:$0xff] %v8709_v0  ;;  %442 = vst [vmem:[#allocation4 + $0x8] sm:$0xff] %v8709_v0 }
  0x86   : > { %443 = vst [vmem:[#allocation4 + $0x10] sm:$0x3] %v8709_v0  ;;  %444 = vst [vmem:[#allocation4 + $0x18] sm:$0xff] %v8709_v0 }
  0x87   : > { %445 = vst [vmem:[#allocation4 + $0x20] sm:$0xff] %v8709_v0  ;;  %446 = vst [vmem:[#allocation4 + $0x28] sm:$0x3] %v8709_v0 }
  0x88   : > { %447 = vst [vmem:[#allocation4 + $0x30] sm:$0xff] %v8709_v0  ;;  %448 = vst [vmem:[#allocation4 + $0x38] sm:$0xff] %v8709_v0 }
  0x89   : > { %449 = vst [vmem:[#allocation4 + $0x40] sm:$0x3] %v8709_v0  ;;  %450 = vst [vmem:[#allocation4 + $0x48] sm:$0xff] %v8709_v0 }
  0x8a   : > { %451 = vst [vmem:[#allocation4 + $0x50] sm:$0xff] %v8709_v0  ;;  %452 = vst [vmem:[#allocation4 + $0x58] sm:$0x3] %v8709_v0 }
  0x8b   : > { %453 = vst [vmem:[#allocation4 + $0x60] sm:$0xff] %v8709_v0  ;;  %454 = vst [vmem:[#allocation4 + $0x68] sm:$0xff] %v8709_v0 }
  0x8c   : > { %455 = vst [vmem:[#allocation4 + $0x70] sm:$0x3] %v8709_v0  ;;  %456 = vst [vmem:[#allocation4 + $0x78] sm:$0xff] %v8709_v0 }
  0x8d   : > { %457 = vst [vmem:[#allocation4 + $0x80] sm:$0xff] %v8709_v0  ;;  %458 = vst [vmem:[#allocation4 + $0x88] sm:$0x3] %v8709_v0 }
  0x8e   : > { %459 = vst [vmem:[#allocation4 + $0x90] sm:$0xff] %v8709_v0  ;;  %460 = vst [vmem:[#allocation4 + $0x98] sm:$0xff] %v8709_v0 }
  0x8f   : > { %461 = vst [vmem:[#allocation4 + $0xa0] sm:$0x3] %v8709_v0  ;;  %462 = vst [vmem:[#allocation4 + $0xa8] sm:$0xff] %v8709_v0 }
  0x90   : > { %463 = vst [vmem:[#allocation4 + $0xb0] sm:$0xff] %v8709_v0  ;;  %464 = vst [vmem:[#allocation4 + $0xb8] sm:$0x3] %v8709_v0 }
  0x91   : > { %465 = vst [vmem:[#allocation4 + $0xc0] sm:$0xff] %v8709_v0  ;;  %466 = vst [vmem:[#allocation4 + $0xc8] sm:$0xff] %v8709_v0 }
  0x92   : > { %467 = vst [vmem:[#allocation4 + $0xd0] sm:$0x3] %v8709_v0  ;;  %468 = vst [vmem:[#allocation4 + $0xd8] sm:$0xff] %v8709_v0 }
  0x93   : > { %469 = vst [vmem:[#allocation4 + $0xe0] sm:$0xff] %v8709_v0  ;;  %470 = vst [vmem:[#allocation4 + $0xe8] sm:$0x3] %v8709_v0 }
  0x94   : > { %471 = vst [vmem:[#allocation4 + $0xf0] sm:$0xff] %v8709_v0  ;;  %472 = vst [vmem:[#allocation4 + $0xf8] sm:$0xff] %v8709_v0 }
  0x95   : > { %473 = vst [vmem:[#allocation4 + $0x100] sm:$0x3] %v8709_v0  ;;  %474 = vst [vmem:[#allocation4 + $0x108] sm:$0xff] %v8709_v0 }
  0x96   : > { %475 = vst [vmem:[#allocation4 + $0x110] sm:$0xff] %v8709_v0  ;;  %476 = vst [vmem:[#allocation4 + $0x118] sm:$0x3] %v8709_v0 }
  0x97   : > { %477 = vst [vmem:[#allocation4 + $0x120] sm:$0xff] %v8709_v0  ;;  %478 = vst [vmem:[#allocation4 + $0x128] sm:$0xff] %v8709_v0 }
  0x98   : > { %479 = vst [vmem:[#allocation4 + $0x130] sm:$0x3] %v8709_v0  ;;  %480 = vst [vmem:[#allocation4 + $0x138] sm:$0xff] %v8709_v0 }
  0x99   : > { %481 = vst [vmem:[#allocation4 + $0x140] sm:$0xff] %v8709_v0  ;;  %482 = vst [vmem:[#allocation4 + $0x148] sm:$0x3] %v8709_v0 }
  0x9a   : > { %483 = vst [vmem:[#allocation4 + $0x150] sm:$0xff] %v8709_v0  ;;  %484 = vst [vmem:[#allocation4 + $0x158] sm:$0xff] %v8709_v0 }
  0x9b   : > { %485 = vst [vmem:[#allocation4 + $0x160] sm:$0x3] %v8709_v0  ;;  %486 = vst [vmem:[#allocation4 + $0x168] sm:$0xff] %v8709_v0 }
  0x9c   : > { %487 = vst [vmem:[#allocation4 + $0x170] sm:$0xff] %v8709_v0  ;;  %488 = vst [vmem:[#allocation4 + $0x178] sm:$0x3] %v8709_v0 }
  0x9d   : > { %489 = vst [vmem:[#allocation4 + $0x180] sm:$0xff] %v8709_v0  ;;  %490 = vst [vmem:[#allocation4 + $0x188] sm:$0xff] %v8709_v0 }
  0x9e   : > { %491 = vst [vmem:[#allocation4 + $0x190] sm:$0x3] %v8709_v0  ;;  %492 = vst [vmem:[#allocation4 + $0x198] sm:$0xff] %v8709_v0 }
  0x9f   : > { %493 = vst [vmem:[#allocation4 + $0x1a0] sm:$0xff] %v8709_v0  ;;  %494 = vst [vmem:[#allocation4 + $0x1a8] sm:$0x3] %v8709_v0 }
  0xa0   : > { %653 = vst [vmem:[#allocation3 + $0x121] sm:$0xff] %v6695_v17  ;;  %654 = vst [vmem:[#allocation3 + $0x129] sm:$0xff] %v6696_v18 }
  0xa1   : > { %593 = vst [vmem:[#allocation3 + $0x19] sm:$0xff] %v6643_v24  ;;  %594 = vst [vmem:[#allocation3 + $0x21] sm:$0xff] %v6644_v25 }
  0xa2   : > { %605 = vst [vmem:[#allocation3 + $0x139] sm:$0xff] %v6667_v27  ;;  %606 = vst [vmem:[#allocation3 + $0x141] sm:$0xff] %v6668_v28  ;;  %v6671_v27 = vunpack.c.l.bf16 %v6711_v8  ;;  %v8379_v28 = vld [vmem:[%s11805_s3 + $0xb0] sm:$0xff]   ;;  %v6684_v8 = vunpack.c.h.bf16 %v6714_v2 }
  0xa3   : > { %643 = vst [vmem:[#allocation3 + $0x31] sm:$0xff] %v6675_v37  ;;  %644 = vst [vmem:[#allocation3 + $0x39] sm:$0xff] %v6676_v38 }
  0xa4   : > { %655 = vst [vmem:[#allocation3 + $0x151] sm:$0xff] %v6699_v39  ;;  %656 = vst [vmem:[#allocation3 + $0x159] sm:$0xff] %v6700_v40 }
  0xa5   : > { %595 = vst [vmem:[#allocation3 + $0x49] sm:$0xff] %v6647_v7  ;;  %596 = vst [vmem:[#allocation3 + $0x51] sm:$0xff] %v6648_v15  ;;  %v6683_v7 = vunpack.c.l.bf16 %v6714_v2  ;;  %v6707_v15 = vld [vmem:[%s9078_s12 + $0x18] sm:$0xff]  }
  0xa6   : > { %607 = vst [vmem:[#allocation3 + $0x169] sm:$0xff] %v6671_v27  ;;  %608 = vst [vmem:[#allocation3 + $0x171] sm:$0xff] %v6672_v41  ;;  %v6655_v27 = vunpack.c.l.bf16 %v6707_v15 }
  0xa7   : > { %v695_v34 = vld [vmem:[#allocation3 + $0x120] sm:$0xff]  ;;  %v696_v35 = vld [vmem:[#allocation3 + $0x128] sm:$0xff]  ;;  %v697_v36 = vld [vmem:[#allocation3 + $0x130] sm:$0x3]  ;;  %647 = vst [vmem:[#allocation3 + $0x91] sm:$0xff] %v6683_v7 }
  0xa8   : > { %v9110_v42 = vpack.c.bf16 %v696_v35, %v695_v34  ;;  %v9112_v43 = vpack.c.bf16 %v697_v36, %v697_v36  ;;  %v662_v48 = vld [vmem:[#allocation3 + $0x18] sm:$0xff]  ;;  %v663_v49 = vld [vmem:[#allocation3 + $0x20] sm:$0xff]  ;;  %v664_v50 = vld [vmem:[#allocation3 + $0x28] sm:$0x3]  ;;  %648 = vst [vmem:[#allocation3 + $0x99] sm:$0xff] %v6684_v8 }
  0xa9   : > { %v9120_v53 = vpack.c.bf16 %v663_v49, %v662_v48  ;;  %v9122_v54 = vpack.c.bf16 %v664_v50, %v664_v50  ;;  %v698_v55 = vld [vmem:[#allocation3 + $0x138] sm:$0xff]  ;;  %v699_v56 = vld [vmem:[#allocation3 + $0x140] sm:$0xff]  ;;  %v700_v57 = vld [vmem:[#allocation3 + $0x148] sm:$0x3]  ;;  %599 = vst [vmem:[#allocation3 + $0xa9] sm:$0xff] %v6655_v27 }
  0xaa   : > { %v1468_v45 = vshrl.u32 %v9110_v42, 16  ;;  %v1470_v46 = vshll.u32 %v9110_v42, 16  ;;  %v1475_v47 = vshll.u32 %v9112_v43, 16  ;;  %v9124_v58 = vpack.c.bf16 %v699_v56, %v698_v55  ;;  %v665_v12 = vld [vmem:[#allocation3 + $0x30] sm:$0xff]  ;;  %v666_v13 = vld [vmem:[#allocation3 + $0x38] sm:$0xff]  ;;  %v8400_v27 = vld [vmem:[%s11805_s3 + $0x170] sm:$0xff]  }
  0xab   : > { %v9126_v59 = vpack.c.bf16 %v700_v57, %v700_v57  ;;  %v1336_v63 = vshrl.u32 %v9120_v53, 16  ;;  %v1338_v0 = vshll.u32 %v9120_v53, 16  ;;  %v1343_v1 = vshll.u32 %v9122_v54, 16  ;;  %v667_v14 = vld [vmem:[#allocation3 + $0x40] sm:$0x3]  ;;  %v701_v21 = vld [vmem:[#allocation3 + $0x150] sm:$0xff] }
  0xac   : > { %v1472_v51 = vrot.slane %v1470_v46, 1  ;;  %v1477_v52 = vrot.slane %v1475_v47, 1  ;;  %v1480_v4 = vshrl.u32 %v9124_v58, 16  ;;  %v1482_v5 = vshll.u32 %v9124_v58, 16  ;;  %v702_v22 = vld [vmem:[#allocation3 + $0x158] sm:$0xff]  ;;  %v668_v55 = vld [vmem:[#allocation3 + $0x48] sm:$0xff] }
  0xad   : > { %v1487_v6 = vshll.u32 %v9126_v59, 16  ;;  %v1340_v10 = vrot.slane %v1338_v0, 1  ;;  %v1345_v11 = vrot.slane %v1343_v1, 1  ;;  %v9147_v19 = vpack.c.bf16 %v666_v13, %v665_v12  ;;  %v703_v23 = vld [vmem:[#allocation3 + $0x160] sm:$0x3]  ;;  %v8380_v34 = vld [vmem:[%s11805_s3 + $0xe8] sm:$0xff]  }
  0xae   : > { %v1473_v60 = vor.u32 %v1472_v51, %v1468_v45  ;;  %v1484_v17 = vrot.slane %v1482_v5, 1  ;;  %v9149_v20 = vpack.c.bf16 %v667_v14, %v667_v14  ;;  %v9152_v25 = vpack.c.bf16 %v702_v22, %v701_v21  ;;  %v6713_v46 = vld [vmem:[%s9078_s12 + $0x48] sm:$0xff]   ;;  %v8382_v51 = vld [vmem:[%s11805_s3 + $0xe0] sm:$0xff]   ;;  %v8384_v5 = vld [vmem:[%s11805_s3 + $0xd8] sm:$0xff]  }
  0xaf   : > { %v1489_v18 = vrot.slane %v1487_v6, 1  ;;  %v1341_v24 = vor.u32 %v1340_v10, %v1336_v63  ;;  %v9154_v26 = vpack.c.bf16 %v703_v23, %v703_v23  ;;  %v1348_v30 = vshrl.u32 %v9147_v19, 16  ;;  %v8381_v47 = vld [vmem:[%s11805_s3 + $0xa8] sm:$0xff]   ;;  %v669_v57 = vld [vmem:[#allocation3 + $0x50] sm:$0xff]  ;;  %v704_v13 = vld [vmem:[#allocation3 + $0x168] sm:$0xff] }
  0xb0   : > { %v9144_v9 = vsel %vm1322_vm0, %v1473_v60, %v1477_v52  ;;  %v1485_v29 = vor.u32 %v1484_v17, %v1480_v4  ;;  %v1350_v31 = vshll.u32 %v9147_v19, 16  ;;  %v1355_v32 = vshll.u32 %v9149_v20, 16  ;;  %v670_v60 = vld [vmem:[#allocation3 + $0x58] sm:$0x3]  ;;  %v8383_v4 = vld [vmem:[%s11805_s3 + $0xa0] sm:$0xff]   ;;  %v8385_v14 = vld [vmem:[%s11805_s3 + $0x98] sm:$0xff]  }
  0xb1   : > { %2374 = vmatprep.mubr.bf16.mxu1 %v9144_v9  ;;  %v9163_v33 = vsel %vm1322_vm0, %v1341_v24, %v1345_v11  ;;  %v1492_v35 = vshrl.u32 %v9152_v25, 16  ;;  %v1494_v36 = vshll.u32 %v9152_v25, 16  ;;  %v1499_v37 = vshll.u32 %v9154_v26, 16  ;;  %v6715_v17 = vld [vmem:[%s9078_s12 + $0x58] sm:$0xff]   ;;  %v705_v23 = vld [vmem:[#allocation3 + $0x170] sm:$0xff] }
  0xb2   : > { %2375 = vmatmul.mubr.bf16.vlgmr.msra.gmra.mxu1 %v9110_v42  ;;  %2286 = vmatprep.mubr.bf16.mxu0 %v9163_v33  ;;  %v9173_v38 = vsel %vm1322_vm0, %v1485_v29, %v1489_v18  ;;  %v1352_v39 = vrot.slane %v1350_v31, 1  ;;  %v1357_v40 = vrot.slane %v1355_v32, 1  ;;  %v6679_v49 = vunpack.c.l.bf16 %v6713_v46  ;;  %v8386_v18 = vld [vmem:[%s11805_s3 + $0xd0] sm:$0xff]   ;;  %v706_v24 = vld [vmem:[#allocation3 + $0x178] sm:$0x3]  ;;  %v8396_v29 = vld [vmem:[%s11805_s3 + $0x178] sm:$0xff]  }
  0xb3   : > { %6833 = vmatpush3.bf16.msra.mxu1 %v8377_v61  ;;  %2382 = vmatprep.mubr.bf16.mxu1 %v9173_v38  ;;  %v1496_v44 = vrot.slane %v1494_v36, 1  ;;  %v1501_v45 = vrot.slane %v1499_v37, 1  ;;  %v6680_v50 = vunpack.c.h.bf16 %v6713_v46  ;;  %v6706_v61 = vld [vmem:[%s9078_s12 + $0x10] sm:$0xff]   ;;  %v9193_v63 = vpack.c.bf16 %v669_v57, %v668_v55 }
  0xb4   : > { %6834 = vmatprep.subr.bf16.mxu1 %v8378_v62  ;;  %2287 = vmatmul.mubr.bf16.gmra.mxu0 %v9120_v53  ;;  %v1353_v48 = vor.u32 %v1352_v39, %v1348_v30  ;;  %645 = vst [vmem:[#allocation3 + $0x61] sm:$0xff] %v6679_v49  ;;  %v9195_v0 = vpack.c.bf16 %v670_v60, %v670_v60  ;;  %v6651_v1 = vunpack.c.l.bf16 %v6706_v61  ;;  %v6652_v6 = vunpack.c.h.bf16 %v6706_v61  ;;  %v8398_v49 = vld [vmem:[%s11805_s3 + $0x138] sm:$0xff]  }
  0xb5   : > { %v1497_v52 = vor.u32 %v1496_v44, %v1492_v35  ;;  %646 = vst [vmem:[#allocation3 + $0x69] sm:$0xff] %v6680_v50  ;;  %v1360_v10 = vshrl.u32 %v9193_v63, 16  ;;  %v1362_v11 = vshll.u32 %v9193_v63, 16  ;;  %v9220_v30 = vpack.c.bf16 %v705_v23, %v704_v13  ;;  %6944 = vmatprep.subr.bf16.mxu0 %v8396_v29 }
  0xb6   : > { %v9185_v56 = vsel %vm1322_vm0, %v1353_v48, %v1357_v40  ;;  %v1367_v12 = vshll.u32 %v9195_v0, 16  ;;  %597 = vst [vmem:[#allocation3 + $0x79] sm:$0xff] %v6651_v1  ;;  %598 = vst [vmem:[#allocation3 + $0x81] sm:$0xff] %v6652_v6  ;;  %v9222_v31 = vpack.c.bf16 %v706_v24, %v706_v24  ;;  %v6687_v32 = vunpack.c.l.bf16 %v6715_v17  ;;  %v8387_v40 = vld [vmem:[%s11805_s3 + $0x90] sm:$0xff]   ;;  %6945 = vmatpush3.bf16.msra.mxu0 %v8398_v49  ;;  %v6708_v49 = vld [vmem:[%s9078_s12 + $0x20] sm:$0xff]  }
  0xb7   : > { %6835 = vmatpush3.bf16.msra.mxu1 %v8379_v28  ;;  %2294 = vmatprep.mubr.bf16.mxu0 %v9185_v56  ;;  %v9191_v62 = vsel %vm1322_vm0, %v1497_v52, %v1501_v45  ;;  %v1364_v21 = vrot.slane %v1362_v11, 1  ;;  %v6656_v28 = vunpack.c.h.bf16 %v6707_v15  ;;  %v6688_v39 = vunpack.c.h.bf16 %v6715_v17  ;;  %v8388_v52 = vld [vmem:[%s11805_s3 + $0xc8] sm:$0xff]   ;;  %v679_v11 = vld [vmem:[#allocation3 + $0xa0] sm:$0x3] }
  0xb8   : > { %6836 = vmatprep.subr.bf16.mxu1 %v8380_v34  ;;  %v1369_v22 = vrot.slane %v1367_v12, 1  ;;  %v1504_v41 = vshrl.u32 %v9220_v30, 16  ;;  %v1506_v44 = vshll.u32 %v9220_v30, 16  ;;  %v1511_v45 = vshll.u32 %v9222_v31, 16  ;;  %649 = vst [vmem:[#allocation3 + $0xc1] sm:$0xff] %v6687_v32  ;;  %v8389_v15 = vld [vmem:[%s11805_s3 + $0x88] sm:$0xff]   ;;  %6946 = vmatprep.subr.bf16.mxu0 %v8400_v27 }
  0xb9   : > { %v1365_v34 = vor.u32 %v1364_v21, %v1360_v10  ;;  %600 = vst [vmem:[#allocation3 + $0xb1] sm:$0xff] %v6656_v28  ;;  %650 = vst [vmem:[#allocation3 + $0xc9] sm:$0xff] %v6688_v39  ;;  %v678_v10 = vld [vmem:[#allocation3 + $0x98] sm:$0xff]  ;;  %v9268_v24 = vpack.c.bf16 %v679_v11, %v679_v11  ;;  %v8391_v28 = vld [vmem:[%s11805_s3 + $0x80] sm:$0xff]  }
  0xba   : > { %2383 = vmatmul.mubr.bf16.gmra.mxu1 %v9124_v58  ;;  %v1508_v50 = vrot.slane %v1506_v44, 1 }
  0xbb   : > { %6837 = vmatpush3.bf16.msra.mxu1 %v8381_v47  ;;  %2390 = vmatprep.mubr.bf16.mxu1 %v9191_v62  ;;  %v671_v35 = vld [vmem:[#allocation3 + $0x60] sm:$0xff]  ;;  %v9234_v47 = vsel %vm1322_vm0, %v1365_v34, %v1369_v22  ;;  %v8390_v22 = vld [vmem:[%s11805_s3 + $0xc0] sm:$0xff]  }
  0xbc   : > { %6838 = vmatprep.subr.bf16.mxu1 %v8382_v51  ;;  %2295 = vmatmul.mubr.bf16.gmra.mxu0 %v9147_v19  ;;  %v672_v36 = vld [vmem:[#allocation3 + $0x68] sm:$0xff]  ;;  %v673_v37 = vld [vmem:[#allocation3 + $0x70] sm:$0x3]  ;;  %v1513_v51 = vrot.slane %v1511_v45, 1 }
  0xbd   : > { %v9230_v46 = vpack.c.bf16 %v672_v36, %v671_v35  ;;  %v9236_v48 = vpack.c.bf16 %v673_v37, %v673_v37  ;;  %2302 = vmatprep.mubr.bf16.mxu0 %v9234_v47  ;;  %v674_v60 = vld [vmem:[#allocation3 + $0x78] sm:$0xff]  ;;  %v675_v1 = vld [vmem:[#allocation3 + $0x80] sm:$0xff]  ;;  %v676_v2 = vld [vmem:[#allocation3 + $0x88] sm:$0x3]  ;;  %v1564_v36 = vrot.slane %v8711_v3, 1 }
  0xbe   : > { %v9248_v7 = vpack.c.bf16 %v675_v1, %v674_v60  ;;  %v9250_v8 = vpack.c.bf16 %v676_v2, %v676_v2  ;;  %v680_v35 = vld [vmem:[#allocation3 + $0xa8] sm:$0xff]  ;;  %v8394_v1 = vld [vmem:[%s11805_s3 + $0x1f0] sm:$0xff]   ;;  %v6659_v2 = vunpack.c.l.bf16 %v6708_v49 }
  0xbf   : > { %6839 = vmatpush3.bf16.msra.mxu1 %v8383_v4  ;;  %v1372_v55 = vshrl.u32 %v9230_v46, 16  ;;  %v1374_v57 = vshll.u32 %v9230_v46, 16  ;;  %v1379_v61 = vshll.u32 %v9236_v48, 16  ;;  %v677_v4 = vld [vmem:[#allocation3 + $0x90] sm:$0xff] }
  0xc0   : > { %6840 = vmatprep.subr.bf16.mxu1 %v8384_v5  ;;  %v1509_v5 = vor.u32 %v1508_v50, %v1504_v41  ;;  %v9252_v13 = vpack.c.bf16 %v678_v10, %v677_v4  ;;  %v1386_v21 = vshll.u32 %v9248_v7, 16  ;;  %v1391_v23 = vshll.u32 %v9250_v8, 16  ;;  %v681_v39 = vld [vmem:[#allocation3 + $0xb0] sm:$0xff]  ;;  %v682_v45 = vld [vmem:[#allocation3 + $0xb8] sm:$0x3]  ;;  %v8392_v50 = vld [vmem:[%s11805_s3 + $0x1f8] sm:$0xff]  }
  0xc1   : > { %v1376_v6 = vrot.slane %v1374_v57, 1  ;;  %v1381_v12 = vrot.slane %v1379_v61, 1  ;;  %v1565_v41 = vrot.slane %v9087_v16, 1  ;;  %v8402_v16 = vld [vmem:[%s11805_s3 + $0x168] sm:$0xff]   ;;  %v9303_v60 = vpack.c.bf16 %v681_v39, %v680_v35  ;;  %v8404_v10 = vld [vmem:[%s11805_s3 + $0x160] sm:$0xff]   ;;  %601 = vst [vmem:[#allocation3 + $0xd9] sm:$0xff] %v6659_v2 }
  0xc2   : > { %2391 = vmatmul.mubr.bf16.gmra.mxu1 %v9152_v25  ;;  %v1388_v32 = vrot.slane %v1386_v21, 1  ;;  %v1398_v34 = vshll.u32 %v9252_v13, 16  ;;  %v1393_v37 = vrot.slane %v1391_v23, 1  ;;  %v1396_v3 = vshrl.u32 %v9252_v13, 16  ;;  %v8403_v61 = vld [vmem:[%s11805_s3 + $0x128] sm:$0xff]   ;;  %v8395_v21 = vld [vmem:[%s11805_s3 + $0x1b0] sm:$0xff]  }
  0xc3   : > { %6841 = vmatpush3.bf16.msra.mxu1 %v8385_v14  ;;  %v9255_v14 = vsel %vm1322_vm0, %v1509_v5, %v1513_v51  ;;  %v1377_v17 = vor.u32 %v1376_v6, %v1372_v55  ;;  %v1403_v51 = vshll.u32 %v9268_v24, 16  ;;  %v1566_v4 = vsel %vm1563_vm1, %v1564_v36, %v1565_v41  ;;  %v683_v5 = vld [vmem:[#allocation3 + $0xc0] sm:$0xff]  ;;  %v8405_v23 = vld [vmem:[%s11805_s3 + $0x120] sm:$0xff]   ;;  %v8397_v36 = vld [vmem:[%s11805_s3 + $0x1e8] sm:$0xff]  }
  0xc4   : > { %6842 = vmatprep.subr.bf16.mxu1 %v8386_v18  ;;  %2303 = vmatmul.mubr.bf16.gmra.mxu0 %v9193_v63  ;;  %v1384_v18 = vshrl.u32 %v9248_v7, 16  ;;  %v1400_v57 = vrot.slane %v1398_v34, 1  ;;  %v6660_v6 = vunpack.c.h.bf16 %v6708_v49  ;;  %v8406_v34 = vld [vmem:[%s11805_s3 + $0x158] sm:$0xff]   ;;  %v1568_v35 = vrot.slane %v9122_v54, 1  ;;  %v685_v39 = vld [vmem:[#allocation3 + $0xd0] sm:$0x3] }
  0xc5   : > { %2398 = vmatprep.mubr.bf16.mxu1 %v9255_v14  ;;  %v9277_v29 = vsel %vm1322_vm0, %v1377_v17, %v1381_v12  ;;  %v1405_v11 = vrot.slane %v1403_v51, 1  ;;  %v9317_v12 = vpack.c.bf16 %v682_v45, %v682_v45  ;;  %v6716_v17 = vld [vmem:[%s9078_s12 + $0x60] sm:$0xff]   ;;  %v8408_v54 = vld [vmem:[%s11805_s3 + $0x118] sm:$0xff]   ;;  %v8410_v45 = vld [vmem:[%s11805_s3 + $0x150] sm:$0xff]   ;;  %v9362_v2 = vpack.c.bf16 %v685_v39, %v685_v39 }
  0xc6   : > { %2310 = vmatprep.mubr.bf16.mxu0 %v9277_v29  ;;  %v1389_v44 = vor.u32 %v1388_v32, %v1384_v18  ;;  %v1401_v18 = vor.u32 %v1400_v57, %v1396_v3  ;;  %602 = vst [vmem:[#allocation3 + $0xe1] sm:$0xff] %v6660_v6  ;;  %v6691_v27 = vunpack.c.l.bf16 %v6716_v17  ;;  %v1567_v32 = vrot.slane %v9120_v53, 1  ;;  %v6709_v3 = vld [vmem:[%s9078_s12 + $0x28] sm:$0xff]   ;;  %v8417_v39 = vld [vmem:[%s11805_s3 + $0x198] sm:$0xff]  }
  0xc7   : > { %6843 = vmatpush3.bf16.msra.mxu1 %v8387_v40  ;;  %v8401_v40 = vld [vmem:[%s11805_s3 + $0x130] sm:$0xff]   ;;  %v6664_v57 = vunpack.c.h.bf16 %v6709_v3 }
  0xc8   : > { %6844 = vmatprep.subr.bf16.mxu1 %v8388_v52  ;;  %v8393_v52 = vld [vmem:[%s11805_s3 + $0x1b8] sm:$0xff]   ;;  %v9301_v55 = vsel %vm1322_vm0, %v1389_v44, %v1393_v37  ;;  %6947 = vmatpush3.bf16.msra.mxu0 %v8401_v40  ;;  %651 = vst [vmem:[#allocation3 + $0xf1] sm:$0xff] %v6691_v27  ;;  %v1415_v37 = vshll.u32 %v9317_v12, 16  ;;  %v9341_v41 = vsel %vm1322_vm0, %v1401_v18, %v1405_v11  ;;  %v1570_v11 = vrot.slane %v9147_v19, 1  ;;  %v8409_v18 = vld [vmem:[%s11805_s3 + $0x1a0] sm:$0xff]  }
  0xc9   : > { %6948 = vmatprep.subr.bf16.mxu0 %v8402_v16  ;;  %v9351_v49 = vsel %vm1563_vm1, %v1567_v32, %v1568_v35  ;;  %v8407_v16 = vld [vmem:[%s11805_s3 + $0x1e0] sm:$0xff]   ;;  %604 = vst [vmem:[#allocation3 + $0x111] sm:$0xff] %v6664_v57  ;;  %v1427_v27 = vshll.u32 %v9362_v2, 16  ;;  %v1574_v57 = vrot.slane %v9195_v0, 1  ;;  %v8420_v0 = vld [vmem:[%s11805_s3 + $0x1c8] sm:$0xff]  }
  0xca   : > { %2399 = vmatmul.mubr.bf16.gmra.mxu1 %v9220_v30  ;;  %v8414_v35 = vld [vmem:[%s11805_s3 + $0x140] sm:$0xff]  }
  0xcb   : > { %6845 = vmatpush3.bf16.msra.mxu1 %v8389_v15  ;;  %2439 = vmatprep.mubr.bf16.mxu1 %v9120_v53  ;;  %v684_v15 = vld [vmem:[#allocation3 + $0xc8] sm:$0xff]  ;;  %v1408_v53 = vshrl.u32 %v9303_v60, 16 }
  0xcc   : > { %6846 = vmatprep.subr.bf16.mxu1 %v8390_v22  ;;  %2311 = vmatmul.mubr.bf16.gmra.mxu0 %v9230_v46  ;;  %v1410_v22 = vshll.u32 %v9303_v60, 16  ;;  %v9338_v40 = vpack.c.bf16 %v684_v15, %v683_v5  ;;  %v686_v5 = vld [vmem:[#allocation3 + $0xd8] sm:$0xff]  ;;  %v1571_v15 = vrot.slane %v9149_v20, 1 }
  0xcd   : > { %2318 = vmatprep.mubr.bf16.mxu0 %v9301_v55  ;;  %6949 = vmatpush3.bf16.msra.mxu0 %v8403_v61  ;;  %v687_v6 = vld [vmem:[#allocation3 + $0xe0] sm:$0xff]  ;;  %v8413_v20 = vld [vmem:[%s11805_s3 + $0x108] sm:$0xff]  }
  0xce   : > { %6950 = vmatprep.subr.bf16.mxu0 %v8404_v10  ;;  %v1412_v44 = vrot.slane %v1410_v22, 1  ;;  %v1422_v51 = vshll.u32 %v9338_v40, 16  ;;  %v8412_v10 = vld [vmem:[%s11805_s3 + $0x148] sm:$0xff]  }
  0xcf   : > { %6847 = vmatpush3.bf16.msra.mxu1 %v8391_v28  ;;  %v6692_v28 = vunpack.c.h.bf16 %v6716_v17  ;;  %v1420_v17 = vshrl.u32 %v9338_v40, 16  ;;  %v689_v32 = vld [vmem:[#allocation3 + $0xf0] sm:$0xff] }
  0xd0   : > { %7056 = vmatprep.subr.bf16.mxu1 %v8392_v50  ;;  %v8399_v50 = vld [vmem:[%s11805_s3 + $0x1a8] sm:$0xff]   ;;  %v1413_v61 = vor.u32 %v1412_v44, %v1408_v53  ;;  %v8416_v53 = vld [vmem:[%s11805_s3 + $0x1d8] sm:$0xff]   ;;  %v8418_v44 = vld [vmem:[%s11805_s3 + $0x1d0] sm:$0xff]  }
  0xd1   : > { %652 = vst [vmem:[#allocation3 + $0xf9] sm:$0xff] %v6692_v28  ;;  %6951 = vmatpush3.bf16.msra.mxu0 %v8405_v23  ;;  %v1424_v23 = vrot.slane %v1422_v51, 1  ;;  %v9382_v28 = vpack.c.bf16 %v687_v6, %v686_v5 }
  0xd2   : > { %2440 = vmatmul.mubr.bf16.vlgmr.msra.gmra.mxu1 %v1566_v4  ;;  %6952 = vmatprep.subr.bf16.mxu0 %v8406_v34  ;;  %v8411_v4 = vld [vmem:[%s11805_s3 + $0x110] sm:$0xff]  }
  0xd3   : > { %7057 = vmatpush3.bf16.msra.mxu1 %v8393_v52  ;;  %2447 = vmatprep.mubr.bf16.mxu1 %v9147_v19  ;;  %v6663_v52 = vunpack.c.l.bf16 %v6709_v3  ;;  %v1434_v3 = vshll.u32 %v9382_v28, 16 }
  0xd4   : > { %7058 = vmatprep.subr.bf16.mxu1 %v8394_v1  ;;  %2319 = vmatmul.mubr.bf16.gmra.mxu0 %v9248_v7  ;;  %v1417_v1 = vrot.slane %v1415_v37, 1 }
  0xd5   : > { %2326 = vmatprep.mubr.bf16.mxu0 %v9341_v41  ;;  %6953 = vmatpush3.bf16.msra.mxu0 %v8408_v54  ;;  %603 = vst [vmem:[#allocation3 + $0x109] sm:$0xff] %v6663_v52  ;;  %v1573_v54 = vrot.slane %v9193_v63, 1 }
  0xd6   : > { %6954 = vmatprep.subr.bf16.mxu0 %v8410_v45  ;;  %v9379_v22 = vsel %vm1322_vm0, %v1413_v61, %v1417_v1  ;;  %v1425_v45 = vor.u32 %v1424_v23, %v1420_v17  ;;  %v8419_v61 = vld [vmem:[%s11805_s3 + $0x190] sm:$0xff]   ;;  %v1432_v1 = vshrl.u32 %v9382_v28, 16 }
  0xd7   : > { %7059 = vmatpush3.bf16.msra.mxu1 %v8395_v21  ;;  %v688_v21 = vld [vmem:[#allocation3 + $0xe8] sm:$0x3]  ;;  %v9435_v17 = vsel %vm1563_vm1, %v1573_v54, %v1574_v57 }
  0xd8   : > { %7060 = vmatprep.subr.bf16.mxu1 %v8397_v36  ;;  %v690_v34 = vld [vmem:[#allocation3 + $0xf8] sm:$0xff]  ;;  %v9392_v36 = vsel %vm1563_vm1, %v1570_v11, %v1571_v15  ;;  %v9398_v37 = vpack.c.bf16 %v688_v21, %v688_v21  ;;  %v691_v51 = vld [vmem:[#allocation3 + $0x100] sm:$0x3]  ;;  %v1576_v21 = vrot.slane %v9230_v46, 1 }
  0xd9   : > { %6955 = vmatpush3.bf16.msra.mxu0 %v8411_v4  ;;  %v9412_v52 = vpack.c.bf16 %v690_v34, %v689_v32  ;;  %v9421_v5 = vpack.c.bf16 %v691_v51, %v691_v51  ;;  %v8421_v15 = vld [vmem:[%s11805_s3 + $0x188] sm:$0xff]   ;;  %v6719_v32 = vld [vmem:[%s9078_s12 + $0x78] sm:$0xff]  }
  0xda   : > { %2448 = vmatmul.mubr.bf16.gmra.mxu1 %v9351_v49  ;;  %6956 = vmatprep.subr.bf16.mxu0 %v8412_v10  ;;  %v1439_v4 = vshll.u32 %v9398_v37, 16  ;;  %v1436_v10 = vrot.slane %v1434_v3, 1  ;;  %v8423_v3 = vld [vmem:[%s11805_s3 + $0x180] sm:$0xff]  }
  0xdb   : > { %2455 = vmatprep.mubr.bf16.mxu1 %v9193_v63  ;;  %7061 = vmatpush3.bf16.msra.mxu1 %v8399_v50  ;;  %v1429_v50 = vrot.slane %v1427_v27, 1  ;;  %v1446_v11 = vshll.u32 %v9412_v52, 16  ;;  %v1451_v23 = vshll.u32 %v9421_v5, 16  ;;  %v8422_v27 = vld [vmem:[%s11805_s3 + $0x1c0] sm:$0xff]   ;;  %v1444_v54 = vshrl.u32 %v9412_v52, 16 }
  0xdc   : > { %7062 = vmatprep.subr.bf16.mxu1 %v8407_v16  ;;  %2327 = vmatmul.mubr.bf16.gmra.mxu0 %v9252_v13  ;;  %v8415_v16 = vld [vmem:[%s11805_s3 + $0x100] sm:$0xff]   ;;  %v1437_v34 = vor.u32 %v1436_v10, %v1432_v1  ;;  %v8428_v10 = vld [vmem:[%s11805_s3 + $0x238] sm:$0xff]  }
  0xdd   : > { %2334 = vmatprep.mubr.bf16.mxu0 %v9379_v22  ;;  %6957 = vmatpush3.bf16.msra.mxu0 %v8413_v20  ;;  %v9424_v6 = vsel %vm1322_vm0, %v1425_v45, %v1429_v50  ;;  %v1441_v20 = vrot.slane %v1439_v4, 1  ;;  %v1448_v45 = vrot.slane %v1446_v11, 1  ;;  %v694_v50 = vld [vmem:[#allocation3 + $0x118] sm:$0x3]  ;;  %v1453_v51 = vrot.slane %v1451_v23, 1 }
  0xde   : > { %6958 = vmatprep.subr.bf16.mxu0 %v8414_v35  ;;  %v693_v35 = vld [vmem:[#allocation3 + $0x110] sm:$0xff]  ;;  %v9464_v1 = vpack.c.bf16 %v694_v50, %v694_v50  ;;  %v1579_v11 = vrot.slane %v9248_v7, 1  ;;  %v1589_v50 = vrot.slane %v9362_v2, 1  ;;  %v1591_v2 = vrot.slane %v9382_v28, 1 }
  0xdf   : > { %7063 = vmatpush3.bf16.msra.mxu1 %v8409_v18  ;;  %v692_v18 = vld [vmem:[#allocation3 + $0x108] sm:$0xff]  ;;  %v9457_v57 = vsel %vm1322_vm0, %v1437_v34, %v1441_v20 }
  0xe0   : > { %7064 = vmatprep.subr.bf16.mxu1 %v8416_v53  ;;  %v6703_v53 = vunpack.c.l.bf16 %v6719_v32 }
  0xe1   : > { %6959 = vmatpush3.bf16.msra.mxu0 %v8415_v16  ;;  %v9451_v16 = vpack.c.bf16 %v693_v35, %v692_v18  ;;  %v1582_v18 = vrot.slane %v9252_v13, 1 }
  0xe2   : > { %2456 = vmatmul.mubr.bf16.gmra.mxu1 %v9392_v36  ;;  %657 = vst [vmem:[#allocation3 + $0x181] sm:$0xff] %v6703_v53  ;;  %8136 = vmatprep.subr.bf16.mxu0 %v8428_v10 }
  0xe3   : > { %2463 = vmatprep.mubr.bf16.mxu1 %v9230_v46  ;;  %7065 = vmatpush3.bf16.msra.mxu1 %v8417_v39  ;;  %v6704_v39 = vunpack.c.h.bf16 %v6719_v32  ;;  %v1458_v4 = vshll.u32 %v9451_v16, 16 }
  0xe4   : > { %7066 = vmatprep.subr.bf16.mxu1 %v8418_v44  ;;  %2335 = vmatmul.mubr.bf16.gmra.mxu0 %v9303_v60  ;;  %v1577_v44 = vrot.slane %v9236_v48, 1  ;;  %v8424_v48 = vld [vmem:[%s11804_s2 + $0x78] sm:$0xff]  }
  0xe5   : > { %2342 = vmatprep.mubr.bf16.mxu0 %v9424_v6  ;;  %658 = vst [vmem:[#allocation3 + $0x189] sm:$0xff] %v6704_v39  ;;  %v1460_v23 = vrot.slane %v1458_v4, 1  ;;  %v1594_v4 = vrot.slane %v9412_v52, 1 }
  0xe7   : > { %7067 = vmatpush3.bf16.msra.mxu1 %v8419_v61  ;;  %v9461_v61 = vsel %vm1563_vm1, %v1576_v21, %v1577_v44  ;;  %v1456_v21 = vshrl.u32 %v9451_v16, 16  ;;  %v1586_v44 = vrot.slane %v9317_v12, 1  ;;  %v8431_v12 = vld [vmem:[%s11805_s3 + $0x230] sm:$0xff]  }
  0xe8   : > { %7068 = vmatprep.subr.bf16.mxu1 %v8420_v0  ;;  %v1449_v0 = vor.u32 %v1448_v45, %v1444_v54  ;;  %v1588_v45 = vrot.slane %v9338_v40, 1 }
  0xe9   : > { %v1461_v35 = vor.u32 %v1460_v23, %v1456_v21  ;;  %v1598_v21 = vrot.slane %v9464_v1, 1  ;;  %v1601_v23 = vrot.slane %v9112_v43, 1 }
  0xea   : > { %2464 = vmatmul.mubr.bf16.gmra.mxu1 %v9435_v17  ;;  %v9478_v32 = vsel %vm1322_vm0, %v1449_v0, %v1453_v51  ;;  %v9514_v51 = vsel %vm1563_vm1, %v1588_v45, %v1589_v50  ;;  %v1595_v0 = vrot.slane %v9421_v5, 1  ;;  %v8437_v5 = vld [vmem:[%s11805_s3 + $0x210] sm:$0xff]   ;;  %v1607_v50 = vrot.slane %v9154_v26, 1 }
  0xeb   : > { %2471 = vmatprep.mubr.bf16.mxu1 %v9248_v7  ;;  %7069 = vmatpush3.bf16.msra.mxu1 %v8421_v15  ;;  %v1580_v15 = vrot.slane %v9250_v8, 1  ;;  %v1583_v8 = vrot.slane %v9268_v24, 1  ;;  %v1585_v24 = vrot.slane %v9303_v60, 1  ;;  %v707_v45 = vld [vmem:[#allocation3 + $0x180] sm:$0xff]  ;;  %v1610_v26 = vrot.slane %v9222_v31, 1  ;;  %v8425_v31 = vld [vmem:[%s11804_s2 + $0x38] sm:$0xff]  }
  0xec   : > { %7070 = vmatprep.subr.bf16.mxu1 %v8422_v27  ;;  %2343 = vmatmul.mubr.bf16.gmra.mxu0 %v9338_v40  ;;  %v1463_v27 = vshll.u32 %v9464_v1, 16  ;;  %v8446_v1 = vld [vmem:[%s11804_s2 + $0xf8] sm:$0xff]  }
  0xed   : > { %2350 = vmatprep.mubr.bf16.mxu0 %v9457_v57  ;;  %v9482_v34 = vsel %vm1563_vm1, %v1579_v11, %v1580_v15  ;;  %v9493_v39 = vsel %vm1563_vm1, %v1582_v18, %v1583_v8  ;;  %v9502_v54 = vsel %vm1563_vm1, %v1585_v24, %v1586_v44  ;;  %v9544_v11 = vsel %vm1563_vm1, %v1594_v4, %v1595_v0  ;;  %v8438_v15 = vld [vmem:[%s11805_s3 + $0x208] sm:$0xff]   ;;  %v9607_v4 = vld [vmem:[%s8877_s16 + $0x8] sm:$0xff]  ;;  %v8426_v0 = vld [vmem:[%s11804_s2 + $0x70] sm:$0xff]  }
  0xee   : > { %v1465_v20 = vrot.slane %v1463_v27, 1  ;;  %v1597_v18 = vrot.slane %v9451_v16, 1  ;;  %v8439_v27 = vld [vmem:[%s11805_s3 + $0x200] sm:$0xff]   ;;  %v1606_v44 = vrot.slane %v9152_v25, 1  ;;  %529 = vst [vmem:[#allocation2 + $0x21] sm:$0xff] %v9607_v4 }
  0xef   : > { %7071 = vmatpush3.bf16.msra.mxu1 %v8423_v3  ;;  %v1600_v3 = vrot.slane %v9110_v42, 1 }
  0xf0   : > { %7192 = vmatprep.subr.bf16.mxu1 %v8424_v48  ;;  %v9489_v53 = vsel %vm1322_vm0, %v1461_v35, %v1465_v20  ;;  %v1592_v48 = vrot.slane %v9398_v37, 1  ;;  %v8434_v37 = vld [vmem:[%s11805_s3 + $0x218] sm:$0xff]   ;;  %v9560_v8 = vsel %vm1563_vm1, %v1597_v18, %v1598_v21  ;;  %v1603_v20 = vrot.slane %v9124_v58, 1  ;;  %v9648_v18 = vld [vmem:[%s8877_s16 + $0x20] sm:$0xff] }
  0xf1   : > { %v9567_v43 = vsel %vm1563_vm1, %v1600_v3, %v1601_v23  ;;  %v1604_v35 = vrot.slane %v9126_v59, 1  ;;  %v708_v59 = vld [vmem:[#allocation3 + $0x188] sm:$0xff]  ;;  %v9588_v3 = vsel %vm1563_vm1, %v1606_v44, %v1607_v50  ;;  %v8436_v23 = vld [vmem:[%s11804_s2 + $0x20] sm:$0xff]   ;;  %532 = vst [vmem:[#allocation2 + $0x49] sm:$0xff] %v9648_v18  ;;  %v8443_v44 = vld [vmem:[%s11804_s2 + $0x10] sm:$0xff]  }
  0xf2   : > { %2472 = vmatmul.mubr.bf16.gmra.mxu1 %v9461_v61  ;;  %v9651_v21 = vld [vmem:[%s8877_s16 + $0x28] sm:$0xff]  ;;  %v8445_v50 = vld [vmem:[%s11804_s2 + $0x8] sm:$0xff]  }
  0xf3   : > { %2479 = vmatprep.mubr.bf16.mxu1 %v9252_v13  ;;  %v9579_v24 = vsel %vm1563_vm1, %v1603_v20, %v1604_v35  ;;  %533 = vst [vmem:[#allocation2 + $0x51] sm:$0xff] %v9651_v21  ;;  %v9677_v35 = vld [vmem:[%s8877_s16 + $0x38] sm:$0xff] }
  0xf4   : > { %2351 = vmatmul.mubr.bf16.gmra.mxu0 %v9382_v28  ;;  %535 = vst [vmem:[#allocation2 + $0x69] sm:$0xff] %v9677_v35 }
  0xf5   : > { %2358 = vmatprep.mubr.bf16.mxu0 %v9478_v32 }
  0xfa   : > { %2480 = vmatmul.mubr.bf16.gmra.mxu1 %v9482_v34 }
  0xfb   : > { %2487 = vmatprep.mubr.bf16.mxu1 %v9303_v60 }
  0xfc   : > { %2359 = vmatmul.mubr.bf16.gmra.mxu0 %v9412_v52 }
  0xfd   : > { %2366 = vmatprep.mubr.bf16.mxu0 %v9489_v53 }
 0x102   : > { %2488 = vmatmul.mubr.bf16.gmra.mxu1 %v9493_v39 }
 0x103   : > { %2495 = vmatprep.mubr.bf16.mxu1 %v9338_v40 }
 0x104   : > { %2367 = vmatmul.mubr.bf16.gmra.mxu0 %v9451_v16 }
 0x105   : > { %2600 = vmatprep.mubr.bf16.mxu0 %v9351_v49  ;;  %v8432_v49 = vld [vmem:[%s11805_s3 + $0x228] sm:$0xff]  }
 0x10a   : > { %2496 = vmatmul.mubr.bf16.gmra.mxu1 %v9502_v54 }
 0x10b   : > { %2503 = vmatprep.mubr.bf16.mxu1 %v9382_v28 }
 0x10c   : > { %2601 = vmatmul.mubr.bf16.vlgmr.msra.gmra.mxu0 %v9163_v33  ;;  %v8433_v33 = vld [vmem:[%s11805_s3 + $0x220] sm:$0xff]  }
 0x10d   : > { %2608 = vmatprep.mubr.bf16.mxu0 %v9392_v36  ;;  %8137 = vmatpush3.bf16.msra.mxu0 %v8428_v10  ;;  %v9531_v10 = vsel %vm1563_vm1, %v1591_v2, %v1592_v48  ;;  %v9604_v48 = vld [vmem:[%s8877_s16] sm:$0xff] }
 0x10e   : > { %8138 = vmatprep.subr.bf16.mxu0 %v8431_v12  ;;  %528 = vst [vmem:[#allocation2 + $0x19] sm:$0xff] %v9604_v48 }
 0x111   : > { %8139 = vmatpush3.bf16.msra.mxu0 %v8431_v12  ;;  %v9591_v12 = vpack.c.bf16 %v708_v59, %v707_v45  ;;  %v8444_v45 = vld [vmem:[%s11804_s2 + $0x48] sm:$0xff]   ;;  %v9700_v59 = vld [vmem:[%s8877_s16 + $0x40] sm:$0xff] }
 0x112   : > { %2504 = vmatmul.mubr.bf16.gmra.mxu1 %v9514_v51  ;;  %8140 = vmatprep.subr.bf16.mxu0 %v8432_v49  ;;  %11841 = vst [vmem:[#allocation14_spill] sm:$0xff] %v9700_v59  ;;  %536 = vst [vmem:[#allocation2 + $0x79] sm:$0xff] %v9700_v59 }
 0x113   : > { %2511 = vmatprep.mubr.bf16.mxu1 %v9412_v52 }
 0x114   : > { %2609 = vmatmul.mubr.bf16.gmra.mxu0 %v9185_v56 }
 0x115   : > { %2616 = vmatprep.mubr.bf16.mxu0 %v9435_v17  ;;  %8141 = vmatpush3.bf16.msra.mxu0 %v8432_v49  ;;  %v1609_v49 = vrot.slane %v9220_v30, 1 }
 0x116   : > { %8142 = vmatprep.subr.bf16.mxu0 %v8433_v33 }
 0x117   : > { %v9599_v2 = vsel %vm1563_vm1, %v1609_v49, %v1610_v26  ;;  %v9703_v49 = vld [vmem:[%s8877_s16 + $0x48] sm:$0xff]  ;;  %v8455_v26 = vld [vmem:[%s11804_s2] sm:$0xff]  }
 0x118   : > { %537 = vst [vmem:[#allocation2 + $0x81] sm:$0xff] %v9703_v49 }
 0x119   : > { %8143 = vmatpush3.bf16.msra.mxu0 %v8433_v33  ;;  %v9622_v33 = vld [vmem:[%s8877_s16 + $0x10] sm:$0xff] }
 0x11a   : > { %2512 = vmatmul.mubr.bf16.gmra.mxu1 %v9531_v10  ;;  %8144 = vmatprep.subr.bf16.mxu0 %v8434_v37  ;;  %530 = vst [vmem:[#allocation2 + $0x31] sm:$0xff] %v9622_v33 }
 0x11b   : > { %2519 = vmatprep.mubr.bf16.mxu1 %v9451_v16 }
 0x11c   : > { %2617 = vmatmul.mubr.bf16.gmra.mxu0 %v9234_v47 }
 0x11d   : > { %2624 = vmatprep.mubr.bf16.mxu0 %v9461_v61  ;;  %8145 = vmatpush3.bf16.msra.mxu0 %v8434_v37  ;;  %v9625_v37 = vld [vmem:[%s8877_s16 + $0x18] sm:$0xff] }
 0x11e   : > { %8146 = vmatprep.subr.bf16.mxu0 %v8437_v5  ;;  %531 = vst [vmem:[#allocation2 + $0x39] sm:$0xff] %v9625_v37 }
 0x121   : > { %8147 = vmatpush3.bf16.msra.mxu0 %v8437_v5  ;;  %v8429_v5 = vld [vmem:[%s11804_s2 + $0x68] sm:$0xff]  }
 0x122   : > { %2520 = vmatmul.mubr.bf16.gmra.mxu1 %v9544_v11  ;;  %8148 = vmatprep.subr.bf16.mxu0 %v8438_v15 }
 0x123   : > { %2527 = vmatprep.mubr.bf16.mxu1 %v9110_v42 }
 0x124   : > { %2625 = vmatmul.mubr.bf16.gmra.mxu0 %v9277_v29 }
 0x125   : > { %2632 = vmatprep.mubr.bf16.mxu0 %v9482_v34  ;;  %8149 = vmatpush3.bf16.msra.mxu0 %v8438_v15  ;;  %v8430_v15 = vld [vmem:[%s11804_s2 + $0x28] sm:$0xff]  }
 0x126   : > { %8150 = vmatprep.subr.bf16.mxu0 %v8439_v27 }
 0x129   : > { %8151 = vmatpush3.bf16.msra.mxu0 %v8439_v27  ;;  %v8440_v27 = vld [vmem:[%s11804_s2 + $0x58] sm:$0xff]  }
 0x12a   : > { %2528 = vmatmul.mubr.bf16.gmra.mxu1 %v9560_v8  ;;  %7304 = vmatprep.subr.bf16.mxu0 %v8446_v1  ;;  %v8441_v1 = vld [vmem:[%s11804_s2 + $0x18] sm:$0xff]  }
 0x12b   : > { %2535 = vmatprep.mubr.bf16.mxu1 %v9124_v58 }
 0x12c   : > { %2633 = vmatmul.mubr.bf16.gmra.mxu0 %v9301_v55 }
 0x12d   : > { %2640 = vmatprep.mubr.bf16.mxu0 %v9493_v39 }
 0x132   : > { %2536 = vmatmul.mubr.bf16.gmra.mxu1 %v9567_v43 }
 0x133   : > { %2543 = vmatprep.mubr.bf16.mxu1 %v9152_v25 }
 0x134   : > { %2641 = vmatmul.mubr.bf16.gmra.mxu0 %v9341_v41 }
 0x135   : > { %2648 = vmatprep.mubr.bf16.mxu0 %v9502_v54 }
 0x13a   : > { %2544 = vmatmul.mubr.bf16.gmra.mxu1 %v9579_v24 }
 0x13b   : > { %2551 = vmatprep.mubr.bf16.mxu1 %v9220_v30 }
 0x13c   : > { %2649 = vmatmul.mubr.bf16.gmra.mxu0 %v9379_v22 }
 0x13d   : > { %2656 = vmatprep.mubr.bf16.mxu0 %v9514_v51 }
 0x142   : > { %2552 = vmatmul.mubr.bf16.gmra.mxu1 %v9588_v3 }
 0x143   : > { %2559 = vmatprep.mubr.bf16.mxu1 %v9591_v12 }
 0x144   : > { %2657 = vmatmul.mubr.bf16.gmra.mxu0 %v9424_v6 }
 0x145   : > { %2664 = vmatprep.mubr.bf16.mxu0 %v9531_v10 }
 0x14a   : > { %2560 = vmatmul.mubr.bf16.gmra.mxu1 %v9599_v2 }
 0x14b   : > { %2761 = vmatprep.mubr.bf16.mxu1 %v9185_v56  ;;  %v8427_v56 = vld [vmem:[%s11804_s2 + $0x30] sm:$0xff]  }
 0x14c   : > { %2665 = vmatmul.mubr.bf16.gmra.mxu0 %v9457_v57 }
 0x14d   : > { %2672 = vmatprep.mubr.bf16.mxu0 %v9544_v11 }
 0x152   : > { %2762 = vmatmul.mubr.bf16.vlgmr.msra.gmra.mxu1 %v9147_v19 }
 0x153   : > { %7193 = vmatpush3.bf16.msra.mxu1 %v8425_v31  ;;  %2769 = vmatprep.mubr.bf16.mxu1 %v9234_v47  ;;  %v8435_v47 = vld [vmem:[%s11804_s2 + $0x60] sm:$0xff]   ;;  %v8464_v31 = vld [vmem:[%s11804_s2 + $0x178] sm:$0xff]  }
 0x154   : > { %7194 = vmatprep.subr.bf16.mxu1 %v8426_v0  ;;  %2673 = vmatmul.mubr.bf16.gmra.mxu0 %v9478_v32  ;;  %v6736_v0 = vpop.f32.mrf.mxu0 }
 0x155   : > { %2680 = vmatprep.mubr.bf16.mxu0 %v9560_v8 }
 0x157   : > { %7195 = vmatpush3.bf16.msra.mxu1 %v8427_v56 }
 0x158   : > { %7196 = vmatprep.subr.bf16.mxu1 %v8429_v5  ;;  %v9723_v5 = vld [vmem:[%s8877_s16 + $0x58] sm:$0xff] }
 0x159   : > { %539 = vst [vmem:[#allocation2 + $0x99] sm:$0xff] %v9723_v5 }
 0x15a   : > { %2770 = vmatmul.mubr.bf16.gmra.mxu1 %v9193_v63  ;;  %v8442_v63 = vld [vmem:[%s11804_s2 + $0x50] sm:$0xff]  }
 0x15b   : > { %2777 = vmatprep.mubr.bf16.mxu1 %v9277_v29  ;;  %7197 = vmatpush3.bf16.msra.mxu1 %v8430_v15  ;;  %v9674_v29 = vld [vmem:[%s8877_s16 + $0x30] sm:$0xff] }
 0x15c   : > { %7198 = vmatprep.subr.bf16.mxu1 %v8435_v47  ;;  %2681 = vmatmul.mubr.bf16.gmra.mxu0 %v9489_v53  ;;  %534 = vst [vmem:[#allocation2 + $0x61] sm:$0xff] %v9674_v29 }
 0x15d   : > { %2688 = vmatprep.mubr.bf16.mxu0 %v9567_v43 }
 0x15f   : > { %7199 = vmatpush3.bf16.msra.mxu1 %v8436_v23  ;;  %v709_v23 = vld [vmem:[#allocation3 + $0x190] sm:$0x3] }
 0x160   : > { %7200 = vmatprep.subr.bf16.mxu1 %v8440_v27 }
 0x162   : > { %2778 = vmatmul.mubr.bf16.gmra.mxu1 %v9230_v46 }
 0x163   : > { %2785 = vmatprep.mubr.bf16.mxu1 %v9301_v55  ;;  %7201 = vmatpush3.bf16.msra.mxu1 %v8441_v1  ;;  %v8454_v55 = vld [vmem:[%s11804_s2 + $0x40] sm:$0xff]  }
 0x164   : > { %7202 = vmatprep.subr.bf16.mxu1 %v8442_v63  ;;  %2689 = vmatmul.mubr.bf16.gmra.mxu0 %v9144_v9 }
 0x165   : > { %2696 = vmatprep.mubr.bf16.mxu0 %v9579_v24 }
 0x167   : > { %7203 = vmatpush3.bf16.msra.mxu1 %v8443_v44 }
 0x168   : > { %7204 = vmatprep.subr.bf16.mxu1 %v8444_v45  ;;  %v1629_v45 = vpack.c.bf16 %v709_v23, %v709_v23 }
 0x16a   : > { %2786 = vmatmul.mubr.bf16.gmra.mxu1 %v9248_v7  ;;  %v9720_v7 = vld [vmem:[%s8877_s16 + $0x50] sm:$0xff]  ;;  %v1638_v20 = vshll.u32 %v1629_v45, 16 }
 0x16b   : > { %2793 = vmatprep.mubr.bf16.mxu1 %v9341_v41  ;;  %7205 = vmatpush3.bf16.msra.mxu1 %v8445_v50  ;;  %v6737_v41 = vpop.f32.mrf.mxu0  ;;  %538 = vst [vmem:[#allocation2 + $0x91] sm:$0xff] %v9720_v7 }
 0x16c   : > { %7206 = vmatprep.subr.bf16.mxu1 %v8454_v55  ;;  %2697 = vmatmul.mubr.bf16.gmra.mxu0 %v9173_v38  ;;  %v9727_v47 = vadd.f32 %v6737_v41, %v6736_v0  ;;  %v1633_v0 = vshll.u32 %v9591_v12, 16  ;;  %v9744_v41 = vld [vmem:[%s8877_s16 + $0x68] sm:$0xff] }
 0x16d   : > { %2704 = vmatprep.mubr.bf16.mxu0 %v9588_v3  ;;  %v6739_v27 = vpop.f32.mrf.mxu0  ;;  %541 = vst [vmem:[#allocation2 + $0xb1] sm:$0xff] %v9744_v41 }
 0x16f   : > { %7207 = vmatpush3.bf16.msra.mxu1 %v8455_v26  ;;  %v6740_v44 = vpop.f32.mrf.mxu0 }
 0x170   : > { %7416 = vmatprep.subr.bf16.mxu1 %v8464_v31  ;;  %v9733_v55 = vadd.f32 %v6740_v44, %v6739_v27  ;;  %v1645_v27 = vrot.slane %v9591_v12, 1 }
 0x172   : > { %v6808_v15 = vpop.f32.mrf.mxu1  ;;  %2794 = vmatmul.mubr.bf16.gmra.mxu1 %v9252_v13 }
 0x173   : > { %2801 = vmatprep.mubr.bf16.mxu1 %v9379_v22  ;;  %v9741_v22 = vld [vmem:[%s8877_s16 + $0x60] sm:$0xff] }
 0x174   : > { %v6809_v1 = vpop.f32.mrf.mxu1  ;;  %v6742_v26 = vpop.f32.mrf.mxu0  ;;  %2705 = vmatmul.mubr.bf16.gmra.mxu0 %v9191_v62  ;;  %540 = vst [vmem:[#allocation2 + $0xa9] sm:$0xff] %v9741_v22 }
 0x175   : > { %v9731_v63 = vadd.f32 %v6809_v1, %v6808_v15  ;;  %2712 = vmatprep.mubr.bf16.mxu0 %v9599_v2  ;;  %v1646_v1 = vrot.slane %v1629_v45, 1 }
 0x176   : > { %v6811_v50 = vpop.f32.mrf.mxu1  ;;  %v6743_v23 = vpop.f32.mrf.mxu0 }
 0x177   : > { %11842 = vst [vmem:[#allocation15_spill] sm:$0xff] %v9731_v63  ;;  %v9752_v13 = vadd.f32 %v6743_v23, %v6742_v26  ;;  %v9759_v63 = vsel %vm1563_vm1, %v1645_v27, %v1646_v1  ;;  %v9773_v1 = vld [vmem:[%s8877_s16 + $0x78] sm:$0xff] }
 0x178   : > { %v6812_v31 = vpop.f32.mrf.mxu1  ;;  %v6745_v56 = vpop.f32.mrf.mxu0  ;;  %11847 = vst [vmem:[#allocation20_spill] sm:$0xff] %v9773_v1  ;;  %543 = vst [vmem:[#allocation2 + $0xc9] sm:$0xff] %v9773_v1 }
 0x179   : > { %v9746_v15 = vadd.f32 %v6812_v31, %v6811_v50  ;;  %v1631_v50 = vshrl.u32 %v9591_v12, 16  ;;  %v1635_v31 = vrot.slane %v1633_v0, 1  ;;  %v1640_v0 = vrot.slane %v1638_v20, 1 }
 0x17a   : > { %v6814_v44 = vpop.f32.mrf.mxu1  ;;  %2802 = vmatmul.mubr.bf16.gmra.mxu1 %v9303_v60 }
 0x17b   : > { %11843 = vst [vmem:[#allocation16_spill] sm:$0xff] %v9746_v15  ;;  %2809 = vmatprep.mubr.bf16.mxu1 %v9424_v6  ;;  %v6746_v15 = vpop.f32.mrf.mxu0  ;;  %v1636_v45 = vor.u32 %v1635_v31, %v1631_v50 }
 0x17c   : > { %v6815_v46 = vpop.f32.mrf.mxu1  ;;  %v9761_v60 = vadd.f32 %v6746_v15, %v6745_v56  ;;  %2713 = vmatmul.mubr.bf16.gmra.mxu0 %v9255_v14 }
 0x17d   : > { %v9756_v19 = vadd.f32 %v6815_v46, %v6814_v44  ;;  %v6748_v26 = vpop.f32.mrf.mxu0  ;;  %2720 = vmatprep.mubr.bf16.mxu0 %v9759_v63  ;;  %v9768_v46 = vld [vmem:[%s8877_s16 + $0x70] sm:$0xff] }
 0x17e   : > { %v6817_v59 = vpop.f32.mrf.mxu1  ;;  %11845 = vst [vmem:[#allocation18_spill] sm:$0xff] %v9768_v46  ;;  %542 = vst [vmem:[#allocation2 + $0xc1] sm:$0xff] %v9768_v46 }
 0x17f   : > { %11844 = vst [vmem:[#allocation17_spill] sm:$0xff] %v9756_v19  ;;  %v6749_v27 = vpop.f32.mrf.mxu0  ;;  %v9796_v19 = vld [vmem:[%s8877_s16 + $0x88] sm:$0xff] }
 0x180   : > { %v6818_v23 = vpop.f32.mrf.mxu1  ;;  %v9777_v15 = vadd.f32 %v6749_v27, %v6748_v26  ;;  %545 = vst [vmem:[#allocation2 + $0xe1] sm:$0xff] %v9796_v19  ;;  %v8448_v26 = vld [vmem:[%s11804_s2 + $0xf0] sm:$0xff]  }
 0x181   : > { %v9770_v44 = vadd.f32 %v6818_v23, %v6817_v59  ;;  %v6751_v50 = vpop.f32.mrf.mxu0  ;;  %v9782_v59 = vsel %vm1322_vm0, %v1636_v45, %v1640_v0 }
 0x182   : > { %v6820_v56 = vpop.f32.mrf.mxu1  ;;  %2810 = vmatmul.mubr.bf16.gmra.mxu1 %v9338_v40 }
 0x183   : > { %11846 = vst [vmem:[#allocation19_spill] sm:$0xff] %v9770_v44  ;;  %2817 = vmatprep.mubr.bf16.mxu1 %v9457_v57  ;;  %v6752_v23 = vpop.f32.mrf.mxu0  ;;  %v9793_v57 = vld [vmem:[%s8877_s16 + $0x80] sm:$0xff] }
 0x184   : > { %v6821_v20 = vpop.f32.mrf.mxu1  ;;  %v9786_v44 = vadd.f32 %v6752_v23, %v6751_v50  ;;  %2721 = vmatmul.mubr.bf16.gmra.mxu0 %v9782_v59  ;;  %544 = vst [vmem:[#allocation2 + $0xd9] sm:$0xff] %v9793_v57 }
 0x185   : > { %v9784_v31 = vadd.f32 %v6821_v20, %v6820_v56  ;;  %v6754_v40 = vpop.f32.mrf.mxu0  ;;  %8152 = vmatprep.mubr.bf16.mxu0 %v9392_v36 }
 0x186   : > { %v6823_v6 = vpop.f32.mrf.mxu1 }
 0x187   : > { %v6755_v0 = vpop.f32.mrf.mxu0 }
 0x188   : > { %v6824_v27 = vpop.f32.mrf.mxu1  ;;  %v9803_v50 = vadd.f32 %v6755_v0, %v6754_v40 }
 0x189   : > { %v9798_v45 = vadd.f32 %v6824_v27, %v6823_v6  ;;  %v6757_v20 = vpop.f32.mrf.mxu0  ;;  %v8447_v6 = vld [vmem:[%s11804_s2 + $0xb8] sm:$0xff]  }
 0x18a   : > { %v6826_v56 = vpop.f32.mrf.mxu1  ;;  %2818 = vmatmul.mubr.bf16.gmra.mxu1 %v9382_v28 }
 0x18b   : > { %11848 = vst [vmem:[#allocation21_spill] sm:$0xff] %v9798_v45  ;;  %2825 = vmatprep.mubr.bf16.mxu1 %v9478_v32  ;;  %v6758_v27 = vpop.f32.mrf.mxu0 }
 0x18c   : > { %v6827_v36 = vpop.f32.mrf.mxu1  ;;  %v9814_v40 = vadd.f32 %v6758_v27, %v6757_v20  ;;  %8153 = vmatmul.mubr.bf16.vlgmr.msra.gmra.mxu0 %v9435_v17  ;;  %v8450_v17 = vld [vmem:[%s11804_s2 + $0xe8] sm:$0xff]  }
 0x18d   : > { %v9809_v23 = vadd.f32 %v6827_v36, %v6826_v56  ;;  %v6760_v0 = vpop.f32.mrf.mxu0  ;;  %8156 = vmatprep.mubr.bf16.mxu0 %v9461_v61  ;;  %7305 = vmatpush3.bf16.msra.mxu0 %v8447_v6  ;;  %v8449_v56 = vld [vmem:[%s11804_s2 + $0xb0] sm:$0xff]   ;;  %v9824_v36 = vld [vmem:[%s8877_s16 + $0x90] sm:$0xff]  ;;  %v9832_v27 = vld [vmem:[%s8877_s16 + $0x98] sm:$0xff] }
 0x18e   : > { %v6829_v28 = vpop.f32.mrf.mxu1  ;;  %11850 = vst [vmem:[#allocation23_spill] sm:$0xff] %v9824_v36  ;;  %7306 = vmatprep.subr.bf16.mxu0 %v8448_v26  ;;  %546 = vst [vmem:[#allocation2 + $0xf1] sm:$0xff] %v9824_v36  ;;  %v8451_v26 = vld [vmem:[%s11804_s2 + $0xa8] sm:$0xff]  }
 0x18f   : > { %11849 = vst [vmem:[#allocation22_spill] sm:$0xff] %v9809_v23  ;;  %v6761_v20 = vpop.f32.mrf.mxu0  ;;  %547 = vst [vmem:[#allocation2 + $0xf9] sm:$0xff] %v9832_v27 }
 0x190   : > { %v6830_v45 = vpop.f32.mrf.mxu1  ;;  %v9836_v6 = vadd.f32 %v6761_v20, %v6760_v0 }
 0x191   : > { %v9826_v23 = vadd.f32 %v6830_v45, %v6829_v28  ;;  %v6763_v32 = vpop.f32.mrf.mxu0  ;;  %7307 = vmatpush3.bf16.msra.mxu0 %v8449_v56 }
 0x192   : > { %v6848_v61 = vpop.f32.mrf.mxu1  ;;  %2826 = vmatmul.mubr.bf16.gmra.mxu1 %v9412_v52  ;;  %7308 = vmatprep.subr.bf16.mxu0 %v8450_v17  ;;  %v8452_v52 = vld [vmem:[%s11804_s2 + $0xe0] sm:$0xff]  }
 0x193   : > { %11851 = vst [vmem:[#allocation24_spill] sm:$0xff] %v9826_v23  ;;  %2833 = vmatprep.mubr.bf16.mxu1 %v9489_v53  ;;  %v6764_v23 = vpop.f32.mrf.mxu0  ;;  %v8453_v17 = vld [vmem:[%s11804_s2 + $0xa0] sm:$0xff]  }
 0x194   : > { %v6849_v45 = vpop.f32.mrf.mxu1  ;;  %v9846_v20 = vadd.f32 %v6764_v23, %v6763_v32  ;;  %8157 = vmatmul.mubr.bf16.gmra.mxu0 %v9482_v34  ;;  %v9862_v23 = vld [vmem:[%s8877_s16 + $0xa8] sm:$0xff] }
 0x195   : > { %v6850_v28 = vadd.f32 %v6849_v45, %v6848_v61  ;;  %v6766_v56 = vpop.f32.mrf.mxu0  ;;  %8160 = vmatprep.mubr.bf16.mxu0 %v9493_v39  ;;  %7309 = vmatpush3.bf16.msra.mxu0 %v8451_v26  ;;  %v9859_v61 = vld [vmem:[%s8877_s16 + $0xa0] sm:$0xff]  ;;  %11853 = vst [vmem:[#allocation26_spill] sm:$0xff] %v9862_v23  ;;  %v8456_v34 = vld [vmem:[%s11804_s2 + $0xd8] sm:$0xff]   ;;  %549 = vst [vmem:[#allocation2 + $0x111] sm:$0xff] %v9862_v23 }
 0x196   : > { %v6851_v0 = vpop.f32.mrf.mxu1  ;;  %11852 = vst [vmem:[#allocation25_spill] sm:$0xff] %v9859_v61  ;;  %7310 = vmatprep.subr.bf16.mxu0 %v8452_v52  ;;  %548 = vst [vmem:[#allocation2 + $0x109] sm:$0xff] %v9859_v61  ;;  %v8457_v52 = vld [vmem:[%s11804_s2 + $0x98] sm:$0xff]  }
 0x197   : > { %v9849_v53 = vadd.f32 %v6850_v28, %v9727_v47  ;;  %v6767_v32 = vpop.f32.mrf.mxu0 }
 0x198   : > { %v6852_v1 = vpop.f32.mrf.mxu1  ;;  %v9870_v45 = vadd.f32 %v6767_v32, %v6766_v56 }
 0x199   : > { %v6853_v47 = vadd.f32 %v6852_v1, %v6851_v0  ;;  %v6769_v28 = vpop.f32.mrf.mxu0  ;;  %7311 = vmatpush3.bf16.msra.mxu0 %v8453_v17 }
 0x19a   : > { %v6854_v39 = vpop.f32.mrf.mxu1  ;;  %2834 = vmatmul.mubr.bf16.gmra.mxu1 %v9451_v16  ;;  %7312 = vmatprep.subr.bf16.mxu0 %v8456_v34  ;;  %v8458_v16 = vld [vmem:[%s11804_s2 + $0xd0] sm:$0xff]  }
 0x19b   : > { %v9873_v26 = vadd.f32 %v6853_v47, %v9733_v55  ;;  %2841 = vmatprep.mubr.bf16.mxu1 %v9144_v9  ;;  %v6770_v46 = vpop.f32.mrf.mxu0  ;;  %v8459_v34 = vld [vmem:[%s11804_s2 + $0x90] sm:$0xff]  }
 0x19c   : > { %v6855_v1 = vpop.f32.mrf.mxu1  ;;  %v9882_v56 = vadd.f32 %v6770_v46, %v6769_v28  ;;  %8161 = vmatmul.mubr.bf16.gmra.mxu0 %v9502_v54  ;;  %v8460_v54 = vld [vmem:[%s11804_s2 + $0xc8] sm:$0xff]  }
 0x19d   : > { %v6856_v0 = vadd.f32 %v6855_v1, %v6854_v39  ;;  %v6772_v17 = vpop.f32.mrf.mxu0  ;;  %8164 = vmatprep.mubr.bf16.mxu0 %v9514_v51  ;;  %7313 = vmatpush3.bf16.msra.mxu0 %v8457_v52  ;;  %v9895_v39 = vld [vmem:[%s8877_s16 + $0xb0] sm:$0xff] }
 0x19e   : > { %v6857_v55 = vpop.f32.mrf.mxu1  ;;  %11854 = vst [vmem:[#allocation27_spill] sm:$0xff] %v9895_v39  ;;  %7314 = vmatprep.subr.bf16.mxu0 %v8458_v16  ;;  %550 = vst [vmem:[#allocation2 + $0x121] sm:$0xff] %v9895_v39 }
 0x19f   : > { %v9885_v9 = vadd.f32 %v6856_v0, %v9752_v13  ;;  %v6773_v28 = vpop.f32.mrf.mxu0  ;;  %v9901_v13 = vld [vmem:[%s8877_s16 + $0xb8] sm:$0xff] }
 0x1a0   : > { %v6858_v32 = vpop.f32.mrf.mxu1  ;;  %11855 = vst [vmem:[#allocation28_spill] sm:$0xff] %v9901_v13  ;;  %v9905_v51 = vadd.f32 %v6773_v28, %v6772_v17  ;;  %551 = vst [vmem:[#allocation2 + $0x129] sm:$0xff] %v9901_v13  ;;  %v8462_v17 = vld [vmem:[%s11804_s2 + $0xc0] sm:$0xff]  }
 0x1a1   : > { %v6859_v46 = vadd.f32 %v6858_v32, %v6857_v55  ;;  %v6775_v0 = vpop.f32.mrf.mxu0  ;;  %7315 = vmatpush3.bf16.msra.mxu0 %v8459_v34  ;;  %v8461_v55 = vld [vmem:[%s11804_s2 + $0x88] sm:$0xff]  }
 0x1a2   : > { %v6860_v1 = vpop.f32.mrf.mxu1  ;;  %2842 = vmatmul.mubr.bf16.gmra.mxu1 %v9110_v42  ;;  %7316 = vmatprep.subr.bf16.mxu0 %v8460_v54  ;;  %v8463_v54 = vld [vmem:[%s11804_s2 + $0x80] sm:$0xff]  }
 0x1a3   : > { %v9909_v52 = vadd.f32 %v6859_v46, %v9761_v60  ;;  %2849 = vmatprep.mubr.bf16.mxu1 %v9173_v38  ;;  %v6776_v42 = vpop.f32.mrf.mxu0 }
 0x1a4   : > { %v6861_v16 = vpop.f32.mrf.mxu1  ;;  %v9918_v46 = vadd.f32 %v6776_v42, %v6775_v0  ;;  %8165 = vmatmul.mubr.bf16.gmra.mxu0 %v9531_v10  ;;  %v9934_v0 = vld [vmem:[%s8877_s16 + $0xc8] sm:$0xff] }
 0x1a5   : > { %v6862_v32 = vadd.f32 %v6861_v16, %v6860_v1  ;;  %v6778_v34 = vpop.f32.mrf.mxu0  ;;  %8168 = vmatprep.mubr.bf16.mxu0 %v9544_v11  ;;  %7317 = vmatpush3.bf16.msra.mxu0 %v8461_v55  ;;  %v9931_v1 = vld [vmem:[%s8877_s16 + $0xc0] sm:$0xff]  ;;  %11857 = vst [vmem:[#allocation30_spill] sm:$0xff] %v9934_v0  ;;  %553 = vst [vmem:[#allocation2 + $0x141] sm:$0xff] %v9934_v0 }
 0x1a6   : > { %v6863_v60 = vpop.f32.mrf.mxu1  ;;  %11856 = vst [vmem:[#allocation29_spill] sm:$0xff] %v9931_v1  ;;  %7318 = vmatprep.subr.bf16.mxu0 %v8462_v17  ;;  %552 = vst [vmem:[#allocation2 + $0x139] sm:$0xff] %v9931_v1 }
 0x1a7   : > { %v9921_v38 = vadd.f32 %v6862_v32, %v9777_v15  ;;  %v6779_v16 = vpop.f32.mrf.mxu0 }
 0x1a8   : > { %v6864_v47 = vpop.f32.mrf.mxu1  ;;  %v9939_v11 = vadd.f32 %v6779_v16, %v6778_v34 }
 0x1a9   : > { %v6865_v15 = vadd.f32 %v6864_v47, %v6863_v60  ;;  %v6781_v32 = vpop.f32.mrf.mxu0  ;;  %7319 = vmatpush3.bf16.msra.mxu0 %v8463_v54 }
 0x1aa   : > { %v6866_v10 = vpop.f32.mrf.mxu1  ;;  %2850 = vmatmul.mubr.bf16.gmra.mxu1 %v9124_v58 }
 0x1ab   : > { %v9942_v55 = vadd.f32 %v6865_v15, %v9786_v44  ;;  %2857 = vmatprep.mubr.bf16.mxu1 %v9191_v62  ;;  %v6782_v17 = vpop.f32.mrf.mxu0  ;;  %v8576_v62 = vld [vmem:[#allocation3] sm:$0xff]  ;;  %v9957_v15 = vld [vmem:[%s8877_s16 + $0xd0] sm:$0xff] }
 0x1ac   : > { %v6867_v42 = vpop.f32.mrf.mxu1  ;;  %v9945_v28 = vadd.f32 %v6782_v17, %v6781_v32  ;;  %8169 = vmatmul.mubr.bf16.gmra.mxu0 %v9560_v8  ;;  %v9954_v54 = vpack.c.bf16 %v8576_v62, %v8576_v62  ;;  %11858 = vst [vmem:[#allocation31_spill] sm:$0xff] %v9957_v15  ;;  %v712_v32 = vld [vmem:[#allocation3 + $0x1a8] sm:$0x3]  ;;  %554 = vst [vmem:[#allocation2 + $0x151] sm:$0xff] %v9957_v15 }
 0x1ad   : > { %v6868_v47 = vadd.f32 %v6867_v42, %v6866_v10  ;;  %v6784_v58 = vpop.f32.mrf.mxu0  ;;  %8172 = vmatprep.mubr.bf16.mxu0 %v9567_v43  ;;  %v9960_v42 = vld [vmem:[%s8877_s16 + $0xd8] sm:$0xff]  ;;  %v8478_v43 = vld [vmem:[%s11804_s2 + $0x1f8] sm:$0xff]  }
 0x1ae   : > { %v6869_v60 = vpop.f32.mrf.mxu1  ;;  %11859 = vst [vmem:[#allocation32_spill] sm:$0xff] %v9960_v42  ;;  %555 = vst [vmem:[#allocation2 + $0x159] sm:$0xff] %v9960_v42  ;;  %v1654_v62 = vshll.u32 %v9954_v54, 16  ;;  %7528 = vmatprep.subr.bf16.mxu0 %v8478_v43 }
 0x1af   : > { %v9948_v61 = vadd.f32 %v6868_v47, %v9803_v50  ;;  %v6785_v10 = vpop.f32.mrf.mxu0 }
 0x1b0   : > { %v6870_v34 = vpop.f32.mrf.mxu1  ;;  %v9964_v8 = vadd.f32 %v6785_v10, %v6784_v58  ;;  %v1656_v43 = vrot.slane %v1654_v62, 1 }
 0x1b1   : > { %v6871_v16 = vadd.f32 %v6870_v34, %v6869_v60  ;;  %v6787_v17 = vpop.f32.mrf.mxu0  ;;  %v1650_v34 = vpack.c.bf16 %v712_v32, %v712_v32  ;;  %v1652_v32 = vshrl.u32 %v9954_v54, 16 }
 0x1b2   : > { %v6872_v50 = vpop.f32.mrf.mxu1  ;;  %2858 = vmatmul.mubr.bf16.gmra.mxu1 %v9152_v25 }
 0x1b3   : > { %v9971_v47 = vadd.f32 %v6871_v16, %v9814_v40  ;;  %2865 = vmatprep.mubr.bf16.mxu1 %v9255_v14  ;;  %v6788_v58 = vpop.f32.mrf.mxu0  ;;  %v1657_v1 = vor.u32 %v1656_v43, %v1652_v32  ;;  %v1667_v32 = vrot.slane %v1650_v34, 1  ;;  %v525_v43 = vld [vmem:[%s8877_s16 + $0xf0] sm:$0xff] }
 0x1b4   : > { %v6873_v60 = vpop.f32.mrf.mxu1  ;;  %v9975_v44 = vadd.f32 %v6788_v58, %v6787_v17  ;;  %8173 = vmatmul.mubr.bf16.gmra.mxu0 %v9579_v24  ;;  %v9989_v17 = vld [vmem:[%s8877_s16 + $0xe8] sm:$0xff]  ;;  %558 = vst [vmem:[#allocation2 + $0x181] sm:$0xff] %v525_v43 }
 0x1b5   : > { %v6874_v25 = vadd.f32 %v6873_v60, %v6872_v50  ;;  %v6790_v40 = vpop.f32.mrf.mxu0  ;;  %8176 = vmatprep.mubr.bf16.mxu0 %v9588_v3  ;;  %v1659_v50 = vshll.u32 %v1650_v34, 16  ;;  %v9986_v60 = vld [vmem:[%s8877_s16 + $0xe0] sm:$0xff]  ;;  %11861 = vst [vmem:[#allocation34_spill] sm:$0xff] %v9989_v17  ;;  %557 = vst [vmem:[#allocation2 + $0x171] sm:$0xff] %v9989_v17 }
 0x1b6   : > { %v6875_v10 = vpop.f32.mrf.mxu1  ;;  %11860 = vst [vmem:[#allocation33_spill] sm:$0xff] %v9986_v60  ;;  %556 = vst [vmem:[#allocation2 + $0x169] sm:$0xff] %v9986_v60 }
 0x1b7   : > { %v9978_v39 = vadd.f32 %v6874_v25, %v9836_v6  ;;  %v6791_v6 = vpop.f32.mrf.mxu0 }
 0x1b8   : > { %v6876_v16 = vpop.f32.mrf.mxu1  ;;  %v9994_v25 = vadd.f32 %v6791_v6, %v6790_v40  ;;  %v857_v6 = vld [vmem:[#allocation2 + $0x18] sm:$0xff] }
 0x1b9   : > { %v6877_v58 = vadd.f32 %v6876_v16, %v6875_v10  ;;  %v6793_v62 = vpop.f32.mrf.mxu0  ;;  %v1661_v10 = vrot.slane %v1659_v50, 1 }
 0x1ba   : > { %v6878_v24 = vpop.f32.mrf.mxu1  ;;  %2866 = vmatmul.mubr.bf16.gmra.mxu1 %v9220_v30 }
 0x1bb   : > { %v9997_v3 = vadd.f32 %v6877_v58, %v9846_v20  ;;  %2873 = vmatprep.mubr.bf16.mxu1 %v9782_v59  ;;  %v6794_v0 = vpop.f32.mrf.mxu0  ;;  %v1662_v58 = vsel %vm1322_vm0, %v1657_v1, %v1661_v10 }
 0x1bc   : > { %v6879_v14 = vpop.f32.mrf.mxu1  ;;  %v10000_v23 = vadd.f32 %v6794_v0, %v6793_v62  ;;  %8177 = vmatmul.mubr.bf16.gmra.mxu0 %v9599_v2 }
 0x1bd   : > { %v6880_v16 = vadd.f32 %v6879_v14, %v6878_v24  ;;  %v6796_v40 = vpop.f32.mrf.mxu0  ;;  %8180 = vmatprep.mubr.bf16.mxu0 %v9759_v63  ;;  %v1666_v14 = vrot.slane %v9954_v54, 1  ;;  %v526_v24 = vld [vmem:[%s8877_s16 + $0xf8] sm:$0xff] }
 0x1be   : > { %v6881_v13 = vpop.f32.mrf.mxu1  ;;  %559 = vst [vmem:[#allocation2 + $0x189] sm:$0xff] %v526_v24  ;;  %v860_v24 = vld [vmem:[#allocation2 + $0x38] sm:$0xff] }
 0x1bf   : > { %v10003_v30 = vadd.f32 %v6880_v16, %v9870_v45  ;;  %v6797_v50 = vpop.f32.mrf.mxu0  ;;  %v858_v45 = vld [vmem:[#allocation2 + $0x20] sm:$0xff]  ;;  %v1668_v34 = vsel %vm1563_vm1, %v1666_v14, %v1667_v32  ;;  %v762_v16 = vld [vmem:[#allocation2 + $0x9] sm:$0xff] }
 0x1c0   : > { %v6882_v59 = vpop.f32.mrf.mxu1  ;;  %v10014_v2 = vadd.f32 %v6797_v50, %v6796_v40  ;;  %v809_v14 = vld [vmem:[#allocation2 + $0x2] sm:$0xff]  ;;  %v810_v32 = vld [vmem:[#allocation2 + $0xa] sm:$0xff] }
 0x1c1   : > { %v6883_v0 = vadd.f32 %v6882_v59, %v6881_v13  ;;  %v6799_v63 = vpop.f32.mrf.mxu0  ;;  %v761_v13 = vld [vmem:[#allocation2 + $0x1] sm:$0xff]  ;;  %v10020_v59 = vpack.c.bf16 %v858_v45, %v857_v6  ;;  %v859_v45 = vld [vmem:[#allocation2 + $0x30] sm:$0xff] }
 0x1c2   : > { %v6884_v62 = vpop.f32.mrf.mxu1  ;;  %2874 = vmatmul.mubr.bf16.gmra.mxu1 %v9591_v12 }
 0x1c3   : > { %v10017_v1 = vadd.f32 %v6883_v0, %v9882_v56  ;;  %2881 = vmatprep.mubr.bf16.mxu1 %v1662_v58  ;;  %v6800_v43 = vpop.f32.mrf.mxu0  ;;  %v793_v56 = vpack.c.bf16 %v762_v16, %v761_v13  ;;  %v10036_v13 = vpack.c.bf16 %v860_v24, %v859_v45  ;;  %v812_v45 = vld [vmem:[#allocation2 + $0x22] sm:$0xff]  ;;  %v8466_v24 = vld [vmem:[%s11804_s2 + $0x170] sm:$0xff]  }
 0x1c4   : > { %v6885_v10 = vpop.f32.mrf.mxu1  ;;  %v10022_v42 = vadd.f32 %v6800_v43, %v6799_v63  ;;  %8181 = vmatmul.mubr.bf16.gmra.mxu0 %v1668_v34 }
 0x1c5   : > { %v6886_v20 = vadd.f32 %v6885_v10, %v6884_v62  ;;  %v6802_v40 = vpop.f32.mrf.mxu0  ;;  %3676 = vmatprep.mubr.bf16.mxu0 %v10020_v59  ;;  %v841_v10 = vpack.c.bf16 %v810_v32, %v809_v14  ;;  %v8465_v14 = vld [vmem:[%s11804_s2 + $0x138] sm:$0xff]  }
 0x1c6   : > { %v6887_v15 = vpop.f32.mrf.mxu1  ;;  %v811_v32 = vld [vmem:[#allocation2 + $0x1a] sm:$0xff] }
 0x1c7   : > { %v10025_v12 = vadd.f32 %v6886_v20, %v9905_v51  ;;  %v6803_v6 = vpop.f32.mrf.mxu0 }
 0x1c8   : > { %v6888_v0 = vpop.f32.mrf.mxu1  ;;  %v10031_v51 = vadd.f32 %v6803_v6, %v6802_v40  ;;  %v8480_v40 = vld [vmem:[%s11804_s2 + $0x1f0] sm:$0xff]  }
 0x1c9   : > { %v6889_v50 = vadd.f32 %v6888_v0, %v6887_v15  ;;  %v6805_v63 = vpop.f32.mrf.mxu0  ;;  %v8479_v15 = vld [vmem:[%s11804_s2 + $0x1b8] sm:$0xff]  }
 0x1ca   : > { %v6890_v62 = vpop.f32.mrf.mxu1  ;;  %2882 = vmatmul.mubr.bf16.gmra.mxu1 %v9954_v54 }
 0x1cb   : > { %v10034_v20 = vadd.f32 %v6889_v50, %v9918_v46  ;;  %3515 = vmatprep.mubr.bf16.mxu1 %v793_v56  ;;  %v6806_v43 = vpop.f32.mrf.mxu0 }
 0x1cc   : > { %v6891_v34 = vpop.f32.mrf.mxu1  ;;  %v10044_v6 = vadd.f32 %v6806_v43, %v6805_v63  ;;  %3677 = vmatmul.mubr.bf16.vlgmr.msra.gmra.mxu0 %v841_v10  ;;  %v8482_v10 = vld [vmem:[%s11804_s2 + $0x1e8] sm:$0xff]  }
 0x1cd   : > { %v6892_v16 = vadd.f32 %v6891_v34, %v6890_v62  ;;  %v6960_v56 = vpop.f32.mrf.mxu0  ;;  %3684 = vmatprep.mubr.bf16.mxu0 %v10036_v13  ;;  %7529 = vmatpush3.bf16.msra.mxu0 %v8479_v15  ;;  %v861_v34 = vld [vmem:[#allocation2 + $0x48] sm:$0xff] }
 0x1ce   : > { %v6893_v0 = vpop.f32.mrf.mxu1  ;;  %7530 = vmatprep.subr.bf16.mxu0 %v8480_v40  ;;  %v8467_v40 = vld [vmem:[%s11804_s2 + $0x130] sm:$0xff]  }
 0x1cf   : > { %v10047_v46 = vadd.f32 %v6892_v16, %v9939_v11  ;;  %v8481_v11 = vld [vmem:[%s11804_s2 + $0x1b0] sm:$0xff]   ;;  %v6961_v63 = vpop.f32.mrf.mxu0 }
 0x1d0   : > { %v6894_v50 = vpop.f32.mrf.mxu1  ;;  %v862_v16 = vld [vmem:[#allocation2 + $0x50] sm:$0xff]  ;;  %v6962_v58 = vadd.f32 %v6961_v63, %v6960_v56  ;;  %v814_v63 = vld [vmem:[#allocation2 + $0x3a] sm:$0xff] }
 0x1d1   : > { %v6895_v62 = vadd.f32 %v6894_v50, %v6893_v0  ;;  %v6963_v15 = vpop.f32.mrf.mxu0  ;;  %v11862_v0 = vpack.c.bf16 %v9607_v4, %v9604_v48  ;;  %v842_v50 = vpack.c.bf16 %v812_v45, %v811_v32  ;;  %7531 = vmatpush3.bf16.msra.mxu0 %v8481_v11  ;;  %v8483_v4 = vld [vmem:[%s11804_s2 + $0x1a8] sm:$0xff]  }
 0x1d2   : > { %v6896_v43 = vpop.f32.mrf.mxu1  ;;  %3516 = vmatmul.mubr.bf16.vlgmr.msra.gmra.mxu1 %v9954_v54  ;;  %v10073_v36 = vadd.f32 %v6962_v58, %v9849_v53  ;;  %v10075_v54 = vpack.c.bf16 %v862_v16, %v861_v34  ;;  %7532 = vmatprep.subr.bf16.mxu0 %v8482_v10  ;;  %v8484_v53 = vld [vmem:[%s11804_s2 + $0x1e0] sm:$0xff]  }
 0x1d3   : > { %v10064_v60 = vadd.f32 %v6895_v62, %v9945_v28  ;;  %7417 = vmatpush3.bf16.msra.mxu1 %v8465_v14  ;;  %3523 = vmatprep.mubr.bf16.mxu1 %v11862_v0  ;;  %v8468_v28 = vld [vmem:[%s11804_s2 + $0x168] sm:$0xff]   ;;  %v6964_v48 = vpop.f32.mrf.mxu0  ;;  %v813_v62 = vld [vmem:[#allocation2 + $0x32] sm:$0xff]  ;;  %v863_v10 = vld [vmem:[#allocation2 + $0x60] sm:$0xff] }
 0x1d4   : > { %v6897_v17 = vpop.f32.mrf.mxu1  ;;  %7418 = vmatprep.subr.bf16.mxu1 %v8466_v24  ;;  %v6965_v32 = vadd.f32 %v6964_v48, %v6963_v15  ;;  %3685 = vmatmul.mubr.bf16.gmra.mxu0 %v842_v50  ;;  %v8485_v15 = vld [vmem:[%s11804_s2 + $0x1a0] sm:$0xff]   ;;  %v8488_v50 = vld [vmem:[%s11804_s2 + $0x1d8] sm:$0xff]   ;;  %v843_v48 = vpack.c.bf16 %v814_v63, %v813_v62 }
 0x1d5   : > { %v6898_v56 = vadd.f32 %v6897_v17, %v6896_v43  ;;  %v6966_v45 = vpop.f32.mrf.mxu0  ;;  %v8469_v17 = vld [vmem:[%s11804_s2 + $0x128] sm:$0xff]   ;;  %3692 = vmatprep.mubr.bf16.mxu0 %v10075_v54  ;;  %7533 = vmatpush3.bf16.msra.mxu0 %v8483_v4  ;;  %v8473_v63 = vld [vmem:[%s11804_s2 + $0x118] sm:$0xff]  }
 0x1d6   : > { %v6899_v14 = vpop.f32.mrf.mxu1  ;;  %v10093_v11 = vadd.f32 %v6965_v32, %v9873_v26  ;;  %v864_v43 = vld [vmem:[#allocation2 + $0x68] sm:$0xff]  ;;  %7534 = vmatprep.subr.bf16.mxu0 %v8484_v53 }
 0x1d7   : > { %v10087_v58 = vadd.f32 %v6898_v56, %v9964_v8  ;;  %7419 = vmatpush3.bf16.msra.mxu1 %v8467_v40  ;;  %v8470_v8 = vld [vmem:[%s11804_s2 + $0x160] sm:$0xff]   ;;  %v6967_v16 = vpop.f32.mrf.mxu0  ;;  %v11863_v56 = vpack.c.bf16 %v9625_v37, %v9622_v33  ;;  %v10118_v32 = vpack.c.bf16 %v864_v43, %v863_v10  ;;  %v8489_v37 = vld [vmem:[%s11804_s2 + $0x198] sm:$0xff]  }
 0x1d8   : > { %v6900_v24 = vpop.f32.mrf.mxu1  ;;  %7420 = vmatprep.subr.bf16.mxu1 %v8468_v28  ;;  %v6968_v0 = vadd.f32 %v6967_v16, %v6966_v45  ;;  %v815_v16 = vld [vmem:[#allocation2 + $0x4a] sm:$0xff]  ;;  %v816_v10 = vld [vmem:[#allocation2 + $0x52] sm:$0xff] }
 0x1d9   : > { %v6901_v34 = vadd.f32 %v6900_v24, %v6899_v14  ;;  %v6969_v28 = vpop.f32.mrf.mxu0  ;;  %7535 = vmatpush3.bf16.msra.mxu0 %v8485_v15 }
 0x1da   : > { %v6902_v26 = vpop.f32.mrf.mxu1  ;;  %3524 = vmatmul.mubr.bf16.gmra.mxu1 %v10020_v59  ;;  %v8471_v59 = vld [vmem:[%s11804_s2 + $0x120] sm:$0xff]   ;;  %v10116_v14 = vadd.f32 %v6968_v0, %v9885_v9  ;;  %7536 = vmatprep.subr.bf16.mxu0 %v8488_v50  ;;  %v8490_v9 = vld [vmem:[%s11804_s2 + $0x1d0] sm:$0xff]  }
 0x1db   : > { %v10107_v40 = vadd.f32 %v6901_v34, %v9975_v44  ;;  %3531 = vmatprep.mubr.bf16.mxu1 %v11863_v56  ;;  %7421 = vmatpush3.bf16.msra.mxu1 %v8469_v17  ;;  %v8472_v44 = vld [vmem:[%s11804_s2 + $0x158] sm:$0xff]   ;;  %v6970_v33 = vpop.f32.mrf.mxu0  ;;  %v866_v0 = vld [vmem:[#allocation2 + $0x80] sm:$0xff]  ;;  %v8491_v50 = vld [vmem:[%s11804_s2 + $0x190] sm:$0xff]  }
 0x1dc   : > { %v6903_v4 = vpop.f32.mrf.mxu1  ;;  %7422 = vmatprep.subr.bf16.mxu1 %v8470_v8  ;;  %v6971_v17 = vadd.f32 %v6970_v33, %v6969_v28  ;;  %3693 = vmatmul.mubr.bf16.gmra.mxu0 %v843_v48  ;;  %v8492_v56 = vld [vmem:[%s11804_s2 + $0x1c8] sm:$0xff]  }
 0x1dd   : > { %v6904_v53 = vadd.f32 %v6903_v4, %v6902_v26  ;;  %v6972_v62 = vpop.f32.mrf.mxu0  ;;  %3700 = vmatprep.mubr.bf16.mxu0 %v10118_v32  ;;  %v865_v26 = vld [vmem:[#allocation2 + $0x78] sm:$0xff]  ;;  %7537 = vmatpush3.bf16.msra.mxu0 %v8489_v37  ;;  %v11864_v4 = vpack.c.bf16 %v9651_v21, %v9648_v18  ;;  %v8493_v21 = vld [vmem:[%s11804_s2 + $0x188] sm:$0xff]  }
 0x1de   : > { %v6905_v45 = vpop.f32.mrf.mxu1  ;;  %v10136_v34 = vadd.f32 %v6971_v17, %v9909_v52  ;;  %7538 = vmatprep.subr.bf16.mxu0 %v8490_v9  ;;  %v10161_v37 = vpack.c.bf16 %v866_v0, %v865_v26  ;;  %v867_v0 = vld [vmem:[#allocation2 + $0x90] sm:$0xff] }
 0x1df   : > { %v10130_v24 = vadd.f32 %v6904_v53, %v9994_v25  ;;  %7423 = vmatpush3.bf16.msra.mxu1 %v8471_v59  ;;  %v8474_v25 = vld [vmem:[%s11804_s2 + $0x150] sm:$0xff]   ;;  %v6973_v15 = vpop.f32.mrf.mxu0 }
 0x1e0   : > { %v6906_v8 = vpop.f32.mrf.mxu1  ;;  %7424 = vmatprep.subr.bf16.mxu1 %v8472_v44  ;;  %v6974_v28 = vadd.f32 %v6973_v15, %v6972_v62  ;;  %v844_v44 = vpack.c.bf16 %v816_v10, %v815_v16 }
 0x1e1   : > { %v6907_v43 = vadd.f32 %v6906_v8, %v6905_v45  ;;  %v6975_v59 = vpop.f32.mrf.mxu0  ;;  %7539 = vmatpush3.bf16.msra.mxu0 %v8491_v50  ;;  %v8477_v8 = vld [vmem:[%s11804_s2 + $0x108] sm:$0xff]   ;;  %v868_v50 = vld [vmem:[#allocation2 + $0x98] sm:$0xff] }
 0x1e2   : > { %v6908_v52 = vpop.f32.mrf.mxu1  ;;  %3532 = vmatmul.mubr.bf16.gmra.mxu1 %v10036_v13  ;;  %v8475_v13 = vld [vmem:[%s11804_s2 + $0x110] sm:$0xff]   ;;  %v10159_v33 = vadd.f32 %v6974_v28, %v9921_v38  ;;  %7540 = vmatprep.subr.bf16.mxu0 %v8492_v56  ;;  %v8494_v38 = vld [vmem:[%s11804_s2 + $0x1c0] sm:$0xff]  }
 0x1e3   : > { %v10150_v48 = vadd.f32 %v6907_v43, %v10000_v23  ;;  %3539 = vmatprep.mubr.bf16.mxu1 %v11864_v4  ;;  %7425 = vmatpush3.bf16.msra.mxu1 %v8473_v63  ;;  %v8476_v23 = vld [vmem:[%s11804_s2 + $0x148] sm:$0xff]   ;;  %v6976_v18 = vpop.f32.mrf.mxu0  ;;  %v11865_v4 = vpack.c.bf16 %v9677_v35, %v9674_v29 }
 0x1e4   : > { %v6909_v53 = vpop.f32.mrf.mxu1  ;;  %7426 = vmatprep.subr.bf16.mxu1 %v8474_v25  ;;  %v6977_v9 = vadd.f32 %v6976_v18, %v6975_v59  ;;  %3701 = vmatmul.mubr.bf16.gmra.mxu0 %v844_v44  ;;  %v817_v25 = vld [vmem:[#allocation2 + $0x62] sm:$0xff]  ;;  %v818_v43 = vld [vmem:[#allocation2 + $0x6a] sm:$0xff] }
 0x1e5   : > { %v6910_v45 = vadd.f32 %v6909_v53, %v6908_v52  ;;  %v6978_v63 = vpop.f32.mrf.mxu0  ;;  %3708 = vmatprep.mubr.bf16.mxu0 %v10161_v37  ;;  %7541 = vmatpush3.bf16.msra.mxu0 %v8493_v21  ;;  %v8495_v52 = vld [vmem:[%s11804_s2 + $0x180] sm:$0xff]   ;;  %v845_v44 = vpack.c.bf16 %v818_v43, %v817_v25  ;;  %v869_v25 = vld [vmem:[#allocation2 + $0xa8] sm:$0xff]  ;;  %v870_v43 = vld [vmem:[#allocation2 + $0xb0] sm:$0xff] }
 0x1e6   : > { %v6911_v17 = vpop.f32.mrf.mxu1  ;;  %v10179_v10 = vadd.f32 %v6977_v9, %v9942_v55  ;;  %7542 = vmatprep.subr.bf16.mxu0 %v8494_v38  ;;  %v819_v38 = vld [vmem:[#allocation2 + $0x7a] sm:$0xff] }
 0x1e7   : > { %v10173_v62 = vadd.f32 %v6910_v45, %v10014_v2  ;;  %7427 = vmatpush3.bf16.msra.mxu1 %v8475_v13  ;;  %v8486_v2 = vld [vmem:[%s11804_s2 + $0x140] sm:$0xff]   ;;  %v6979_v26 = vpop.f32.mrf.mxu0 }
 0x1e8   : > { %v6912_v16 = vpop.f32.mrf.mxu1  ;;  %7428 = vmatprep.subr.bf16.mxu1 %v8476_v23  ;;  %v6980_v28 = vadd.f32 %v6979_v26, %v6978_v63  ;;  %v8487_v13 = vld [vmem:[%s11804_s2 + $0x100] sm:$0xff]  }
 0x1e9   : > { %v6913_v15 = vadd.f32 %v6912_v16, %v6911_v17  ;;  %v6981_v59 = vpop.f32.mrf.mxu0  ;;  %7543 = vmatpush3.bf16.msra.mxu0 %v8495_v52  ;;  %v820_v63 = vld [vmem:[#allocation2 + $0x82] sm:$0xff] }
 0x1ea   : > { %v6914_v55 = vpop.f32.mrf.mxu1  ;;  %3540 = vmatmul.mubr.bf16.gmra.mxu1 %v10075_v54  ;;  %v10199_v23 = vadd.f32 %v6980_v28, %v9948_v61  ;;  %v10201_v54 = vpack.c.bf16 %v868_v50, %v867_v0  ;;  %v846_v50 = vpack.c.bf16 %v820_v63, %v819_v38  ;;  %v10226_v28 = vpack.c.bf16 %v870_v43, %v869_v25 }
 0x1eb   : > { %v10190_v56 = vadd.f32 %v6913_v15, %v10022_v42  ;;  %3547 = vmatprep.mubr.bf16.mxu1 %v11865_v4  ;;  %7429 = vmatpush3.bf16.msra.mxu1 %v8477_v8  ;;  %v10206_v42 = vld [vmem:[%s11804_s2 + $0x238] sm:$0xff]   ;;  %v6982_v35 = vpop.f32.mrf.mxu0 }
 0x1ec   : > { %v6915_v53 = vpop.f32.mrf.mxu1  ;;  %7430 = vmatprep.subr.bf16.mxu1 %v8486_v2  ;;  %v6983_v18 = vadd.f32 %v6982_v35, %v6981_v59  ;;  %3709 = vmatmul.mubr.bf16.gmra.mxu0 %v845_v44  ;;  %v821_v35 = vld [vmem:[#allocation2 + $0x92] sm:$0xff] }
 0x1ed   : > { %v6916_v29 = vadd.f32 %v6915_v53, %v6914_v55  ;;  %v6984_v17 = vpop.f32.mrf.mxu0  ;;  %3716 = vmatprep.mubr.bf16.mxu0 %v10201_v54 }
 0x1ee   : > { %v6917_v45 = vpop.f32.mrf.mxu1  ;;  %v10212_v9 = vadd.f32 %v6983_v18, %v9971_v47  ;;  %v11866_v47 = vld [vmem:[#allocation14_spill] sm:$0xff] }
 0x1ef   : > { %v10209_v21 = vadd.f32 %v6916_v29, %v10031_v51  ;;  %7431 = vmatpush3.bf16.msra.mxu1 %v8487_v13  ;;  %v6985_v16 = vpop.f32.mrf.mxu0  ;;  %v11867_v0 = vpack.c.bf16 %v9703_v49, %v11866_v47  ;;  %v11868_v13 = vld [vmem:[#allocation15_spill] sm:$0xff] }
 0x1f0   : > { %v6918_v61 = vpop.f32.mrf.mxu1  ;;  %8184 = vmatprep.subr.bf16.mxu1 %v10206_v42  ;;  %v6986_v51 = vadd.f32 %v6985_v16, %v6984_v17  ;;  %v871_v17 = vld [vmem:[#allocation2 + $0xc0] sm:$0xff] }
 0x1f1   : > { %v6919_v8 = vadd.f32 %v6918_v61, %v6917_v45  ;;  %v6987_v26 = vpop.f32.mrf.mxu0  ;;  %v872_v61 = vld [vmem:[#allocation2 + $0xc8] sm:$0xff] }
 0x1f2   : > { %v6920_v2 = vpop.f32.mrf.mxu1  ;;  %3548 = vmatmul.mubr.bf16.gmra.mxu1 %v10118_v32  ;;  %v10224_v55 = vadd.f32 %v6986_v51, %v9978_v39  ;;  %v822_v39 = vld [vmem:[#allocation2 + $0x9a] sm:$0xff] }
 0x1f3   : > { %v10218_v15 = vadd.f32 %v6919_v8, %v10044_v6  ;;  %3555 = vmatprep.mubr.bf16.mxu1 %v11867_v0  ;;  %v6988_v4 = vpop.f32.mrf.mxu0  ;;  %v11869_v8 = vld [vmem:[#allocation16_spill] sm:$0xff]  ;;  %v847_v43 = vpack.c.bf16 %v822_v39, %v821_v35 }
 0x1f4   : > { %v6921_v52 = vpop.f32.mrf.mxu1  ;;  %v6989_v32 = vadd.f32 %v6988_v4, %v6987_v26  ;;  %3717 = vmatmul.mubr.bf16.gmra.mxu0 %v846_v50  ;;  %v10245_v26 = vpack.c.bf16 %v872_v61, %v871_v17 }
 0x1f5   : > { %v6922_v59 = vadd.f32 %v6921_v52, %v6920_v2  ;;  %v6990_v6 = vpop.f32.mrf.mxu0  ;;  %3724 = vmatprep.mubr.bf16.mxu0 %v10226_v28  ;;  %v11871_v52 = vld [vmem:[#allocation17_spill] sm:$0xff] }
 0x1f6   : > { %v6923_v44 = vpop.f32.mrf.mxu1  ;;  %v10232_v49 = vadd.f32 %v6989_v32, %v9997_v3  ;;  %v11870_v3 = vpack.c.bf16 %v9723_v5, %v9720_v7  ;;  %v823_v5 = vld [vmem:[#allocation2 + $0xaa] sm:$0xff] }
 0x1f7   : > { %v10229_v53 = vadd.f32 %v6922_v59, %v11868_v13  ;;  %v6991_v18 = vpop.f32.mrf.mxu0 }
 0x1f8   : > { %v6924_v29 = vpop.f32.mrf.mxu1  ;;  %v6992_v63 = vadd.f32 %v6991_v18, %v6990_v6  ;;  %v873_v6 = vld [vmem:[#allocation2 + $0xd8] sm:$0xff] }
 0x1f9   : > { %v6925_v45 = vadd.f32 %v6924_v29, %v6923_v44  ;;  %v6993_v25 = vpop.f32.mrf.mxu0  ;;  %v874_v29 = vld [vmem:[#allocation2 + $0xe0] sm:$0xff] }
 0x1fa   : > { %v6926_v38 = vpop.f32.mrf.mxu1  ;;  %3556 = vmatmul.mubr.bf16.gmra.mxu1 %v10161_v37  ;;  %v10243_v51 = vadd.f32 %v6992_v63, %v10003_v30  ;;  %v824_v30 = vld [vmem:[#allocation2 + $0xb2] sm:$0xff] }
 0x1fb   : > { %v10237_v16 = vadd.f32 %v6925_v45, %v11869_v8  ;;  %3563 = vmatprep.mubr.bf16.mxu1 %v11870_v3  ;;  %v6994_v0 = vpop.f32.mrf.mxu0  ;;  %v11872_v45 = vld [vmem:[#allocation19_spill] sm:$0xff]  ;;  %v848_v61 = vpack.c.bf16 %v824_v30, %v823_v5  ;;  %v10264_v8 = vpack.c.bf16 %v874_v29, %v873_v6  ;;  %v11876_v6 = vld [vmem:[#allocation18_spill] sm:$0xff] }
 0x1fc   : > { %v6927_v2 = vpop.f32.mrf.mxu1  ;;  %v6995_v37 = vadd.f32 %v6994_v0, %v6993_v25  ;;  %3725 = vmatmul.mubr.bf16.gmra.mxu0 %v847_v43 }
 0x1fd   : > { %v6928_v47 = vadd.f32 %v6927_v2, %v6926_v38  ;;  %v6996_v4 = vpop.f32.mrf.mxu0  ;;  %3732 = vmatprep.mubr.bf16.mxu0 %v10245_v26 }
 0x1fe   : > { %v6929_v50 = vpop.f32.mrf.mxu1  ;;  %v10251_v7 = vadd.f32 %v6995_v37, %v10017_v1  ;;  %v11873_v1 = vpack.c.bf16 %v9744_v41, %v9741_v22  ;;  %v825_v41 = vld [vmem:[#allocation2 + $0xc2] sm:$0xff] }
 0x1ff   : > { %v10248_v59 = vadd.f32 %v6928_v47, %v11871_v52  ;;  %v6997_v13 = vpop.f32.mrf.mxu0  ;;  %v875_v52 = vld [vmem:[#allocation2 + $0xf0] sm:$0xff] }
 0x200   : > { %v6930_v44 = vpop.f32.mrf.mxu1  ;;  %v6998_v39 = vadd.f32 %v6997_v13, %v6996_v4  ;;  %v876_v4 = vld [vmem:[#allocation2 + $0xf8] sm:$0xff]  ;;  %v11875_v13 = vld [vmem:[#allocation20_spill] sm:$0xff] }
 0x201   : > { %v6931_v32 = vadd.f32 %v6930_v44, %v6929_v50  ;;  %v6999_v17 = vpop.f32.mrf.mxu0 }
 0x202   : > { %v6932_v35 = vpop.f32.mrf.mxu1  ;;  %3564 = vmatmul.mubr.bf16.gmra.mxu1 %v10201_v54  ;;  %v10262_v63 = vadd.f32 %v6998_v39, %v10025_v12  ;;  %v826_v12 = vld [vmem:[#allocation2 + $0xca] sm:$0xff] }
 0x203   : > { %v10256_v18 = vadd.f32 %v6931_v32, %v11872_v45  ;;  %3571 = vmatprep.mubr.bf16.mxu1 %v11873_v1  ;;  %v7000_v3 = vpop.f32.mrf.mxu0  ;;  %v849_v29 = vpack.c.bf16 %v826_v12, %v825_v41  ;;  %v10283_v45 = vpack.c.bf16 %v876_v4, %v875_v52  ;;  %v877_v12 = vld [vmem:[#allocation2 + $0x108] sm:$0xff]  ;;  %v11879_v4 = vld [vmem:[#allocation24_spill] sm:$0xff] }
 0x204   : > { %v6933_v38 = vpop.f32.mrf.mxu1  ;;  %v7001_v54 = vadd.f32 %v7000_v3, %v6999_v17  ;;  %3733 = vmatmul.mubr.bf16.gmra.mxu0 %v848_v61 }
 0x205   : > { %v6934_v25 = vadd.f32 %v6933_v38, %v6932_v35  ;;  %v7002_v47 = vpop.f32.mrf.mxu0  ;;  %3740 = vmatprep.mubr.bf16.mxu0 %v10264_v8  ;;  %v11878_v38 = vld [vmem:[#allocation22_spill] sm:$0xff] }
 0x206   : > { %v6935_v43 = vpop.f32.mrf.mxu1  ;;  %v10270_v22 = vadd.f32 %v7001_v54, %v10034_v20  ;;  %v11877_v20 = vpack.c.bf16 %v11875_v13, %v11876_v6 }
 0x207   : > { %v10267_v2 = vadd.f32 %v6934_v25, %v9784_v31  ;;  %v7003_v37 = vpop.f32.mrf.mxu0  ;;  %v11874_v31 = vld [vmem:[#allocation21_spill] sm:$0xff] }
 0x208   : > { %v6936_v0 = vpop.f32.mrf.mxu1  ;;  %v7004_v5 = vadd.f32 %v7003_v37, %v7002_v47  ;;  %v827_v47 = vld [vmem:[#allocation2 + $0xda] sm:$0xff] }
 0x209   : > { %v6937_v50 = vadd.f32 %v6936_v0, %v6935_v43  ;;  %v7005_v32 = vpop.f32.mrf.mxu0 }
 0x20a   : > { %v6938_v44 = vpop.f32.mrf.mxu1  ;;  %3572 = vmatmul.mubr.bf16.gmra.mxu1 %v10226_v28  ;;  %v10281_v39 = vadd.f32 %v7004_v5, %v10047_v46  ;;  %v828_v46 = vld [vmem:[#allocation2 + $0xe2] sm:$0xff] }
 0x20b   : > { %v10275_v30 = vadd.f32 %v6937_v50, %v11874_v31  ;;  %3579 = vmatprep.mubr.bf16.mxu1 %v11877_v20  ;;  %v7006_v1 = vpop.f32.mrf.mxu0  ;;  %v878_v50 = vld [vmem:[#allocation2 + $0x110] sm:$0xff]  ;;  %v850_v31 = vpack.c.bf16 %v828_v46, %v827_v47 }
 0x20c   : > { %v6939_v35 = vpop.f32.mrf.mxu1  ;;  %v7007_v28 = vadd.f32 %v7006_v1, %v7005_v32  ;;  %3741 = vmatmul.mubr.bf16.gmra.mxu0 %v849_v29  ;;  %v10302_v6 = vpack.c.bf16 %v878_v50, %v877_v12 }
 0x20d   : > { %v6940_v17 = vadd.f32 %v6939_v35, %v6938_v44  ;;  %v7008_v3 = vpop.f32.mrf.mxu0  ;;  %3748 = vmatprep.mubr.bf16.mxu0 %v10283_v45 }
 0x20e   : > { %v6941_v61 = vpop.f32.mrf.mxu1  ;;  %v10289_v54 = vadd.f32 %v7007_v28, %v10064_v60  ;;  %v11880_v60 = vpack.c.bf16 %v9796_v19, %v9793_v57  ;;  %v829_v57 = vld [vmem:[#allocation2 + $0xf2] sm:$0xff] }
 0x20f   : > { %v10286_v25 = vadd.f32 %v6940_v17, %v11878_v38  ;;  %v7009_v41 = vpop.f32.mrf.mxu0 }
 0x210   : > { %v6942_v43 = vpop.f32.mrf.mxu1  ;;  %v7010_v52 = vadd.f32 %v7009_v41, %v7008_v3  ;;  %v879_v3 = vld [vmem:[#allocation2 + $0x120] sm:$0xff] }
 0x211   : > { %v6943_v0 = vadd.f32 %v6942_v43, %v6941_v61  ;;  %v7011_v5 = vpop.f32.mrf.mxu0  ;;  %v880_v43 = vld [vmem:[#allocation2 + $0x128] sm:$0xff] }
 0x212   : > { %v7072_v37 = vpop.f32.mrf.mxu1  ;;  %3580 = vmatmul.mubr.bf16.gmra.mxu1 %v10245_v26  ;;  %v10300_v32 = vadd.f32 %v7010_v52, %v10087_v58  ;;  %v830_v58 = vld [vmem:[#allocation2 + $0xfa] sm:$0xff]  ;;  %v10321_v52 = vpack.c.bf16 %v880_v43, %v879_v3 }
 0x213   : > { %v10294_v44 = vadd.f32 %v6943_v0, %v11879_v4  ;;  %3587 = vmatprep.mubr.bf16.mxu1 %v11880_v60  ;;  %v7012_v29 = vpop.f32.mrf.mxu0 }
 0x214   : > { %v7073_v13 = vpop.f32.mrf.mxu1  ;;  %v7013_v26 = vadd.f32 %v7012_v29, %v7011_v5  ;;  %3749 = vmatmul.mubr.bf16.gmra.mxu0 %v850_v31 }
 0x215   : > { %v7074_v20 = vadd.f32 %v7073_v13, %v7072_v37  ;;  %v7014_v17 = vpop.f32.mrf.mxu0  ;;  %3756 = vmatprep.mubr.bf16.mxu0 %v10302_v6 }
 0x216   : > { %v7075_v35 = vpop.f32.mrf.mxu1  ;;  %v10308_v61 = vadd.f32 %v7013_v26, %v10107_v40  ;;  %v851_v40 = vpack.c.bf16 %v830_v58, %v829_v57  ;;  %v881_v26 = vld [vmem:[#allocation2 + $0x138] sm:$0xff] }
 0x217   : > { %v10305_v1 = vadd.f32 %v7074_v20, %v10073_v36  ;;  %v7015_v38 = vpop.f32.mrf.mxu0  ;;  %v11881_v36 = vld [vmem:[#allocation23_spill] sm:$0xff] }
 0x218   : > { %v7076_v19 = vpop.f32.mrf.mxu1  ;;  %v7016_v46 = vadd.f32 %v7015_v38, %v7014_v17  ;;  %v11882_v41 = vpack.c.bf16 %v9832_v27, %v11881_v36  ;;  %v832_v20 = vld [vmem:[#allocation2 + $0x112] sm:$0xff]  ;;  %v882_v17 = vld [vmem:[#allocation2 + $0x140] sm:$0xff] }
 0x219   : > { %v7077_v28 = vadd.f32 %v7076_v19, %v7075_v35  ;;  %v7017_v0 = vpop.f32.mrf.mxu0 }
 0x21a   : > { %v7078_v47 = vpop.f32.mrf.mxu1  ;;  %3588 = vmatmul.mubr.bf16.gmra.mxu1 %v10264_v8  ;;  %v10319_v50 = vadd.f32 %v7016_v46, %v10130_v24  ;;  %v831_v24 = vld [vmem:[#allocation2 + $0x10a] sm:$0xff]  ;;  %v10340_v46 = vpack.c.bf16 %v882_v17, %v881_v26 }
 0x21b   : > { %3595 = vmatprep.mubr.bf16.mxu1 %v11882_v41  ;;  %v10316_v12 = vadd.f32 %v7077_v28, %v10093_v11  ;;  %v7018_v5 = vpop.f32.mrf.mxu0  ;;  %v11883_v28 = vld [vmem:[#allocation26_spill] sm:$0xff] }
 0x21c   : > { %v7079_v37 = vpop.f32.mrf.mxu1  ;;  %v7019_v8 = vadd.f32 %v7018_v5, %v7017_v0  ;;  %3757 = vmatmul.mubr.bf16.gmra.mxu0 %v851_v40  ;;  %v834_v5 = vld [vmem:[#allocation2 + $0x12a] sm:$0xff] }
 0x21d   : > { %v7080_v4 = vadd.f32 %v7079_v37, %v7078_v47  ;;  %v7020_v31 = vpop.f32.mrf.mxu0  ;;  %3764 = vmatprep.mubr.bf16.mxu0 %v10321_v52 }
 0x21e   : > { %v7081_v60 = vpop.f32.mrf.mxu1  ;;  %v10327_v27 = vadd.f32 %v7019_v8, %v10150_v48  ;;  %v852_v48 = vpack.c.bf16 %v832_v20, %v831_v24 }
 0x21f   : > { %v10324_v13 = vadd.f32 %v7080_v4, %v10116_v14  ;;  %v7021_v35 = vpop.f32.mrf.mxu0  ;;  %v11884_v14 = vld [vmem:[#allocation25_spill] sm:$0xff] }
 0x220   : > { %v7082_v11 = vpop.f32.mrf.mxu1  ;;  %v7022_v57 = vadd.f32 %v7021_v35, %v7020_v31  ;;  %v11885_v38 = vpack.c.bf16 %v11883_v28, %v11884_v14  ;;  %v883_v31 = vld [vmem:[#allocation2 + $0x150] sm:$0xff]  ;;  %v11886_v35 = vld [vmem:[#allocation28_spill] sm:$0xff] }
 0x221   : > { %v7083_v29 = vadd.f32 %v7082_v11, %v7081_v60  ;;  %v7023_v58 = vpop.f32.mrf.mxu0  ;;  %v884_v11 = vld [vmem:[#allocation2 + $0x158] sm:$0xff] }
 0x222   : > { %v7084_v19 = vpop.f32.mrf.mxu1  ;;  %3596 = vmatmul.mubr.bf16.gmra.mxu1 %v10283_v45  ;;  %v10338_v43 = vadd.f32 %v7022_v57, %v10173_v62  ;;  %v833_v62 = vld [vmem:[#allocation2 + $0x122] sm:$0xff] }
 0x223   : > { %3603 = vmatprep.mubr.bf16.mxu1 %v11885_v38  ;;  %v10335_v3 = vadd.f32 %v7083_v29, %v10136_v34  ;;  %v7024_v36 = vpop.f32.mrf.mxu0 }
 0x224   : > { %v7085_v47 = vpop.f32.mrf.mxu1  ;;  %v7025_v45 = vadd.f32 %v7024_v36, %v7023_v58  ;;  %3765 = vmatmul.mubr.bf16.gmra.mxu0 %v852_v48  ;;  %v10359_v58 = vpack.c.bf16 %v884_v11, %v883_v31  ;;  %v836_v36 = vld [vmem:[#allocation2 + $0x142] sm:$0xff] }
 0x225   : > { %v7086_v0 = vadd.f32 %v7085_v47, %v7084_v19  ;;  %v7026_v40 = vpop.f32.mrf.mxu0  ;;  %3772 = vmatprep.mubr.bf16.mxu0 %v10340_v46 }
 0x226   : > { %v7087_v41 = vpop.f32.mrf.mxu1  ;;  %v10346_v4 = vadd.f32 %v7025_v45, %v10190_v56  ;;  %v853_v56 = vpack.c.bf16 %v834_v5, %v833_v62 }
 0x227   : > { %v10343_v37 = vadd.f32 %v7086_v0, %v10159_v33  ;;  %v7027_v8 = vpop.f32.mrf.mxu0  ;;  %v11887_v33 = vld [vmem:[#allocation27_spill] sm:$0xff] }
 0x228   : > { %v7088_v34 = vpop.f32.mrf.mxu1  ;;  %v7028_v20 = vadd.f32 %v7027_v8, %v7026_v40  ;;  %v11888_v26 = vpack.c.bf16 %v11886_v35, %v11887_v33  ;;  %v885_v40 = vld [vmem:[#allocation2 + $0x168] sm:$0xff]  ;;  %v11889_v8 = vld [vmem:[#allocation30_spill] sm:$0xff] }
 0x229   : > { %v7089_v60 = vadd.f32 %v7088_v34, %v7087_v41  ;;  %v7029_v29 = vpop.f32.mrf.mxu0  ;;  %v886_v34 = vld [vmem:[#allocation2 + $0x170] sm:$0xff] }
 0x22a   : > { %v7090_v24 = vpop.f32.mrf.mxu1  ;;  %3604 = vmatmul.mubr.bf16.gmra.mxu1 %v10302_v6  ;;  %v10357_v19 = vadd.f32 %v7028_v20, %v10209_v21  ;;  %v835_v21 = vld [vmem:[#allocation2 + $0x13a] sm:$0xff] }
 0x22b   : > { %3611 = vmatprep.mubr.bf16.mxu1 %v11888_v26  ;;  %v10354_v17 = vadd.f32 %v7089_v60, %v10179_v10  ;;  %v7030_v14 = vpop.f32.mrf.mxu0 }
 0x22c   : > { %v7091_v57 = vpop.f32.mrf.mxu1  ;;  %v7031_v6 = vadd.f32 %v7030_v14, %v7029_v29  ;;  %3773 = vmatmul.mubr.bf16.gmra.mxu0 %v853_v56  ;;  %v10378_v29 = vpack.c.bf16 %v886_v34, %v885_v40  ;;  %v838_v14 = vld [vmem:[#allocation2 + $0x15a] sm:$0xff] }
 0x22d   : > { %v7092_v28 = vadd.f32 %v7091_v57, %v7090_v24  ;;  %v7032_v48 = vpop.f32.mrf.mxu0  ;;  %3780 = vmatprep.mubr.bf16.mxu0 %v10359_v58 }
 0x22e   : > { %v7093_v38 = vpop.f32.mrf.mxu1  ;;  %v10365_v0 = vadd.f32 %v7031_v6, %v10218_v15  ;;  %v854_v15 = vpack.c.bf16 %v836_v36, %v835_v21 }
 0x22f   : > { %v10362_v47 = vadd.f32 %v7092_v28, %v10199_v23  ;;  %v7033_v45 = vpop.f32.mrf.mxu0  ;;  %v11890_v23 = vld [vmem:[#allocation29_spill] sm:$0xff] }
 0x230   : > { %v7094_v10 = vpop.f32.mrf.mxu1  ;;  %v7034_v5 = vadd.f32 %v7033_v45, %v7032_v48  ;;  %v11891_v31 = vpack.c.bf16 %v11889_v8, %v11890_v23  ;;  %v887_v48 = vld [vmem:[#allocation2 + $0x180] sm:$0xff] }
 0x231   : > { %v7095_v41 = vadd.f32 %v7094_v10, %v7093_v38  ;;  %v7035_v60 = vpop.f32.mrf.mxu0  ;;  %v888_v10 = vld [vmem:[#allocation2 + $0x188] sm:$0xff]  ;;  %v11892_v45 = vld [vmem:[#allocation32_spill] sm:$0xff] }
 0x232   : > { %v7096_v62 = vpop.f32.mrf.mxu1  ;;  %3612 = vmatmul.mubr.bf16.gmra.mxu1 %v10321_v52  ;;  %v10376_v24 = vadd.f32 %v7034_v5, %v10229_v53  ;;  %v837_v53 = vld [vmem:[#allocation2 + $0x152] sm:$0xff] }
 0x233   : > { %3619 = vmatprep.mubr.bf16.mxu1 %v11891_v31  ;;  %v10373_v11 = vadd.f32 %v7095_v41, %v10212_v9  ;;  %v7036_v33 = vpop.f32.mrf.mxu0 }
 0x234   : > { %v7097_v20 = vpop.f32.mrf.mxu1  ;;  %v7037_v52 = vadd.f32 %v7036_v33, %v7035_v60  ;;  %3781 = vmatmul.mubr.bf16.gmra.mxu0 %v854_v15  ;;  %v904_v60 = vpack.c.bf16 %v888_v10, %v887_v48  ;;  %v11896_v48 = vld [vmem:[#allocation33_spill] sm:$0xff] }
 0x235   : > { %v7098_v35 = vadd.f32 %v7097_v20, %v7096_v62  ;;  %v7038_v56 = vpop.f32.mrf.mxu0  ;;  %3788 = vmatprep.mubr.bf16.mxu0 %v10378_v29 }
 0x236   : > { %v7099_v26 = vpop.f32.mrf.mxu1  ;;  %v10384_v28 = vadd.f32 %v7037_v52, %v10237_v16  ;;  %v855_v16 = vpack.c.bf16 %v838_v14, %v837_v53 }
 0x237   : > { %v10381_v57 = vadd.f32 %v7098_v35, %v10224_v55  ;;  %v7039_v6 = vpop.f32.mrf.mxu0  ;;  %v11893_v55 = vld [vmem:[#allocation31_spill] sm:$0xff] }
 0x238   : > { %v7100_v9 = vpop.f32.mrf.mxu1  ;;  %v7040_v36 = vadd.f32 %v7039_v6, %v7038_v56  ;;  %v11894_v40 = vpack.c.bf16 %v11892_v45, %v11893_v55  ;;  %v1050_v56 = vld [vmem:[#allocation2 + $0x31] sm:$0xff]  ;;  %v954_v45 = vld [vmem:[#allocation2 + $0x22] sm:$0xff] }
 0x239   : > { %v7101_v38 = vadd.f32 %v7100_v9, %v7099_v26  ;;  %v7041_v41 = vpop.f32.mrf.mxu0  ;;  %v840_v26 = vld [vmem:[#allocation2 + $0x172] sm:$0xff] }
 0x23a   : > { %v7102_v21 = vpop.f32.mrf.mxu1  ;;  %3620 = vmatmul.mubr.bf16.gmra.mxu1 %v10340_v46  ;;  %v10395_v62 = vadd.f32 %v7040_v36, %v10248_v59  ;;  %v1051_v9 = vld [vmem:[#allocation2 + $0x39] sm:$0xff]  ;;  %v11895_v6 = vld [vmem:[#allocation34_spill] sm:$0xff] }
 0x23b   : > { %3627 = vmatprep.mubr.bf16.mxu1 %v11894_v40  ;;  %v10392_v34 = vadd.f32 %v7101_v38, %v10232_v49  ;;  %v7042_v23 = vpop.f32.mrf.mxu0  ;;  %v839_v49 = vld [vmem:[#allocation2 + $0x16a] sm:$0xff]  ;;  %v10413_v55 = vpack.c.bf16 %v1051_v9, %v1050_v56  ;;  %v906_v9 = vld [vmem:[#allocation2 + $0x21] sm:$0xff] }
 0x23c   : > { %v7103_v5 = vpop.f32.mrf.mxu1  ;;  %v7043_v15 = vadd.f32 %v7042_v23, %v7041_v41  ;;  %3789 = vmatmul.mubr.bf16.gmra.mxu0 %v855_v16  ;;  %v856_v10 = vpack.c.bf16 %v840_v26, %v839_v49  ;;  %v953_v41 = vld [vmem:[#allocation2 + $0x1a] sm:$0xff]  ;;  %v1052_v49 = vld [vmem:[#allocation2 + $0x49] sm:$0xff]  ;;  %v1053_v26 = vld [vmem:[#allocation2 + $0x51] sm:$0xff] }
 0x23d   : > { %v7104_v8 = vadd.f32 %v7103_v5, %v7102_v21  ;;  %v7044_v46 = vpop.f32.mrf.mxu0  ;;  %3796 = vmatprep.mubr.bf16.mxu0 %v904_v60 }
 0x23e   : > { %v7105_v31 = vpop.f32.mrf.mxu1  ;;  %v10401_v35 = vadd.f32 %v7043_v15, %v10256_v18  ;;  %v1003_v15 = vld [vmem:[#allocation2 + $0x38] sm:$0xff] }
 0x23f   : > { %v10398_v20 = vadd.f32 %v7104_v8, %v10243_v51  ;;  %v7045_v52 = vpop.f32.mrf.mxu0  ;;  %v11897_v51 = vpack.c.bf16 %v11895_v6, %v11896_v48  ;;  %v985_v8 = vpack.c.bf16 %v954_v45, %v953_v41  ;;  %v955_v6 = vld [vmem:[#allocation2 + $0x32] sm:$0xff]  ;;  %v956_v48 = vld [vmem:[#allocation2 + $0x3a] sm:$0xff] }
 0x240   : > { %v7106_v33 = vpop.f32.mrf.mxu1  ;;  %v7046_v14 = vadd.f32 %v7045_v52, %v7044_v46 }
 0x241   : > { %v7107_v59 = vadd.f32 %v7106_v33, %v7105_v31  ;;  %v7047_v38 = vpop.f32.mrf.mxu0  ;;  %v1002_v31 = vld [vmem:[#allocation2 + $0x30] sm:$0xff] }
 0x242   : > { %v7108_v53 = vpop.f32.mrf.mxu1  ;;  %3628 = vmatmul.mubr.bf16.gmra.mxu1 %v10359_v58  ;;  %v10411_v21 = vadd.f32 %v7046_v14, %v10267_v2 }
 0x243   : > { %3635 = vmatprep.mubr.bf16.mxu1 %v11897_v51  ;;  %v10408_v18 = vadd.f32 %v7107_v59, %v10251_v7  ;;  %v7048_v58 = vpop.f32.mrf.mxu0  ;;  %v10429_v51 = vpack.c.bf16 %v1053_v26, %v1052_v49 }
 0x244   : > { %v7109_v36 = vpop.f32.mrf.mxu1  ;;  %v7049_v5 = vadd.f32 %v7048_v58, %v7047_v38  ;;  %3797 = vmatmul.mubr.bf16.gmra.mxu0 %v856_v10  ;;  %v986_v58 = vpack.c.bf16 %v956_v48, %v955_v6 }
 0x245   : > { %v7110_v40 = vadd.f32 %v7109_v36, %v7108_v53  ;;  %v7050_v60 = vpop.f32.mrf.mxu0  ;;  %3998 = vmatprep.mubr.bf16.mxu0 %v10413_v55  ;;  %v1034_v53 = vpack.c.bf16 %v1003_v15, %v1002_v31 }
 0x246   : > { %v7111_v16 = vpop.f32.mrf.mxu1  ;;  %v10419_v7 = vadd.f32 %v7049_v5, %v10275_v30 }
 0x247   : > { %v10416_v23 = vadd.f32 %v7110_v40, %v10262_v63  ;;  %v7051_v33 = vpop.f32.mrf.mxu0  ;;  %v905_v63 = vld [vmem:[#allocation2 + $0x19] sm:$0xff] }
 0x248   : > { %v7112_v2 = vpop.f32.mrf.mxu1  ;;  %v7052_v52 = vadd.f32 %v7051_v33, %v7050_v60  ;;  %v937_v45 = vpack.c.bf16 %v906_v9, %v905_v63  ;;  %v1004_v60 = vld [vmem:[#allocation2 + $0x48] sm:$0xff]  ;;  %v958_v63 = vld [vmem:[#allocation2 + $0x52] sm:$0xff] }
 0x249   : > { %v7113_v46 = vadd.f32 %v7112_v2, %v7111_v16  ;;  %v7053_v56 = vpop.f32.mrf.mxu0  ;;  %v8497_v2 = vld [vmem:[%s11804_s2 + $0x230] sm:$0xff]  }
 0x24a   : > { %v7114_v59 = vpop.f32.mrf.mxu1  ;;  %3636 = vmatmul.mubr.bf16.gmra.mxu1 %v10378_v29  ;;  %v10427_v14 = vadd.f32 %v7052_v52, %v10286_v25 }
 0x24b   : > { %3837 = vmatprep.mubr.bf16.mxu1 %v985_v8  ;;  %v10424_v30 = vadd.f32 %v7113_v46, %v10270_v22  ;;  %v7054_v36 = vpop.f32.mrf.mxu0  ;;  %v1005_v8 = vld [vmem:[#allocation2 + $0x50] sm:$0xff]  ;;  %v1054_v46 = vld [vmem:[#allocation2 + $0x61] sm:$0xff] }
 0x24c   : > { %v7115_v38 = vpop.f32.mrf.mxu1  ;;  %v7055_v41 = vadd.f32 %v7054_v36, %v7053_v56  ;;  %3999 = vmatmul.mubr.bf16.vlgmr.msra.gmra.mxu0 %v1034_v53  ;;  %v1035_v49 = vpack.c.bf16 %v1005_v8, %v1004_v60  ;;  %v957_v56 = vld [vmem:[#allocation2 + $0x4a] sm:$0xff] }
 0x24d   : > { %v7116_v10 = vadd.f32 %v7115_v38, %v7114_v59  ;;  %v8154_v40 = vpop.f32.mrf.mxu0  ;;  %4006 = vmatprep.mubr.bf16.mxu0 %v10429_v51  ;;  %v10462_v48 = vpack.c.bf16 %v958_v63, %v957_v56 }
 0x24e   : > { %v7117_v29 = vpop.f32.mrf.mxu1  ;;  %v10435_v22 = vadd.f32 %v7055_v41, %v10294_v44  ;;  %v10438_v5 = vadd.f32 %v8154_v40, %v10324_v13  ;;  %v1007_v41 = vld [vmem:[#allocation2 + $0x68] sm:$0xff] }
 0x24f   : > { %v10432_v16 = vadd.f32 %v7116_v10, %v10281_v39  ;;  %v2924_v15 = vpop.f32.mrf.mxu0  ;;  %v1055_v39 = vld [vmem:[#allocation2 + $0x69] sm:$0xff] }
 0x250   : > { %v7118_v25 = vpop.f32.mrf.mxu1  ;;  %v10445_v44 = vadd.f32 %v2924_v15, %v10305_v1  ;;  %v10454_v9 = vpack.c.bf16 %v1055_v39, %v1054_v46  ;;  %v8498_v1 = vld [vmem:[%s11804_s2 + $0x228] sm:$0xff]  }
 0x251   : > { %v7119_v31 = vadd.f32 %v7118_v25, %v7117_v29  ;;  %v8155_v13 = vpop.f32.mrf.mxu0  ;;  %v1006_v29 = vld [vmem:[#allocation2 + $0x60] sm:$0xff]  ;;  %v960_v39 = vld [vmem:[#allocation2 + $0x6a] sm:$0xff] }
 0x252   : > { %v7120_v33 = vpop.f32.mrf.mxu1  ;;  %3838 = vmatmul.mubr.bf16.vlgmr.msra.gmra.mxu1 %v937_v45  ;;  %v10452_v52 = vadd.f32 %v8155_v13, %v10335_v3  ;;  %v1057_v25 = vld [vmem:[#allocation2 + $0x81] sm:$0xff]  ;;  %v1036_v8 = vpack.c.bf16 %v1007_v41, %v1006_v29  ;;  %v1059_v29 = vld [vmem:[#allocation2 + $0x99] sm:$0xff] }
 0x253   : > { %8185 = vmatpush3.bf16.msra.mxu1 %v10206_v42  ;;  %3845 = vmatprep.mubr.bf16.mxu1 %v986_v58  ;;  %v10449_v26 = vadd.f32 %v7119_v31, %v10289_v54  ;;  %v2927_v53 = vpop.f32.mrf.mxu0  ;;  %v1056_v58 = vld [vmem:[#allocation2 + $0x79] sm:$0xff]  ;;  %v959_v46 = vld [vmem:[#allocation2 + $0x62] sm:$0xff] }
 0x254   : > { %v7121_v59 = vpop.f32.mrf.mxu1  ;;  %8186 = vmatprep.subr.bf16.mxu1 %v8497_v2  ;;  %v10460_v6 = vadd.f32 %v2927_v53, %v10316_v12  ;;  %4007 = vmatmul.mubr.bf16.gmra.mxu0 %v1035_v49  ;;  %v8499_v12 = vld [vmem:[%s11804_s2 + $0x220] sm:$0xff]   ;;  %v10493_v56 = vpack.c.bf16 %v960_v39, %v959_v46 }
 0x255   : > { %v7122_v42 = vadd.f32 %v7121_v59, %v7120_v33  ;;  %v8158_v54 = vpop.f32.mrf.mxu0  ;;  %4014 = vmatprep.mubr.bf16.mxu0 %v10454_v9  ;;  %v10485_v33 = vpack.c.bf16 %v1057_v25, %v1056_v58  ;;  %v1009_v53 = vld [vmem:[#allocation2 + $0x80] sm:$0xff] }
 0x256   : > { %v7123_v38 = vpop.f32.mrf.mxu1  ;;  %v10468_v36 = vadd.f32 %v8158_v54, %v10362_v47  ;;  %v961_v25 = vld [vmem:[#allocation2 + $0x7a] sm:$0xff] }
 0x257   : > { %8187 = vmatpush3.bf16.msra.mxu1 %v8497_v2  ;;  %v10465_v3 = vadd.f32 %v7122_v42, %v10300_v32  ;;  %v2940_v40 = vpop.f32.mrf.mxu0  ;;  %v1008_v42 = vld [vmem:[#allocation2 + $0x78] sm:$0xff] }
 0x258   : > { %v7124_v10 = vpop.f32.mrf.mxu1  ;;  %8188 = vmatprep.subr.bf16.mxu1 %v8498_v1  ;;  %v10476_v32 = vadd.f32 %v2940_v40, %v10343_v37  ;;  %v8500_v37 = vld [vmem:[%s11804_s2 + $0x218] sm:$0xff]  }
 0x259   : > { %v7125_v45 = vadd.f32 %v7124_v10, %v7123_v38  ;;  %v8159_v47 = vpop.f32.mrf.mxu0  ;;  %v1058_v10 = vld [vmem:[#allocation2 + $0x91] sm:$0xff] }
 0x25a   : > { %v7126_v60 = vpop.f32.mrf.mxu1  ;;  %3846 = vmatmul.mubr.bf16.gmra.mxu1 %v10413_v55  ;;  %v10483_v15 = vadd.f32 %v8159_v47, %v10373_v11  ;;  %v10516_v47 = vpack.c.bf16 %v1059_v29, %v1058_v10 }
 0x25b   : > { %3853 = vmatprep.mubr.bf16.mxu1 %v10462_v48  ;;  %8189 = vmatpush3.bf16.msra.mxu1 %v8498_v1  ;;  %v10480_v2 = vadd.f32 %v7125_v45, %v10308_v61  ;;  %v2943_v13 = vpop.f32.mrf.mxu0 }
 0x25c   : > { %v7127_v31 = vpop.f32.mrf.mxu1  ;;  %8190 = vmatprep.subr.bf16.mxu1 %v8499_v12  ;;  %v10491_v59 = vadd.f32 %v2943_v13, %v10354_v17  ;;  %4015 = vmatmul.mubr.bf16.gmra.mxu0 %v1036_v8  ;;  %v8501_v17 = vld [vmem:[%s11804_s2 + $0x210] sm:$0xff]  }
 0x25d   : > { %v7128_v55 = vadd.f32 %v7127_v31, %v7126_v60  ;;  %v8162_v61 = vpop.f32.mrf.mxu0  ;;  %4022 = vmatprep.mubr.bf16.mxu0 %v10485_v33  ;;  %v962_v60 = vld [vmem:[#allocation2 + $0x82] sm:$0xff]  ;;  %v1010_v13 = vld [vmem:[#allocation2 + $0x90] sm:$0xff] }
 0x25e   : > { %v7129_v49 = vpop.f32.mrf.mxu1  ;;  %v10499_v1 = vadd.f32 %v8162_v61, %v10398_v20  ;;  %v10524_v39 = vpack.c.bf16 %v962_v60, %v961_v25 }
 0x25f   : > { %v10496_v11 = vadd.f32 %v7128_v55, %v10319_v50  ;;  %8191 = vmatpush3.bf16.msra.mxu1 %v8499_v12  ;;  %v2956_v54 = vpop.f32.mrf.mxu0  ;;  %v1037_v12 = vpack.c.bf16 %v1009_v53, %v1008_v42  ;;  %v1060_v42 = vld [vmem:[#allocation2 + $0xa9] sm:$0xff]  ;;  %v1061_v53 = vld [vmem:[#allocation2 + $0xb1] sm:$0xff] }
 0x260   : > { %v7130_v63 = vpop.f32.mrf.mxu1  ;;  %8192 = vmatprep.subr.bf16.mxu1 %v8500_v37  ;;  %v10507_v41 = vadd.f32 %v2956_v54, %v10381_v57  ;;  %v8502_v57 = vld [vmem:[%s11804_s2 + $0x208] sm:$0xff]  }
 0x261   : > { %v7131_v38 = vadd.f32 %v7130_v63, %v7129_v49  ;;  %v8163_v20 = vpop.f32.mrf.mxu0  ;;  %v1011_v49 = vld [vmem:[#allocation2 + $0x98] sm:$0xff] }
 0x262   : > { %v7132_v50 = vpop.f32.mrf.mxu1  ;;  %3854 = vmatmul.mubr.bf16.gmra.mxu1 %v10429_v51  ;;  %v10514_v58 = vadd.f32 %v8163_v20, %v10408_v18  ;;  %v964_v20 = vld [vmem:[#allocation2 + $0x9a] sm:$0xff] }
 0x263   : > { %3861 = vmatprep.mubr.bf16.mxu1 %v10493_v56  ;;  %v10511_v45 = vadd.f32 %v7131_v38, %v10327_v27  ;;  %8193 = vmatpush3.bf16.msra.mxu1 %v8500_v37  ;;  %v2959_v8 = vpop.f32.mrf.mxu0  ;;  %v1038_v38 = vpack.c.bf16 %v1011_v49, %v1010_v13  ;;  %v1062_v13 = vld [vmem:[#allocation2 + $0xc1] sm:$0xff] }
 0x264   : > { %v7133_v40 = vpop.f32.mrf.mxu1  ;;  %8194 = vmatprep.subr.bf16.mxu1 %v8501_v17  ;;  %v10522_v27 = vadd.f32 %v2959_v8, %v10392_v34  ;;  %4023 = vmatmul.mubr.bf16.gmra.mxu0 %v1037_v12  ;;  %v8503_v34 = vld [vmem:[%s11804_s2 + $0x200] sm:$0xff]   ;;  %v10547_v12 = vpack.c.bf16 %v1061_v53, %v1060_v42  ;;  %v1012_v8 = vld [vmem:[#allocation2 + $0xa8] sm:$0xff] }
 0x265   : > { %v7134_v51 = vadd.f32 %v7133_v40, %v7132_v50  ;;  %v8166_v46 = vpop.f32.mrf.mxu0  ;;  %4030 = vmatprep.mubr.bf16.mxu0 %v10516_v47  ;;  %v963_v50 = vld [vmem:[#allocation2 + $0x92] sm:$0xff]  ;;  %v965_v53 = vld [vmem:[#allocation2 + $0xaa] sm:$0xff] }
 0x266   : > { %v7135_v31 = vpop.f32.mrf.mxu1  ;;  %v10530_v55 = vadd.f32 %v8166_v46, %v10432_v16 }
 0x267   : > { %v10527_v18 = vadd.f32 %v7134_v51, %v10338_v43  ;;  %8195 = vmatpush3.bf16.msra.mxu1 %v8501_v17  ;;  %v2972_v63 = vpop.f32.mrf.mxu0 }
 0x268   : > { %v7136_v37 = vpop.f32.mrf.mxu1  ;;  %8196 = vmatprep.subr.bf16.mxu1 %v8502_v57  ;;  %v10538_v17 = vadd.f32 %v2972_v63, %v10416_v23 }
 0x269   : > { %v7137_v61 = vadd.f32 %v7136_v37, %v7135_v31  ;;  %v8167_v16 = vpop.f32.mrf.mxu0  ;;  %v1013_v31 = vld [vmem:[#allocation2 + $0xb0] sm:$0xff] }
 0x26a   : > { %v7138_v43 = vpop.f32.mrf.mxu1  ;;  %3862 = vmatmul.mubr.bf16.gmra.mxu1 %v10454_v9  ;;  %v10545_v29 = vadd.f32 %v8167_v16, %v10449_v26 }
 0x26b   : > { %3869 = vmatprep.mubr.bf16.mxu1 %v10524_v39  ;;  %v10542_v54 = vadd.f32 %v7137_v61, %v10346_v4  ;;  %8197 = vmatpush3.bf16.msra.mxu1 %v8502_v57  ;;  %v2975_v23 = vpop.f32.mrf.mxu0  ;;  %v10552_v4 = vpack.c.bf16 %v964_v20, %v963_v50 }
 0x26c   : > { %v7139_v10 = vpop.f32.mrf.mxu1  ;;  %8198 = vmatprep.subr.bf16.mxu1 %v8503_v34  ;;  %v10550_v25 = vadd.f32 %v2975_v23, %v10424_v30  ;;  %4031 = vmatmul.mubr.bf16.gmra.mxu0 %v1038_v38  ;;  %v1063_v30 = vld [vmem:[#allocation2 + $0xc9] sm:$0xff] }
 0x26d   : > { %v7140_v9 = vadd.f32 %v7139_v10, %v7138_v43  ;;  %v8170_v60 = vpop.f32.mrf.mxu0  ;;  %4038 = vmatprep.mubr.bf16.mxu0 %v10547_v12  ;;  %v966_v43 = vld [vmem:[#allocation2 + $0xb2] sm:$0xff]  ;;  %v10568_v16 = vpack.c.bf16 %v1063_v30, %v1062_v13 }
 0x26e   : > { %v7141_v40 = vpop.f32.mrf.mxu1  ;;  %v10556_v51 = vadd.f32 %v8170_v60, %v10496_v11  ;;  %v10573_v20 = vpack.c.bf16 %v966_v43, %v965_v53 }
 0x26f   : > { %v2852_v57 = vadd.f32 %v7140_v9, %v10357_v19  ;;  %8199 = vmatpush3.bf16.msra.mxu1 %v8503_v34  ;;  %v2988_v37 = vpop.f32.mrf.mxu0  ;;  %v1039_v34 = vpack.c.bf16 %v1013_v31, %v1012_v8  ;;  %v1064_v8 = vld [vmem:[#allocation2 + $0xd9] sm:$0xff]  ;;  %v1065_v31 = vld [vmem:[#allocation2 + $0xe1] sm:$0xff] }
 0x270   : > { %v7142_v26 = vpop.f32.mrf.mxu1  ;;  %v10561_v61 = vadd.f32 %v2988_v37, %v10465_v3 }
 0x271   : > { %v7143_v46 = vadd.f32 %v7142_v26, %v7141_v40  ;;  %v8171_v19 = vpop.f32.mrf.mxu0  ;;  %v1015_v40 = vld [vmem:[#allocation2 + $0xc8] sm:$0xff] }
 0x272   : > { %v7144_v49 = vpop.f32.mrf.mxu1  ;;  %3870 = vmatmul.mubr.bf16.gmra.mxu1 %v10485_v33  ;;  %v10566_v42 = vadd.f32 %v8171_v19, %v10511_v45  ;;  %v1014_v45 = vld [vmem:[#allocation2 + $0xc0] sm:$0xff]  ;;  %v968_v19 = vld [vmem:[#allocation2 + $0xca] sm:$0xff] }
 0x273   : > { %3877 = vmatprep.mubr.bf16.mxu1 %v10552_v4  ;;  %v2855_v11 = vadd.f32 %v7143_v46, %v10365_v0  ;;  %v2991_v10 = vpop.f32.mrf.mxu0 }
 0x274   : > { %v7145_v63 = vpop.f32.mrf.mxu1  ;;  %v10571_v3 = vadd.f32 %v2991_v10, %v10480_v2  ;;  %4039 = vmatmul.mubr.bf16.gmra.mxu0 %v1039_v34  ;;  %v10587_v34 = vpack.c.bf16 %v1065_v31, %v1064_v8 }
 0x275   : > { %v7146_v38 = vadd.f32 %v7145_v63, %v7144_v49  ;;  %v8174_v50 = vpop.f32.mrf.mxu0  ;;  %4046 = vmatprep.mubr.bf16.mxu0 %v10568_v16  ;;  %v967_v49 = vld [vmem:[#allocation2 + $0xc2] sm:$0xff] }
 0x276   : > { %v7147_v33 = vpop.f32.mrf.mxu1  ;;  %v10576_v23 = vadd.f32 %v8174_v50, %v2852_v57  ;;  %v10593_v10 = vpack.c.bf16 %v968_v19, %v967_v49 }
 0x277   : > { %v2860_v0 = vadd.f32 %v7146_v38, %v10376_v24  ;;  %v3004_v26 = vpop.f32.mrf.mxu0  ;;  %v1040_v24 = vpack.c.bf16 %v1015_v40, %v1014_v45  ;;  %v1066_v40 = vld [vmem:[#allocation2 + $0xf1] sm:$0xff] }
 0x278   : > { %v7148_v9 = vpop.f32.mrf.mxu1  ;;  %v10581_v2 = vadd.f32 %v3004_v26, %v10527_v18 }
 0x279   : > { %v7149_v60 = vadd.f32 %v7148_v9, %v7147_v33  ;;  %v8175_v37 = vpop.f32.mrf.mxu0  ;;  %v1017_v33 = vld [vmem:[#allocation2 + $0xe0] sm:$0xff] }
 0x27a   : > { %v7150_v46 = vpop.f32.mrf.mxu1  ;;  %3878 = vmatmul.mubr.bf16.gmra.mxu1 %v10516_v47  ;;  %v10585_v30 = vadd.f32 %v8175_v37, %v2855_v11  ;;  %v1016_v11 = vld [vmem:[#allocation2 + $0xd8] sm:$0xff] }
 0x27b   : > { %3885 = vmatprep.mubr.bf16.mxu1 %v10573_v20  ;;  %v2863_v57 = vadd.f32 %v7149_v60, %v10384_v28  ;;  %v3007_v53 = vpop.f32.mrf.mxu0  ;;  %v1067_v60 = vld [vmem:[#allocation2 + $0xf9] sm:$0xff]  ;;  %v1041_v31 = vpack.c.bf16 %v1017_v33, %v1016_v11 }
 0x27c   : > { %v7151_v13 = vpop.f32.mrf.mxu1  ;;  %v10590_v47 = vadd.f32 %v3007_v53, %v10542_v54  ;;  %4047 = vmatmul.mubr.bf16.gmra.mxu0 %v1040_v24  ;;  %v969_v37 = vld [vmem:[#allocation2 + $0xda] sm:$0xff]  ;;  %v970_v24 = vld [vmem:[#allocation2 + $0xe2] sm:$0xff] }
 0x27d   : > { %v7152_v63 = vadd.f32 %v7151_v13, %v7150_v46  ;;  %v8178_v38 = vpop.f32.mrf.mxu0  ;;  %4054 = vmatprep.mubr.bf16.mxu0 %v10587_v34  ;;  %v10603_v13 = vpack.c.bf16 %v1067_v60, %v1066_v40 }
 0x27e   : > { %v7153_v43 = vpop.f32.mrf.mxu1 }
 0x27f   : > { %v2868_v18 = vadd.f32 %v7152_v63, %v10395_v62  ;;  %v3020_v45 = vpop.f32.mrf.mxu0 }
 0x280   : > { %v7154_v28 = vpop.f32.mrf.mxu1  ;;  %v10599_v54 = vadd.f32 %v3020_v45, %v2860_v0  ;;  %v1069_v45 = vld [vmem:[#allocation2 + $0x111] sm:$0xff] }
 0x281   : > { %v7155_v50 = vadd.f32 %v7154_v28, %v7153_v43  ;;  %v10596_v9 = vadd.f32 %v8178_v38, %v2868_v18  ;;  %v8179_v8 = vpop.f32.mrf.mxu0  ;;  %v1018_v38 = vld [vmem:[#allocation2 + $0xf0] sm:$0xff]  ;;  %v1019_v28 = vld [vmem:[#allocation2 + $0xf8] sm:$0xff] }
 0x282   : > { %v7156_v26 = vpop.f32.mrf.mxu1  ;;  %3886 = vmatmul.mubr.bf16.gmra.mxu1 %v10547_v12 }
 0x283   : > { %v2871_v62 = vadd.f32 %v7155_v50, %v10401_v35  ;;  %3893 = vmatprep.mubr.bf16.mxu1 %v10593_v10  ;;  %v3023_v63 = vpop.f32.mrf.mxu0  ;;  %v10610_v35 = vpack.c.bf16 %v970_v24, %v969_v37  ;;  %v1068_v50 = vld [vmem:[#allocation2 + $0x109] sm:$0xff] }
 0x284   : > { %v7157_v46 = vpop.f32.mrf.mxu1  ;;  %v10607_v43 = vadd.f32 %v3023_v63, %v2863_v57  ;;  %4055 = vmatmul.mubr.bf16.gmra.mxu0 %v1041_v31  ;;  %v972_v31 = vld [vmem:[#allocation2 + $0xfa] sm:$0xff] }
 0x285   : > { %v7158_v49 = vadd.f32 %v7157_v46, %v7156_v26  ;;  %v10605_v19 = vadd.f32 %v8179_v8, %v2871_v62  ;;  %v8182_v12 = vpop.f32.mrf.mxu0  ;;  %4062 = vmatprep.mubr.bf16.mxu0 %v10603_v13  ;;  %v1042_v26 = vpack.c.bf16 %v1019_v28, %v1018_v38  ;;  %v971_v8 = vld [vmem:[#allocation2 + $0xf2] sm:$0xff]  ;;  %v10618_v46 = vpack.c.bf16 %v1069_v45, %v1068_v50  ;;  %v1071_v50 = vld [vmem:[#allocation2 + $0x129] sm:$0xff] }
 0x286   : > { %v7159_v53 = vpop.f32.mrf.mxu1  ;;  %v1021_v38 = vld [vmem:[#allocation2 + $0x110] sm:$0xff] }
 0x287   : > { %v2876_v0 = vadd.f32 %v7158_v49, %v10411_v21  ;;  %v3036_v33 = vpop.f32.mrf.mxu0 }
 0x288   : > { %v7160_v18 = vpop.f32.mrf.mxu1 }
 0x289   : > { %v7161_v11 = vadd.f32 %v7160_v18, %v7159_v53  ;;  %v10614_v57 = vadd.f32 %v3036_v33, %v2876_v0  ;;  %v8183_v60 = vpop.f32.mrf.mxu0  ;;  %v10623_v0 = vpack.c.bf16 %v972_v31, %v971_v8  ;;  %v1020_v18 = vld [vmem:[#allocation2 + $0x108] sm:$0xff] }
 0x28a   : > { %v7162_v40 = vpop.f32.mrf.mxu1  ;;  %3894 = vmatmul.mubr.bf16.gmra.mxu1 %v10568_v16  ;;  %v1070_v33 = vld [vmem:[#allocation2 + $0x121] sm:$0xff]  ;;  %v973_v31 = vld [vmem:[#allocation2 + $0x10a] sm:$0xff] }
 0x28b   : > { %v2879_v21 = vadd.f32 %v7161_v11, %v10419_v7  ;;  %3901 = vmatprep.mubr.bf16.mxu1 %v10610_v35  ;;  %v3039_v24 = vpop.f32.mrf.mxu0 }
 0x28c   : > { %v7163_v62 = vpop.f32.mrf.mxu1  ;;  %4063 = vmatmul.mubr.bf16.gmra.mxu0 %v1042_v26 }
 0x28d   : > { %v7164_v37 = vadd.f32 %v7163_v62, %v7162_v40  ;;  %v10620_v63 = vadd.f32 %v3039_v24, %v2879_v21  ;;  %v7320_v53 = vpop.f32.mrf.mxu0  ;;  %4070 = vmatprep.mubr.bf16.mxu0 %v10618_v46  ;;  %v1043_v62 = vpack.c.bf16 %v1021_v38, %v1020_v18  ;;  %v10631_v24 = vpack.c.bf16 %v1071_v50, %v1070_v33  ;;  %v1022_v18 = vld [vmem:[#allocation2 + $0x120] sm:$0xff]  ;;  %v1023_v38 = vld [vmem:[#allocation2 + $0x128] sm:$0xff] }
 0x28e   : > { %v7165_v49 = vpop.f32.mrf.mxu1 }
 0x28f   : > { %11898 = vst [vmem:[#allocation14_spill] sm:$0xff] %v10620_v63  ;;  %v2884_v16 = vadd.f32 %v7164_v37, %v10427_v14  ;;  %v7321_v11 = vpop.f32.mrf.mxu0  ;;  %v974_v37 = vld [vmem:[#allocation2 + $0x112] sm:$0xff] }
 0x290   : > { %v7166_v7 = vpop.f32.mrf.mxu1  ;;  %v7322_v21 = vadd.f32 %v7321_v11, %v7320_v53 }
 0x291   : > { %v7167_v28 = vadd.f32 %v7166_v7, %v7165_v49  ;;  %v10626_v45 = vadd.f32 %v8182_v12, %v2884_v16  ;;  %v7323_v26 = vpop.f32.mrf.mxu0 }
 0x292   : > { %v7208_v40 = vpop.f32.mrf.mxu1  ;;  %3902 = vmatmul.mubr.bf16.gmra.mxu1 %v10587_v34 }
 0x293   : > { %v2887_v14 = vadd.f32 %v7167_v28, %v10435_v22  ;;  %3909 = vmatprep.mubr.bf16.mxu1 %v10623_v0  ;;  %v7324_v7 = vpop.f32.mrf.mxu0  ;;  %v10636_v22 = vpack.c.bf16 %v974_v37, %v973_v31  ;;  %v975_v37 = vld [vmem:[#allocation2 + $0x122] sm:$0xff] }
 0x294   : > { %v7209_v8 = vpop.f32.mrf.mxu1  ;;  %v7325_v16 = vadd.f32 %v7324_v7, %v7323_v26  ;;  %4071 = vmatmul.mubr.bf16.gmra.mxu0 %v1043_v62 }
 0x295   : > { %v7210_v49 = vadd.f32 %v7209_v8, %v7208_v40  ;;  %v10633_v63 = vadd.f32 %v8183_v60, %v2887_v14  ;;  %v7326_v53 = vpop.f32.mrf.mxu0  ;;  %4078 = vmatprep.mubr.bf16.mxu0 %v10631_v24  ;;  %v1072_v40 = vld [vmem:[#allocation2 + $0x139] sm:$0xff]  ;;  %v1073_v60 = vld [vmem:[#allocation2 + $0x141] sm:$0xff]  ;;  %v1044_v8 = vpack.c.bf16 %v1023_v38, %v1022_v18 }
 0x296   : > { %v7211_v12 = vpop.f32.mrf.mxu1  ;;  %v10644_v7 = vpack.c.bf16 %v1073_v60, %v1072_v40  ;;  %v1024_v18 = vld [vmem:[#allocation2 + $0x138] sm:$0xff]  ;;  %v1025_v38 = vld [vmem:[#allocation2 + $0x140] sm:$0xff] }
 0x297   : > { %v3518_v34 = vadd.f32 %v7210_v49, %v10445_v44  ;;  %v7327_v50 = vpop.f32.mrf.mxu0  ;;  %v976_v49 = vld [vmem:[#allocation2 + $0x12a] sm:$0xff] }
 0x298   : > { %v7212_v28 = vpop.f32.mrf.mxu1  ;;  %v7328_v26 = vadd.f32 %v7327_v50, %v7326_v53  ;;  %v1074_v60 = vld [vmem:[#allocation2 + $0x151] sm:$0xff] }
 0x299   : > { %v10639_v11 = vadd.f32 %v7322_v21, %v3518_v34  ;;  %v7213_v33 = vadd.f32 %v7212_v28, %v7211_v12  ;;  %v7329_v62 = vpop.f32.mrf.mxu0 }
 0x29a   : > { %v7214_v14 = vpop.f32.mrf.mxu1  ;;  %3910 = vmatmul.mubr.bf16.gmra.mxu1 %v10603_v13 }
 0x29b   : > { %11899 = vst [vmem:[#allocation15_spill] sm:$0xff] %v10639_v11  ;;  %v3521_v44 = vadd.f32 %v7213_v33, %v10460_v6  ;;  %3917 = vmatprep.mubr.bf16.mxu1 %v10636_v22  ;;  %v7330_v34 = vpop.f32.mrf.mxu0  ;;  %v10649_v6 = vpack.c.bf16 %v976_v49, %v975_v37  ;;  %v8504_v37 = vld [vmem:[#allocation8 + $0x78] sm:$0xff]  }
 0x29c   : > { %v7215_v31 = vpop.f32.mrf.mxu1  ;;  %v7331_v11 = vadd.f32 %v7330_v34, %v7329_v62  ;;  %4079 = vmatmul.mubr.bf16.gmra.mxu0 %v1044_v8  ;;  %v8505_v49 = vld [vmem:[#allocation8 + $0x38] sm:$0xff]   ;;  %v977_v34 = vld [vmem:[#allocation2 + $0x13a] sm:$0xff]  ;;  %7664 = vmatprep.subr.bf16.mxu0 %v8504_v37  ;;  %v1077_v37 = vld [vmem:[#allocation2 + $0x171] sm:$0xff] }
 0x29d   : > { %v10646_v21 = vadd.f32 %v7325_v16, %v3521_v44  ;;  %v7216_v12 = vadd.f32 %v7215_v31, %v7214_v14  ;;  %v7332_v53 = vpop.f32.mrf.mxu0  ;;  %4086 = vmatprep.mubr.bf16.mxu0 %v10644_v7  ;;  %v1075_v14 = vld [vmem:[#allocation2 + $0x159] sm:$0xff]  ;;  %v1045_v31 = vpack.c.bf16 %v1025_v38, %v1024_v18  ;;  %7665 = vmatpush3.bf16.msra.mxu0 %v8505_v49 }
 0x29e   : > { %v7217_v28 = vpop.f32.mrf.mxu1 }
 0x29f   : > { %v3526_v13 = vadd.f32 %v7216_v12, %v10438_v5  ;;  %v7333_v16 = vpop.f32.mrf.mxu0 }
 0x2a0   : > { %v7218_v33 = vpop.f32.mrf.mxu1  ;;  %v7334_v62 = vadd.f32 %v7333_v16, %v7332_v53  ;;  %v1026_v16 = vld [vmem:[#allocation2 + $0x150] sm:$0xff] }
 0x2a1   : > { %v10652_v50 = vadd.f32 %v7328_v26, %v3526_v13  ;;  %v7219_v40 = vadd.f32 %v7218_v33, %v7217_v28  ;;  %v7335_v8 = vpop.f32.mrf.mxu0  ;;  %v978_v26 = vld [vmem:[#allocation2 + $0x142] sm:$0xff]  ;;  %v10657_v13 = vpack.c.bf16 %v1075_v14, %v1074_v60  ;;  %v1027_v60 = vld [vmem:[#allocation2 + $0x158] sm:$0xff] }
 0x2a2   : > { %v7220_v44 = vpop.f32.mrf.mxu1  ;;  %3918 = vmatmul.mubr.bf16.gmra.mxu1 %v10618_v46  ;;  %v10662_v18 = vpack.c.bf16 %v978_v26, %v977_v34  ;;  %v979_v34 = vld [vmem:[#allocation2 + $0x152] sm:$0xff]  ;;  %v980_v26 = vld [vmem:[#allocation2 + $0x15a] sm:$0xff] }
 0x2a3   : > { %11900 = vst [vmem:[#allocation16_spill] sm:$0xff] %v10652_v50  ;;  %v3529_v5 = vadd.f32 %v7219_v40, %v10452_v52  ;;  %3925 = vmatprep.mubr.bf16.mxu1 %v10649_v6  ;;  %v7336_v50 = vpop.f32.mrf.mxu0 }
 0x2a4   : > { %v7221_v12 = vpop.f32.mrf.mxu1  ;;  %v7337_v53 = vadd.f32 %v7336_v50, %v7335_v8  ;;  %4087 = vmatmul.mubr.bf16.gmra.mxu0 %v1045_v31  ;;  %v1046_v31 = vpack.c.bf16 %v1027_v60, %v1026_v16  ;;  %v1028_v16 = vld [vmem:[#allocation2 + $0x168] sm:$0xff]  ;;  %v1029_v60 = vld [vmem:[#allocation2 + $0x170] sm:$0xff] }
 0x2a5   : > { %v10659_v28 = vadd.f32 %v7331_v11, %v3529_v5  ;;  %v7222_v33 = vadd.f32 %v7221_v12, %v7220_v44  ;;  %v7338_v40 = vpop.f32.mrf.mxu0  ;;  %4094 = vmatprep.mubr.bf16.mxu0 %v10657_v13  ;;  %v1076_v5 = vld [vmem:[#allocation2 + $0x169] sm:$0xff] }
 0x2a6   : > { %v7223_v46 = vpop.f32.mrf.mxu1 }
 0x2a7   : > { %v3534_v52 = vadd.f32 %v7222_v33, %v10476_v32  ;;  %v7339_v44 = vpop.f32.mrf.mxu0  ;;  %v10670_v33 = vpack.c.bf16 %v1077_v37, %v1076_v5  ;;  %v1078_v37 = vld [vmem:[#allocation2 + $0x181] sm:$0xff] }
 0x2a8   : > { %v7224_v38 = vpop.f32.mrf.mxu1  ;;  %v7340_v50 = vadd.f32 %v7339_v44, %v7338_v40 }
 0x2a9   : > { %v10665_v14 = vadd.f32 %v7334_v62, %v3534_v52  ;;  %v7225_v11 = vadd.f32 %v7224_v38, %v7223_v46  ;;  %v7341_v8 = vpop.f32.mrf.mxu0 }
 0x2aa   : > { %v7226_v12 = vpop.f32.mrf.mxu1  ;;  %3926 = vmatmul.mubr.bf16.gmra.mxu1 %v10631_v24 }
 0x2ab   : > { %11901 = vst [vmem:[#allocation17_spill] sm:$0xff] %v10665_v14  ;;  %v3537_v32 = vadd.f32 %v7225_v11, %v10491_v59  ;;  %3933 = vmatprep.mubr.bf16.mxu1 %v10662_v18  ;;  %v7342_v52 = vpop.f32.mrf.mxu0  ;;  %v10675_v59 = vpack.c.bf16 %v980_v26, %v979_v34  ;;  %v8506_v34 = vld [vmem:[#allocation8 + $0x70] sm:$0xff]  }
 0x2ac   : > { %v7227_v49 = vpop.f32.mrf.mxu1  ;;  %v7343_v14 = vadd.f32 %v7342_v52, %v7341_v8  ;;  %4095 = vmatmul.mubr.bf16.gmra.mxu0 %v1046_v31  ;;  %v8507_v26 = vld [vmem:[#allocation8 + $0x30] sm:$0xff]   ;;  %v981_v52 = vld [vmem:[#allocation2 + $0x16a] sm:$0xff]  ;;  %7666 = vmatprep.subr.bf16.mxu0 %v8506_v34 }
 0x2ad   : > { %v10672_v62 = vadd.f32 %v7337_v53, %v3537_v32  ;;  %v7228_v46 = vadd.f32 %v7227_v49, %v7226_v12  ;;  %v7344_v40 = vpop.f32.mrf.mxu0  ;;  %4102 = vmatprep.mubr.bf16.mxu0 %v10670_v33  ;;  %v1079_v12 = vld [vmem:[#allocation2 + $0x189] sm:$0xff]  ;;  %v1047_v49 = vpack.c.bf16 %v1029_v60, %v1028_v16  ;;  %7667 = vmatpush3.bf16.msra.mxu0 %v8507_v26  ;;  %v1030_v60 = vld [vmem:[#allocation2 + $0x180] sm:$0xff] }
 0x2ae   : > { %v7229_v38 = vpop.f32.mrf.mxu1  ;;  %v1081_v34 = vld [vmem:[#allocation2 + $0x1a1] sm:$0xff] }
 0x2af   : > { %v3542_v24 = vadd.f32 %v7228_v46, %v10468_v36  ;;  %v7345_v53 = vpop.f32.mrf.mxu0 }
 0x2b0   : > { %v7230_v11 = vpop.f32.mrf.mxu1  ;;  %v7346_v8 = vadd.f32 %v7345_v53, %v7344_v40  ;;  %v1031_v53 = vld [vmem:[#allocation2 + $0x188] sm:$0xff] }
 0x2b1   : > { %v10678_v44 = vadd.f32 %v7340_v50, %v3542_v24  ;;  %v7231_v5 = vadd.f32 %v7230_v11, %v7229_v38  ;;  %v7347_v31 = vpop.f32.mrf.mxu0  ;;  %v982_v50 = vld [vmem:[#allocation2 + $0x172] sm:$0xff]  ;;  %v10683_v24 = vpack.c.bf16 %v1079_v12, %v1078_v37 }
 0x2b2   : > { %v7232_v32 = vpop.f32.mrf.mxu1  ;;  %3934 = vmatmul.mubr.bf16.gmra.mxu1 %v10644_v7 }
 0x2b3   : > { %11902 = vst [vmem:[#allocation19_spill] sm:$0xff] %v10678_v44  ;;  %v3545_v36 = vadd.f32 %v7231_v5, %v10483_v15  ;;  %3941 = vmatprep.mubr.bf16.mxu1 %v10675_v59  ;;  %v7348_v44 = vpop.f32.mrf.mxu0  ;;  %v10688_v5 = vpack.c.bf16 %v982_v50, %v981_v52  ;;  %v1048_v52 = vpack.c.bf16 %v1031_v53, %v1030_v60 }
 0x2b4   : > { %v7233_v46 = vpop.f32.mrf.mxu1  ;;  %4103 = vmatmul.mubr.bf16.gmra.mxu0 %v1047_v49  ;;  %v7349_v12 = vadd.f32 %v7348_v44, %v7347_v31 }
 0x2b5   : > { %v10685_v38 = vadd.f32 %v7343_v14, %v3545_v36  ;;  %v7234_v11 = vadd.f32 %v7233_v46, %v7232_v32  ;;  %v7350_v40 = vpop.f32.mrf.mxu0  ;;  %4110 = vmatprep.mubr.bf16.mxu0 %v10683_v24  ;;  %v1080_v36 = vld [vmem:[#allocation2 + $0x199] sm:$0xff] }
 0x2b6   : > { %v7235_v7 = vpop.f32.mrf.mxu1 }
 0x2b7   : > { %11903 = vst [vmem:[#allocation21_spill] sm:$0xff] %v10685_v38  ;;  %v3550_v15 = vadd.f32 %v7234_v11, %v10507_v41  ;;  %v7351_v32 = vpop.f32.mrf.mxu0  ;;  %v983_v11 = vld [vmem:[#allocation2 + $0x182] sm:$0xff]  ;;  %v984_v38 = vld [vmem:[#allocation2 + $0x18a] sm:$0xff] }
 0x2b8   : > { %v7236_v16 = vpop.f32.mrf.mxu1  ;;  %v7352_v41 = vadd.f32 %v7351_v32, %v7350_v40 }
 0x2b9   : > { %v10691_v37 = vadd.f32 %v7346_v8, %v3550_v15  ;;  %v7237_v14 = vadd.f32 %v7236_v16, %v7235_v7  ;;  %v7353_v26 = vpop.f32.mrf.mxu0  ;;  %v1097_v8 = vpack.c.bf16 %v1081_v34, %v1080_v36 }
 0x2ba   : > { %v7238_v46 = vpop.f32.mrf.mxu1  ;;  %3942 = vmatmul.mubr.bf16.gmra.mxu1 %v10657_v13  ;;  %v10699_v13 = vpack.c.bf16 %v984_v38, %v983_v11  ;;  %v8508_v38 = vld [vmem:[#allocation8 + $0x68] sm:$0xff]  }
 0x2bb   : > { %11904 = vst [vmem:[#allocation20_spill] sm:$0xff] %v10691_v37  ;;  %v3553_v49 = vadd.f32 %v7237_v14, %v10522_v27  ;;  %3949 = vmatprep.mubr.bf16.mxu1 %v10688_v5  ;;  %v7354_v31 = vpop.f32.mrf.mxu0  ;;  %7668 = vmatprep.subr.bf16.mxu0 %v8508_v38 }
 0x2bc   : > { %v7239_v50 = vpop.f32.mrf.mxu1  ;;  %4111 = vmatmul.mubr.bf16.gmra.mxu0 %v1048_v52  ;;  %v7355_v53 = vadd.f32 %v7354_v31, %v7353_v26 }
 0x2bd   : > { %v10696_v15 = vadd.f32 %v7349_v12, %v3553_v49  ;;  %v7240_v44 = vadd.f32 %v7239_v50, %v7238_v46  ;;  %v7356_v37 = vpop.f32.mrf.mxu0  ;;  %4118 = vmatprep.mubr.bf16.mxu0 %v1097_v8  ;;  %v8509_v49 = vld [vmem:[#allocation8 + $0x28] sm:$0xff]  }
 0x2be   : > { %v7241_v7 = vpop.f32.mrf.mxu1  ;;  %v1099_v50 = vld [vmem:[#allocation2 + $0x3a] sm:$0xff]  ;;  %7669 = vmatpush3.bf16.msra.mxu0 %v8509_v49 }
 0x2bf   : > { %v3558_v16 = vadd.f32 %v7240_v44, %v10499_v1  ;;  %v7357_v14 = vpop.f32.mrf.mxu0  ;;  %v8577_v1 = vld [vmem:[#allocation3] sm:$0xff] }
 0x2c0   : > { %v7242_v27 = vpop.f32.mrf.mxu1  ;;  %v7358_v12 = vadd.f32 %v7357_v14, %v7356_v37  ;;  %v10706_v46 = vpack.c.bf16 %v8577_v1, %v8577_v1 }
 0x2c1   : > { %v10701_v40 = vadd.f32 %v7352_v41, %v3558_v16  ;;  %v7243_v60 = vadd.f32 %v7242_v27, %v7241_v7  ;;  %v7359_v34 = vpop.f32.mrf.mxu0  ;;  %v1098_v41 = vld [vmem:[#allocation2 + $0x32] sm:$0xff] }
 0x2c2   : > { %v7244_v32 = vpop.f32.mrf.mxu1  ;;  %3950 = vmatmul.mubr.bf16.gmra.mxu1 %v10670_v33  ;;  %v1130_v44 = vpack.c.bf16 %v1099_v50, %v1098_v41 }
 0x2c3   : > { %v3561_v36 = vadd.f32 %v7243_v60, %v10514_v58  ;;  %3957 = vmatprep.mubr.bf16.mxu1 %v10699_v13  ;;  %v7360_v8 = vpop.f32.mrf.mxu0 }
 0x2c4   : > { %v7245_v52 = vpop.f32.mrf.mxu1  ;;  %4119 = vmatmul.mubr.bf16.gmra.mxu0 %v10706_v46  ;;  %v7361_v27 = vadd.f32 %v7360_v8, %v7359_v34 }
 0x2c5   : > { %v10708_v11 = vadd.f32 %v7355_v53, %v3561_v36  ;;  %v7246_v26 = vadd.f32 %v7245_v52, %v7244_v32  ;;  %v7362_v37 = vpop.f32.mrf.mxu0 }
 0x2c6   : > { %v7247_v33 = vpop.f32.mrf.mxu1 }
 0x2c7   : > { %v3566_v58 = vadd.f32 %v7246_v26, %v10538_v17  ;;  %v7363_v60 = vpop.f32.mrf.mxu0 }
 0x2c8   : > { %v7248_v31 = vpop.f32.mrf.mxu1  ;;  %v7364_v53 = vadd.f32 %v7363_v60, %v7362_v37 }
 0x2c9   : > { %v10712_v7 = vadd.f32 %v7358_v12, %v3566_v58  ;;  %v7249_v16 = vadd.f32 %v7248_v31, %v7247_v33  ;;  %v7365_v36 = vpop.f32.mrf.mxu0  ;;  %v8511_v31 = vld [vmem:[#allocation8 + $0x20] sm:$0xff]  }
 0x2ca   : > { %v7250_v14 = vpop.f32.mrf.mxu1  ;;  %3958 = vmatmul.mubr.bf16.gmra.mxu1 %v10683_v24 }
 0x2cb   : > { %v3569_v32 = vadd.f32 %v7249_v16, %v10550_v25  ;;  %8200 = vmatprep.mubr.bf16.mxu1 %v1130_v44  ;;  %v7366_v49 = vpop.f32.mrf.mxu0  ;;  %v8510_v44 = vld [vmem:[#allocation8 + $0x60] sm:$0xff]  }
 0x2cc   : > { %v7251_v1 = vpop.f32.mrf.mxu1  ;;  %v7367_v8 = vadd.f32 %v7366_v49, %v7365_v36  ;;  %7670 = vmatprep.subr.bf16.mxu0 %v8510_v44 }
 0x2cd   : > { %v10716_v17 = vadd.f32 %v7361_v27, %v3569_v32  ;;  %v7252_v38 = vadd.f32 %v7251_v1, %v7250_v14  ;;  %v7368_v41 = vpop.f32.mrf.mxu0  ;;  %7671 = vmatpush3.bf16.msra.mxu0 %v8511_v31 }
 0x2ce   : > { %v7253_v52 = vpop.f32.mrf.mxu1 }
 0x2cf   : > { %v3574_v12 = vadd.f32 %v7252_v38, %v10530_v55  ;;  %v7369_v24 = vpop.f32.mrf.mxu0 }
 0x2d0   : > { %v7254_v50 = vpop.f32.mrf.mxu1  ;;  %v7370_v25 = vadd.f32 %v7369_v24, %v7368_v41 }
 0x2d1   : > { %v10719_v34 = vadd.f32 %v7364_v53, %v3574_v12  ;;  %v7255_v26 = vadd.f32 %v7254_v50, %v7253_v52  ;;  %v7371_v37 = vpop.f32.mrf.mxu0 }
 0x2d2   : > { %v7256_v33 = vpop.f32.mrf.mxu1  ;;  %8201 = vmatmul.mubr.bf16.vlgmr.msra.gmra.mxu1 %v10462_v48 }
 0x2d3   : > { %v3577_v58 = vadd.f32 %v7255_v26, %v10545_v29  ;;  %8204 = vmatprep.mubr.bf16.mxu1 %v10493_v56  ;;  %v7372_v60 = vpop.f32.mrf.mxu0 }
 0x2d4   : > { %v7257_v16 = vpop.f32.mrf.mxu1  ;;  %v7373_v1 = vadd.f32 %v7372_v60, %v7371_v37  ;;  %v8513_v60 = vld [vmem:[#allocation8 + $0x18] sm:$0xff]  }
 0x2d5   : > { %v10724_v55 = vadd.f32 %v7367_v8, %v3577_v58  ;;  %v7258_v27 = vadd.f32 %v7257_v16, %v7256_v33  ;;  %v7374_v32 = vpop.f32.mrf.mxu0 }
 0x2d6   : > { %v7259_v14 = vpop.f32.mrf.mxu1 }
 0x2d7   : > { %v3582_v53 = vadd.f32 %v7258_v27, %v10561_v61  ;;  %v7375_v38 = vpop.f32.mrf.mxu0  ;;  %v8512_v27 = vld [vmem:[#allocation8 + $0x58] sm:$0xff]  }
 0x2d8   : > { %v7260_v48 = vpop.f32.mrf.mxu1  ;;  %v7376_v49 = vadd.f32 %v7375_v38, %v7374_v32  ;;  %7672 = vmatprep.subr.bf16.mxu0 %v8512_v27  ;;  %v8515_v27 = vld [vmem:[#allocation8 + $0x10] sm:$0xff]  }
 0x2d9   : > { %v10727_v36 = vadd.f32 %v7370_v25, %v3582_v53  ;;  %v7261_v29 = vadd.f32 %v7260_v48, %v7259_v14  ;;  %v7377_v12 = vpop.f32.mrf.mxu0  ;;  %7673 = vmatpush3.bf16.msra.mxu0 %v8513_v60 }
 0x2da   : > { %v7262_v56 = vpop.f32.mrf.mxu1  ;;  %8205 = vmatmul.mubr.bf16.gmra.mxu1 %v10524_v39 }
 0x2db   : > { %v3585_v52 = vadd.f32 %v7261_v29, %v10571_v3  ;;  %8208 = vmatprep.mubr.bf16.mxu1 %v10552_v4  ;;  %v7378_v26 = vpop.f32.mrf.mxu0 }
 0x2dc   : > { %v7263_v41 = vpop.f32.mrf.mxu1  ;;  %v7379_v39 = vadd.f32 %v7378_v26, %v7377_v12 }
 0x2dd   : > { %v10732_v50 = vadd.f32 %v7373_v1, %v3585_v52  ;;  %v7264_v61 = vadd.f32 %v7263_v41, %v7262_v56  ;;  %v7380_v33 = vpop.f32.mrf.mxu0 }
 0x2de   : > { %v7265_v8 = vpop.f32.mrf.mxu1 }
 0x2df   : > { %v3590_v24 = vadd.f32 %v7264_v61, %v10556_v51  ;;  %v7381_v44 = vpop.f32.mrf.mxu0 }
 0x2e0   : > { %v7266_v25 = vpop.f32.mrf.mxu1  ;;  %v7382_v3 = vadd.f32 %v7381_v44, %v7380_v33 }
 0x2e1   : > { %v10735_v58 = vadd.f32 %v7376_v49, %v3590_v24  ;;  %v7267_v37 = vadd.f32 %v7266_v25, %v7265_v8  ;;  %v7383_v16 = vpop.f32.mrf.mxu0 }
 0x2e2   : > { %v7268_v31 = vpop.f32.mrf.mxu1  ;;  %8209 = vmatmul.mubr.bf16.gmra.mxu1 %v10573_v20 }
 0x2e3   : > { %v3593_v4 = vadd.f32 %v7267_v37, %v10566_v42  ;;  %8212 = vmatprep.mubr.bf16.mxu1 %v10593_v10  ;;  %v7384_v32 = vpop.f32.mrf.mxu0 }
 0x2e4   : > { %v7269_v14 = vpop.f32.mrf.mxu1  ;;  %v7385_v56 = vadd.f32 %v7384_v32, %v7383_v16  ;;  %v8514_v16 = vld [vmem:[#allocation8 + $0x50] sm:$0xff]  }
 0x2e5   : > { %v10740_v51 = vadd.f32 %v7379_v39, %v3593_v4  ;;  %v7270_v53 = vadd.f32 %v7269_v14, %v7268_v31  ;;  %v7386_v1 = vpop.f32.mrf.mxu0  ;;  %7674 = vmatprep.subr.bf16.mxu0 %v8514_v16 }
 0x2e6   : > { %v7271_v48 = vpop.f32.mrf.mxu1  ;;  %7675 = vmatpush3.bf16.msra.mxu0 %v8515_v27 }
 0x2e7   : > { %v3598_v29 = vadd.f32 %v7270_v53, %v10581_v2  ;;  %v7387_v49 = vpop.f32.mrf.mxu0 }
 0x2e8   : > { %v7272_v20 = vpop.f32.mrf.mxu1  ;;  %v7388_v52 = vadd.f32 %v7387_v49, %v7386_v1 }
 0x2e9   : > { %v10743_v38 = vadd.f32 %v7382_v3, %v3598_v29  ;;  %v7273_v42 = vadd.f32 %v7272_v20, %v7271_v48  ;;  %v7389_v41 = vpop.f32.mrf.mxu0 }
 0x2ea   : > { %v7274_v10 = vpop.f32.mrf.mxu1  ;;  %8213 = vmatmul.mubr.bf16.gmra.mxu1 %v10610_v35 }
 0x2eb   : > { %v3601_v12 = vadd.f32 %v7273_v42, %v10590_v47  ;;  %8216 = vmatprep.mubr.bf16.mxu1 %v10623_v0  ;;  %v7390_v8 = vpop.f32.mrf.mxu0 }
 0x2ec   : > { %v7275_v61 = vpop.f32.mrf.mxu1  ;;  %v7391_v35 = vadd.f32 %v7390_v8, %v7389_v41 }
 0x2ed   : > { %v10748_v26 = vadd.f32 %v7385_v56, %v3601_v12  ;;  %v7276_v2 = vadd.f32 %v7275_v61, %v7274_v10  ;;  %v7392_v25 = vpop.f32.mrf.mxu0 }
 0x2ee   : > { %v7277_v24 = vpop.f32.mrf.mxu1 }
 0x2ef   : > { %v3606_v33 = vadd.f32 %v7276_v2, %v10576_v23  ;;  %v7393_v31 = vpop.f32.mrf.mxu0 }
 0x2f0   : > { %v7278_v37 = vpop.f32.mrf.mxu1  ;;  %v7394_v47 = vadd.f32 %v7393_v31, %v7392_v25 }
 0x2f1   : > { %v10751_v39 = vadd.f32 %v7388_v52, %v3606_v33  ;;  %v7279_v44 = vadd.f32 %v7278_v37, %v7277_v24  ;;  %v7395_v4 = vpop.f32.mrf.mxu0 }
 0x2f2   : > { %v7280_v3 = vpop.f32.mrf.mxu1  ;;  %8217 = vmatmul.mubr.bf16.gmra.mxu1 %v10636_v22 }
 0x2f3   : > { %v3609_v0 = vadd.f32 %v7279_v44, %v10585_v30  ;;  %8220 = vmatprep.mubr.bf16.mxu1 %v10649_v6  ;;  %v7396_v53 = vpop.f32.mrf.mxu0 }
 0x2f4   : > { %v7281_v60 = vpop.f32.mrf.mxu1  ;;  %v7397_v20 = vadd.f32 %v7396_v53, %v7395_v4 }
 0x2f5   : > { %v10756_v23 = vadd.f32 %v7391_v35, %v3609_v0  ;;  %v7282_v14 = vadd.f32 %v7281_v60, %v7280_v3  ;;  %v7398_v29 = vpop.f32.mrf.mxu0  ;;  %v1129_v3 = vld [vmem:[#allocation2 + $0x1a2] sm:$0xff] }
 0x2f6   : > { %v7283_v32 = vpop.f32.mrf.mxu1 }
 0x2f7   : > { %v3614_v48 = vadd.f32 %v7282_v14, %v10599_v54  ;;  %v7399_v42 = vpop.f32.mrf.mxu0 }
 0x2f8   : > { %v7284_v22 = vpop.f32.mrf.mxu1  ;;  %v7400_v56 = vadd.f32 %v7399_v42, %v7398_v29 }
 0x2f9   : > { %v10759_v1 = vadd.f32 %v7394_v47, %v3614_v48  ;;  %v7285_v30 = vadd.f32 %v7284_v22, %v7283_v32  ;;  %v7401_v10 = vpop.f32.mrf.mxu0  ;;  %v8516_v47 = vld [vmem:[#allocation8 + $0x48] sm:$0xff]  }
 0x2fa   : > { %v7286_v6 = vpop.f32.mrf.mxu1  ;;  %8221 = vmatmul.mubr.bf16.gmra.mxu1 %v10662_v18  ;;  %7676 = vmatprep.subr.bf16.mxu0 %v8516_v47 }
 0x2fb   : > { %v3617_v49 = vadd.f32 %v7285_v30, %v10607_v43  ;;  %8224 = vmatprep.mubr.bf16.mxu1 %v10675_v59  ;;  %v7402_v41 = vpop.f32.mrf.mxu0  ;;  %v1128_v59 = vld [vmem:[#allocation2 + $0x19a] sm:$0xff]  ;;  %v8519_v30 = vld [vmem:[#allocation8 + $0xb8] sm:$0xff]  }
 0x2fc   : > { %v7287_v52 = vpop.f32.mrf.mxu1  ;;  %v7403_v18 = vadd.f32 %v7402_v41, %v7401_v10  ;;  %v1145_v14 = vpack.c.bf16 %v1129_v3, %v1128_v59 }
 0x2fd   : > { %v10764_v12 = vadd.f32 %v7397_v20, %v3617_v49  ;;  %v7288_v54 = vadd.f32 %v7287_v52, %v7286_v6  ;;  %v7404_v8 = vpop.f32.mrf.mxu0  ;;  %v11905_v6 = vld [vmem:[#allocation14_spill] sm:$0xff]  ;;  %v8520_v52 = vld [vmem:[#allocation8 + $0xf0] sm:$0xff]  }
 0x2fe   : > { %v7289_v61 = vpop.f32.mrf.mxu1 }
 0x2ff   : > { %v3622_v2 = vadd.f32 %v7288_v54, %v10596_v9  ;;  %v7405_v37 = vpop.f32.mrf.mxu0  ;;  %v8517_v9 = vld [vmem:[#allocation8 + $0x8] sm:$0xff]  }
 0x300   : > { %v7290_v24 = vpop.f32.mrf.mxu1  ;;  %v7406_v43 = vadd.f32 %v7405_v37, %v7404_v8  ;;  %7677 = vmatpush3.bf16.msra.mxu0 %v8517_v9 }
 0x301   : > { %v10767_v33 = vadd.f32 %v7400_v56, %v3622_v2  ;;  %v7291_v25 = vadd.f32 %v7290_v24, %v7289_v61  ;;  %v7407_v31 = vpop.f32.mrf.mxu0  ;;  %v8521_v61 = vld [vmem:[#allocation8 + $0xb0] sm:$0xff]  }
 0x302   : > { %v7292_v44 = vpop.f32.mrf.mxu1  ;;  %8225 = vmatmul.mubr.bf16.gmra.mxu1 %v10688_v5 }
 0x303   : > { %v3625_v35 = vadd.f32 %v7291_v25, %v10605_v19  ;;  %8228 = vmatprep.mubr.bf16.mxu1 %v10699_v13  ;;  %v7408_v27 = vpop.f32.mrf.mxu0  ;;  %v8518_v19 = vld [vmem:[#allocation8 + $0xf8] sm:$0xff]  }
 0x304   : > { %v7293_v0 = vpop.f32.mrf.mxu1  ;;  %v7409_v29 = vadd.f32 %v7408_v27, %v7407_v31  ;;  %7776 = vmatprep.subr.bf16.mxu1 %v8518_v19  ;;  %v11908_v19 = vld [vmem:[#allocation15_spill] sm:$0xff] }
 0x305   : > { %v10772_v4 = vadd.f32 %v7403_v18, %v3625_v35  ;;  %v7294_v16 = vadd.f32 %v7293_v0, %v7292_v44  ;;  %v7410_v53 = vpop.f32.mrf.mxu0  ;;  %7777 = vmatpush3.bf16.msra.mxu1 %v8519_v30  ;;  %v8523_v18 = vld [vmem:[#allocation8 + $0xe8] sm:$0xff]  }
 0x306   : > { %v7295_v60 = vpop.f32.mrf.mxu1  ;;  %7778 = vmatprep.subr.bf16.mxu1 %v8520_v52  ;;  %v8525_v35 = vld [vmem:[#allocation8 + $0xa8] sm:$0xff]   ;;  %v8529_v52 = vld [vmem:[#allocation8 + $0x98] sm:$0xff]  }
 0x307   : > { %v3630_v5 = vadd.f32 %v7294_v16, %v10614_v57  ;;  %v7411_v22 = vpop.f32.mrf.mxu0  ;;  %v8526_v16 = vld [vmem:[#allocation8 + $0xe0] sm:$0xff]  }
 0x308   : > { %v7296_v32 = vpop.f32.mrf.mxu1  ;;  %v7412_v42 = vadd.f32 %v7411_v22, %v7410_v53  ;;  %v4441_v22 = vld [vmem:[#allocation4 + $0x9] sm:$0xff] }
 0x309   : > { %v10775_v48 = vadd.f32 %v7406_v43, %v3630_v5  ;;  %v7297_v13 = vadd.f32 %v7296_v32, %v7295_v60  ;;  %v7413_v49 = vpop.f32.mrf.mxu0  ;;  %7779 = vmatpush3.bf16.msra.mxu1 %v8521_v61  ;;  %v8527_v5 = vld [vmem:[#allocation8 + $0xa0] sm:$0xff]  }
 0x30a   : > { %v7298_v20 = vpop.f32.mrf.mxu1  ;;  %8229 = vmatmul.mubr.bf16.gmra.mxu1 %v1145_v14  ;;  %7780 = vmatprep.subr.bf16.mxu1 %v8523_v18  ;;  %v8522_v14 = vld [vmem:[#allocation8 + $0x40] sm:$0xff]  }
 0x30b   : > { %v3633_v56 = vadd.f32 %v7297_v13, %v11905_v6  ;;  %v7414_v41 = vpop.f32.mrf.mxu0  ;;  %v8524_v32 = vld [vmem:[#allocation8] sm:$0xff]   ;;  %7678 = vmatprep.subr.bf16.mxu0 %v8522_v14 }
 0x30c   : > { %v7299_v10 = vpop.f32.mrf.mxu1  ;;  %v7415_v43 = vadd.f32 %v7414_v41, %v7413_v49  ;;  %7679 = vmatpush3.bf16.msra.mxu0 %v8524_v32  ;;  %v8536_v14 = vld [vmem:[#allocation8 + $0xc0] sm:$0xff]  }
 0x30d   : > { %v10778_v57 = vadd.f32 %v7409_v29, %v3633_v56  ;;  %v7300_v54 = vadd.f32 %v7299_v10, %v7298_v20  ;;  %v7544_v24 = vpop.f32.mrf.mxu0  ;;  %7781 = vmatpush3.bf16.msra.mxu1 %v8525_v35  ;;  %v8528_v20 = vld [vmem:[#allocation8 + $0xd8] sm:$0xff]   ;;  %v8537_v32 = vld [vmem:[#allocation8 + $0x80] sm:$0xff]  }
 0x30e   : > { %v7301_v2 = vpop.f32.mrf.mxu1  ;;  %7782 = vmatprep.subr.bf16.mxu1 %v8526_v16 }
 0x30f   : > { %v3638_v8 = vadd.f32 %v7300_v54, %v10626_v45  ;;  %v7545_v59 = vpop.f32.mrf.mxu0 }
 0x310   : > { %v7302_v25 = vpop.f32.mrf.mxu1  ;;  %v7546_v3 = vadd.f32 %v7545_v59, %v7544_v24  ;;  %v11909_v59 = vld [vmem:[#allocation16_spill] sm:$0xff] }
 0x311   : > { %v10781_v37 = vadd.f32 %v7412_v42, %v3638_v8  ;;  %v7303_v44 = vadd.f32 %v7302_v25, %v7301_v2  ;;  %v7547_v9 = vpop.f32.mrf.mxu0  ;;  %7783 = vmatpush3.bf16.msra.mxu1 %v8527_v5  ;;  %v8530_v8 = vld [vmem:[#allocation8 + $0xd0] sm:$0xff]  }
 0x312   : > { %v7432_v31 = vpop.f32.mrf.mxu1  ;;  %7784 = vmatprep.subr.bf16.mxu1 %v8528_v20 }
 0x313   : > { %11906 = vst [vmem:[#allocation18_spill] sm:$0xff] %v10781_v37  ;;  %v3641_v47 = vadd.f32 %v7303_v44, %v10633_v63  ;;  %v7548_v60 = vpop.f32.mrf.mxu0  ;;  %v4440_v63 = vld [vmem:[#allocation4 + $0x1] sm:$0xff] }
 0x314   : > { %v7433_v0 = vpop.f32.mrf.mxu1  ;;  %v4472_v42 = vpack.c.bf16 %v4441_v22, %v4440_v63  ;;  %v7549_v56 = vadd.f32 %v7548_v60, %v7547_v9  ;;  %v8531_v44 = vld [vmem:[#allocation8 + $0x90] sm:$0xff]   ;;  %v8534_v9 = vld [vmem:[#allocation8 + $0x88] sm:$0xff]  }
 0x315   : > { %v10784_v45 = vadd.f32 %v7415_v43, %v3641_v47  ;;  %v7434_v27 = vadd.f32 %v7433_v0, %v7432_v31  ;;  %v10787_v29 = vpop.f32.mrf.mxu0  ;;  %7785 = vmatpush3.bf16.msra.mxu1 %v8529_v52 }
 0x316   : > { %v7435_v53 = vpop.f32.mrf.mxu1  ;;  %5440 = vmatprep.mubr.bf16.mxu0 %v4472_v42  ;;  %7786 = vmatprep.subr.bf16.mxu1 %v8530_v8  ;;  %v8533_v42 = vld [vmem:[#allocation8 + $0x178] sm:$0xff]  }
 0x317   : > { %11907 = vst [vmem:[#allocation22_spill] sm:$0xff] %v10784_v45  ;;  %v3840_v13 = vadd.f32 %v7434_v27, %v11908_v19  ;;  %v10789_v49 = vpop.f32.mrf.mxu0  ;;  %5441 = vmatmul.mubr.bf16.vlgmr.msra.gmra.mxu0 %v10706_v46  ;;  %7888 = vmatprep.subr.bf16.mxu0 %v8533_v42 }
 0x318   : > { %v7436_v30 = vpop.f32.mrf.mxu1 }
 0x319   : > { %v7437_v6 = vadd.f32 %v7436_v30, %v7435_v53  ;;  %v10791_v10 = vadd.f32 %v7546_v3, %v3840_v13  ;;  %v10794_v61 = vpop.f32.mrf.mxu0  ;;  %7787 = vmatpush3.bf16.msra.mxu1 %v8531_v44  ;;  %v8532_v3 = vld [vmem:[#allocation8 + $0xc8] sm:$0xff]   ;;  %v11910_v13 = vld [vmem:[#allocation17_spill] sm:$0xff] }
 0x31a   : > { %v7438_v54 = vpop.f32.mrf.mxu1  ;;  %7788 = vmatprep.subr.bf16.mxu1 %v8532_v3  ;;  %v11911_v44 = vld [vmem:[#allocation19_spill] sm:$0xff] }
 0x31b   : > { %v3843_v41 = vadd.f32 %v7437_v6, %v10646_v21  ;;  %v10797_v25 = vpop.f32.mrf.mxu0  ;;  %v8535_v6 = vld [vmem:[#allocation8 + $0x138] sm:$0xff]  }
 0x31c   : > { %v7439_v2 = vpop.f32.mrf.mxu1  ;;  %7889 = vmatpush3.bf16.msra.mxu0 %v8535_v6 }
 0x31d   : > { %v7440_v24 = vadd.f32 %v7439_v2, %v7438_v54  ;;  %v10799_v18 = vadd.f32 %v7549_v56, %v3843_v41  ;;  %v10804_v31 = vpop.f32.mrf.mxu0  ;;  %7789 = vmatpush3.bf16.msra.mxu1 %v8534_v9  ;;  %v11912_v9 = vld [vmem:[#allocation21_spill] sm:$0xff] }
 0x31e   : > { %v7441_v43 = vpop.f32.mrf.mxu1  ;;  %7790 = vmatprep.subr.bf16.mxu1 %v8536_v14 }
 0x31f   : > { %v10802_v35 = vadd.f32 %v7440_v24, %v11909_v59  ;;  %v10806_v46 = vpop.f32.mrf.mxu0 }
 0x320   : > { %v7442_v21 = vpop.f32.mrf.mxu1 }
 0x321   : > { %v7443_v47 = vadd.f32 %v7442_v21, %v7441_v43  ;;  %v10811_v27 = vpop.f32.mrf.mxu0  ;;  %7791 = vmatpush3.bf16.msra.mxu1 %v8537_v32 }
 0x322   : > { %v7444_v0 = vpop.f32.mrf.mxu1 }
 0x323   : > { %v10809_v16 = vadd.f32 %v7443_v47, %v10659_v28  ;;  %v10813_v53 = vpop.f32.mrf.mxu0 }
 0x324   : > { %v7445_v60 = vpop.f32.mrf.mxu1 }
 0x325   : > { %v7446_v5 = vadd.f32 %v7445_v60, %v7444_v0  ;;  %v10818_v22 = vpop.f32.mrf.mxu0 }
 0x326   : > { %v7447_v19 = vpop.f32.mrf.mxu1 }
 0x327   : > { %v10816_v63 = vadd.f32 %v7446_v5, %v11910_v13  ;;  %v10820_v20 = vpop.f32.mrf.mxu0  ;;  %v11913_v13 = vld [vmem:[#allocation20_spill] sm:$0xff] }
 0x328   : > { %v7448_v30 = vpop.f32.mrf.mxu1 }
 0x329   : > { %v7449_v28 = vadd.f32 %v7448_v30, %v7447_v19  ;;  %v10825_v54 = vpop.f32.mrf.mxu0 }
 0x32a   : > { %v7450_v56 = vpop.f32.mrf.mxu1 }
 0x32b   : > { %v10823_v52 = vadd.f32 %v7449_v28, %v10672_v62  ;;  %v10827_v8 = vpop.f32.mrf.mxu0 }
 0x32c   : > { %v7451_v41 = vpop.f32.mrf.mxu1 }
 0x32d   : > { %v7452_v2 = vadd.f32 %v7451_v41, %v7450_v56  ;;  %v10832_v59 = vpop.f32.mrf.mxu0  ;;  %v8538_v41 = vld [vmem:[#allocation8 + $0x170] sm:$0xff]  }
 0x32e   : > { %v7453_v24 = vpop.f32.mrf.mxu1  ;;  %7890 = vmatprep.subr.bf16.mxu0 %v8538_v41 }
 0x32f   : > { %v10830_v43 = vadd.f32 %v7452_v2, %v11911_v44  ;;  %v10834_v47 = vpop.f32.mrf.mxu0  ;;  %v8539_v2 = vld [vmem:[#allocation8 + $0x130] sm:$0xff]  }
 0x330   : > { %v7454_v21 = vpop.f32.mrf.mxu1  ;;  %7891 = vmatpush3.bf16.msra.mxu0 %v8539_v2 }
 0x331   : > { %v7455_v3 = vadd.f32 %v7454_v21, %v7453_v24  ;;  %v10839_v60 = vpop.f32.mrf.mxu0 }
 0x332   : > { %v7456_v62 = vpop.f32.mrf.mxu1 }
 0x333   : > { %v10837_v0 = vadd.f32 %v7455_v3, %v11912_v9  ;;  %v10841_v32 = vpop.f32.mrf.mxu0 }
 0x334   : > { %v7457_v14 = vpop.f32.mrf.mxu1 }
 0x335   : > { %v7458_v5 = vadd.f32 %v7457_v14, %v7456_v62  ;;  %v10846_v28 = vpop.f32.mrf.mxu0 }
 0x336   : > { %v7459_v19 = vpop.f32.mrf.mxu1 }
 0x337   : > { %v10844_v30 = vadd.f32 %v7458_v5, %v11913_v13  ;;  %v10848_v56 = vpop.f32.mrf.mxu0 }
 0x338   : > { %v7460_v42 = vpop.f32.mrf.mxu1 }
 0x339   : > { %v7461_v6 = vadd.f32 %v7460_v42, %v7459_v19  ;;  %v10853_v21 = vpop.f32.mrf.mxu0 }
 0x33a   : > { %v7462_v24 = vpop.f32.mrf.mxu1 }
 0x33b   : > { %v10851_v44 = vadd.f32 %v7461_v6, %v10696_v15  ;;  %v10855_v9 = vpop.f32.mrf.mxu0 }
 0x33c   : > { %v7463_v3 = vpop.f32.mrf.mxu1 }
 0x33d   : > { %11914 = vst [vmem:[#allocation24_spill] sm:$0xff] %v10851_v44  ;;  %v7464_v62 = vadd.f32 %v7463_v3, %v7462_v24  ;;  %v10860_v19 = vpop.f32.mrf.mxu0 }
 0x33e   : > { %v7465_v14 = vpop.f32.mrf.mxu1  ;;  %11915 = vst [vmem:[#allocation23_spill] sm:$0xff] %v10860_v19  ;;  %v8541_v19 = vld [vmem:[#allocation8 + $0x128] sm:$0xff]  }
 0x33f   : > { %v10858_v5 = vadd.f32 %v7464_v62, %v10701_v40  ;;  %v10862_v45 = vpop.f32.mrf.mxu0 }
 0x340   : > { %v7466_v13 = vpop.f32.mrf.mxu1  ;;  %11916 = vst [vmem:[#allocation26_spill] sm:$0xff] %v10862_v45  ;;  %v8540_v45 = vld [vmem:[#allocation8 + $0x168] sm:$0xff]  }
 0x341   : > { %v7467_v42 = vadd.f32 %v7466_v13, %v7465_v14  ;;  %v10867_v41 = vpop.f32.mrf.mxu0  ;;  %7892 = vmatprep.subr.bf16.mxu0 %v8540_v45 }
 0x342   : > { %v7468_v15 = vpop.f32.mrf.mxu1  ;;  %11918 = vst [vmem:[#allocation28_spill] sm:$0xff] %v10867_v41  ;;  %7893 = vmatpush3.bf16.msra.mxu0 %v8541_v19 }
 0x343   : > { %v10865_v6 = vadd.f32 %v7467_v42, %v10708_v11  ;;  %v10869_v3 = vpop.f32.mrf.mxu0 }
 0x344   : > { %v7469_v2 = vpop.f32.mrf.mxu1  ;;  %11919 = vst [vmem:[#allocation27_spill] sm:$0xff] %v10869_v3 }
 0x345   : > { %11917 = vst [vmem:[#allocation25_spill] sm:$0xff] %v10865_v6  ;;  %v7470_v24 = vadd.f32 %v7469_v2, %v7468_v15  ;;  %v10874_v62 = vpop.f32.mrf.mxu0 }
 0x346   : > { %v7471_v37 = vpop.f32.mrf.mxu1 }
 0x347   : > { %v10872_v40 = vadd.f32 %v7470_v24, %v10712_v7  ;;  %v10876_v13 = vpop.f32.mrf.mxu0 }
 0x348   : > { %v7472_v44 = vpop.f32.mrf.mxu1 }
 0x349   : > { %11920 = vst [vmem:[#allocation30_spill] sm:$0xff] %v10872_v40  ;;  %v7473_v14 = vadd.f32 %v7472_v44, %v7471_v37  ;;  %v10881_v41 = vpop.f32.mrf.mxu0 }
 0x34a   : > { %v7474_v11 = vpop.f32.mrf.mxu1 }
 0x34b   : > { %v10879_v42 = vadd.f32 %v7473_v14, %v10716_v17  ;;  %v10883_v7 = vpop.f32.mrf.mxu0 }
 0x34c   : > { %v7475_v15 = vpop.f32.mrf.mxu1 }
 0x34d   : > { %11921 = vst [vmem:[#allocation29_spill] sm:$0xff] %v10879_v42  ;;  %v7476_v2 = vadd.f32 %v7475_v15, %v7474_v11  ;;  %v10888_v37 = vpop.f32.mrf.mxu0 }
 0x34e   : > { %v7477_v24 = vpop.f32.mrf.mxu1  ;;  %11923 = vst [vmem:[#allocation31_spill] sm:$0xff] %v10888_v37  ;;  %v8543_v37 = vld [vmem:[#allocation8 + $0x120] sm:$0xff]  }
 0x34f   : > { %v10886_v40 = vadd.f32 %v7476_v2, %v10719_v34  ;;  %v10890_v6 = vpop.f32.mrf.mxu0  ;;  %v8542_v2 = vld [vmem:[#allocation8 + $0x160] sm:$0xff]  }
 0x350   : > { %v7478_v44 = vpop.f32.mrf.mxu1  ;;  %11924 = vst [vmem:[#allocation34_spill] sm:$0xff] %v10890_v6  ;;  %7894 = vmatprep.subr.bf16.mxu0 %v8542_v2  ;;  %v8546_v2 = vld [vmem:[#allocation8 + $0x158] sm:$0xff]  }
 0x351   : > { %11922 = vst [vmem:[#allocation32_spill] sm:$0xff] %v10886_v40  ;;  %v7479_v3 = vadd.f32 %v7478_v44, %v7477_v24  ;;  %v10895_v45 = vpop.f32.mrf.mxu0  ;;  %7895 = vmatpush3.bf16.msra.mxu0 %v8543_v37 }
 0x352   : > { %v7480_v17 = vpop.f32.mrf.mxu1  ;;  %11925 = vst [vmem:[#allocation33_spill] sm:$0xff] %v10895_v45  ;;  %7896 = vmatprep.subr.bf16.mxu0 %v8546_v2 }
 0x353   : > { %v10893_v14 = vadd.f32 %v7479_v3, %v10724_v55  ;;  %v10897_v15 = vpop.f32.mrf.mxu0  ;;  %v8544_v3 = vld [vmem:[#allocation8 + $0x1f8] sm:$0xff]  }
 0x354   : > { %v7481_v19 = vpop.f32.mrf.mxu1  ;;  %11926 = vst [vmem:[#allocation14_spill] sm:$0xff] %v10897_v15  ;;  %8000 = vmatprep.subr.bf16.mxu1 %v8544_v3 }
 0x355   : > { %v7482_v11 = vadd.f32 %v7481_v19, %v7480_v17  ;;  %v10902_v24 = vpop.f32.mrf.mxu0 }
 0x356   : > { %v7483_v42 = vpop.f32.mrf.mxu1 }
 0x357   : > { %v10900_v34 = vadd.f32 %v7482_v11, %v10727_v36  ;;  %v10907_v19 = vpop.f32.mrf.mxu0 }
 0x358   : > { %v7484_v40 = vpop.f32.mrf.mxu1 }
 0x359   : > { %11927 = vst [vmem:[#allocation15_spill] sm:$0xff] %v10900_v34  ;;  %v7485_v44 = vadd.f32 %v7484_v40, %v7483_v42  ;;  %v10912_v45 = vpop.f32.mrf.mxu0 }
 0x35a   : > { %v7486_v6 = vpop.f32.mrf.mxu1 }
 0x35b   : > { %v10905_v55 = vadd.f32 %v7485_v44, %v10732_v50  ;;  %v8547_v50 = vld [vmem:[#allocation8 + $0x118] sm:$0xff]   ;;  %v10917_v44 = vpop.f32.mrf.mxu0 }
 0x35c   : > { %v7487_v17 = vpop.f32.mrf.mxu1  ;;  %11931 = vst [vmem:[#allocation21_spill] sm:$0xff] %v10917_v44  ;;  %7897 = vmatpush3.bf16.msra.mxu0 %v8547_v50 }
 0x35d   : > { %11928 = vst [vmem:[#allocation16_spill] sm:$0xff] %v10905_v55  ;;  %v7488_v15 = vadd.f32 %v7487_v17, %v7486_v6 }
 0x35e   : > { %v7489_v36 = vpop.f32.mrf.mxu1 }
 0x35f   : > { %v10910_v11 = vadd.f32 %v7488_v15, %v10735_v58  ;;  %v10922_v15 = vpop.f32.mrf.mxu0 }
 0x360   : > { %v7490_v34 = vpop.f32.mrf.mxu1 }
 0x361   : > { %11929 = vst [vmem:[#allocation17_spill] sm:$0xff] %v10910_v11  ;;  %v7491_v40 = vadd.f32 %v7490_v34, %v7489_v36 }
 0x362   : > { %v7492_v42 = vpop.f32.mrf.mxu1 }
 0x363   : > { %v10915_v37 = vadd.f32 %v7491_v40, %v10740_v51  ;;  %v10927_v51 = vpop.f32.mrf.mxu0 }
 0x364   : > { %v7493_v55 = vpop.f32.mrf.mxu1 }
 0x365   : > { %11930 = vst [vmem:[#allocation19_spill] sm:$0xff] %v10915_v37  ;;  %v7494_v6 = vadd.f32 %v7493_v55, %v7492_v42  ;;  %v10932_v42 = vpop.f32.mrf.mxu0 }
 0x366   : > { %v7495_v3 = vpop.f32.mrf.mxu1 }
 0x367   : > { %v10920_v58 = vadd.f32 %v7494_v6, %v10743_v38  ;;  %v8550_v6 = vld [vmem:[#allocation8 + $0x150] sm:$0xff]  }
 0x368   : > { %v7496_v17 = vpop.f32.mrf.mxu1  ;;  %7898 = vmatprep.subr.bf16.mxu0 %v8550_v6 }
 0x369   : > { %11932 = vst [vmem:[#allocation20_spill] sm:$0xff] %v10920_v58  ;;  %v7497_v34 = vadd.f32 %v7496_v17, %v7495_v3  ;;  %v8551_v17 = vld [vmem:[#allocation8 + $0x110] sm:$0xff]  }
 0x36a   : > { %v7498_v36 = vpop.f32.mrf.mxu1  ;;  %7899 = vmatpush3.bf16.msra.mxu0 %v8551_v17 }
 0x36b   : > { %v10925_v11 = vadd.f32 %v7497_v34, %v10748_v26  ;;  %v10937_v26 = vpop.f32.mrf.mxu0 }
 0x36c   : > { %v7499_v40 = vpop.f32.mrf.mxu1  ;;  %11935 = vst [vmem:[#allocation37_spill] sm:$0xff] %v10937_v26 }
 0x36d   : > { %11933 = vst [vmem:[#allocation35_spill] sm:$0xff] %v10925_v11  ;;  %v7500_v37 = vadd.f32 %v7499_v40, %v7498_v36 }
 0x36e   : > { %v7501_v44 = vpop.f32.mrf.mxu1 }
 0x36f   : > { %v10930_v55 = vadd.f32 %v7500_v37, %v10751_v39  ;;  %v10942_v37 = vpop.f32.mrf.mxu0 }
 0x370   : > { %v7502_v38 = vpop.f32.mrf.mxu1 }
 0x371   : > { %v7503_v2 = vadd.f32 %v7502_v38, %v7501_v44 }
 0x372   : > { %v7504_v50 = vpop.f32.mrf.mxu1 }
 0x373   : > { %v10935_v3 = vadd.f32 %v7503_v2, %v10756_v23  ;;  %v10947_v23 = vpop.f32.mrf.mxu0 }
 0x374   : > { %v7505_v34 = vpop.f32.mrf.mxu1 }
 0x375   : > { %11934 = vst [vmem:[#allocation36_spill] sm:$0xff] %v10935_v3  ;;  %v7506_v11 = vadd.f32 %v7505_v34, %v7504_v50  ;;  %v10952_v6 = vpop.f32.mrf.mxu0  ;;  %v8554_v34 = vld [vmem:[#allocation8 + $0x148] sm:$0xff]  }
 0x376   : > { %v7507_v36 = vpop.f32.mrf.mxu1  ;;  %7900 = vmatprep.subr.bf16.mxu0 %v8554_v34 }
 0x377   : > { %v10940_v39 = vadd.f32 %v7506_v11, %v10759_v1 }
 0x378   : > { %v7508_v40 = vpop.f32.mrf.mxu1 }
 0x379   : > { %11936 = vst [vmem:[#allocation38_spill] sm:$0xff] %v10940_v39  ;;  %v7509_v44 = vadd.f32 %v7508_v40, %v7507_v36  ;;  %v8555_v40 = vld [vmem:[#allocation8 + $0x108] sm:$0xff]  }
 0x37a   : > { %v7510_v38 = vpop.f32.mrf.mxu1  ;;  %7901 = vmatpush3.bf16.msra.mxu0 %v8555_v40  ;;  %v7555_v40 = vadd.f32 %v10797_v25, %v10794_v61 }
 0x37b   : > { %v10945_v58 = vadd.f32 %v7509_v44, %v10764_v12  ;;  %v10957_v12 = vpop.f32.mrf.mxu0 }
 0x37c   : > { %v7511_v2 = vpop.f32.mrf.mxu1 }
 0x37d   : > { %11937 = vst [vmem:[#allocation39_spill] sm:$0xff] %v10945_v58  ;;  %v7512_v3 = vadd.f32 %v7511_v2, %v7510_v38 }
 0x37e   : > { %v7513_v26 = vpop.f32.mrf.mxu1 }
 0x37f   : > { %v10950_v50 = vadd.f32 %v7512_v3, %v10767_v33  ;;  %v10962_v3 = vpop.f32.mrf.mxu0 }
 0x380   : > { %v7514_v1 = vpop.f32.mrf.mxu1 }
 0x381   : > { %v7515_v11 = vadd.f32 %v7514_v1, %v7513_v26 }
 0x382   : > { %v7516_v17 = vpop.f32.mrf.mxu1 }
 0x383   : > { %v10955_v36 = vadd.f32 %v7515_v11, %v10772_v4  ;;  %v10969_v11 = vpop.f32.mrf.mxu0 }
 0x384   : > { %v7517_v44 = vpop.f32.mrf.mxu1 }
 0x385   : > { %11938 = vst [vmem:[#allocation40_spill] sm:$0xff] %v10955_v36  ;;  %v7518_v58 = vadd.f32 %v7517_v44, %v7516_v17  ;;  %v7552_v17 = vadd.f32 %v10789_v49, %v10787_v29  ;;  %v8559_v29 = vld [vmem:[#allocation8 + $0x100] sm:$0xff]  }
 0x386   : > { %v7519_v38 = vpop.f32.mrf.mxu1 }
 0x387   : > { %v10960_v33 = vadd.f32 %v7518_v58, %v10775_v48  ;;  %v10977_v48 = vpop.f32.mrf.mxu0  ;;  %v4009_v44 = vadd.f32 %v7552_v17, %v10802_v35  ;;  %v4012_v35 = vadd.f32 %v7555_v40, %v10809_v16 }
 0x388   : > { %v7520_v2 = vpop.f32.mrf.mxu1 }
 0x389   : > { %11939 = vst [vmem:[#allocation41_spill] sm:$0xff] %v10960_v33  ;;  %v7521_v26 = vadd.f32 %v7520_v2, %v7519_v38  ;;  %v10987_v38 = vld [vmem:[%s11806_s4] ss:$0 sm:$0xff]  ;;  %v8558_v2 = vld [vmem:[#allocation8 + $0x140] sm:$0xff]   ;;  %v10989_v49 = vpop.f32.mrf.mxu0  ;;  %v7564_v33 = vadd.f32 %v10820_v20, %v10818_v22 }
 0x38a   : > { %v10964_v1 = vpop.f32.mrf.mxu1  ;;  %7902 = vmatprep.subr.bf16.mxu0 %v8558_v2  ;;  %v7567_v2 = vadd.f32 %v10827_v8, %v10825_v54 }
 0x38b   : > { %v10967_v4 = vadd.f32 %v7521_v26, %v10778_v57  ;;  %7903 = vmatpush3.bf16.msra.mxu0 %v8559_v29  ;;  %v11001_v39 = vpop.f32.mrf.mxu0  ;;  %v7576_v29 = vadd.f32 %v10848_v56, %v10846_v28 }
 0x38c   : > { %v10971_v36 = vpop.f32.mrf.mxu1 }
 0x38d   : > { %11940 = vst [vmem:[#allocation42_spill] sm:$0xff] %v10967_v4 }
 0x38e   : > { %v10975_v34 = vpop.f32.mrf.mxu1 }
 0x38f   : > { %11941 = vst [vmem:[#allocation43_spill] sm:$0xff] %v10975_v34 }
 0x390   : > { %v10979_v58 = vpop.f32.mrf.mxu1 }
 0x391   : > { %11942 = vst [vmem:[#allocation44_spill] sm:$0xff] %v10979_v58  ;;  %v7558_v58 = vadd.f32 %v10806_v46, %v10804_v31  ;;  %v7561_v31 = vadd.f32 %v10813_v53, %v10811_v27 }
 0x392   : > { %v8202_v57 = vpop.f32.mrf.mxu1 }
 0x393   : > { %v4170_v26 = vadd.f32 %v8202_v57, %v4009_v44  ;;  %v4017_v8 = vadd.f32 %v7558_v58, %v10816_v63  ;;  %v4020_v63 = vadd.f32 %v7561_v31, %v10823_v52  ;;  %v7573_v52 = vadd.f32 %v10841_v32, %v10839_v60  ;;  %v4488_v31 = vld [vmem:[#allocation4 + $0x2] sm:$0xff] }
 0x394   : > { %v4161_v4 = vpop.f32.mrf.mxu1 }
 0x395   : > { %v4297_v61 = vadd.f32 %v10987_v38, %v4170_v26  ;;  %v4162_v25 = vadd.f32 %v4161_v4, %v10791_v10  ;;  %v4025_v4 = vadd.f32 %v7564_v33, %v10830_v43 }
 0x396   : > { %v8203_v17 = vpop.f32.mrf.mxu1 }
 0x397   : > { %v4329_v44 = vmax.f32 %v4297_v61, 0.0  ;;  %v4295_v57 = vadd.f32 %v10987_v38, %v4162_v25  ;;  %v4173_v34 = vadd.f32 %v8203_v17, %v4012_v35  ;;  %v11012_v61 = vpop.f32.mrf.mxu0  ;;  %v7570_v25 = vadd.f32 %v10834_v47, %v10832_v59 }
 0x398   : > { %v4164_v22 = vpop.f32.mrf.mxu1  ;;  %v4041_v47 = vadd.f32 %v7576_v29, %v10858_v5 }
 0x399   : > { %4362 = vst [vmem:[#allocation4 + $0x31] sm:$0xff] %v4329_v44  ;;  %v4327_v20 = vmax.f32 %v4295_v57, 0.0  ;;  %v4298_v10 = vadd.f32 %v10987_v38, %v4173_v34  ;;  %v4165_v16 = vadd.f32 %v4164_v22, %v10799_v18  ;;  %v4028_v18 = vadd.f32 %v7567_v2, %v10837_v0  ;;  %v11024_v57 = vpop.f32.mrf.mxu0 }
 0x39a   : > { %v8206_v46 = vpop.f32.mrf.mxu1  ;;  %v7579_v0 = vadd.f32 %v10855_v9, %v10853_v21 }
 0x39b   : > { %4360 = vst [vmem:[#allocation4 + $0x19] sm:$0xff] %v4327_v20  ;;  %v4330_v40 = vmax.f32 %v4298_v10, 0.0  ;;  %v4296_v26 = vadd.f32 %v10987_v38, %v4165_v16  ;;  %v4186_v54 = vadd.f32 %v8206_v46, %v4025_v4  ;;  %v11030_v16 = vld [vmem:[#allocation8 + $0x238] sm:$0xff]   ;;  %v4033_v4 = vadd.f32 %v7570_v25, %v10844_v30  ;;  %v11036_v5 = vpop.f32.mrf.mxu0 }
 0x39c   : > { %v4177_v34 = vpop.f32.mrf.mxu1  ;;  %v4489_v46 = vld [vmem:[#allocation4 + $0xa] sm:$0xff]  ;;  %8232 = vmatprep.subr.bf16.mxu0 %v11030_v16 }
 0x39d   : > { %4363 = vst [vmem:[#allocation4 + $0x39] sm:$0xff] %v4330_v40  ;;  %v4328_v43 = vmax.f32 %v4296_v26, 0.0  ;;  %v4301_v27 = vadd.f32 %v10987_v38, %v4186_v54  ;;  %v4178_v53 = vadd.f32 %v4177_v34, %v4017_v8  ;;  %v11016_v33 = vpack.c.bf16 %v4330_v40, %v4329_v44  ;;  %v11943_v8 = vld [vmem:[#allocation25_spill] sm:$0xff]  ;;  %v11944_v34 = vld [vmem:[#allocation23_spill] sm:$0xff] }
 0x39e   : > { %v8207_v35 = vpop.f32.mrf.mxu1  ;;  %v7588_v40 = vadd.f32 %v10876_v13, %v10874_v62  ;;  %v4044_v29 = vadd.f32 %v7579_v0, %v11943_v8  ;;  %v4520_v13 = vpack.c.bf16 %v4489_v46, %v4488_v31  ;;  %v7591_v0 = vadd.f32 %v10883_v7, %v10881_v41 }
 0x39f   : > { %4361 = vst [vmem:[#allocation4 + $0x21] sm:$0xff] %v4328_v43  ;;  %v4333_v28 = vmax.f32 %v4301_v27, 0.0  ;;  %v4299_v56 = vadd.f32 %v10987_v38, %v4178_v53  ;;  %v4189_v58 = vadd.f32 %v8207_v35, %v4028_v18  ;;  %v4473_v17 = vpack.c.bf16 %v4328_v43, %v4327_v20  ;;  %v11945_v18 = vld [vmem:[#allocation26_spill] sm:$0xff]  ;;  %v11946_v27 = vld [vmem:[#allocation24_spill] sm:$0xff] }
 0x3a0   : > { %v4180_v2 = vpop.f32.mrf.mxu1  ;;  %v7582_v30 = vadd.f32 %v11945_v18, %v11944_v34  ;;  %v4036_v53 = vadd.f32 %v7573_v52, %v11946_v27  ;;  %v11947_v52 = vld [vmem:[#allocation32_spill] sm:$0xff]  ;;  %v7600_v34 = vadd.f32 %v10907_v19, %v10902_v24  ;;  %v8552_v27 = vld [vmem:[#allocation8 + $0x1e8] sm:$0xff]   ;;  %v11953_v19 = vld [vmem:[#allocation34_spill] sm:$0xff] }
 0x3a1   : > { %4366 = vst [vmem:[#allocation4 + $0x61] sm:$0xff] %v4333_v28  ;;  %v4331_v44 = vmax.f32 %v4299_v56, 0.0  ;;  %v4302_v22 = vadd.f32 %v10987_v38, %v4189_v58  ;;  %v4181_v59 = vadd.f32 %v4180_v2, %v4020_v63  ;;  %5448 = vmatprep.mubr.bf16.mxu0 %v4473_v17  ;;  %v11952_v24 = vld [vmem:[#allocation31_spill] sm:$0xff] }
 0x3a2   : > { %v8210_v10 = vpop.f32.mrf.mxu1  ;;  %v4536_v25 = vld [vmem:[#allocation4 + $0x18] sm:$0xff] }
 0x3a3   : > { %4364 = vst [vmem:[#allocation4 + $0x49] sm:$0xff] %v4331_v44  ;;  %v4334_v20 = vmax.f32 %v4302_v22, 0.0  ;;  %v4300_v21 = vadd.f32 %v10987_v38, %v4181_v59  ;;  %v4202_v9 = vadd.f32 %v8210_v10, %v4041_v47  ;;  %v8545_v22 = vld [vmem:[#allocation8 + $0x1b8] sm:$0xff]   ;;  %v11049_v59 = vpop.f32.mrf.mxu0  ;;  %v4057_v10 = vadd.f32 %v7588_v40, %v11947_v52 }
 0x3a4   : > { %v4193_v26 = vpop.f32.mrf.mxu1  ;;  %v4539_v35 = vld [vmem:[#allocation4 + $0x38] sm:$0xff] }
 0x3a5   : > { %4367 = vst [vmem:[#allocation4 + $0x69] sm:$0xff] %v4334_v20  ;;  %v4332_v60 = vmax.f32 %v4300_v21, 0.0  ;;  %v4305_v32 = vadd.f32 %v10987_v38, %v4202_v9  ;;  %v4194_v54 = vadd.f32 %v4193_v26, %v4033_v4  ;;  %v11044_v63 = vpack.c.bf16 %v4334_v20, %v4333_v28  ;;  %v4538_v21 = vld [vmem:[#allocation4 + $0x30] sm:$0xff]  ;;  %v8548_v4 = vld [vmem:[#allocation8 + $0x1f0] sm:$0xff]   ;;  %v11063_v18 = vpop.f32.mrf.mxu0 }
 0x3a6   : > { %v8211_v43 = vpop.f32.mrf.mxu1  ;;  %v4537_v62 = vld [vmem:[#allocation4 + $0x20] sm:$0xff]  ;;  %v11053_v46 = vpack.c.bf16 %v4539_v35, %v4538_v21 }
 0x3a7   : > { %4365 = vst [vmem:[#allocation4 + $0x51] sm:$0xff] %v4332_v60  ;;  %v4337_v56 = vmax.f32 %v4305_v32, 0.0  ;;  %v4303_v58 = vadd.f32 %v10987_v38, %v4194_v54  ;;  %v4205_v17 = vadd.f32 %v8211_v43, %v4044_v29  ;;  %v4568_v2 = vpack.c.bf16 %v4537_v62, %v4536_v25  ;;  %v11948_v26 = vld [vmem:[#allocation28_spill] sm:$0xff]  ;;  %v11949_v32 = vld [vmem:[#allocation27_spill] sm:$0xff]  ;;  %v11950_v54 = vld [vmem:[#allocation30_spill] sm:$0xff] }
 0x3a8   : > { %v4196_v47 = vpop.f32.mrf.mxu1  ;;  %v4475_v9 = vpack.c.bf16 %v4332_v60, %v4331_v44  ;;  %v7585_v41 = vadd.f32 %v11949_v32, %v11948_v26  ;;  %v4049_v8 = vadd.f32 %v7582_v30, %v11950_v54  ;;  %v8549_v29 = vld [vmem:[#allocation8 + $0x1b0] sm:$0xff]   ;;  %v4060_v62 = vadd.f32 %v7591_v0, %v10893_v14  ;;  %v11954_v14 = vld [vmem:[#allocation21_spill] sm:$0xff] }
 0x3a9   : > { %4370 = vst [vmem:[#allocation4 + $0x91] sm:$0xff] %v4337_v56  ;;  %v4335_v28 = vmax.f32 %v4303_v58, 0.0  ;;  %v4306_v20 = vadd.f32 %v10987_v38, %v4205_v17  ;;  %v4197_v31 = vadd.f32 %v4196_v47, %v4036_v53  ;;  %5601 = vmatprep.mubr.bf16.mxu1 %v4568_v2  ;;  %5449 = vmatmul.mubr.bf16.gmra.mxu0 %v4568_v2  ;;  %v4491_v35 = vld [vmem:[#allocation4 + $0x22] sm:$0xff] }
 0x3aa   : > { %v8214_v7 = vpop.f32.mrf.mxu1  ;;  %5602 = vmatmul.mubr.bf16.vlgmr.msra.gmra.mxu1 %v4520_v13  ;;  %5456 = vmatprep.mubr.bf16.mxu0 %v11016_v33  ;;  %v4490_v13 = vld [vmem:[#allocation4 + $0x1a] sm:$0xff]  ;;  %v11951_v58 = vld [vmem:[#allocation29_spill] sm:$0xff]  ;;  %v7594_v47 = vadd.f32 %v11953_v19, %v11952_v24  ;;  %v7603_v0 = vadd.f32 %v11954_v14, %v10912_v45 }
 0x3ab   : > { %4368 = vst [vmem:[#allocation4 + $0x79] sm:$0xff] %v4335_v28  ;;  %v4338_v40 = vmax.f32 %v4306_v20, 0.0  ;;  %v4304_v44 = vadd.f32 %v10987_v38, %v4197_v31  ;;  %v4218_v60 = vadd.f32 %v8214_v7, %v4057_v10  ;;  %5609 = vmatprep.mubr.bf16.mxu1 %v11053_v46  ;;  %8001 = vmatpush3.bf16.msra.mxu1 %v8545_v22  ;;  %v11075_v20 = vpop.f32.mrf.mxu0  ;;  %v11955_v26 = vld [vmem:[#allocation17_spill] sm:$0xff]  ;;  %v11959_v24 = vld [vmem:[#allocation19_spill] sm:$0xff] }
 0x3ac   : > { %v4209_v43 = vpop.f32.mrf.mxu1  ;;  %8002 = vmatprep.subr.bf16.mxu1 %v8548_v4  ;;  %v4052_v17 = vadd.f32 %v7585_v41, %v11951_v58  ;;  %v8553_v4 = vld [vmem:[#allocation8 + $0x1a8] sm:$0xff]   ;;  %v4073_v32 = vadd.f32 %v7600_v34, %v11955_v26  ;;  %v4540_v41 = vld [vmem:[#allocation4 + $0x48] sm:$0xff]  ;;  %v4076_v19 = vadd.f32 %v7603_v0, %v11959_v24  ;;  %v7615_v0 = vadd.f32 %v10957_v12, %v10952_v6  ;;  %v11963_v24 = vld [vmem:[#allocation36_spill] sm:$0xff] }
 0x3ad   : > { %4371 = vst [vmem:[#allocation4 + $0x99] sm:$0xff] %v4338_v40  ;;  %v4336_v33 = vmax.f32 %v4304_v44, 0.0  ;;  %v4309_v53 = vadd.f32 %v10987_v38, %v4218_v60  ;;  %v4210_v25 = vadd.f32 %v4209_v43, %v4049_v8  ;;  %v11068_v22 = vpack.c.bf16 %v4338_v40, %v4337_v56  ;;  %v8556_v40 = vld [vmem:[#allocation8 + $0x1e0] sm:$0xff]   ;;  %v11956_v8 = vld [vmem:[#allocation33_spill] sm:$0xff] }
 0x3ae   : > { %v8215_v30 = vpop.f32.mrf.mxu1  ;;  %v4541_v2 = vld [vmem:[#allocation4 + $0x50] sm:$0xff]  ;;  %v11078_v56 = vpack.c.bf16 %v4491_v35, %v4490_v13  ;;  %v7612_v13 = vadd.f32 %v10947_v23, %v10942_v37  ;;  %v11094_v35 = vpop.f32.mrf.mxu0  ;;  %v8560_v58 = vld [vmem:[#allocation8 + $0x1d8] sm:$0xff]   ;;  %v7606_v37 = vadd.f32 %v10927_v51, %v10922_v15  ;;  %v8562_v15 = vld [vmem:[#allocation8 + $0x1d0] sm:$0xff]  }
 0x3af   : > { %4369 = vst [vmem:[#allocation4 + $0x81] sm:$0xff] %v4336_v33  ;;  %v4341_v52 = vmax.f32 %v4309_v53, 0.0  ;;  %v4307_v10 = vadd.f32 %v10987_v38, %v4210_v25  ;;  %v4221_v21 = vadd.f32 %v8215_v30, %v4060_v62  ;;  %8003 = vmatpush3.bf16.msra.mxu1 %v8549_v29  ;;  %v11080_v7 = vpack.c.bf16 %v4336_v33, %v4335_v28  ;;  %v11957_v29 = vld [vmem:[#allocation14_spill] sm:$0xff]  ;;  %v11958_v53 = vld [vmem:[#allocation15_spill] sm:$0xff]  ;;  %v11961_v12 = vld [vmem:[#allocation37_spill] sm:$0xff] }
 0x3b0   : > { %v4212_v31 = vpop.f32.mrf.mxu1  ;;  %8004 = vmatprep.subr.bf16.mxu1 %v8552_v27  ;;  %v11084_v45 = vpack.c.bf16 %v4541_v2, %v4540_v41  ;;  %v7597_v43 = vadd.f32 %v11957_v29, %v11956_v8  ;;  %v4065_v25 = vadd.f32 %v7594_v47, %v11958_v53  ;;  %v8557_v62 = vld [vmem:[#allocation8 + $0x1a0] sm:$0xff]   ;;  %v4089_v8 = vadd.f32 %v7612_v13, %v10930_v55  ;;  %v4542_v29 = vld [vmem:[#allocation4 + $0x60] sm:$0xff] }
 0x3b1   : > { %4374 = vst [vmem:[#allocation4 + $0xc1] sm:$0xff] %v4341_v52  ;;  %v4339_v44 = vmax.f32 %v4307_v10, 0.0  ;;  %v4310_v60 = vadd.f32 %v10987_v38, %v4221_v21  ;;  %v4213_v54 = vadd.f32 %v4212_v31, %v4052_v17  ;;  %5457 = vmatmul.mubr.bf16.gmra.mxu0 %v11053_v46  ;;  %v4492_v10 = vld [vmem:[#allocation4 + $0x32] sm:$0xff]  ;;  %v4493_v21 = vld [vmem:[#allocation4 + $0x3a] sm:$0xff]  ;;  %v4543_v31 = vld [vmem:[#allocation4 + $0x68] sm:$0xff] }
 0x3b2   : > { %v8218_v34 = vpop.f32.mrf.mxu1  ;;  %5610 = vmatmul.mubr.bf16.gmra.mxu1 %v11078_v56  ;;  %5464 = vmatprep.mubr.bf16.mxu0 %v4475_v9  ;;  %v11115_v6 = vpack.c.bf16 %v4543_v31, %v4542_v29  ;;  %v8563_v13 = vld [vmem:[#allocation8 + $0x190] sm:$0xff]  }
 0x3b3   : > { %4372 = vst [vmem:[#allocation4 + $0xa9] sm:$0xff] %v4339_v44  ;;  %v4342_v28 = vmax.f32 %v4310_v60, 0.0  ;;  %v4308_v27 = vadd.f32 %v10987_v38, %v4213_v54  ;;  %v4234_v33 = vadd.f32 %v8218_v34, %v4073_v32  ;;  %5617 = vmatprep.mubr.bf16.mxu1 %v11084_v45  ;;  %8005 = vmatpush3.bf16.msra.mxu1 %v8553_v4  ;;  %v11960_v4 = vld [vmem:[#allocation16_spill] sm:$0xff]  ;;  %v11106_v60 = vpop.f32.mrf.mxu0 }
 0x3b4   : > { %v4225_v30 = vpop.f32.mrf.mxu1  ;;  %8006 = vmatprep.subr.bf16.mxu1 %v8556_v40  ;;  %v4068_v14 = vadd.f32 %v7597_v43, %v11960_v4  ;;  %v8561_v40 = vld [vmem:[#allocation8 + $0x198] sm:$0xff]  }
 0x3b5   : > { %4375 = vst [vmem:[#allocation4 + $0xc9] sm:$0xff] %v4342_v28  ;;  %v4340_v9 = vmax.f32 %v4308_v27, 0.0  ;;  %v4313_v17 = vadd.f32 %v10987_v38, %v4234_v33  ;;  %v4226_v2 = vadd.f32 %v4225_v30, %v4065_v25  ;;  %v11099_v26 = vpack.c.bf16 %v4342_v28, %v4341_v52  ;;  %v11962_v25 = vld [vmem:[#allocation20_spill] sm:$0xff] }
 0x3b6   : > { %v8219_v47 = vpop.f32.mrf.mxu1  ;;  %v11109_v52 = vpack.c.bf16 %v4493_v21, %v4492_v10  ;;  %v7609_v27 = vadd.f32 %v11961_v12, %v10932_v42  ;;  %v7624_v30 = vadd.f32 %v11012_v61, %v11001_v39  ;;  %v7635_v42 = vpop.f32.mrf.mxu0  ;;  %v4494_v10 = vld [vmem:[#allocation4 + $0x4a] sm:$0xff]  ;;  %v4495_v21 = vld [vmem:[#allocation4 + $0x52] sm:$0xff]  ;;  %v4545_v39 = vld [vmem:[#allocation4 + $0x80] sm:$0xff] }
 0x3b7   : > { %4373 = vst [vmem:[#allocation4 + $0xb1] sm:$0xff] %v4340_v9  ;;  %v4345_v23 = vmax.f32 %v4313_v17, 0.0  ;;  %v4311_v32 = vadd.f32 %v10987_v38, %v4226_v2  ;;  %v4237_v41 = vadd.f32 %v8219_v47, %v4076_v19  ;;  %8007 = vmatpush3.bf16.msra.mxu1 %v8557_v62  ;;  %v11111_v43 = vpack.c.bf16 %v4340_v9, %v4339_v44  ;;  %v8564_v9 = vld [vmem:[#allocation8 + $0x1c8] sm:$0xff]  }
 0x3b8   : > { %v4228_v54 = vpop.f32.mrf.mxu1  ;;  %8008 = vmatprep.subr.bf16.mxu1 %v8560_v58  ;;  %v4081_v62 = vadd.f32 %v7606_v37, %v11962_v25  ;;  %v4092_v19 = vadd.f32 %v7615_v0, %v11963_v24  ;;  %v7618_v47 = vadd.f32 %v10969_v11, %v10962_v3  ;;  %v7627_v37 = vadd.f32 %v11036_v5, %v11024_v57  ;;  %v8566_v0 = vld [vmem:[#allocation8 + $0x188] sm:$0xff]   ;;  %v7637_v3 = vpop.f32.mrf.mxu0  ;;  %v8567_v57 = vld [vmem:[#allocation8 + $0x1c0] sm:$0xff]   ;;  %v4496_v24 = vld [vmem:[#allocation4 + $0x62] sm:$0xff] }
 0x3b9   : > { %4378 = vst [vmem:[#allocation4 + $0xf1] sm:$0xff] %v4345_v23  ;;  %v4343_v51 = vmax.f32 %v4311_v32, 0.0  ;;  %v4314_v34 = vadd.f32 %v10987_v38, %v4237_v41  ;;  %v4229_v28 = vadd.f32 %v4228_v54, %v4068_v14  ;;  %5465 = vmatmul.mubr.bf16.gmra.mxu0 %v11084_v45  ;;  %v11964_v14 = vld [vmem:[#allocation35_spill] sm:$0xff]  ;;  %v7524_v54 = vadd.f32 %v10971_v36, %v10964_v1 }
 0x3ba   : > { %v8222_v55 = vpop.f32.mrf.mxu1  ;;  %5618 = vmatmul.mubr.bf16.gmra.mxu1 %v11109_v52  ;;  %5472 = vmatprep.mubr.bf16.mxu0 %v11044_v63  ;;  %v4084_v31 = vadd.f32 %v7609_v27, %v11964_v14  ;;  %v11139_v29 = vpack.c.bf16 %v4495_v21, %v4494_v10  ;;  %v7621_v36 = vadd.f32 %v10989_v49, %v10977_v48  ;;  %v11967_v49 = vld [vmem:[#allocation43_spill] sm:$0xff] }
 0x3bb   : > { %4376 = vst [vmem:[#allocation4 + $0xd9] sm:$0xff] %v4343_v51  ;;  %v4346_v44 = vmax.f32 %v4314_v34, 0.0  ;;  %v4312_v33 = vadd.f32 %v10987_v38, %v4229_v28  ;;  %v4250_v53 = vadd.f32 %v8222_v55, %v4089_v8  ;;  %5625 = vmatprep.mubr.bf16.mxu1 %v11115_v6  ;;  %8009 = vmatpush3.bf16.msra.mxu1 %v8561_v40  ;;  %v11965_v55 = vld [vmem:[#allocation38_spill] sm:$0xff] }
 0x3bc   : > { %v4241_v58 = vpop.f32.mrf.mxu1  ;;  %8010 = vmatprep.subr.bf16.mxu1 %v8562_v15  ;;  %v4105_v8 = vadd.f32 %v7624_v30, %v10950_v50  ;;  %v7636_v48 = vadd.f32 %v7635_v42, %v11106_v60  ;;  %v7638_v30 = vpop.f32.mrf.mxu0  ;;  %v7630_v10 = vadd.f32 %v11063_v18, %v11049_v59  ;;  %v11970_v60 = vld [vmem:[#allocation39_spill] sm:$0xff]  ;;  %v4546_v59 = vld [vmem:[#allocation4 + $0x90] sm:$0xff] }
 0x3bd   : > { %4379 = vst [vmem:[#allocation4 + $0xf9] sm:$0xff] %v4346_v44  ;;  %v4344_v63 = vmax.f32 %v4312_v33, 0.0  ;;  %v4317_v17 = vadd.f32 %v10987_v38, %v4250_v53  ;;  %v4242_v2 = vadd.f32 %v4241_v58, %v4081_v62  ;;  %v11131_v61 = vpack.c.bf16 %v4346_v44, %v4345_v23  ;;  %v4544_v23 = vld [vmem:[#allocation4 + $0x78] sm:$0xff]  ;;  %v8568_v33 = vld [vmem:[#allocation8 + $0x180] sm:$0xff]   ;;  %v11968_v62 = vld [vmem:[#allocation44_spill] sm:$0xff] }
 0x3be   : > { %v8223_v4 = vpop.f32.mrf.mxu1  ;;  %v11145_v12 = vpack.c.bf16 %v4545_v39, %v4544_v23  ;;  %v4097_v44 = vadd.f32 %v7618_v47, %v11965_v55  ;;  %v11966_v53 = vld [vmem:[#allocation18_spill] sm:$0xff]  ;;  %v4100_v42 = vadd.f32 %v7621_v36, %v11970_v60  ;;  %v4547_v47 = vld [vmem:[#allocation4 + $0x98] sm:$0xff]  ;;  %v7639_v14 = vadd.f32 %v7638_v30, %v7637_v3 }
 0x3bf   : > { %4377 = vst [vmem:[#allocation4 + $0xe1] sm:$0xff] %v4344_v63  ;;  %v4349_v32 = vmax.f32 %v4317_v17, 0.0  ;;  %v4315_v41 = vadd.f32 %v10987_v38, %v4242_v2  ;;  %v4253_v40 = vadd.f32 %v8223_v4, %v4092_v19  ;;  %8011 = vmatpush3.bf16.msra.mxu1 %v8563_v13  ;;  %v11141_v15 = vpack.c.bf16 %v4344_v63, %v4343_v51  ;;  %v11969_v17 = vld [vmem:[#allocation40_spill] sm:$0xff]  ;;  %v4497_v19 = vld [vmem:[#allocation4 + $0x6a] sm:$0xff] }
 0x3c0   : > { %v4244_v11 = vpop.f32.mrf.mxu1  ;;  %8012 = vmatprep.subr.bf16.mxu1 %v8564_v9  ;;  %v3960_v25 = vadd.f32 %v7524_v54, %v11966_v53  ;;  %v7527_v13 = vadd.f32 %v11968_v62, %v11967_v49  ;;  %v4108_v2 = vadd.f32 %v7627_v37, %v11969_v17  ;;  %v11173_v23 = vpack.c.bf16 %v4547_v47, %v4546_v59  ;;  %v4501_v47 = vld [vmem:[#allocation4 + $0x9a] sm:$0xff] }
 0x3c1   : > { %4382 = vst [vmem:[#allocation4 + $0x121] sm:$0xff] %v4349_v32  ;;  %v4347_v5 = vmax.f32 %v4315_v41, 0.0  ;;  %v4318_v34 = vadd.f32 %v10987_v38, %v4253_v40  ;;  %v4245_v28 = vadd.f32 %v4244_v11, %v4084_v31  ;;  %5473 = vmatmul.mubr.bf16.gmra.mxu0 %v11115_v6  ;;  %v11971_v40 = vld [vmem:[#allocation22_spill] sm:$0xff]  ;;  %v11167_v11 = vpack.c.bf16 %v4497_v19, %v4496_v24 }
 0x3c2   : > { %v8226_v50 = vpop.f32.mrf.mxu1  ;;  %5626 = vmatmul.mubr.bf16.gmra.mxu1 %v11139_v29  ;;  %5480 = vmatprep.mubr.bf16.mxu0 %v11080_v7  ;;  %v3963_v37 = vadd.f32 %v7527_v13, %v11971_v40  ;;  %v4121_v54 = vadd.f32 %v7636_v48, %v3960_v25  ;;  %v11973_v13 = vld [vmem:[#allocation42_spill] sm:$0xff] }
 0x3c3   : > { %4380 = vst [vmem:[#allocation4 + $0x109] sm:$0xff] %v4347_v5  ;;  %v4350_v1 = vmax.f32 %v4318_v34, 0.0  ;;  %v4316_v51 = vadd.f32 %v10987_v38, %v4245_v28  ;;  %v4266_v27 = vadd.f32 %v8226_v50, %v4105_v8  ;;  %5633 = vmatprep.mubr.bf16.mxu1 %v11145_v12  ;;  %8013 = vmatpush3.bf16.msra.mxu1 %v8566_v0  ;;  %v11972_v50 = vld [vmem:[#allocation41_spill] sm:$0xff] }
 0x3c4   : > { %v4257_v7 = vpop.f32.mrf.mxu1  ;;  %8014 = vmatprep.subr.bf16.mxu1 %v8567_v57  ;;  %v7633_v57 = vadd.f32 %v11094_v35, %v11075_v20  ;;  %v4124_v35 = vadd.f32 %v7639_v14, %v3963_v37  ;;  %v4551_v14 = vld [vmem:[#allocation4 + $0xc8] sm:$0xff]  ;;  %v4503_v37 = vld [vmem:[#allocation4 + $0xb2] sm:$0xff] }
 0x3c5   : > { %4383 = vst [vmem:[#allocation4 + $0x129] sm:$0xff] %v4350_v1  ;;  %v4348_v58 = vmax.f32 %v4316_v51, 0.0  ;;  %v4321_v9 = vadd.f32 %v10987_v38, %v4266_v27  ;;  %v4258_v63 = vadd.f32 %v4257_v7, %v4097_v44  ;;  %v11163_v4 = vpack.c.bf16 %v4350_v1, %v4349_v32  ;;  %v4498_v44 = vld [vmem:[#allocation4 + $0x7a] sm:$0xff]  ;;  %v4502_v40 = vld [vmem:[#allocation4 + $0xaa] sm:$0xff] }
 0x3c6   : > { %v8227_v21 = vpop.f32.mrf.mxu1  ;;  %v4113_v1 = vadd.f32 %v7630_v10, %v11972_v50  ;;  %v4116_v30 = vadd.f32 %v7633_v57, %v11973_v13  ;;  %v4505_v57 = vld [vmem:[#allocation4 + $0xca] sm:$0xff]  ;;  %v4506_v50 = vld [vmem:[#allocation4 + $0xda] sm:$0xff] }
 0x3c7   : > { %4381 = vst [vmem:[#allocation4 + $0x111] sm:$0xff] %v4348_v58  ;;  %v4353_v31 = vmax.f32 %v4321_v9, 0.0  ;;  %v4319_v39 = vadd.f32 %v10987_v38, %v4258_v63  ;;  %v4269_v41 = vadd.f32 %v8227_v21, %v4108_v2  ;;  %8015 = vmatpush3.bf16.msra.mxu1 %v8568_v33  ;;  %v11169_v18 = vpack.c.bf16 %v4348_v58, %v4347_v5  ;;  %v4499_v33 = vld [vmem:[#allocation4 + $0x82] sm:$0xff] }
 0x3c8   : > { %v4260_v0 = vpop.f32.mrf.mxu1  ;;  %v11187_v58 = vpack.c.bf16 %v4499_v33, %v4498_v44  ;;  %v4548_v9 = vld [vmem:[#allocation4 + $0xa8] sm:$0xff]  ;;  %v4558_v33 = vld [vmem:[#allocation4 + $0x120] sm:$0xff] }
 0x3c9   : > { %4386 = vst [vmem:[#allocation4 + $0x151] sm:$0xff] %v4353_v31  ;;  %v4351_v8 = vmax.f32 %v4319_v39, 0.0  ;;  %v4322_v32 = vadd.f32 %v10987_v38, %v4269_v41  ;;  %v4261_v3 = vadd.f32 %v4260_v0, %v4100_v42  ;;  %5481 = vmatmul.mubr.bf16.gmra.mxu0 %v11145_v12  ;;  %v4500_v42 = vld [vmem:[#allocation4 + $0x92] sm:$0xff]  ;;  %v4550_v41 = vld [vmem:[#allocation4 + $0xc0] sm:$0xff] }
 0x3ca   : > { %v8230_v34 = vpop.f32.mrf.mxu1  ;;  %5634 = vmatmul.mubr.bf16.gmra.mxu1 %v11167_v11  ;;  %5488 = vmatprep.mubr.bf16.mxu0 %v11068_v22  ;;  %v4549_v22 = vld [vmem:[#allocation4 + $0xb0] sm:$0xff]  ;;  %v11201_v39 = vpack.c.bf16 %v4501_v47, %v4500_v42 }
 0x3cb   : > { %4384 = vst [vmem:[#allocation4 + $0x139] sm:$0xff] %v4351_v8  ;;  %v4354_v5 = vmax.f32 %v4322_v32, 0.0  ;;  %v4320_v28 = vadd.f32 %v10987_v38, %v4261_v3  ;;  %v4282_v36 = vadd.f32 %v8230_v34, %v4121_v54  ;;  %5641 = vmatprep.mubr.bf16.mxu1 %v11173_v23  ;;  %v11193_v19 = vpack.c.bf16 %v4549_v22, %v4548_v9  ;;  %v4553_v54 = vld [vmem:[#allocation4 + $0xe0] sm:$0xff]  ;;  %v4552_v32 = vld [vmem:[#allocation4 + $0xd8] sm:$0xff] }
 0x3cc   : > { %v4273_v51 = vpop.f32.mrf.mxu1  ;;  %v11214_v3 = vpack.c.bf16 %v4553_v54, %v4552_v32  ;;  %v4555_v34 = vld [vmem:[#allocation4 + $0xf8] sm:$0xff] }
 0x3cd   : > { %4387 = vst [vmem:[#allocation4 + $0x159] sm:$0xff] %v4354_v5  ;;  %v4352_v27 = vmax.f32 %v4320_v28, 0.0  ;;  %v4325_v55 = vadd.f32 %v10987_v38, %v4282_v36  ;;  %v4274_v20 = vadd.f32 %v4273_v51, %v4113_v1  ;;  %v11183_v25 = vpack.c.bf16 %v4354_v5, %v4353_v31  ;;  %v4554_v28 = vld [vmem:[#allocation4 + $0xf0] sm:$0xff]  ;;  %v4584_v54 = vld [vmem:[#allocation4 + $0x19] sm:$0xff] }
 0x3ce   : > { %v8231_v53 = vpop.f32.mrf.mxu1  ;;  %v11222_v36 = vpack.c.bf16 %v4555_v34, %v4554_v28  ;;  %v4557_v1 = vld [vmem:[#allocation4 + $0x110] sm:$0xff]  ;;  %v4730_v32 = vld [vmem:[#allocation4 + $0x39] sm:$0xff] }
 0x3cf   : > { %4385 = vst [vmem:[#allocation4 + $0x141] sm:$0xff] %v4352_v27  ;;  %v4357_v48 = vmax.f32 %v4325_v55, 0.0  ;;  %v4323_v49 = vadd.f32 %v10987_v38, %v4274_v20  ;;  %v4285_v62 = vadd.f32 %v8231_v53, %v4124_v35  ;;  %v11189_v63 = vpack.c.bf16 %v4352_v27, %v4351_v8  ;;  %v4556_v27 = vld [vmem:[#allocation4 + $0x108] sm:$0xff]  ;;  %v4508_v20 = vld [vmem:[#allocation4 + $0xf2] sm:$0xff]  ;;  %v8569_v28 = vld [vmem:[#allocation8 + $0x230] sm:$0xff]  }
 0x3d0   : > { %v4276_v7 = vpop.f32.mrf.mxu1  ;;  %v11211_v8 = vpack.c.bf16 %v4503_v37, %v4502_v40  ;;  %v11230_v55 = vpack.c.bf16 %v4557_v1, %v4556_v27  ;;  %v4559_v35 = vld [vmem:[#allocation4 + $0x128] sm:$0xff]  ;;  %v4729_v34 = vld [vmem:[#allocation4 + $0x31] sm:$0xff] }
 0x3d1   : > { %4390 = vst [vmem:[#allocation4 + $0x181] sm:$0xff] %v4357_v48  ;;  %v4355_v17 = vmax.f32 %v4323_v49, 0.0  ;;  %v4326_v2 = vadd.f32 %v10987_v38, %v4285_v62  ;;  %v4277_v24 = vadd.f32 %v4276_v7, %v4116_v30  ;;  %5489 = vmatmul.mubr.bf16.gmra.mxu0 %v11173_v23  ;;  %v11238_v53 = vpack.c.bf16 %v4559_v35, %v4558_v33  ;;  %v4510_v22 = vld [vmem:[#allocation4 + $0x10a] sm:$0xff]  ;;  %v4512_v30 = vld [vmem:[#allocation4 + $0x122] sm:$0xff] }
 0x3d2   : > { %5642 = vmatmul.mubr.bf16.gmra.mxu1 %v11187_v58  ;;  %5496 = vmatprep.mubr.bf16.mxu0 %v11111_v43  ;;  %v11204_v43 = vpack.c.bf16 %v4551_v14, %v4550_v41  ;;  %v4560_v62 = vld [vmem:[#allocation4 + $0x138] sm:$0xff]  ;;  %v4585_v37 = vld [vmem:[#allocation4 + $0x21] sm:$0xff]  ;;  %v4731_v1 = vld [vmem:[#allocation4 + $0x49] sm:$0xff] }
 0x3d3   : > { %4388 = vst [vmem:[#allocation4 + $0x169] sm:$0xff] %v4355_v17  ;;  %v4358_v10 = vmax.f32 %v4326_v2, 0.0  ;;  %v4324_v21 = vadd.f32 %v10987_v38, %v4277_v24  ;;  %5649 = vmatprep.mubr.bf16.mxu1 %v11193_v19  ;;  %v8571_v27 = vld [vmem:[#allocation8 + $0x220] sm:$0xff]   ;;  %v8573_v35 = vld [vmem:[#allocation8 + $0x210] sm:$0xff]  }
 0x3d4   : > { %v4563_v7 = vld [vmem:[#allocation4 + $0x158] sm:$0xff] }
 0x3d5   : > { %4391 = vst [vmem:[#allocation4 + $0x189] sm:$0xff] %v4358_v10  ;;  %v4356_v60 = vmax.f32 %v4324_v21, 0.0  ;;  %v4516_v47 = vld [vmem:[#allocation4 + $0x152] sm:$0xff] }
 0x3d6   : > { %v4561_v48 = vld [vmem:[#allocation4 + $0x140] sm:$0xff] }
 0x3d7   : > { %4389 = vst [vmem:[#allocation4 + $0x171] sm:$0xff] %v4356_v60  ;;  %v11199_v31 = vpack.c.bf16 %v4356_v60, %v4355_v17  ;;  %v7680_v38 = vpop.f32.mrf.mxu0  ;;  %v11246_v13 = vpack.c.bf16 %v4561_v48, %v4560_v62  ;;  %v4562_v17 = vld [vmem:[#allocation4 + $0x150] sm:$0xff]  ;;  %v4514_v24 = vld [vmem:[#allocation4 + $0x13a] sm:$0xff] }
 0x3d8   : > { %v11254_v2 = vpack.c.bf16 %v4563_v7, %v4562_v17 }
 0x3d9   : > { %5497 = vmatmul.mubr.bf16.gmra.mxu0 %v11193_v19  ;;  %v7681_v0 = vpop.f32.mrf.mxu0 }
 0x3da   : > { %5650 = vmatmul.mubr.bf16.gmra.mxu1 %v11201_v39  ;;  %5504 = vmatprep.mubr.bf16.mxu0 %v11099_v26  ;;  %v11209_v59 = vadd.f32 %v7681_v0, %v7680_v38  ;;  %v4504_v26 = vld [vmem:[#allocation4 + $0xc2] sm:$0xff] }
 0x3db   : > { %5657 = vmatprep.mubr.bf16.mxu1 %v11204_v43  ;;  %v11219_v5 = vpack.c.bf16 %v4505_v57, %v4504_v26  ;;  %v4564_v60 = vld [vmem:[#allocation4 + $0x168] sm:$0xff]  ;;  %v4566_v38 = vld [vmem:[#allocation4 + $0x180] sm:$0xff]  ;;  %v4616_v26 = vpack.c.bf16 %v4585_v37, %v4584_v54 }
 0x3dc   : > { %v4567_v14 = vld [vmem:[#allocation4 + $0x188] sm:$0xff] }
 0x3dd   : > { %v11270_v40 = vpack.c.bf16 %v4567_v14, %v4566_v38 }
 0x3de   : > { %v4565_v10 = vld [vmem:[#allocation4 + $0x170] sm:$0xff] }
 0x3df   : > { %v11262_v42 = vpack.c.bf16 %v4565_v10, %v4564_v60  ;;  %v4519_v0 = vld [vmem:[#allocation4 + $0x172] sm:$0xff]  ;;  %v4747_v60 = vld [vmem:[#allocation4 + $0x109] sm:$0xff] }
 0x3e1   : > { %5505 = vmatmul.mubr.bf16.gmra.mxu0 %v11204_v43 }
 0x3e2   : > { %5658 = vmatmul.mubr.bf16.gmra.mxu1 %v11211_v8  ;;  %5512 = vmatprep.mubr.bf16.mxu0 %v11141_v15  ;;  %v4507_v15 = vld [vmem:[#allocation4 + $0xe2] sm:$0xff] }
 0x3e3   : > { %5665 = vmatprep.mubr.bf16.mxu1 %v11214_v3  ;;  %v11227_v51 = vpack.c.bf16 %v4507_v15, %v4506_v50  ;;  %v4761_v50 = vpack.c.bf16 %v4730_v32, %v4729_v34  ;;  %v4732_v15 = vld [vmem:[#allocation4 + $0x51] sm:$0xff]  ;;  %v4750_v32 = vld [vmem:[#allocation4 + $0x129] sm:$0xff] }
 0x3e9   : > { %5513 = vmatmul.mubr.bf16.gmra.mxu0 %v11214_v3 }
 0x3ea   : > { %5666 = vmatmul.mubr.bf16.gmra.mxu1 %v11219_v5  ;;  %5520 = vmatprep.mubr.bf16.mxu0 %v11131_v61  ;;  %v4509_v61 = vld [vmem:[#allocation4 + $0xfa] sm:$0xff] }
 0x3eb   : > { %5673 = vmatprep.mubr.bf16.mxu1 %v11222_v36  ;;  %v11235_v44 = vpack.c.bf16 %v4509_v61, %v4508_v20  ;;  %v4762_v20 = vpack.c.bf16 %v4732_v15, %v4731_v1  ;;  %v4734_v61 = vld [vmem:[#allocation4 + $0x69] sm:$0xff] }
 0x3f1   : > { %5521 = vmatmul.mubr.bf16.gmra.mxu0 %v11222_v36 }
 0x3f2   : > { %5674 = vmatmul.mubr.bf16.gmra.mxu1 %v11227_v51  ;;  %5528 = vmatprep.mubr.bf16.mxu0 %v11169_v18  ;;  %v4511_v18 = vld [vmem:[#allocation4 + $0x112] sm:$0xff] }
 0x3f3   : > { %5681 = vmatprep.mubr.bf16.mxu1 %v11230_v55  ;;  %v11243_v49 = vpack.c.bf16 %v4511_v18, %v4510_v22  ;;  %v4735_v22 = vld [vmem:[#allocation4 + $0x79] sm:$0xff]  ;;  %v8575_v18 = vld [vmem:[#allocation8 + $0x200] sm:$0xff]  }
 0x3f9   : > { %5529 = vmatmul.mubr.bf16.gmra.mxu0 %v11230_v55 }
 0x3fa   : > { %5682 = vmatmul.mubr.bf16.gmra.mxu1 %v11235_v44  ;;  %5536 = vmatprep.mubr.bf16.mxu0 %v11163_v4  ;;  %v4513_v4 = vld [vmem:[#allocation4 + $0x12a] sm:$0xff] }
 0x3fb   : > { %5689 = vmatprep.mubr.bf16.mxu1 %v11238_v53  ;;  %v11251_v9 = vpack.c.bf16 %v4513_v4, %v4512_v30  ;;  %v4740_v30 = vld [vmem:[#allocation4 + $0xb1] sm:$0xff]  ;;  %v4739_v4 = vld [vmem:[#allocation4 + $0xa9] sm:$0xff] }
 0x3fc   : > { %v4766_v7 = vpack.c.bf16 %v4740_v30, %v4739_v4 }
 0x401   : > { %5537 = vmatmul.mubr.bf16.gmra.mxu0 %v11238_v53 }
 0x402   : > { %5690 = vmatmul.mubr.bf16.gmra.mxu1 %v11243_v49  ;;  %5544 = vmatprep.mubr.bf16.mxu0 %v11189_v63  ;;  %v4515_v63 = vld [vmem:[#allocation4 + $0x142] sm:$0xff] }
 0x403   : > { %5697 = vmatprep.mubr.bf16.mxu1 %v11246_v13  ;;  %v11259_v21 = vpack.c.bf16 %v4515_v63, %v4514_v24 }
 0x409   : > { %5545 = vmatmul.mubr.bf16.gmra.mxu0 %v11246_v13 }
 0x40a   : > { %5698 = vmatmul.mubr.bf16.gmra.mxu1 %v11251_v9  ;;  %5552 = vmatprep.mubr.bf16.mxu0 %v11183_v25  ;;  %v4517_v25 = vld [vmem:[#allocation4 + $0x15a] sm:$0xff] }
 0x40b   : > { %5705 = vmatprep.mubr.bf16.mxu1 %v11254_v2  ;;  %v11267_v41 = vpack.c.bf16 %v4517_v25, %v4516_v47 }
 0x411   : > { %5553 = vmatmul.mubr.bf16.gmra.mxu0 %v11254_v2 }
 0x412   : > { %5706 = vmatmul.mubr.bf16.gmra.mxu1 %v11259_v21  ;;  %5560 = vmatprep.mubr.bf16.mxu0 %v11199_v31  ;;  %v4518_v31 = vld [vmem:[#allocation4 + $0x16a] sm:$0xff] }
 0x413   : > { %5713 = vmatprep.mubr.bf16.mxu1 %v11262_v42  ;;  %v11275_v57 = vpack.c.bf16 %v4519_v0, %v4518_v31 }
 0x419   : > { %5561 = vmatmul.mubr.bf16.gmra.mxu0 %v11262_v42 }
 0x41a   : > { %5714 = vmatmul.mubr.bf16.gmra.mxu1 %v11267_v41  ;;  %5762 = vmatprep.mubr.bf16.mxu0 %v11078_v56  ;;  %v8570_v56 = vld [vmem:[#allocation8 + $0x228] sm:$0xff]  }
 0x41b   : > { %5721 = vmatprep.mubr.bf16.mxu1 %v11270_v40 }
 0x421   : > { %5763 = vmatmul.mubr.bf16.vlgmr.msra.gmra.mxu0 %v4616_v26 }
 0x422   : > { %5722 = vmatmul.mubr.bf16.gmra.mxu1 %v11275_v57  ;;  %5770 = vmatprep.mubr.bf16.mxu0 %v11109_v52  ;;  %v8572_v52 = vld [vmem:[#allocation8 + $0x218] sm:$0xff]  }
 0x423   : > { %5923 = vmatprep.mubr.bf16.mxu1 %v4761_v50  ;;  %8233 = vmatpush3.bf16.msra.mxu0 %v11030_v16  ;;  %v4733_v16 = vld [vmem:[#allocation4 + $0x61] sm:$0xff] }
 0x424   : > { %8234 = vmatprep.subr.bf16.mxu0 %v8569_v28  ;;  %v4763_v33 = vpack.c.bf16 %v4734_v61, %v4733_v16 }
 0x427   : > { %8235 = vmatpush3.bf16.msra.mxu0 %v8569_v28 }
 0x428   : > { %8236 = vmatprep.subr.bf16.mxu0 %v8570_v56 }
 0x429   : > { %5771 = vmatmul.mubr.bf16.gmra.mxu0 %v4761_v50 }
 0x42a   : > { %5924 = vmatmul.mubr.bf16.vlgmr.msra.gmra.mxu1 %v11053_v46  ;;  %5778 = vmatprep.mubr.bf16.mxu0 %v11139_v29  ;;  %v8574_v46 = vld [vmem:[#allocation8 + $0x208] sm:$0xff]   ;;  %v4736_v29 = vld [vmem:[#allocation4 + $0x81] sm:$0xff] }
 0x42b   : > { %5931 = vmatprep.mubr.bf16.mxu1 %v4762_v20  ;;  %8237 = vmatpush3.bf16.msra.mxu0 %v8570_v56  ;;  %v4764_v48 = vpack.c.bf16 %v4736_v29, %v4735_v22  ;;  %v4752_v29 = vld [vmem:[#allocation4 + $0x141] sm:$0xff] }
 0x42c   : > { %8238 = vmatprep.subr.bf16.mxu0 %v8571_v27 }
 0x42f   : > { %8239 = vmatpush3.bf16.msra.mxu0 %v8571_v27 }
 0x430   : > { %8240 = vmatprep.subr.bf16.mxu0 %v8572_v52 }
 0x431   : > { %5779 = vmatmul.mubr.bf16.gmra.mxu0 %v4762_v20 }
 0x432   : > { %5932 = vmatmul.mubr.bf16.gmra.mxu1 %v11084_v45  ;;  %5786 = vmatprep.mubr.bf16.mxu0 %v11167_v11  ;;  %v4738_v45 = vld [vmem:[#allocation4 + $0x99] sm:$0xff]  ;;  %v4737_v11 = vld [vmem:[#allocation4 + $0x91] sm:$0xff] }
 0x433   : > { %5939 = vmatprep.mubr.bf16.mxu1 %v4763_v33  ;;  %8241 = vmatpush3.bf16.msra.mxu0 %v8572_v52  ;;  %v4765_v62 = vpack.c.bf16 %v4738_v45, %v4737_v11 }
 0x434   : > { %8242 = vmatprep.subr.bf16.mxu0 %v8573_v35 }
 0x437   : > { %8243 = vmatpush3.bf16.msra.mxu0 %v8573_v35 }
 0x438   : > { %8244 = vmatprep.subr.bf16.mxu0 %v8574_v46 }
 0x439   : > { %5787 = vmatmul.mubr.bf16.gmra.mxu0 %v4763_v33 }
 0x43a   : > { %5940 = vmatmul.mubr.bf16.gmra.mxu1 %v11115_v6  ;;  %5794 = vmatprep.mubr.bf16.mxu0 %v11187_v58  ;;  %v4742_v6 = vld [vmem:[#allocation4 + $0xc9] sm:$0xff]  ;;  %v4741_v58 = vld [vmem:[#allocation4 + $0xc1] sm:$0xff] }
 0x43b   : > { %5947 = vmatprep.mubr.bf16.mxu1 %v4764_v48  ;;  %8245 = vmatpush3.bf16.msra.mxu0 %v8574_v46  ;;  %v4767_v17 = vpack.c.bf16 %v4742_v6, %v4741_v58 }
 0x43c   : > { %8246 = vmatprep.subr.bf16.mxu0 %v8575_v18 }
 0x43f   : > { %8247 = vmatpush3.bf16.msra.mxu0 %v8575_v18 }
 0x441   : > { %5795 = vmatmul.mubr.bf16.gmra.mxu0 %v4764_v48 }
 0x442   : > { %5948 = vmatmul.mubr.bf16.gmra.mxu1 %v11145_v12  ;;  %5802 = vmatprep.mubr.bf16.mxu0 %v11201_v39  ;;  %v4744_v12 = vld [vmem:[#allocation4 + $0xe1] sm:$0xff]  ;;  %v4743_v39 = vld [vmem:[#allocation4 + $0xd9] sm:$0xff] }
 0x443   : > { %5955 = vmatprep.mubr.bf16.mxu1 %v4765_v62  ;;  %v4768_v24 = vpack.c.bf16 %v4744_v12, %v4743_v39 }
 0x449   : > { %5803 = vmatmul.mubr.bf16.gmra.mxu0 %v4765_v62 }
 0x44a   : > { %5956 = vmatmul.mubr.bf16.gmra.mxu1 %v11173_v23  ;;  %5810 = vmatprep.mubr.bf16.mxu0 %v11211_v8  ;;  %v4746_v23 = vld [vmem:[#allocation4 + $0xf9] sm:$0xff]  ;;  %v4745_v8 = vld [vmem:[#allocation4 + $0xf1] sm:$0xff] }
 0x44b   : > { %5963 = vmatprep.mubr.bf16.mxu1 %v4766_v7  ;;  %v4769_v63 = vpack.c.bf16 %v4746_v23, %v4745_v8  ;;  %v4754_v8 = vld [vmem:[#allocation4 + $0x159] sm:$0xff] }
 0x451   : > { %5811 = vmatmul.mubr.bf16.gmra.mxu0 %v4766_v7 }
 0x452   : > { %5964 = vmatmul.mubr.bf16.gmra.mxu1 %v11193_v19  ;;  %5818 = vmatprep.mubr.bf16.mxu0 %v11219_v5  ;;  %v7683_v19 = vpop.f32.mrf.mxu0  ;;  %v4748_v5 = vld [vmem:[#allocation4 + $0x111] sm:$0xff] }
 0x453   : > { %5971 = vmatprep.mubr.bf16.mxu1 %v4767_v17  ;;  %v4770_v25 = vpack.c.bf16 %v4748_v5, %v4747_v60 }
 0x454   : > { %v7684_v10 = vpop.f32.mrf.mxu0 }
 0x455   : > { %v7685_v37 = vadd.f32 %v7684_v10, %v7683_v19 }
 0x459   : > { %5819 = vmatmul.mubr.bf16.gmra.mxu0 %v4767_v17 }
 0x45a   : > { %5972 = vmatmul.mubr.bf16.gmra.mxu1 %v11204_v43  ;;  %5826 = vmatprep.mubr.bf16.mxu0 %v11227_v51  ;;  %v11299_v43 = vld [vmem:[%s11808_s6] ss:$0 sm:$0xff] }
 0x45b   : > { %5979 = vmatprep.mubr.bf16.mxu1 %v4768_v24  ;;  %v5443_v38 = vadd.f32 %v11209_v59, %v11299_v43 }
 0x461   : > { %5827 = vmatmul.mubr.bf16.gmra.mxu0 %v4768_v24 }
 0x462   : > { %5980 = vmatmul.mubr.bf16.gmra.mxu1 %v11214_v3  ;;  %5834 = vmatprep.mubr.bf16.mxu0 %v11235_v44 }
 0x463   : > { %5987 = vmatprep.mubr.bf16.mxu1 %v4769_v63 }
 0x469   : > { %v7686_v47 = vpop.f32.mrf.mxu0  ;;  %5835 = vmatmul.mubr.bf16.gmra.mxu0 %v4769_v63 }
 0x46a   : > { %v7792_v51 = vpop.f32.mrf.mxu1  ;;  %5988 = vmatmul.mubr.bf16.gmra.mxu1 %v11222_v36  ;;  %5842 = vmatprep.mubr.bf16.mxu0 %v11243_v49  ;;  %v4749_v36 = vld [vmem:[#allocation4 + $0x121] sm:$0xff]  ;;  %v5446_v49 = vadd.f32 %v7685_v37, %v11299_v43 }
 0x46b   : > { %5995 = vmatprep.mubr.bf16.mxu1 %v4770_v25  ;;  %v7687_v3 = vpop.f32.mrf.mxu0  ;;  %v4771_v1 = vpack.c.bf16 %v4750_v32, %v4749_v36  ;;  %v4756_v32 = vld [vmem:[#allocation4 + $0x171] sm:$0xff] }
 0x46c   : > { %v7688_v44 = vadd.f32 %v7687_v3, %v7686_v47  ;;  %v7793_v14 = vpop.f32.mrf.mxu1 }
 0x46d   : > { %v7794_v31 = vadd.f32 %v7793_v14, %v7792_v51  ;;  %v7689_v0 = vpop.f32.mrf.mxu0 }
 0x46e   : > { %v7795_v54 = vpop.f32.mrf.mxu1  ;;  %v5451_v16 = vadd.f32 %v7688_v44, %v11299_v43 }
 0x46f   : > { %v11305_v26 = vadd.f32 %v7794_v31, %v5443_v38  ;;  %v7690_v34 = vpop.f32.mrf.mxu0 }
 0x470   : > { %v7691_v28 = vadd.f32 %v7690_v34, %v7689_v0  ;;  %v7796_v50 = vpop.f32.mrf.mxu1 }
 0x471   : > { %v7797_v56 = vadd.f32 %v7796_v50, %v7795_v54  ;;  %v7692_v15 = vpop.f32.mrf.mxu0  ;;  %5843 = vmatmul.mubr.bf16.gmra.mxu0 %v4770_v25 }
 0x472   : > { %v7798_v27 = vpop.f32.mrf.mxu1  ;;  %5996 = vmatmul.mubr.bf16.gmra.mxu1 %v11230_v55  ;;  %5850 = vmatprep.mubr.bf16.mxu0 %v11251_v9  ;;  %v4751_v55 = vld [vmem:[#allocation4 + $0x139] sm:$0xff]  ;;  %v5454_v9 = vadd.f32 %v7691_v28, %v11299_v43 }
 0x473   : > { %v11310_v59 = vadd.f32 %v7797_v56, %v5446_v49  ;;  %6003 = vmatprep.mubr.bf16.mxu1 %v4771_v1  ;;  %v7693_v20 = vpop.f32.mrf.mxu0  ;;  %v4772_v30 = vpack.c.bf16 %v4752_v29, %v4751_v55  ;;  %v4663_v29 = vld [vmem:[#allocation4 + $0x18a] sm:$0xff] }
 0x474   : > { %v7694_v52 = vadd.f32 %v7693_v20, %v7692_v15  ;;  %v7799_v61 = vpop.f32.mrf.mxu1 }
 0x475   : > { %v7800_v35 = vadd.f32 %v7799_v61, %v7798_v27  ;;  %v7695_v33 = vpop.f32.mrf.mxu0 }
 0x476   : > { %v7801_v46 = vpop.f32.mrf.mxu1  ;;  %v5459_v12 = vadd.f32 %v7694_v52, %v11299_v43 }
 0x477   : > { %v11313_v22 = vadd.f32 %v7800_v35, %v5451_v16  ;;  %v7696_v18 = vpop.f32.mrf.mxu0 }
 0x478   : > { %v7697_v48 = vadd.f32 %v7696_v18, %v7695_v33  ;;  %v7802_v45 = vpop.f32.mrf.mxu1 }
 0x479   : > { %v7803_v11 = vadd.f32 %v7802_v45, %v7801_v46  ;;  %v7698_v62 = vpop.f32.mrf.mxu0  ;;  %5851 = vmatmul.mubr.bf16.gmra.mxu0 %v4771_v1  ;;  %v4662_v46 = vld [vmem:[#allocation4 + $0x182] sm:$0xff] }
 0x47a   : > { %v7804_v4 = vpop.f32.mrf.mxu1  ;;  %6004 = vmatmul.mubr.bf16.gmra.mxu1 %v11238_v53  ;;  %5858 = vmatprep.mubr.bf16.mxu0 %v11259_v21  ;;  %v4753_v53 = vld [vmem:[#allocation4 + $0x151] sm:$0xff]  ;;  %v5462_v21 = vadd.f32 %v7697_v48, %v11299_v43  ;;  %v4758_v48 = vld [vmem:[#allocation4 + $0x189] sm:$0xff] }
 0x47b   : > { %v11318_v7 = vadd.f32 %v7803_v11, %v5454_v9  ;;  %6011 = vmatprep.mubr.bf16.mxu1 %v4772_v30  ;;  %v7699_v6 = vpop.f32.mrf.mxu0  ;;  %v4773_v25 = vpack.c.bf16 %v4754_v8, %v4753_v53  ;;  %v4757_v11 = vld [vmem:[#allocation4 + $0x181] sm:$0xff]  ;;  %v4777_v53 = vld [vmem:[#allocation4 + $0x32] sm:$0xff] }
 0x47c   : > { %v7700_v58 = vadd.f32 %v7699_v6, %v7698_v62  ;;  %v7805_v17 = vpop.f32.mrf.mxu1  ;;  %v4775_v6 = vpack.c.bf16 %v4758_v48, %v4757_v11  ;;  %v4760_v8 = vld [vmem:[#allocation4 + $0x1a1] sm:$0xff] }
 0x47d   : > { %v7806_v39 = vadd.f32 %v7805_v17, %v7804_v4  ;;  %v7701_v24 = vpop.f32.mrf.mxu0 }
 0x47e   : > { %v7807_v23 = vpop.f32.mrf.mxu1  ;;  %v5467_v37 = vadd.f32 %v7700_v58, %v11299_v43 }
 0x47f   : > { %v11321_v63 = vadd.f32 %v7806_v39, %v5459_v12  ;;  %v7702_v19 = vpop.f32.mrf.mxu0 }
 0x480   : > { %v7703_v5 = vadd.f32 %v7702_v19, %v7701_v24  ;;  %v7808_v10 = vpop.f32.mrf.mxu1 }
 0x481   : > { %v7809_v60 = vadd.f32 %v7808_v10, %v7807_v23  ;;  %v7704_v47 = vpop.f32.mrf.mxu0  ;;  %5859 = vmatmul.mubr.bf16.gmra.mxu0 %v4772_v30  ;;  %v4759_v23 = vld [vmem:[#allocation4 + $0x199] sm:$0xff] }
 0x482   : > { %v7810_v51 = vpop.f32.mrf.mxu1  ;;  %6012 = vmatmul.mubr.bf16.gmra.mxu1 %v11246_v13  ;;  %5866 = vmatprep.mubr.bf16.mxu0 %v11267_v41  ;;  %v4755_v13 = vld [vmem:[#allocation4 + $0x169] sm:$0xff]  ;;  %v5470_v41 = vadd.f32 %v7703_v5, %v11299_v43 }
 0x483   : > { %v11326_v3 = vadd.f32 %v7809_v60, %v5462_v21  ;;  %6019 = vmatprep.mubr.bf16.mxu1 %v4773_v25  ;;  %v7705_v44 = vpop.f32.mrf.mxu0  ;;  %v4774_v15 = vpack.c.bf16 %v4756_v32, %v4755_v13  ;;  %v4778_v21 = vld [vmem:[#allocation4 + $0x3a] sm:$0xff]  ;;  %v4780_v13 = vld [vmem:[#allocation4 + $0x52] sm:$0xff] }
 0x484   : > { %v7706_v14 = vadd.f32 %v7705_v44, %v7704_v47  ;;  %v7811_v38 = vpop.f32.mrf.mxu1 }
 0x485   : > { %v7812_v31 = vadd.f32 %v7811_v38, %v7810_v51  ;;  %v7707_v0 = vpop.f32.mrf.mxu0 }
 0x486   : > { %v7813_v54 = vpop.f32.mrf.mxu1  ;;  %v5475_v16 = vadd.f32 %v7706_v14, %v11299_v43  ;;  %v4809_v14 = vpack.c.bf16 %v4778_v21, %v4777_v53 }
 0x487   : > { %v11329_v34 = vadd.f32 %v7812_v31, %v5467_v37  ;;  %v7708_v28 = vpop.f32.mrf.mxu0 }
 0x488   : > { %v7709_v50 = vadd.f32 %v7708_v28, %v7707_v0  ;;  %v7814_v36 = vpop.f32.mrf.mxu1 }
 0x489   : > { %v7815_v49 = vadd.f32 %v7814_v36, %v7813_v54  ;;  %v7710_v56 = vpop.f32.mrf.mxu0  ;;  %5867 = vmatmul.mubr.bf16.gmra.mxu0 %v4773_v25  ;;  %v4776_v25 = vpack.c.bf16 %v4760_v8, %v4759_v23  ;;  %v4779_v36 = vld [vmem:[#allocation4 + $0x4a] sm:$0xff]  ;;  %v4786_v23 = vld [vmem:[#allocation4 + $0x9a] sm:$0xff] }
 0x48a   : > { %v7816_v1 = vpop.f32.mrf.mxu1  ;;  %6020 = vmatmul.mubr.bf16.gmra.mxu1 %v11254_v2  ;;  %5874 = vmatprep.mubr.bf16.mxu0 %v11275_v57  ;;  %v11339_v57 = vpack.c.bf16 %v4663_v29, %v4662_v46  ;;  %v5478_v62 = vadd.f32 %v7709_v50, %v11299_v43 }
 0x48b   : > { %v11334_v27 = vadd.f32 %v7815_v49, %v5470_v41  ;;  %6027 = vmatprep.mubr.bf16.mxu1 %v4774_v15  ;;  %v7711_v20 = vpop.f32.mrf.mxu0 }
 0x48c   : > { %v7712_v52 = vadd.f32 %v7711_v20, %v7710_v56  ;;  %v7817_v61 = vpop.f32.mrf.mxu1 }
 0x48d   : > { %v7818_v35 = vadd.f32 %v7817_v61, %v7816_v1  ;;  %v7713_v33 = vpop.f32.mrf.mxu0  ;;  %v4782_v1 = vld [vmem:[#allocation4 + $0x6a] sm:$0xff] }
 0x48e   : > { %v7819_v18 = vpop.f32.mrf.mxu1  ;;  %v5483_v19 = vadd.f32 %v7712_v52, %v11299_v43  ;;  %v8578_v52 = vld [vmem:[#allocation3] sm:$0xff] }
 0x48f   : > { %v11337_v45 = vadd.f32 %v7818_v35, %v5475_v16  ;;  %v7714_v55 = vpop.f32.mrf.mxu0  ;;  %v4728_v61 = vpack.c.bf16 %v8578_v52, %v8578_v52  ;;  %v4810_v35 = vpack.c.bf16 %v4780_v13, %v4779_v36  ;;  %v4789_v13 = vld [vmem:[#allocation4 + $0xc2] sm:$0xff] }
 0x490   : > { %v7715_v2 = vadd.f32 %v7714_v55, %v7713_v33  ;;  %v7820_v9 = vpop.f32.mrf.mxu1 }
 0x491   : > { %v7821_v30 = vadd.f32 %v7820_v9, %v7819_v18  ;;  %v7716_v4 = vpop.f32.mrf.mxu0  ;;  %5875 = vmatmul.mubr.bf16.gmra.mxu0 %v4774_v15  ;;  %v4781_v15 = vld [vmem:[#allocation4 + $0x62] sm:$0xff] }
 0x492   : > { %v7822_v58 = vpop.f32.mrf.mxu1  ;;  %6028 = vmatmul.mubr.bf16.gmra.mxu1 %v11262_v42  ;;  %5882 = vmatprep.mubr.bf16.mxu0 %v11339_v57  ;;  %v5486_v38 = vadd.f32 %v7715_v2, %v11299_v43  ;;  %v4811_v29 = vpack.c.bf16 %v4782_v1, %v4781_v15 }
 0x493   : > { %v11344_v17 = vadd.f32 %v7821_v30, %v5478_v62  ;;  %6035 = vmatprep.mubr.bf16.mxu1 %v4775_v6  ;;  %v7717_v12 = vpop.f32.mrf.mxu0 }
 0x494   : > { %v7718_v39 = vadd.f32 %v7717_v12, %v7716_v4  ;;  %v7823_v24 = vpop.f32.mrf.mxu1  ;;  %v4783_v4 = vld [vmem:[#allocation4 + $0x7a] sm:$0xff] }
 0x495   : > { %v7824_v5 = vadd.f32 %v7823_v24, %v7822_v58  ;;  %v7719_v10 = vpop.f32.mrf.mxu0  ;;  %v4785_v24 = vld [vmem:[#allocation4 + $0x92] sm:$0xff] }
 0x496   : > { %v7825_v60 = vpop.f32.mrf.mxu1  ;;  %v5491_v41 = vadd.f32 %v7718_v39, %v11299_v43 }
 0x497   : > { %v11347_v47 = vadd.f32 %v7824_v5, %v5483_v19  ;;  %v7720_v42 = vpop.f32.mrf.mxu0 }
 0x498   : > { %v7721_v51 = vadd.f32 %v7720_v42, %v7719_v10  ;;  %v7826_v44 = vpop.f32.mrf.mxu1 }
 0x499   : > { %v7827_v37 = vadd.f32 %v7826_v44, %v7825_v60  ;;  %v7722_v31 = vpop.f32.mrf.mxu0  ;;  %5883 = vmatmul.mubr.bf16.gmra.mxu0 %v4775_v6  ;;  %v4784_v6 = vld [vmem:[#allocation4 + $0x82] sm:$0xff]  ;;  %v4813_v60 = vpack.c.bf16 %v4786_v23, %v4785_v24 }
 0x49a   : > { %v7828_v0 = vpop.f32.mrf.mxu1  ;;  %6036 = vmatmul.mubr.bf16.gmra.mxu1 %v11270_v40  ;;  %8248 = vmatprep.mubr.bf16.mxu0 %v4809_v14  ;;  %v5494_v18 = vadd.f32 %v7721_v51, %v11299_v43  ;;  %v4812_v10 = vpack.c.bf16 %v4784_v6, %v4783_v4  ;;  %v4793_v6 = vld [vmem:[#allocation4 + $0xf2] sm:$0xff] }
 0x49b   : > { %v11351_v54 = vadd.f32 %v7827_v37, %v5486_v38  ;;  %v7723_v32 = vpop.f32.mrf.mxu0  ;;  %6043 = vmatprep.mubr.bf16.mxu1 %v4776_v25 }
 0x49c   : > { %v7724_v28 = vadd.f32 %v7723_v32, %v7722_v31  ;;  %v7829_v50 = vpop.f32.mrf.mxu1  ;;  %v4788_v32 = vld [vmem:[#allocation4 + $0xb2] sm:$0xff] }
 0x49d   : > { %v7830_v49 = vadd.f32 %v7829_v50, %v7828_v0  ;;  %v7725_v56 = vpop.f32.mrf.mxu0  ;;  %v4787_v0 = vld [vmem:[#allocation4 + $0xaa] sm:$0xff] }
 0x49e   : > { %v7831_v20 = vpop.f32.mrf.mxu1  ;;  %v5499_v58 = vadd.f32 %v7724_v28, %v11299_v43  ;;  %v4814_v1 = vpack.c.bf16 %v4788_v32, %v4787_v0 }
 0x49f   : > { %v11354_v16 = vadd.f32 %v7830_v49, %v5491_v41  ;;  %v7726_v40 = vpop.f32.mrf.mxu0  ;;  %v4790_v41 = vld [vmem:[#allocation4 + $0xca] sm:$0xff] }
 0x4a0   : > { %v7727_v33 = vadd.f32 %v7726_v40, %v7725_v56  ;;  %v7832_v46 = vpop.f32.mrf.mxu1 }
 0x4a1   : > { %v7833_v48 = vadd.f32 %v7832_v46, %v7831_v20  ;;  %v7728_v55 = vpop.f32.mrf.mxu0  ;;  %8249 = vmatmul.mubr.bf16.vlgmr.msra.gmra.mxu0 %v4810_v35 }
 0x4a2   : > { %v7834_v2 = vpop.f32.mrf.mxu1  ;;  %6044 = vmatmul.mubr.bf16.gmra.mxu1 %v4728_v61  ;;  %8252 = vmatprep.mubr.bf16.mxu0 %v4811_v29  ;;  %v5502_v42 = vadd.f32 %v7727_v33, %v11299_v43  ;;  %v4815_v61 = vpack.c.bf16 %v4790_v41, %v4789_v13 }
 0x4a3   : > { %v11357_v9 = vadd.f32 %v7833_v48, %v5494_v18  ;;  %v7729_v11 = vpop.f32.mrf.mxu0 }
 0x4a4   : > { %v7730_v62 = vadd.f32 %v7729_v11, %v7728_v55  ;;  %v7835_v30 = vpop.f32.mrf.mxu1  ;;  %v4792_v11 = vld [vmem:[#allocation4 + $0xe2] sm:$0xff] }
 0x4a5   : > { %v7836_v12 = vadd.f32 %v7835_v30, %v7834_v2  ;;  %v7731_v39 = vpop.f32.mrf.mxu0  ;;  %v4791_v2 = vld [vmem:[#allocation4 + $0xda] sm:$0xff] }
 0x4a6   : > { %v7837_v8 = vpop.f32.mrf.mxu1  ;;  %v5507_v28 = vadd.f32 %v7730_v62, %v11299_v43  ;;  %v4816_v23 = vpack.c.bf16 %v4792_v11, %v4791_v2  ;;  %v4799_v2 = vld [vmem:[#allocation4 + $0x13a] sm:$0xff]  ;;  %v4800_v11 = vld [vmem:[#allocation4 + $0x142] sm:$0xff] }
 0x4a7   : > { %v11360_v19 = vadd.f32 %v7836_v12, %v5499_v58  ;;  %v7732_v5 = vpop.f32.mrf.mxu0  ;;  %v4794_v58 = vld [vmem:[#allocation4 + $0xfa] sm:$0xff] }
 0x4a8   : > { %v7733_v53 = vadd.f32 %v7732_v5, %v7731_v39  ;;  %v7838_v21 = vpop.f32.mrf.mxu1 }
 0x4a9   : > { %v7839_v25 = vadd.f32 %v7838_v21, %v7837_v8  ;;  %v7734_v51 = vpop.f32.mrf.mxu0  ;;  %8253 = vmatmul.mubr.bf16.gmra.mxu0 %v4812_v10  ;;  %v4817_v10 = vpack.c.bf16 %v4794_v58, %v4793_v6  ;;  %v4801_v6 = vld [vmem:[#allocation4 + $0x152] sm:$0xff]  ;;  %v4802_v58 = vld [vmem:[#allocation4 + $0x15a] sm:$0xff] }
 0x4aa   : > { %v7840_v44 = vpop.f32.mrf.mxu1  ;;  %8256 = vmatprep.mubr.bf16.mxu0 %v4813_v60  ;;  %v5510_v40 = vadd.f32 %v7733_v53, %v11299_v43 }
 0x4ab   : > { %v11363_v14 = vadd.f32 %v7839_v25, %v5502_v42  ;;  %v7735_v38 = vpop.f32.mrf.mxu0 }
 0x4ac   : > { %v7736_v37 = vadd.f32 %v7735_v38, %v7734_v51  ;;  %v7841_v31 = vpop.f32.mrf.mxu1 }
 0x4ad   : > { %v7842_v50 = vadd.f32 %v7841_v31, %v7840_v44  ;;  %v7737_v36 = vpop.f32.mrf.mxu0  ;;  %v4796_v31 = vld [vmem:[#allocation4 + $0x112] sm:$0xff] }
 0x4ae   : > { %v7843_v49 = vpop.f32.mrf.mxu1  ;;  %v5515_v62 = vadd.f32 %v7736_v37, %v11299_v43  ;;  %v4795_v37 = vld [vmem:[#allocation4 + $0x10a] sm:$0xff] }
 0x4af   : > { %v11366_v56 = vadd.f32 %v7842_v50, %v5507_v28  ;;  %v7738_v15 = vpop.f32.mrf.mxu0  ;;  %v4797_v50 = vld [vmem:[#allocation4 + $0x122] sm:$0xff] }
 0x4b0   : > { %v7739_v20 = vadd.f32 %v7738_v15, %v7737_v36  ;;  %v7844_v52 = vpop.f32.mrf.mxu1  ;;  %v4798_v36 = vld [vmem:[#allocation4 + $0x12a] sm:$0xff]  ;;  %v4818_v15 = vpack.c.bf16 %v4796_v31, %v4795_v37 }
 0x4b1   : > { %v7845_v35 = vadd.f32 %v7844_v52, %v7843_v49  ;;  %v7740_v33 = vpop.f32.mrf.mxu0  ;;  %8257 = vmatmul.mubr.bf16.gmra.mxu0 %v4814_v1  ;;  %v4819_v52 = vpack.c.bf16 %v4798_v36, %v4797_v50 }
 0x4b2   : > { %v7846_v46 = vpop.f32.mrf.mxu1  ;;  %8260 = vmatprep.mubr.bf16.mxu0 %v4815_v61  ;;  %v5518_v53 = vadd.f32 %v7739_v20, %v11299_v43 }
 0x4b3   : > { %v11369_v29 = vadd.f32 %v7845_v35, %v5510_v40  ;;  %v7741_v18 = vpop.f32.mrf.mxu0 }
 0x4b4   : > { %v7742_v48 = vadd.f32 %v7741_v18, %v7740_v33  ;;  %v7847_v55 = vpop.f32.mrf.mxu1 }
 0x4b5   : > { %v7848_v30 = vadd.f32 %v7847_v55, %v7846_v46  ;;  %v7743_v4 = vpop.f32.mrf.mxu0 }
 0x4b6   : > { %v7849_v12 = vpop.f32.mrf.mxu1  ;;  %v5523_v0 = vadd.f32 %v7742_v48, %v11299_v43 }
 0x4b7   : > { %v11372_v39 = vadd.f32 %v7848_v30, %v5515_v62  ;;  %v7744_v24 = vpop.f32.mrf.mxu0 }
 0x4b8   : > { %v7745_v8 = vadd.f32 %v7744_v24, %v7743_v4  ;;  %v7850_v5 = vpop.f32.mrf.mxu1 }
 0x4b9   : > { %v7851_v21 = vadd.f32 %v7850_v5, %v7849_v12  ;;  %v7746_v60 = vpop.f32.mrf.mxu0  ;;  %8261 = vmatmul.mubr.bf16.gmra.mxu0 %v4816_v23 }
 0x4ba   : > { %v7852_v42 = vpop.f32.mrf.mxu1  ;;  %8264 = vmatprep.mubr.bf16.mxu0 %v4817_v10  ;;  %v5526_v61 = vadd.f32 %v7745_v8, %v11299_v43  ;;  %v4820_v8 = vpack.c.bf16 %v4800_v11, %v4799_v2 }
 0x4bb   : > { %v11375_v25 = vadd.f32 %v7851_v21, %v5518_v53  ;;  %v7747_v51 = vpop.f32.mrf.mxu0  ;;  %v4821_v53 = vpack.c.bf16 %v4802_v58, %v4801_v6 }
 0x4bc   : > { %v7748_v44 = vadd.f32 %v7747_v51, %v7746_v60  ;;  %v7853_v38 = vpop.f32.mrf.mxu1 }
 0x4bd   : > { %v7854_v32 = vadd.f32 %v7853_v38, %v7852_v42  ;;  %v7749_v28 = vpop.f32.mrf.mxu0 }
 0x4be   : > { %v7855_v13 = vpop.f32.mrf.mxu1  ;;  %v5531_v62 = vadd.f32 %v7748_v44, %v11299_v43 }
 0x4bf   : > { %v11378_v41 = vadd.f32 %v7854_v32, %v5523_v0  ;;  %v7750_v49 = vpop.f32.mrf.mxu0  ;;  %v4803_v0 = vld [vmem:[#allocation4 + $0x16a] sm:$0xff]  ;;  %v4804_v32 = vld [vmem:[#allocation4 + $0x172] sm:$0xff] }
 0x4c0   : > { %v7751_v1 = vadd.f32 %v7750_v49, %v7749_v28  ;;  %v7856_v20 = vpop.f32.mrf.mxu1 }
 0x4c1   : > { %v7857_v40 = vadd.f32 %v7856_v20, %v7855_v13  ;;  %v7752_v35 = vpop.f32.mrf.mxu0  ;;  %8265 = vmatmul.mubr.bf16.gmra.mxu0 %v4818_v15 }
 0x4c2   : > { %v7858_v33 = vpop.f32.mrf.mxu1  ;;  %8268 = vmatprep.mubr.bf16.mxu0 %v4819_v52  ;;  %v5534_v21 = vadd.f32 %v7751_v1, %v11299_v43  ;;  %v4822_v1 = vpack.c.bf16 %v4804_v32, %v4803_v0 }
 0x4c3   : > { %v11381_v46 = vadd.f32 %v7857_v40, %v5526_v61  ;;  %v7753_v18 = vpop.f32.mrf.mxu0 }
 0x4c4   : > { %v7754_v48 = vadd.f32 %v7753_v18, %v7752_v35  ;;  %v7859_v55 = vpop.f32.mrf.mxu1  ;;  %v4807_v18 = vld [vmem:[#allocation4 + $0x19a] sm:$0xff] }
 0x4c5   : > { %v7860_v30 = vadd.f32 %v7859_v55, %v7858_v33  ;;  %v7755_v4 = vpop.f32.mrf.mxu0  ;;  %v4808_v55 = vld [vmem:[#allocation4 + $0x1a2] sm:$0xff] }
 0x4c6   : > { %v7861_v12 = vpop.f32.mrf.mxu1  ;;  %v5539_v28 = vadd.f32 %v7754_v48, %v11299_v43  ;;  %v4824_v58 = vpack.c.bf16 %v4808_v55, %v4807_v18 }
 0x4c7   : > { %v11384_v24 = vadd.f32 %v7860_v30, %v5531_v62  ;;  %v7756_v23 = vpop.f32.mrf.mxu0 }
 0x4c8   : > { %v7757_v5 = vadd.f32 %v7756_v23, %v7755_v4  ;;  %v7862_v10 = vpop.f32.mrf.mxu1 }
 0x4c9   : > { %v7863_v60 = vadd.f32 %v7862_v10, %v7861_v12  ;;  %v7758_v42 = vpop.f32.mrf.mxu0  ;;  %8269 = vmatmul.mubr.bf16.gmra.mxu0 %v4820_v8 }
 0x4ca   : > { %v7864_v51 = vpop.f32.mrf.mxu1  ;;  %8272 = vmatprep.mubr.bf16.mxu0 %v4821_v53  ;;  %v5542_v61 = vadd.f32 %v7757_v5, %v11299_v43 }
 0x4cb   : > { %v11387_v44 = vadd.f32 %v7863_v60, %v5534_v21  ;;  %v7759_v38 = vpop.f32.mrf.mxu0 }
 0x4cc   : > { %v7760_v37 = vadd.f32 %v7759_v38, %v7758_v42  ;;  %v7865_v31 = vpop.f32.mrf.mxu1 }
 0x4cd   : > { %v7866_v50 = vadd.f32 %v7865_v31, %v7864_v51  ;;  %v7761_v36 = vpop.f32.mrf.mxu0 }
 0x4ce   : > { %v7867_v13 = vpop.f32.mrf.mxu1  ;;  %v5547_v30 = vadd.f32 %v7760_v37, %v11299_v43 }
 0x4cf   : > { %v11390_v49 = vadd.f32 %v7866_v50, %v5539_v28  ;;  %v7762_v15 = vpop.f32.mrf.mxu0 }
 0x4d0   : > { %v7763_v20 = vadd.f32 %v7762_v15, %v7761_v36  ;;  %v7868_v52 = vpop.f32.mrf.mxu1 }
 0x4d1   : > { %v7869_v40 = vadd.f32 %v7868_v52, %v7867_v13  ;;  %v7764_v35 = vpop.f32.mrf.mxu0  ;;  %8273 = vmatmul.mubr.bf16.gmra.mxu0 %v4822_v1 }
 0x4d2   : > { %v7870_v33 = vpop.f32.mrf.mxu1  ;;  %8276 = vmatprep.mubr.bf16.mxu0 %v11339_v57  ;;  %v5550_v57 = vadd.f32 %v7763_v20, %v11299_v43 }
 0x4d3   : > { %v11394_v48 = vadd.f32 %v7869_v40, %v5542_v61  ;;  %v7765_v2 = vpop.f32.mrf.mxu0 }
 0x4d4   : > { %v7766_v11 = vadd.f32 %v7765_v2, %v7764_v35  ;;  %v7871_v62 = vpop.f32.mrf.mxu1 }
 0x4d5   : > { %v7872_v4 = vadd.f32 %v7871_v62, %v7870_v33  ;;  %v7767_v6 = vpop.f32.mrf.mxu0 }
 0x4d6   : > { %v7873_v12 = vpop.f32.mrf.mxu1  ;;  %v5555_v31 = vadd.f32 %v7766_v11, %v11299_v43 }
 0x4d7   : > { %v11397_v23 = vadd.f32 %v7872_v4, %v5547_v30  ;;  %v7768_v8 = vpop.f32.mrf.mxu0 }
 0x4d8   : > { %v7769_v5 = vadd.f32 %v7768_v8, %v7767_v6  ;;  %v7874_v10 = vpop.f32.mrf.mxu1 }
 0x4d9   : > { %v7875_v53 = vadd.f32 %v7874_v10, %v7873_v12  ;;  %v7770_v21 = vpop.f32.mrf.mxu0  ;;  %8277 = vmatmul.mubr.bf16.gmra.mxu0 %v4824_v58 }
 0x4da   : > { %v7876_v60 = vpop.f32.mrf.mxu1  ;;  %v5558_v1 = vadd.f32 %v7769_v5, %v11299_v43 }
 0x4db   : > { %v11400_v42 = vadd.f32 %v7875_v53, %v5550_v57  ;;  %v7771_v51 = vpop.f32.mrf.mxu0 }
 0x4dc   : > { %v7772_v38 = vadd.f32 %v7771_v51, %v7770_v21  ;;  %v7877_v37 = vpop.f32.mrf.mxu1 }
 0x4dd   : > { %v7878_v0 = vadd.f32 %v7877_v37, %v7876_v60  ;;  %v7773_v32 = vpop.f32.mrf.mxu0 }
 0x4de   : > { %v7879_v28 = vpop.f32.mrf.mxu1  ;;  %v5563_v55 = vadd.f32 %v7772_v38, %v11299_v43 }
 0x4df   : > { %v11403_v50 = vadd.f32 %v7878_v0, %v5555_v31  ;;  %v7774_v36 = vpop.f32.mrf.mxu0 }
 0x4e0   : > { %v7775_v13 = vadd.f32 %v7774_v36, %v7773_v32  ;;  %v7880_v15 = vpop.f32.mrf.mxu1 }
 0x4e1   : > { %v7881_v20 = vadd.f32 %v7880_v15, %v7879_v28  ;;  %v7904_v52 = vpop.f32.mrf.mxu0 }
 0x4e2   : > { %v7882_v61 = vpop.f32.mrf.mxu1  ;;  %v5566_v8 = vadd.f32 %v7775_v13, %v11299_v43 }
 0x4e3   : > { %v11406_v40 = vadd.f32 %v7881_v20, %v5558_v1  ;;  %v7905_v35 = vpop.f32.mrf.mxu0 }
 0x4e4   : > { %v7883_v33 = vpop.f32.mrf.mxu1  ;;  %v7906_v18 = vadd.f32 %v7905_v35, %v7904_v52 }
 0x4e5   : > { %v7884_v2 = vadd.f32 %v7883_v33, %v7882_v61  ;;  %v7907_v11 = vpop.f32.mrf.mxu0 }
 0x4e6   : > { %v5765_v62 = vadd.f32 %v7906_v18, %v11305_v26  ;;  %v7885_v30 = vpop.f32.mrf.mxu1 }
 0x4e7   : > { %v11410_v4 = vadd.f32 %v7884_v2, %v5563_v55  ;;  %v7908_v6 = vpop.f32.mrf.mxu0 }
 0x4e8   : > { %v7886_v58 = vpop.f32.mrf.mxu1  ;;  %v7909_v12 = vadd.f32 %v7908_v6, %v7907_v11 }
 0x4e9   : > { %11974 = vst [vmem:[#allocation25_spill] sm:$0xff] %v11410_v4  ;;  %v7887_v5 = vadd.f32 %v7886_v58, %v7885_v30  ;;  %v7910_v10 = vpop.f32.mrf.mxu0 }
 0x4ea   : > { %v5768_v57 = vadd.f32 %v7909_v12, %v11310_v59  ;;  %v8016_v53 = vpop.f32.mrf.mxu1 }
 0x4eb   : > { %v11414_v21 = vadd.f32 %v7887_v5, %v5566_v8  ;;  %v7911_v60 = vpop.f32.mrf.mxu0 }
 0x4ec   : > { %v7912_v51 = vadd.f32 %v7911_v60, %v7910_v10  ;;  %v8017_v38 = vpop.f32.mrf.mxu1 }
 0x4ed   : > { %11975 = vst [vmem:[#allocation23_spill] sm:$0xff] %v11414_v21  ;;  %v8018_v37 = vadd.f32 %v8017_v38, %v8016_v53  ;;  %v7913_v26 = vpop.f32.mrf.mxu0 }
 0x4ee   : > { %v11417_v31 = vadd.f32 %v7912_v51, %v11313_v22  ;;  %v8019_v0 = vpop.f32.mrf.mxu1 }
 0x4ef   : > { %v7914_v32 = vpop.f32.mrf.mxu0  ;;  %v11419_v28 = vadd.f32 %v8018_v37, %v5765_v62 }
 0x4f0   : > { %v7915_v43 = vadd.f32 %v7914_v32, %v7913_v26  ;;  %v8020_v36 = vpop.f32.mrf.mxu1 }
 0x4f1   : > { %v8021_v13 = vadd.f32 %v8020_v36, %v8019_v0  ;;  %v7916_v15 = vpop.f32.mrf.mxu0 }
 0x4f2   : > { %v11422_v59 = vadd.f32 %v7915_v43, %v11318_v7  ;;  %v11424_v1 = vpop.f32.mrf.mxu1 }
 0x4f3   : > { %v7917_v20 = vpop.f32.mrf.mxu0  ;;  %v11426_v52 = vadd.f32 %v8021_v13, %v5768_v57 }
 0x4f4   : > { %v7918_v61 = vadd.f32 %v7917_v20, %v7916_v15  ;;  %v11428_v35 = vpop.f32.mrf.mxu1 }
 0x4f5   : > { %v7919_v22 = vpop.f32.mrf.mxu0 }
 0x4f6   : > { %v11431_v33 = vadd.f32 %v7918_v61, %v11321_v63  ;;  %v11433_v18 = vpop.f32.mrf.mxu1 }
 0x4f7   : > { %v7920_v55 = vpop.f32.mrf.mxu0 }
 0x4f8   : > { %v7921_v2 = vadd.f32 %v7920_v55, %v7919_v22  ;;  %v11435_v11 = vpop.f32.mrf.mxu1 }
 0x4f9   : > { %v7922_v7 = vpop.f32.mrf.mxu0 }
 0x4fa   : > { %v11438_v62 = vadd.f32 %v7921_v2, %v11326_v3  ;;  %v11440_v30 = vpop.f32.mrf.mxu1 }
 0x4fb   : > { %v7923_v6 = vpop.f32.mrf.mxu0 }
 0x4fc   : > { %v7924_v58 = vadd.f32 %v7923_v6, %v7922_v7  ;;  %v11442_v12 = vpop.f32.mrf.mxu1 }
 0x4fd   : > { %v7925_v8 = vpop.f32.mrf.mxu0 }
 0x4fe   : > { %v11445_v63 = vadd.f32 %v7924_v58, %v11329_v34  ;;  %v11447_v5 = vpop.f32.mrf.mxu1 }
 0x4ff   : > { %v7926_v10 = vpop.f32.mrf.mxu0 }
 0x500   : > { %v7927_v57 = vadd.f32 %v7926_v10, %v7925_v8  ;;  %v11449_v53 = vpop.f32.mrf.mxu1 }
 0x501   : > { %v7928_v60 = vpop.f32.mrf.mxu0 }
 0x502   : > { %v11452_v3 = vadd.f32 %v7927_v57, %v11334_v27  ;;  %v11454_v51 = vpop.f32.mrf.mxu1 }
 0x503   : > { %v7929_v38 = vpop.f32.mrf.mxu0 }
 0x504   : > { %v7930_v37 = vadd.f32 %v7929_v38, %v7928_v60  ;;  %v11456_v26 = vpop.f32.mrf.mxu1 }
 0x505   : > { %v7931_v0 = vpop.f32.mrf.mxu0 }
 0x506   : > { %v11459_v34 = vadd.f32 %v7930_v37, %v11337_v45  ;;  %v11461_v32 = vpop.f32.mrf.mxu1 }
 0x507   : > { %v7932_v43 = vpop.f32.mrf.mxu0 }
 0x508   : > { %v7933_v36 = vadd.f32 %v7932_v43, %v7931_v0  ;;  %v11463_v13 = vpop.f32.mrf.mxu1 }
 0x509   : > { %v7934_v15 = vpop.f32.mrf.mxu0 }
 0x50a   : > { %v11466_v27 = vadd.f32 %v7933_v36, %v11344_v17  ;;  %v11468_v20 = vpop.f32.mrf.mxu1 }
 0x50b   : > { %v7935_v61 = vpop.f32.mrf.mxu0 }
 0x50c   : > { %v7936_v22 = vadd.f32 %v7935_v61, %v7934_v15  ;;  %v11470_v55 = vpop.f32.mrf.mxu1 }
 0x50d   : > { %v7937_v2 = vpop.f32.mrf.mxu0 }
 0x50e   : > { %v11473_v45 = vadd.f32 %v7936_v22, %v11347_v47  ;;  %v11475_v7 = vpop.f32.mrf.mxu1 }
 0x50f   : > { %v7938_v6 = vpop.f32.mrf.mxu0 }
 0x510   : > { %v7939_v58 = vadd.f32 %v7938_v6, %v7937_v2  ;;  %v11477_v8 = vpop.f32.mrf.mxu1 }
 0x511   : > { %v7940_v10 = vpop.f32.mrf.mxu0 }
 0x512   : > { %v11480_v17 = vadd.f32 %v7939_v58, %v11351_v54  ;;  %v11482_v57 = vpop.f32.mrf.mxu1 }
 0x513   : > { %v7941_v60 = vpop.f32.mrf.mxu0 }
 0x514   : > { %v7942_v38 = vadd.f32 %v7941_v60, %v7940_v10  ;;  %v11484_v37 = vpop.f32.mrf.mxu1 }
 0x515   : > { %v7943_v0 = vpop.f32.mrf.mxu0 }
 0x516   : > { %v11487_v47 = vadd.f32 %v7942_v38, %v11354_v16  ;;  %v11489_v43 = vpop.f32.mrf.mxu1 }
 0x517   : > { %v7944_v36 = vpop.f32.mrf.mxu0 }
 0x518   : > { %11976 = vst [vmem:[#allocation26_spill] sm:$0xff] %v11487_v47  ;;  %v7945_v15 = vadd.f32 %v7944_v36, %v7943_v0  ;;  %v11491_v61 = vpop.f32.mrf.mxu1 }
 0x519   : > { %v7946_v22 = vpop.f32.mrf.mxu0 }
 0x51a   : > { %v11494_v54 = vadd.f32 %v7945_v15, %v11357_v9  ;;  %v11496_v2 = vpop.f32.mrf.mxu1 }
 0x51b   : > { %v7947_v6 = vpop.f32.mrf.mxu0 }
 0x51c   : > { %11977 = vst [vmem:[#allocation24_spill] sm:$0xff] %v11494_v54  ;;  %v7948_v58 = vadd.f32 %v7947_v6, %v7946_v22  ;;  %v11498_v10 = vpop.f32.mrf.mxu1 }
 0x51d   : > { %v7949_v60 = vpop.f32.mrf.mxu0 }
 0x51e   : > { %v11501_v16 = vadd.f32 %v7948_v58, %v11360_v19  ;;  %v11503_v38 = vpop.f32.mrf.mxu1 }
 0x51f   : > { %11979 = vst [vmem:[#allocation28_spill] sm:$0xff] %v11503_v38  ;;  %v7950_v21 = vpop.f32.mrf.mxu0 }
 0x520   : > { %11978 = vst [vmem:[#allocation32_spill] sm:$0xff] %v11501_v16  ;;  %v7951_v0 = vadd.f32 %v7950_v21, %v7949_v60  ;;  %v11505_v36 = vpop.f32.mrf.mxu1 }
 0x521   : > { %11980 = vst [vmem:[#allocation27_spill] sm:$0xff] %v11505_v36  ;;  %v7952_v4 = vpop.f32.mrf.mxu0 }
 0x522   : > { %v11508_v9 = vadd.f32 %v7951_v0, %v11363_v14  ;;  %v11510_v15 = vpop.f32.mrf.mxu1 }
 0x523   : > { %v7953_v54 = vpop.f32.mrf.mxu0 }
 0x524   : > { %11981 = vst [vmem:[#allocation30_spill] sm:$0xff] %v11508_v9  ;;  %v7954_v22 = vadd.f32 %v7953_v54, %v7952_v4  ;;  %v11512_v6 = vpop.f32.mrf.mxu1 }
 0x525   : > { %v7955_v47 = vpop.f32.mrf.mxu0 }
 0x526   : > { %v11515_v19 = vadd.f32 %v7954_v22, %v11366_v56  ;;  %v11517_v58 = vpop.f32.mrf.mxu1 }
 0x527   : > { %v7956_v38 = vpop.f32.mrf.mxu0 }
 0x528   : > { %11982 = vst [vmem:[#allocation29_spill] sm:$0xff] %v11515_v19  ;;  %v7957_v21 = vadd.f32 %v7956_v38, %v7955_v47  ;;  %v11519_v60 = vpop.f32.mrf.mxu1 }
 0x529   : > { %11983 = vst [vmem:[#allocation31_spill] sm:$0xff] %v11519_v60  ;;  %v7958_v36 = vpop.f32.mrf.mxu0 }
 0x52a   : > { %v11522_v14 = vadd.f32 %v7957_v21, %v11369_v29  ;;  %v11524_v0 = vpop.f32.mrf.mxu1 }
 0x52b   : > { %v7959_v9 = vpop.f32.mrf.mxu0 }
 0x52c   : > { %11984 = vst [vmem:[#allocation34_spill] sm:$0xff] %v11522_v14  ;;  %v7960_v4 = vadd.f32 %v7959_v9, %v7958_v36  ;;  %v11526_v54 = vpop.f32.mrf.mxu1 }
 0x52d   : > { %11985 = vst [vmem:[#allocation21_spill] sm:$0xff] %v11526_v54  ;;  %v7961_v16 = vpop.f32.mrf.mxu0 }
 0x52e   : > { %v11529_v56 = vadd.f32 %v7960_v4, %v11372_v39  ;;  %v11531_v22 = vpop.f32.mrf.mxu1 }
 0x52f   : > { %11987 = vst [vmem:[#allocation33_spill] sm:$0xff] %v11531_v22  ;;  %v7962_v19 = vpop.f32.mrf.mxu0 }
 0x530   : > { %11986 = vst [vmem:[#allocation17_spill] sm:$0xff] %v11529_v56  ;;  %v7963_v47 = vadd.f32 %v7962_v19, %v7961_v16  ;;  %v11533_v38 = vpop.f32.mrf.mxu1 }
 0x531   : > { %11988 = vst [vmem:[#allocation14_spill] sm:$0xff] %v11533_v38  ;;  %v7964_v60 = vpop.f32.mrf.mxu0 }
 0x532   : > { %v11536_v29 = vadd.f32 %v7963_v47, %v11375_v25  ;;  %v11538_v21 = vpop.f32.mrf.mxu1 }
 0x533   : > { %v7965_v14 = vpop.f32.mrf.mxu0 }
 0x534   : > { %11989 = vst [vmem:[#allocation15_spill] sm:$0xff] %v11536_v29  ;;  %v7966_v36 = vadd.f32 %v7965_v14, %v7964_v60  ;;  %v11540_v9 = vpop.f32.mrf.mxu1 }
 0x535   : > { %v7967_v54 = vpop.f32.mrf.mxu0 }
 0x536   : > { %v11543_v39 = vadd.f32 %v7966_v36, %v11378_v41  ;;  %v11545_v4 = vpop.f32.mrf.mxu1 }
 0x537   : > { %11991 = vst [vmem:[#allocation16_spill] sm:$0xff] %v11545_v4  ;;  %v7968_v22 = vpop.f32.mrf.mxu0 }
 0x538   : > { %11990 = vst [vmem:[#allocation19_spill] sm:$0xff] %v11543_v39  ;;  %v7969_v16 = vadd.f32 %v7968_v22, %v7967_v54  ;;  %v11547_v19 = vpop.f32.mrf.mxu1 }
 0x539   : > { %v7970_v38 = vpop.f32.mrf.mxu0 }
 0x53a   : > { %v11550_v25 = vadd.f32 %v7969_v16, %v11381_v46  ;;  %v11552_v47 = vpop.f32.mrf.mxu1 }
 0x53b   : > { %11993 = vst [vmem:[#allocation20_spill] sm:$0xff] %v11552_v47  ;;  %v7971_v29 = vpop.f32.mrf.mxu0 }
 0x53c   : > { %11992 = vst [vmem:[#allocation37_spill] sm:$0xff] %v11550_v25  ;;  %v7972_v60 = vadd.f32 %v7971_v29, %v7970_v38  ;;  %v11554_v14 = vpop.f32.mrf.mxu1 }
 0x53d   : > { %11994 = vst [vmem:[#allocation36_spill] sm:$0xff] %v11554_v14  ;;  %v7973_v56 = vpop.f32.mrf.mxu0 }
 0x53e   : > { %v11557_v41 = vadd.f32 %v7972_v60, %v11384_v24  ;;  %v11559_v4 = vpop.f32.mrf.mxu1 }
 0x53f   : > { %v7974_v36 = vpop.f32.mrf.mxu0  ;;  %11995 = vst [vmem:[#allocation35_spill] sm:$0xff] %v11559_v4 }
 0x540   : > { %v7975_v39 = vadd.f32 %v7974_v36, %v7973_v56  ;;  %v11564_v25 = vpop.f32.mrf.mxu1 }
 0x541   : > { %v7976_v54 = vpop.f32.mrf.mxu0 }
 0x542   : > { %v11562_v22 = vadd.f32 %v7975_v39, %v11387_v44  ;;  %v11569_v24 = vpop.f32.mrf.mxu1 }
 0x543   : > { %v7977_v46 = vpop.f32.mrf.mxu0 }
 0x544   : > { %11996 = vst [vmem:[#allocation38_spill] sm:$0xff] %v11562_v22  ;;  %v7978_v16 = vadd.f32 %v7977_v46, %v7976_v54  ;;  %v11574_v44 = vpop.f32.mrf.mxu1 }
 0x545   : > { %v7979_v47 = vpop.f32.mrf.mxu0 }
 0x546   : > { %v11567_v38 = vadd.f32 %v7978_v16, %v11390_v49  ;;  %v11579_v49 = vpop.f32.mrf.mxu1 }
 0x547   : > { %v7980_v29 = vpop.f32.mrf.mxu0 }
 0x548   : > { %11997 = vst [vmem:[#allocation18_spill] sm:$0xff] %v11567_v38  ;;  %v7981_v14 = vadd.f32 %v7980_v29, %v7979_v47 }
 0x549   : > { %v7982_v60 = vpop.f32.mrf.mxu0 }
 0x54a   : > { %v11572_v56 = vadd.f32 %v7981_v14, %v11394_v48  ;;  %v11584_v48 = vpop.f32.mrf.mxu1 }
 0x54b   : > { %v7983_v36 = vpop.f32.mrf.mxu0 }
 0x54c   : > { %11998 = vst [vmem:[#allocation43_spill] sm:$0xff] %v11572_v56  ;;  %v7984_v4 = vadd.f32 %v7983_v36, %v7982_v60 }
 0x54d   : > { %v7985_v39 = vpop.f32.mrf.mxu0 }
 0x54e   : > { %v11577_v54 = vadd.f32 %v7984_v4, %v11397_v23  ;;  %v11589_v23 = vpop.f32.mrf.mxu1 }
 0x54f   : > { %v7986_v46 = vpop.f32.mrf.mxu0 }
 0x550   : > { %v7987_v22 = vadd.f32 %v7986_v46, %v7985_v39 }
 0x551   : > { %v7988_v16 = vpop.f32.mrf.mxu0 }
 0x552   : > { %v11582_v47 = vadd.f32 %v7987_v22, %v11400_v42  ;;  %v8024_v42 = vadd.f32 %v11428_v35, %v11424_v1  ;;  %v11600_v22 = vpop.f32.mrf.mxu1  ;;  %v8036_v1 = vadd.f32 %v11456_v26, %v11454_v51 }
 0x553   : > { %v7989_v29 = vpop.f32.mrf.mxu0 }
 0x554   : > { %v7990_v38 = vadd.f32 %v7989_v29, %v7988_v16  ;;  %v5934_v29 = vadd.f32 %v8024_v42, %v11417_v31 }
 0x555   : > { %v7991_v14 = vpop.f32.mrf.mxu0 }
 0x556   : > { %v11587_v60 = vadd.f32 %v7990_v38, %v11403_v50  ;;  %v8027_v38 = vadd.f32 %v11435_v11, %v11433_v18  ;;  %v8030_v18 = vadd.f32 %v11442_v12, %v11440_v30  ;;  %v5950_v30 = vadd.f32 %v8036_v1, %v11445_v63 }
 0x557   : > { %v7992_v36 = vpop.f32.mrf.mxu0 }
 0x558   : > { %11999 = vst [vmem:[#allocation44_spill] sm:$0xff] %v11587_v60  ;;  %v7993_v56 = vadd.f32 %v7992_v36, %v7991_v14  ;;  %v11609_v14 = vpop.f32.mrf.mxu1  ;;  %v5937_v60 = vadd.f32 %v8027_v38, %v11422_v59  ;;  %v8033_v38 = vadd.f32 %v11449_v53, %v11447_v5  ;;  %v8042_v5 = vadd.f32 %v11470_v55, %v11468_v20 }
 0x559   : > { %v11591_v4 = vpop.f32.mrf.mxu0  ;;  %v8045_v20 = vadd.f32 %v11477_v8, %v11475_v7  ;;  %v8054_v7 = vadd.f32 %v11498_v10, %v11496_v2  ;;  %v12005_v2 = vld [vmem:[#allocation28_spill] sm:$0xff]  ;;  %v12006_v10 = vld [vmem:[#allocation27_spill] sm:$0xff] }
 0x55a   : > { %v11594_v39 = vadd.f32 %v7993_v56, %v11406_v40 }
 0x55b   : > { %v11596_v46 = vpop.f32.mrf.mxu0 }
 0x55c   : > { %12000 = vst [vmem:[#allocation40_spill] sm:$0xff] %v11594_v39 }
 0x55d   : > { %v11602_v16 = vpop.f32.mrf.mxu0 }
 0x55e   : > { %12001 = vst [vmem:[#allocation39_spill] sm:$0xff] %v11602_v16  ;;  %v11615_v16 = vpop.f32.mrf.mxu1 }
 0x55f   : > { %v11604_v50 = vpop.f32.mrf.mxu0 }
 0x560   : > { %12002 = vst [vmem:[#allocation22_spill] sm:$0xff] %v11604_v50  ;;  %v11629_v12 = vpop.f32.mrf.mxu1 }
 0x561   : > { %v8250_v40 = vpop.f32.mrf.mxu0 }
 0x562   : > { %v6095_v56 = vadd.f32 %v8250_v40, %v5934_v29  ;;  %v11639_v40 = vpop.f32.mrf.mxu1 }
 0x563   : > { %v6086_v36 = vpop.f32.mrf.mxu0 }
 0x564   : > { %v6215_v35 = vmax.f32 %v6095_v56, 0.0  ;;  %v6087_v39 = vadd.f32 %v6086_v36, %v11419_v28  ;;  %v8039_v28 = vadd.f32 %v11463_v13, %v11461_v32  ;;  %v8048_v13 = vadd.f32 %v11484_v37, %v11482_v57 }
 0x565   : > { %v8251_v50 = vpop.f32.mrf.mxu0  ;;  %v5945_v36 = vadd.f32 %v8033_v38, %v11438_v62  ;;  %v8051_v57 = vadd.f32 %v11491_v61, %v11489_v43  ;;  %v8060_v43 = vadd.f32 %v11512_v6, %v11510_v15  ;;  %v12003_v15 = vld [vmem:[#allocation31_spill] sm:$0xff] }
 0x566   : > { %6247 = vst [vmem:[%s11621_s30 + $0x10] sm:$0xff] %v6215_v35  ;;  %v6213_v31 = vmax.f32 %v6087_v39, 0.0  ;;  %v6098_v11 = vadd.f32 %v8251_v50, %v5937_v60  ;;  %v5942_v50 = vadd.f32 %v8030_v18, %v11431_v33  ;;  %v5953_v29 = vadd.f32 %v8039_v28, %v11452_v3  ;;  %v11649_v18 = vpop.f32.mrf.mxu1 }
 0x567   : > { %v6089_v51 = vpop.f32.mrf.mxu0  ;;  %v5966_v35 = vadd.f32 %v8048_v13, %v11473_v45  ;;  %v5969_v28 = vadd.f32 %v8051_v57, %v11480_v17  ;;  %v8063_v6 = vadd.f32 %v12003_v15, %v11517_v58  ;;  %v8057_v13 = vadd.f32 %v12006_v10, %v12005_v2  ;;  %v12017_v2 = vld [vmem:[#allocation20_spill] sm:$0xff] }
 0x568   : > { %6245 = vst [vmem:[%s11621_s30] sm:$0xff] %v6213_v31  ;;  %v6216_v59 = vmax.f32 %v6098_v11, 0.0  ;;  %v6090_v26 = vadd.f32 %v6089_v51, %v11426_v52  ;;  %v5958_v11 = vadd.f32 %v8042_v5, %v11459_v34  ;;  %v8072_v58 = vadd.f32 %v11540_v9, %v11538_v21  ;;  %v12011_v21 = vld [vmem:[#allocation16_spill] sm:$0xff] }
 0x569   : > { %v8254_v42 = vpop.f32.mrf.mxu0  ;;  %v8075_v9 = vadd.f32 %v11547_v19, %v12011_v21  ;;  %v8084_v19 = vadd.f32 %v11574_v44, %v11569_v24  ;;  %v12018_v10 = vld [vmem:[#allocation36_spill] sm:$0xff]  ;;  %v8087_v24 = vadd.f32 %v11584_v48, %v11579_v49  ;;  %v8096_v49 = vadd.f32 %v11639_v40, %v11629_v12 }
 0x56a   : > { %6248 = vst [vmem:[%s11621_s30 + $0x18] sm:$0xff] %v6216_v59  ;;  %v6214_v60 = vmax.f32 %v6090_v26, 0.0  ;;  %v6111_v39 = vadd.f32 %v8254_v42, %v5950_v30  ;;  %v11659_v59 = vpop.f32.mrf.mxu1  ;;  %v5961_v30 = vadd.f32 %v8045_v20, %v11466_v27  ;;  %v12010_v20 = vld [vmem:[#allocation24_spill] sm:$0xff] }
 0x56b   : > { %v6102_v32 = vpop.f32.mrf.mxu0  ;;  %v8099_v12 = vadd.f32 %v11659_v59, %v11649_v18 }
 0x56c   : > { %6246 = vst [vmem:[%s11621_s30 + $0x8] sm:$0xff] %v6214_v60  ;;  %v6219_v52 = vmax.f32 %v6111_v39, 0.0  ;;  %v6103_v63 = vadd.f32 %v6102_v32, %v5942_v50  ;;  %v12004_v60 = vld [vmem:[#allocation32_spill] sm:$0xff]  ;;  %v11669_v50 = vpop.f32.mrf.mxu1 }
 0x56d   : > { %v8255_v56 = vpop.f32.mrf.mxu0  ;;  %v5982_v39 = vadd.f32 %v8060_v43, %v12004_v60  ;;  %v12012_v43 = vld [vmem:[#allocation17_spill] sm:$0xff] }
 0x56e   : > { %6251 = vst [vmem:[%s11621_s30 + $0x30] sm:$0xff] %v6219_v52  ;;  %v6217_v53 = vmax.f32 %v6103_v63, 0.0  ;;  %v6114_v33 = vadd.f32 %v8255_v56, %v5953_v29  ;;  %v12007_v63 = vld [vmem:[#allocation26_spill] sm:$0xff] }
 0x56f   : > { %v6105_v1 = vpop.f32.mrf.mxu0  ;;  %v5974_v29 = vadd.f32 %v8054_v7, %v12007_v63  ;;  %v12019_v63 = vld [vmem:[#allocation34_spill] sm:$0xff] }
 0x570   : > { %6249 = vst [vmem:[%s11621_s30 + $0x20] sm:$0xff] %v6217_v53  ;;  %v6220_v37 = vmax.f32 %v6114_v33, 0.0  ;;  %v6106_v3 = vadd.f32 %v6105_v1, %v5945_v36  ;;  %v12008_v33 = vld [vmem:[#allocation30_spill] sm:$0xff]  ;;  %v11679_v1 = vpop.f32.mrf.mxu1 }
 0x571   : > { %v8258_v31 = vpop.f32.mrf.mxu0  ;;  %v5985_v36 = vadd.f32 %v8063_v6, %v12008_v33 }
 0x572   : > { %6252 = vst [vmem:[%s11621_s30 + $0x38] sm:$0xff] %v6220_v37  ;;  %v6218_v55 = vmax.f32 %v6106_v3, 0.0  ;;  %v6127_v62 = vadd.f32 %v8258_v31, %v5966_v35  ;;  %v12009_v37 = vld [vmem:[#allocation21_spill] sm:$0xff] }
 0x573   : > { %v6118_v51 = vpop.f32.mrf.mxu0  ;;  %v8066_v3 = vadd.f32 %v12009_v37, %v11524_v0  ;;  %v12013_v0 = vld [vmem:[#allocation33_spill] sm:$0xff] }
 0x574   : > { %6250 = vst [vmem:[%s11621_s30 + $0x28] sm:$0xff] %v6218_v55  ;;  %v6223_v61 = vmax.f32 %v6127_v62, 0.0  ;;  %v6119_v45 = vadd.f32 %v6118_v51, %v5958_v11  ;;  %v5977_v55 = vadd.f32 %v8057_v13, %v12010_v20  ;;  %v8078_v13 = vadd.f32 %v12018_v10, %v12017_v2  ;;  %v12028_v2 = vld [vmem:[#allocation22_spill] sm:$0xff] }
 0x575   : > { %v8259_v26 = vpop.f32.mrf.mxu0 }
 0x576   : > { %6255 = vst [vmem:[%s11621_s30 + $0x50] sm:$0xff] %v6223_v61  ;;  %v6221_v8 = vmax.f32 %v6119_v45, 0.0  ;;  %v6130_v34 = vadd.f32 %v8259_v26, %v5969_v28  ;;  %v5998_v61 = vadd.f32 %v8072_v58, %v12012_v43  ;;  %v11689_v45 = vpop.f32.mrf.mxu1  ;;  %v12014_v26 = vld [vmem:[#allocation14_spill] sm:$0xff]  ;;  %v12023_v43 = vld [vmem:[#allocation37_spill] sm:$0xff] }
 0x577   : > { %v6121_v42 = vpop.f32.mrf.mxu0  ;;  %v8069_v7 = vadd.f32 %v12014_v26, %v12013_v0  ;;  %v6030_v26 = vadd.f32 %v8096_v49, %v11577_v54  ;;  %v12031_v49 = vld [vmem:[#allocation40_spill] sm:$0xff] }
 0x578   : > { %6253 = vst [vmem:[%s11621_s30 + $0x40] sm:$0xff] %v6221_v8  ;;  %v6224_v38 = vmax.f32 %v6130_v34, 0.0  ;;  %v6122_v17 = vadd.f32 %v6121_v42, %v5961_v30  ;;  %v12015_v30 = vld [vmem:[#allocation29_spill] sm:$0xff] }
 0x579   : > { %v8262_v32 = vpop.f32.mrf.mxu0  ;;  %v5990_v42 = vadd.f32 %v8066_v3, %v12015_v30 }
 0x57a   : > { %6256 = vst [vmem:[%s11621_s30 + $0x58] sm:$0xff] %v6224_v38  ;;  %v6222_v52 = vmax.f32 %v6122_v17, 0.0  ;;  %v6143_v27 = vadd.f32 %v8262_v32, %v5982_v39  ;;  %v12016_v17 = vld [vmem:[#allocation15_spill] sm:$0xff]  ;;  %v11699_v39 = vpop.f32.mrf.mxu1 }
 0x57b   : > { %v6134_v56 = vpop.f32.mrf.mxu0  ;;  %v6001_v60 = vadd.f32 %v8075_v9, %v12016_v17  ;;  %v12026_v17 = vld [vmem:[#allocation25_spill] sm:$0xff] }
 0x57c   : > { %6254 = vst [vmem:[%s11621_s30 + $0x48] sm:$0xff] %v6222_v52  ;;  %v6227_v5 = vmax.f32 %v6143_v27, 0.0  ;;  %v6135_v53 = vadd.f32 %v6134_v56, %v5974_v29  ;;  %v5993_v29 = vadd.f32 %v8069_v7, %v12019_v63  ;;  %v8093_v7 = vadd.f32 %v11615_v16, %v11609_v14 }
 0x57d   : > { %v8263_v57 = vpop.f32.mrf.mxu0  ;;  %v8102_v16 = vadd.f32 %v11679_v1, %v11669_v50 }
 0x57e   : > { %6259 = vst [vmem:[%s11621_s30 + $0x70] sm:$0xff] %v6227_v5  ;;  %v6225_v35 = vmax.f32 %v6135_v53, 0.0  ;;  %v6146_v31 = vadd.f32 %v8263_v57, %v5985_v36  ;;  %v6014_v5 = vadd.f32 %v8084_v19, %v11557_v41  ;;  %v8106_v53 = vpop.f32.mrf.mxu1  ;;  %v12020_v36 = vld [vmem:[#allocation35_spill] sm:$0xff]  ;;  %v12022_v41 = vld [vmem:[#allocation38_spill] sm:$0xff] }
 0x57f   : > { %v6137_v62 = vpop.f32.mrf.mxu0  ;;  %v8081_v57 = vadd.f32 %v11564_v25, %v12020_v36  ;;  %v8090_v25 = vadd.f32 %v11600_v22, %v11589_v23  ;;  %v7996_v22 = vadd.f32 %v11596_v46, %v11591_v4  ;;  %v12025_v4 = vld [vmem:[#allocation43_spill] sm:$0xff] }
 0x580   : > { %6257 = vst [vmem:[%s11621_s30 + $0x60] sm:$0xff] %v6225_v35  ;;  %v6228_v11 = vmax.f32 %v6146_v31, 0.0  ;;  %v6138_v51 = vadd.f32 %v6137_v62, %v5977_v55  ;;  %v12021_v35 = vld [vmem:[#allocation19_spill] sm:$0xff]  ;;  %v6017_v62 = vadd.f32 %v8087_v24, %v12022_v41  ;;  %v8107_v21 = vpop.f32.mrf.mxu1  ;;  %v6025_v46 = vadd.f32 %v8093_v7, %v12025_v4 }
 0x581   : > { %v8266_v28 = vpop.f32.mrf.mxu0  ;;  %v6006_v31 = vadd.f32 %v8078_v13, %v12021_v35  ;;  %v8108_v59 = vadd.f32 %v8107_v21, %v8106_v53 }
 0x582   : > { %6260 = vst [vmem:[%s11621_s30 + $0x78] sm:$0xff] %v6228_v11  ;;  %v6226_v8 = vmax.f32 %v6138_v51, 0.0  ;;  %v6159_v34 = vadd.f32 %v8266_v28, %v5998_v61  ;;  %v6009_v61 = vadd.f32 %v8081_v57, %v12023_v43 }
 0x583   : > { %v6150_v15 = vpop.f32.mrf.mxu0 }
 0x584   : > { %6258 = vst [vmem:[%s11621_s30 + $0x68] sm:$0xff] %v6226_v8  ;;  %v6231_v6 = vmax.f32 %v6159_v34, 0.0  ;;  %v6151_v38 = vadd.f32 %v6150_v15, %v5990_v42  ;;  %v8109_v8 = vpop.f32.mrf.mxu1  ;;  %v12024_v42 = vld [vmem:[#allocation18_spill] sm:$0xff] }
 0x585   : > { %v8267_v32 = vpop.f32.mrf.mxu0  ;;  %v6022_v15 = vadd.f32 %v8090_v25, %v12024_v42 }
 0x586   : > { %6263 = vst [vmem:[%s11621_s30 + $0x90] sm:$0xff] %v6231_v6  ;;  %v6229_v52 = vmax.f32 %v6151_v38, 0.0  ;;  %v6162_v27 = vadd.f32 %v8267_v32, %v6001_v60  ;;  %v6033_v6 = vadd.f32 %v8099_v12, %v11582_v47  ;;  %v8110_v14 = vpop.f32.mrf.mxu1  ;;  %v5885_v60 = vadd.f32 %v7996_v22, %v12026_v17  ;;  %v12027_v32 = vld [vmem:[#allocation39_spill] sm:$0xff] }
 0x587   : > { %v6153_v56 = vpop.f32.mrf.mxu0  ;;  %v7999_v10 = vadd.f32 %v12028_v2, %v12027_v32  ;;  %v8111_v63 = vadd.f32 %v8110_v14, %v8109_v8 }
 0x588   : > { %6261 = vst [vmem:[%s11621_s30 + $0x80] sm:$0xff] %v6229_v52  ;;  %v6232_v44 = vmax.f32 %v6162_v27, 0.0  ;;  %v6154_v58 = vadd.f32 %v6153_v56, %v5993_v29  ;;  %v6046_v1 = vadd.f32 %v8108_v59, %v5885_v60  ;;  %v12029_v56 = vld [vmem:[#allocation44_spill] sm:$0xff] }
 0x589   : > { %v8270_v33 = vpop.f32.mrf.mxu0  ;;  %v6038_v24 = vadd.f32 %v8102_v16, %v12029_v56 }
 0x58a   : > { %6264 = vst [vmem:[%s11621_s30 + $0x98] sm:$0xff] %v6232_v44  ;;  %v6230_v37 = vmax.f32 %v6154_v58, 0.0  ;;  %v6175_v3 = vadd.f32 %v8270_v33, %v6014_v5  ;;  %v12030_v44 = vld [vmem:[#allocation23_spill] sm:$0xff]  ;;  %v8105_v5 = vadd.f32 %v11699_v39, %v11689_v45 }
 0x58b   : > { %v6166_v20 = vpop.f32.mrf.mxu0  ;;  %v5888_v58 = vadd.f32 %v7999_v10, %v12030_v44 }
 0x58c   : > { %6262 = vst [vmem:[%s11621_s30 + $0x88] sm:$0xff] %v6230_v37  ;;  %v6235_v48 = vmax.f32 %v6175_v3, 0.0  ;;  %v6167_v55 = vadd.f32 %v6166_v20, %v6006_v31 }
 0x58d   : > { %v8271_v9 = vpop.f32.mrf.mxu0  ;;  %v6049_v3 = vadd.f32 %v8111_v63, %v5888_v58 }
 0x58e   : > { %6267 = vst [vmem:[%s11621_s30 + $0xb0] sm:$0xff] %v6235_v48  ;;  %v6233_v11 = vmax.f32 %v6167_v55, 0.0  ;;  %v6178_v51 = vadd.f32 %v8271_v9, %v6017_v62  ;;  %v6041_v48 = vadd.f32 %v8105_v5, %v12031_v49 }
 0x58f   : > { %v6169_v28 = vpop.f32.mrf.mxu0 }
 0x590   : > { %6265 = vst [vmem:[%s11621_s30 + $0xa0] sm:$0xff] %v6233_v11  ;;  %v6236_v40 = vmax.f32 %v6178_v51, 0.0  ;;  %v6170_v0 = vadd.f32 %v6169_v28, %v6009_v61 }
 0x591   : > { %v8274_v23 = vpop.f32.mrf.mxu0 }
 0x592   : > { %6268 = vst [vmem:[%s11621_s30 + $0xb8] sm:$0xff] %v6236_v40  ;;  %v6234_v34 = vmax.f32 %v6170_v0, 0.0  ;;  %v6191_v30 = vadd.f32 %v8274_v23, %v6030_v26 }
 0x593   : > { %v6182_v18 = vpop.f32.mrf.mxu0 }
 0x594   : > { %6266 = vst [vmem:[%s11621_s30 + $0xa8] sm:$0xff] %v6234_v34  ;;  %v6239_v19 = vmax.f32 %v6191_v30, 0.0  ;;  %v6183_v54 = vadd.f32 %v6182_v18, %v6022_v15 }
 0x595   : > { %v8275_v38 = vpop.f32.mrf.mxu0 }
 0x596   : > { %6271 = vst [vmem:[%s11621_s30 + $0xd0] sm:$0xff] %v6239_v19  ;;  %v6237_v13 = vmax.f32 %v6183_v54, 0.0  ;;  %v6194_v52 = vadd.f32 %v8275_v38, %v6033_v6 }
 0x597   : > { %v6185_v27 = vpop.f32.mrf.mxu0 }
 0x598   : > { %6269 = vst [vmem:[%s11621_s30 + $0xc0] sm:$0xff] %v6237_v13  ;;  %v6240_v47 = vmax.f32 %v6194_v52, 0.0  ;;  %v6186_v50 = vadd.f32 %v6185_v27, %v6025_v46 }
 0x599   : > { %v8278_v29 = vpop.f32.mrf.mxu0 }
 0x59a   : > { %6272 = vst [vmem:[%s11621_s30 + $0xd8] sm:$0xff] %v6240_v47  ;;  %v6238_v53 = vmax.f32 %v6186_v50, 0.0  ;;  %v6207_v33 = vadd.f32 %v8278_v29, %v6046_v1 }
 0x59b   : > { %v6198_v36 = vpop.f32.mrf.mxu0 }
 0x59c   : > { %6270 = vst [vmem:[%s11621_s30 + $0xc8] sm:$0xff] %v6238_v53  ;;  %v6243_v57 = vmax.f32 %v6207_v33, 0.0  ;;  %v6199_v37 = vadd.f32 %v6198_v36, %v6038_v24 }
 0x59d   : > { %v8279_v35 = vpop.f32.mrf.mxu0 }
 0x59e   : > { %6275 = vst [vmem:[%s11621_s30 + $0xf0] sm:$0xff] %v6243_v57  ;;  %v6241_v31 = vmax.f32 %v6199_v37, 0.0  ;;  %v6210_v20 = vadd.f32 %v8279_v35, %v6049_v3 }
 0x59f   : > { %v6201_v45 = vpop.f32.mrf.mxu0 }
 0x5a0   : > { %6273 = vst [vmem:[%s11621_s30 + $0xe0] sm:$0xff] %v6241_v31  ;;  %v6244_v39 = vmax.f32 %v6210_v20, 0.0  ;;  %v6202_v55 = vadd.f32 %v6201_v45, %v6041_v48 }
 0x5a2   : > { %6276 = vst [vmem:[%s11621_s30 + $0xf8] sm:$0xff] %v6244_v39  ;;  %v6242_v41 = vmax.f32 %v6202_v55, 0.0 }
 0x5a4   : > { %6274 = vst [vmem:[%s11621_s30 + $0xe8] sm:$0xff] %v6242_v41 }
 0x5a5   : > { %8646 = shalt.err (!%p8643_p5)
}
 0x5a6   : > { %s8647_s20 = scalar_lea.hbm %s11755_s14, 4096  ;;  %s8651_s12 = scalar_lea.hbm %s11809_s7, 8192 }
 0x5a7   : > { %p8648_p9 = scmp.ne.s32.totalorder %s11755_s14, %s8647_s20  ;;  %p8652_p6 = scmp.lt.s32.totalorder %s11755_s14, %s11809_s7 }
 0x5a8   : > { %p8653_p8 = scmp.lt.s32.totalorder %s8651_s12, %s8647_s20 }
 0x5a9   : > { %p8649_p1 = pnand %p8648_p9, %p12032_p7 }
 0x5aa   : > { %p8654_p3 = por %p8653_p8, %p8652_p6 }
 0x5ab   : > { %p8650_p4 = pneg %p8649_p1 }
 0x5ad   : > { %p8655_p11 = pnand %p8654_p3, %p8650_p4 }
 0x5af   : > { %8658 = shalt.err (!%p8655_p11)
}
 0x5b0   : > { %s8713_s29 = smov 128   ;;  %s8714_s19 = smov 8  }
 0x5b1   : > { %8302 = dma.vmem_to_hbm [thread:$0]  (%p12032_p7), %s11757_s9, 4096, %s11755_s14, %s6278_s15, %s8713_s29, %s8713_s29, %s8714_s19  }
 0x5b2 PF: > { %s6306_s28 = sand.u32 1, %s8689_s24   ;;  %p12033_p12 = scmp.ne.s32.totalorder %s11830_s8, 0 }
 0x5b3   : > { %p12034_p10 = scmp.ge.s32.totalorder %s8701_s27, 2  ;;  %s6307_s17 = scalar_lea.sflag [#allocation7], %s6306_s28 }
 0x5b5   : > { %p8313_p2 = pnand %p12034_p10, %p12033_p12 }
 0x5b7   : > { %p8314_p13 = pneg %p8313_p2 }
 0x5b9   : > { %8684 = dma.done.wait (%p8314_p13), %s6307_s17, 4096  }
 0x5ba   : > { %8686 = vsyncadd (%p8314_p13), %s6307_s17, 4294963200  ;;  %p21_p0 = scmp.ge.s32.totalorder %s8809_s13, 4   ;;  %s12035_s24 = smov %s8693_s25 }
 0x5bb   : > { %s12036_s25 = smov %s8697_s26  ;;  %s12037_s26 = smov %s8826_s21 }
 0x5bc   : > { %s12038_s27 = smov %s8809_s13  ;;  %23 = sbr.rel (!%p21_p0) target bundleno = 8 (0x8), region = 107 }
 0x5c1   :  { %6312 = vsyncpa [#allocation6], 1 }
 0x5c2   :  { %6314 = vsyncpa [#allocation6 + $0x1], 1 }
 0x5c3   :  { %6315 = vsyncpa [#allocation9], 1 }
 0x5c4   :  { %6316 = vsyncpa [#allocation7], 1 }
 0x5c5   :  { %6318 = vsyncpa [#allocation7 + $0x1], 1 }

</bundles_post_ra>
